<compile_context>
chip_gen: v7x
topology: tpu7x:2x2x1
jax: 0.10.0
libtpu: 0.0.40
codegen_flags: <defaults>
</compile_context>

<pallas_src>
import functools

import jax
import jax.numpy as jnp
import numpy as np
from jax import lax
from jax.experimental import pallas as pl
from jax.experimental.pallas import tpu as pltpu


# ---------------------------------------------------------------------------
# Fused kernel: depthwise 3x3 (q/k/v) + pointwise 1x1 + multi-head attention
# ---------------------------------------------------------------------------
def _cab_kernel(xp_ref, cp_ref, taps_ref, wp_ref, bias_ref, o_ref, *,
                H, W, C, num_heads, b_tile):
    # xp_ref  : (b_tile, H+2, W+2, C)  zero-padded NHWC x slab
    # cp_ref  : (b_tile, H+2, W+2, C)  zero-padded NHWC ctx slab (shared by k & v)
    # taps_ref: (3, 9, C)              depthwise taps [q, k, v], tap index = ky*3+kx
    # wp_ref  : (3, C, C)  bf16        pointwise weights (input-major); q pre-scaled
    # bias_ref: (3, 1, C)  f32         effective bias (depthwise bias folded; q scaled)
    # o_ref   : (b_tile, C, H*W)       output block (transpose folded in-kernel)
    HW = H * W
    HD = C // num_heads
    G = b_tile * num_heads
    f32, bf16 = jnp.float32, jnp.bfloat16

    # ---- depthwise 3x3 (VPU, f32): shifted windows loaded straight from the refs ----
    acc_q = acc_k = acc_v = None
    for dy in range(3):
        for dx in range(3):
            i = dy * 3 + dx
            xwin = xp_ref[:, dy:dy + H, dx:dx + W, :]          # (bt, H, W, C)
            cwin = cp_ref[:, dy:dy + H, dx:dx + W, :]          # (bt, H, W, C)
            tq = taps_ref[0, i, :].reshape(1, 1, 1, C)
            tk = taps_ref[1, i, :].reshape(1, 1, 1, C)
            tv = taps_ref[2, i, :].reshape(1, 1, 1, C)
            if acc_q is None:                                  # first tap: no zeros-init
                acc_q, acc_k, acc_v = xwin * tq, cwin * tk, cwin * tv
            else:
                acc_q = acc_q + xwin * tq
                acc_k = acc_k + cwin * tk
                acc_v = acc_v + cwin * tv

    # ---- pointwise 1x1 per projection: (b_tile*HW, C) @ (C, C) MXU matmuls
    #      (bf16 operands, f32 accumulate); effective bias added in f32.
    def pointwise(acc, j):
        dw = acc.reshape(b_tile * HW, C).astype(bf16)
        return jnp.dot(dw, wp_ref[j], preferred_element_type=f32) + bias_ref[j]

    q_p = pointwise(acc_q, 0)                                  # attention scale folded in
    k_p = pointwise(acc_k, 1)
    v_p = pointwise(acc_v, 2)

    # ---- regroup once to (b_tile*num_heads, HW, HD): no per-head lane slicing ----
    def to_groups(t):
        t4 = t.reshape(b_tile, HW, num_heads, HD)
        return jnp.transpose(t4, (0, 2, 1, 3)).reshape(G, HW, HD)

    q_g = to_groups(q_p).astype(bf16)
    k_g = to_groups(k_p).astype(bf16)
    v_g = to_groups(v_p).astype(bf16)

    # ---- attention, phased: all QK^T -> softmax -> all P@V (batched over G groups) ----
    s = jnp.einsum("gqd,gkd->gqk", q_g, k_g,
                   preferred_element_type=f32)                 # (G, HW, HW), pre-scaled
    s = s - jnp.max(s, axis=-1, keepdims=True)
    p = jnp.exp(s)
    p = p * pl.reciprocal(jnp.sum(p, axis=-1, keepdims=True), approx=True)
    o = jnp.einsum("gqk,gkd->gqd", p.astype(bf16), v_g,
                   preferred_element_type=f32)                 # (G, HW, HD)

    # ---- one transpose + one contiguous store of the whole (b_tile, C, HW) block ----
    # (output minor dim is HW, the module's native layout; pad to a multiple of 128
    #  in a real workload to get unmasked stores)
    o = jnp.transpose(o.reshape(b_tile, num_heads, HW, HD), (0, 1, 3, 2))
    o_ref[...] = o.reshape(b_tile, C, HW).astype(o_ref.dtype)


# ---------------------------------------------------------------------------
# Parameter init (PyTorch-shaped) and fused-operand preparation
# ---------------------------------------------------------------------------
def init_dsconv_params(key, dim):
    k1, k2, k3, k4 = jax.random.split(key, 4)
    return dict(
        wd=jax.random.normal(k1, (dim, 1, 3, 3), jnp.float32) * 0.1,  # depthwise (C,1,3,3)
        bd=jax.random.normal(k2, (dim,), jnp.float32) * 0.1,
        wp=jax.random.normal(k3, (dim, dim), jnp.float32) * 0.1,      # pointwise (Cout, Cin)
        bp=jax.random.normal(k4, (dim,), jnp.float32) * 0.1,
    )


def _fused_proj_params(params, dim, num_heads):
    """Fold the three DepthSepConv projections (and the softmax scale) into kernel operands."""
    inv_scale = 1.0 / float(dim // num_heads) ** 0.5

    def taps(p):   # (C,1,3,3) -> (9, C), row index = ky*3 + kx
        return jnp.transpose(p["wd"][:, 0, :, :], (1, 2, 0)).reshape(9, dim)

    def beff(p):   # depthwise bias folded through the 1x1 conv
        return p["bd"] @ p["wp"].T + p["bp"]

    taps_all = jnp.stack([taps(params["q"]), taps(params["k"]), taps(params["v"])])  # (3,9,C)
    wp_all = jnp.stack([params["q"]["wp"].T * inv_scale,     # scale folded into q weights
                        params["k"]["wp"].T,
                        params["v"]["wp"].T]).astype(jnp.bfloat16)                   # (3,C,C)
    bias_all = jnp.stack([beff(params["q"]) * inv_scale,     # ... and into the q bias
                          beff(params["k"]),
                          beff(params["v"])]).reshape(3, 1, dim)                     # (3,1,C)
    return taps_all, wp_all, bias_all


def _pick_b_tile(B, HW):
    """Largest batch tile with M = b_tile*HW >= ~128 while keeping >=2 parallel grid
    steps (both v7x TensorCores fed) whenever B allows."""
    target = max(1, -(-128 // HW))                     # ceil(128 / HW)
    divisors = [t for t in range(1, B + 1) if B % t == 0]
    cands = [t for t in divisors if B // t >= 2] or divisors
    under = [t for t in cands if t <= target]
    return max(under) if under else min(cands)


# ---------------------------------------------------------------------------
# CrossAttentionBlock forward: one fused pallas_call, grid over batch tiles
# ---------------------------------------------------------------------------
def cross_attention_block(x_nchw, ctx_nchw, params, *, num_heads, b_tile=None):
    B, C, H, W = x_nchw.shape
    HW = H * W
    if b_tile is None:
        b_tile = _pick_b_tile(B, HW)
    assert B % b_tile == 0

    taps_all, wp_all, bias_all = _fused_proj_params(params, C, num_heads)

    # NHWC, zero-padded once; x and ctx kept as separate C-channel slabs (2C of DMA,
    # no duplicated ctx channels).
    def pad_nhwc(t):
        return jnp.pad(jnp.transpose(t, (0, 2, 3, 1)), ((0, 0), (1, 1), (1, 1), (0, 0)))

    xp = pad_nhwc(x_nchw)           # (B, H+2, W+2, C)
    cp = pad_nhwc(ctx_nchw)         # (B, H+2, W+2, C)

    kernel = functools.partial(_cab_kernel, H=H, W=W, C=C,
                               num_heads=num_heads, b_tile=b_tile)
    return pl.pallas_call(
        kernel,
        out_shape=jax.ShapeDtypeStruct((B, C, HW), jnp.float32),
        grid=(B // b_tile,),
        in_specs=[
            pl.BlockSpec((b_tile, H + 2, W + 2, C), lambda i: (i, 0, 0, 0)),
            pl.BlockSpec((b_tile, H + 2, W + 2, C), lambda i: (i, 0, 0, 0)),
            pl.BlockSpec((3, 9, C), lambda i: (0, 0, 0)),
            pl.BlockSpec((3, C, C), lambda i: (0, 0, 0)),
            pl.BlockSpec((3, 1, C), lambda i: (0, 0, 0)),
        ],
        out_specs=pl.BlockSpec((b_tile, C, HW), lambda i: (i, 0, 0)),
        compiler_params=pltpu.CompilerParams(dimension_semantics=("parallel",)),
    )(xp, cp, taps_all, wp_all, bias_all)


# ---------------------------------------------------------------------------
# Pure-JAX reference (mirrors the PyTorch module) for correctness check
# ---------------------------------------------------------------------------
def ref_dsconv(x_nchw, p):
    C = x_nchw.shape[1]
    d = lax.conv_general_dilated(
        x_nchw, p["wd"], (1, 1), ((1, 1), (1, 1)),
        dimension_numbers=("NCHW", "OIHW", "NCHW"),
        feature_group_count=C) + p["bd"][None, :, None, None]
    return jnp.einsum("bchw,oc->bohw", d, p["wp"]) + p["bp"][None, :, None, None]


def ref_cross_attention_block(x, ctx, params, num_heads):
    B, C, H, W = x.shape
    hd = C // num_heads
    scale = float(hd) ** 0.5

    def heads(t):
        return jnp.transpose(t.reshape(B, num_heads, hd, H * W), (0, 1, 3, 2))

    q = heads(ref_dsconv(x, params["q"]))
    k = heads(ref_dsconv(ctx, params["k"]))
    v = heads(ref_dsconv(ctx, params["v"]))
    attn = jnp.einsum("bhqd,bhkd->bhqk", q, k) / scale
    attn = jax.nn.softmax(attn, axis=-1)
    o = jnp.einsum("bhqk,bhkd->bhqd", attn, v)
    return jnp.transpose(o, (0, 1, 3, 2)).reshape(B, C, H * W)


if __name__ == "__main__":
    # B=4 with HW=64 -> b_tile=2 (M = 128 for the MXU) and 2 parallel grid steps.
    B, dim, H, W, num_heads = 4, 32, 8, 8, 4

    key = jax.random.PRNGKey(0)
    kx, kc, kq, kk, kv = jax.random.split(key, 5)
    x = jax.random.normal(kx, (B, dim, H, W), jnp.float32)
    ctx = jax.random.normal(kc, (B, dim, H, W), jnp.float32)
    params = {
        "q": init_dsconv_params(kq, dim),
        "k": init_dsconv_params(kk, dim),
        "v": init_dsconv_params(kv, dim),
    }

    fwd = jax.jit(functools.partial(cross_attention_block, num_heads=num_heads))
    out = jax.block_until_ready(fwd(x, ctx, params))
    assert out.shape == (B, dim, H * W)

    ref = ref_cross_attention_block(x, ctx, params, num_heads)
    # bf16 MXU operands + approx reciprocal in the softmax denom -> ~1e-3-level error
    np.testing.assert_allclose(np.asarray(out), np.asarray(ref), atol=1e-2, rtol=1e-2)

    print("KERNEL_OK")
</pallas_src>

<mosaic_0001>
module attributes {stable_mosaic.version = 11 : i64} {
  func.func @_cab_kernel(%arg0: i32, %arg1: memref<2x10x10x32xf32, #tpu.memory_space<vmem>>, %arg2: memref<2x10x10x32xf32, #tpu.memory_space<vmem>>, %arg3: memref<3x9x32xf32, #tpu.memory_space<vmem>>, %arg4: memref<3x32x32xbf16, #tpu.memory_space<vmem>>, %arg5: memref<3x1x32xf32, #tpu.memory_space<vmem>>, %arg6: memref<2x32x64xf32, #tpu.memory_space<vmem>>) attributes {dimension_semantics = [#tpu.dimension_semantics<parallel>], iteration_bounds = array<i64: 2>, scalar_prefetch = 0 : i64, scratch_operands = 0 : i64, tpu.core_type = #tpu.core_type<tc>, window_params = [{transform_indices = @transform_0, window_bounds = array<i64: 2, 10, 10, 32>}, {transform_indices = @transform_1, window_bounds = array<i64: 2, 10, 10, 32>}, {pipeline_mode = #tpu.pipeline_mode<synchronous>, transform_indices = @transform_2, window_bounds = array<i64: 3, 9, 32>}, {pipeline_mode = #tpu.pipeline_mode<synchronous>, transform_indices = @transform_3, window_bounds = array<i64: 3, 32, 32>}, {pipeline_mode = #tpu.pipeline_mode<synchronous>, transform_indices = @transform_4, window_bounds = array<i64: 3, 1, 32>}, {transform_indices = @transform_5, window_bounds = array<i64: 2, 32, 64>}]} {
    %c0 = arith.constant 0 : index
    %c0_0 = arith.constant 0 : index
    %c0_1 = arith.constant 0 : index
    %c0_2 = arith.constant 0 : index
    %0 = vector.load %arg1[%c0, %c0_0, %c0_1, %c0_2] : memref<2x10x10x32xf32, #tpu.memory_space<vmem>>, vector<2x8x8x32xf32>
    %c0_3 = arith.constant 0 : index
    %c0_4 = arith.constant 0 : index
    %c0_5 = arith.constant 0 : index
    %c0_6 = arith.constant 0 : index
    %1 = vector.load %arg2[%c0_3, %c0_4, %c0_5, %c0_6] : memref<2x10x10x32xf32, #tpu.memory_space<vmem>>, vector<2x8x8x32xf32>
    %c0_7 = arith.constant 0 : index
    %c0_8 = arith.constant 0 : index
    %c0_9 = arith.constant 0 : index
    %2 = vector.load %arg3[%c0_7, %c0_8, %c0_9] : memref<3x9x32xf32, #tpu.memory_space<vmem>>, vector<1x1x32xf32>
    %3 = vector.shape_cast %2 : vector<1x1x32xf32> to vector<32xf32>
    %4 = vector.shape_cast %3 : vector<32xf32> to vector<1x1x1x32xf32>
    %c1 = arith.constant 1 : index
    %c0_10 = arith.constant 0 : index
    %c0_11 = arith.constant 0 : index
    %5 = vector.load %arg3[%c1, %c0_10, %c0_11] : memref<3x9x32xf32, #tpu.memory_space<vmem>>, vector<1x1x32xf32>
    %6 = vector.shape_cast %5 : vector<1x1x32xf32> to vector<32xf32>
    %7 = vector.shape_cast %6 : vector<32xf32> to vector<1x1x1x32xf32>
    %c2 = arith.constant 2 : index
    %c0_12 = arith.constant 0 : index
    %c0_13 = arith.constant 0 : index
    %8 = vector.load %arg3[%c2, %c0_12, %c0_13] : memref<3x9x32xf32, #tpu.memory_space<vmem>>, vector<1x1x32xf32>
    %9 = vector.shape_cast %8 : vector<1x1x32xf32> to vector<32xf32>
    %10 = vector.shape_cast %9 : vector<32xf32> to vector<1x1x1x32xf32>
    %11 = vector.broadcast %4 : vector<1x1x1x32xf32> to vector<2x8x8x32xf32>
    %12 = arith.mulf %0, %11 : vector<2x8x8x32xf32>
    %13 = vector.broadcast %7 : vector<1x1x1x32xf32> to vector<2x8x8x32xf32>
    %14 = arith.mulf %1, %13 : vector<2x8x8x32xf32>
    %15 = vector.broadcast %10 : vector<1x1x1x32xf32> to vector<2x8x8x32xf32>
    %16 = arith.mulf %1, %15 : vector<2x8x8x32xf32>
    %c0_14 = arith.constant 0 : index
    %c0_15 = arith.constant 0 : index
    %c1_16 = arith.constant 1 : index
    %c0_17 = arith.constant 0 : index
    %17 = vector.load %arg1[%c0_14, %c0_15, %c1_16, %c0_17] : memref<2x10x10x32xf32, #tpu.memory_space<vmem>>, vector<2x8x8x32xf32>
    %c0_18 = arith.constant 0 : index
    %c0_19 = arith.constant 0 : index
    %c1_20 = arith.constant 1 : index
    %c0_21 = arith.constant 0 : index
    %18 = vector.load %arg2[%c0_18, %c0_19, %c1_20, %c0_21] : memref<2x10x10x32xf32, #tpu.memory_space<vmem>>, vector<2x8x8x32xf32>
    %c0_22 = arith.constant 0 : index
    %c1_23 = arith.constant 1 : index
    %c0_24 = arith.constant 0 : index
    %19 = vector.load %arg3[%c0_22, %c1_23, %c0_24] : memref<3x9x32xf32, #tpu.memory_space<vmem>>, vector<1x1x32xf32>
    %20 = vector.shape_cast %19 : vector<1x1x32xf32> to vector<32xf32>
    %21 = vector.shape_cast %20 : vector<32xf32> to vector<1x1x1x32xf32>
    %c1_25 = arith.constant 1 : index
    %c1_26 = arith.constant 1 : index
    %c0_27 = arith.constant 0 : index
    %22 = vector.load %arg3[%c1_25, %c1_26, %c0_27] : memref<3x9x32xf32, #tpu.memory_space<vmem>>, vector<1x1x32xf32>
    %23 = vector.shape_cast %22 : vector<1x1x32xf32> to vector<32xf32>
    %24 = vector.shape_cast %23 : vector<32xf32> to vector<1x1x1x32xf32>
    %c2_28 = arith.constant 2 : index
    %c1_29 = arith.constant 1 : index
    %c0_30 = arith.constant 0 : index
    %25 = vector.load %arg3[%c2_28, %c1_29, %c0_30] : memref<3x9x32xf32, #tpu.memory_space<vmem>>, vector<1x1x32xf32>
    %26 = vector.shape_cast %25 : vector<1x1x32xf32> to vector<32xf32>
    %27 = vector.shape_cast %26 : vector<32xf32> to vector<1x1x1x32xf32>
    %28 = vector.broadcast %21 : vector<1x1x1x32xf32> to vector<2x8x8x32xf32>
    %29 = arith.mulf %17, %28 : vector<2x8x8x32xf32>
    %30 = arith.addf %12, %29 : vector<2x8x8x32xf32>
    %31 = vector.broadcast %24 : vector<1x1x1x32xf32> to vector<2x8x8x32xf32>
    %32 = arith.mulf %18, %31 : vector<2x8x8x32xf32>
    %33 = arith.addf %14, %32 : vector<2x8x8x32xf32>
    %34 = vector.broadcast %27 : vector<1x1x1x32xf32> to vector<2x8x8x32xf32>
    %35 = arith.mulf %18, %34 : vector<2x8x8x32xf32>
    %36 = arith.addf %16, %35 : vector<2x8x8x32xf32>
    %c0_31 = arith.constant 0 : index
    %c0_32 = arith.constant 0 : index
    %c2_33 = arith.constant 2 : index
    %c0_34 = arith.constant 0 : index
    %37 = vector.load %arg1[%c0_31, %c0_32, %c2_33, %c0_34] : memref<2x10x10x32xf32, #tpu.memory_space<vmem>>, vector<2x8x8x32xf32>
    %c0_35 = arith.constant 0 : index
    %c0_36 = arith.constant 0 : index
    %c2_37 = arith.constant 2 : index
    %c0_38 = arith.constant 0 : index
    %38 = vector.load %arg2[%c0_35, %c0_36, %c2_37, %c0_38] : memref<2x10x10x32xf32, #tpu.memory_space<vmem>>, vector<2x8x8x32xf32>
    %c0_39 = arith.constant 0 : index
    %c2_40 = arith.constant 2 : index
    %c0_41 = arith.constant 0 : index
    %39 = vector.load %arg3[%c0_39, %c2_40, %c0_41] : memref<3x9x32xf32, #tpu.memory_space<vmem>>, vector<1x1x32xf32>
    %40 = vector.shape_cast %39 : vector<1x1x32xf32> to vector<32xf32>
    %41 = vector.shape_cast %40 : vector<32xf32> to vector<1x1x1x32xf32>
    %c1_42 = arith.constant 1 : index
    %c2_43 = arith.constant 2 : index
    %c0_44 = arith.constant 0 : index
    %42 = vector.load %arg3[%c1_42, %c2_43, %c0_44] : memref<3x9x32xf32, #tpu.memory_space<vmem>>, vector<1x1x32xf32>
    %43 = vector.shape_cast %42 : vector<1x1x32xf32> to vector<32xf32>
    %44 = vector.shape_cast %43 : vector<32xf32> to vector<1x1x1x32xf32>
    %c2_45 = arith.constant 2 : index
    %c2_46 = arith.constant 2 : index
    %c0_47 = arith.constant 0 : index
    %45 = vector.load %arg3[%c2_45, %c2_46, %c0_47] : memref<3x9x32xf32, #tpu.memory_space<vmem>>, vector<1x1x32xf32>
    %46 = vector.shape_cast %45 : vector<1x1x32xf32> to vector<32xf32>
    %47 = vector.shape_cast %46 : vector<32xf32> to vector<1x1x1x32xf32>
    %48 = vector.broadcast %41 : vector<1x1x1x32xf32> to vector<2x8x8x32xf32>
    %49 = arith.mulf %37, %48 : vector<2x8x8x32xf32>
    %50 = arith.addf %30, %49 : vector<2x8x8x32xf32>
    %51 = vector.broadcast %44 : vector<1x1x1x32xf32> to vector<2x8x8x32xf32>
    %52 = arith.mulf %38, %51 : vector<2x8x8x32xf32>
    %53 = arith.addf %33, %52 : vector<2x8x8x32xf32>
    %54 = vector.broadcast %47 : vector<1x1x1x32xf32> to vector<2x8x8x32xf32>
    %55 = arith.mulf %38, %54 : vector<2x8x8x32xf32>
    %56 = arith.addf %36, %55 : vector<2x8x8x32xf32>
    %c0_48 = arith.constant 0 : index
    %c1_49 = arith.constant 1 : index
    %c0_50 = arith.constant 0 : index
    %c0_51 = arith.constant 0 : index
    %57 = vector.load %arg1[%c0_48, %c1_49, %c0_50, %c0_51] : memref<2x10x10x32xf32, #tpu.memory_space<vmem>>, vector<2x8x8x32xf32>
    %c0_52 = arith.constant 0 : index
    %c1_53 = arith.constant 1 : index
    %c0_54 = arith.constant 0 : index
    %c0_55 = arith.constant 0 : index
    %58 = vector.load %arg2[%c0_52, %c1_53, %c0_54, %c0_55] : memref<2x10x10x32xf32, #tpu.memory_space<vmem>>, vector<2x8x8x32xf32>
    %c0_56 = arith.constant 0 : index
    %c3 = arith.constant 3 : index
    %c0_57 = arith.constant 0 : index
    %59 = vector.load %arg3[%c0_56, %c3, %c0_57] : memref<3x9x32xf32, #tpu.memory_space<vmem>>, vector<1x1x32xf32>
    %60 = vector.shape_cast %59 : vector<1x1x32xf32> to vector<32xf32>
    %61 = vector.shape_cast %60 : vector<32xf32> to vector<1x1x1x32xf32>
    %c1_58 = arith.constant 1 : index
    %c3_59 = arith.constant 3 : index
    %c0_60 = arith.constant 0 : index
    %62 = vector.load %arg3[%c1_58, %c3_59, %c0_60] : memref<3x9x32xf32, #tpu.memory_space<vmem>>, vector<1x1x32xf32>
    %63 = vector.shape_cast %62 : vector<1x1x32xf32> to vector<32xf32>
    %64 = vector.shape_cast %63 : vector<32xf32> to vector<1x1x1x32xf32>
    %c2_61 = arith.constant 2 : index
    %c3_62 = arith.constant 3 : index
    %c0_63 = arith.constant 0 : index
    %65 = vector.load %arg3[%c2_61, %c3_62, %c0_63] : memref<3x9x32xf32, #tpu.memory_space<vmem>>, vector<1x1x32xf32>
    %66 = vector.shape_cast %65 : vector<1x1x32xf32> to vector<32xf32>
    %67 = vector.shape_cast %66 : vector<32xf32> to vector<1x1x1x32xf32>
    %68 = vector.broadcast %61 : vector<1x1x1x32xf32> to vector<2x8x8x32xf32>
    %69 = arith.mulf %57, %68 : vector<2x8x8x32xf32>
    %70 = arith.addf %50, %69 : vector<2x8x8x32xf32>
    %71 = vector.broadcast %64 : vector<1x1x1x32xf32> to vector<2x8x8x32xf32>
    %72 = arith.mulf %58, %71 : vector<2x8x8x32xf32>
    %73 = arith.addf %53, %72 : vector<2x8x8x32xf32>
    %74 = vector.broadcast %67 : vector<1x1x1x32xf32> to vector<2x8x8x32xf32>
    %75 = arith.mulf %58, %74 : vector<2x8x8x32xf32>
    %76 = arith.addf %56, %75 : vector<2x8x8x32xf32>
    %c0_64 = arith.constant 0 : index
    %c1_65 = arith.constant 1 : index
    %c1_66 = arith.constant 1 : index
    %c0_67 = arith.constant 0 : index
    %77 = vector.load %arg1[%c0_64, %c1_65, %c1_66, %c0_67] : memref<2x10x10x32xf32, #tpu.memory_space<vmem>>, vector<2x8x8x32xf32>
    %c0_68 = arith.constant 0 : index
    %c1_69 = arith.constant 1 : index
    %c1_70 = arith.constant 1 : index
    %c0_71 = arith.constant 0 : index
    %78 = vector.load %arg2[%c0_68, %c1_69, %c1_70, %c0_71] : memref<2x10x10x32xf32, #tpu.memory_space<vmem>>, vector<2x8x8x32xf32>
    %c0_72 = arith.constant 0 : index
    %c4 = arith.constant 4 : index
    %c0_73 = arith.constant 0 : index
    %79 = vector.load %arg3[%c0_72, %c4, %c0_73] : memref<3x9x32xf32, #tpu.memory_space<vmem>>, vector<1x1x32xf32>
    %80 = vector.shape_cast %79 : vector<1x1x32xf32> to vector<32xf32>
    %81 = vector.shape_cast %80 : vector<32xf32> to vector<1x1x1x32xf32>
    %c1_74 = arith.constant 1 : index
    %c4_75 = arith.constant 4 : index
    %c0_76 = arith.constant 0 : index
    %82 = vector.load %arg3[%c1_74, %c4_75, %c0_76] : memref<3x9x32xf32, #tpu.memory_space<vmem>>, vector<1x1x32xf32>
    %83 = vector.shape_cast %82 : vector<1x1x32xf32> to vector<32xf32>
    %84 = vector.shape_cast %83 : vector<32xf32> to vector<1x1x1x32xf32>
    %c2_77 = arith.constant 2 : index
    %c4_78 = arith.constant 4 : index
    %c0_79 = arith.constant 0 : index
    %85 = vector.load %arg3[%c2_77, %c4_78, %c0_79] : memref<3x9x32xf32, #tpu.memory_space<vmem>>, vector<1x1x32xf32>
    %86 = vector.shape_cast %85 : vector<1x1x32xf32> to vector<32xf32>
    %87 = vector.shape_cast %86 : vector<32xf32> to vector<1x1x1x32xf32>
    %88 = vector.broadcast %81 : vector<1x1x1x32xf32> to vector<2x8x8x32xf32>
    %89 = arith.mulf %77, %88 : vector<2x8x8x32xf32>
    %90 = arith.addf %70, %89 : vector<2x8x8x32xf32>
    %91 = vector.broadcast %84 : vector<1x1x1x32xf32> to vector<2x8x8x32xf32>
    %92 = arith.mulf %78, %91 : vector<2x8x8x32xf32>
    %93 = arith.addf %73, %92 : vector<2x8x8x32xf32>
    %94 = vector.broadcast %87 : vector<1x1x1x32xf32> to vector<2x8x8x32xf32>
    %95 = arith.mulf %78, %94 : vector<2x8x8x32xf32>
    %96 = arith.addf %76, %95 : vector<2x8x8x32xf32>
    %c0_80 = arith.constant 0 : index
    %c1_81 = arith.constant 1 : index
    %c2_82 = arith.constant 2 : index
    %c0_83 = arith.constant 0 : index
    %97 = vector.load %arg1[%c0_80, %c1_81, %c2_82, %c0_83] : memref<2x10x10x32xf32, #tpu.memory_space<vmem>>, vector<2x8x8x32xf32>
    %c0_84 = arith.constant 0 : index
    %c1_85 = arith.constant 1 : index
    %c2_86 = arith.constant 2 : index
    %c0_87 = arith.constant 0 : index
    %98 = vector.load %arg2[%c0_84, %c1_85, %c2_86, %c0_87] : memref<2x10x10x32xf32, #tpu.memory_space<vmem>>, vector<2x8x8x32xf32>
    %c0_88 = arith.constant 0 : index
    %c5 = arith.constant 5 : index
    %c0_89 = arith.constant 0 : index
    %99 = vector.load %arg3[%c0_88, %c5, %c0_89] : memref<3x9x32xf32, #tpu.memory_space<vmem>>, vector<1x1x32xf32>
    %100 = vector.shape_cast %99 : vector<1x1x32xf32> to vector<32xf32>
    %101 = vector.shape_cast %100 : vector<32xf32> to vector<1x1x1x32xf32>
    %c1_90 = arith.constant 1 : index
    %c5_91 = arith.constant 5 : index
    %c0_92 = arith.constant 0 : index
    %102 = vector.load %arg3[%c1_90, %c5_91, %c0_92] : memref<3x9x32xf32, #tpu.memory_space<vmem>>, vector<1x1x32xf32>
    %103 = vector.shape_cast %102 : vector<1x1x32xf32> to vector<32xf32>
    %104 = vector.shape_cast %103 : vector<32xf32> to vector<1x1x1x32xf32>
    %c2_93 = arith.constant 2 : index
    %c5_94 = arith.constant 5 : index
    %c0_95 = arith.constant 0 : index
    %105 = vector.load %arg3[%c2_93, %c5_94, %c0_95] : memref<3x9x32xf32, #tpu.memory_space<vmem>>, vector<1x1x32xf32>
    %106 = vector.shape_cast %105 : vector<1x1x32xf32> to vector<32xf32>
    %107 = vector.shape_cast %106 : vector<32xf32> to vector<1x1x1x32xf32>
    %108 = vector.broadcast %101 : vector<1x1x1x32xf32> to vector<2x8x8x32xf32>
    %109 = arith.mulf %97, %108 : vector<2x8x8x32xf32>
    %110 = arith.addf %90, %109 : vector<2x8x8x32xf32>
    %111 = vector.broadcast %104 : vector<1x1x1x32xf32> to vector<2x8x8x32xf32>
    %112 = arith.mulf %98, %111 : vector<2x8x8x32xf32>
    %113 = arith.addf %93, %112 : vector<2x8x8x32xf32>
    %114 = vector.broadcast %107 : vector<1x1x1x32xf32> to vector<2x8x8x32xf32>
    %115 = arith.mulf %98, %114 : vector<2x8x8x32xf32>
    %116 = arith.addf %96, %115 : vector<2x8x8x32xf32>
    %c0_96 = arith.constant 0 : index
    %c2_97 = arith.constant 2 : index
    %c0_98 = arith.constant 0 : index
    %c0_99 = arith.constant 0 : index
    %117 = vector.load %arg1[%c0_96, %c2_97, %c0_98, %c0_99] : memref<2x10x10x32xf32, #tpu.memory_space<vmem>>, vector<2x8x8x32xf32>
    %c0_100 = arith.constant 0 : index
    %c2_101 = arith.constant 2 : index
    %c0_102 = arith.constant 0 : index
    %c0_103 = arith.constant 0 : index
    %118 = vector.load %arg2[%c0_100, %c2_101, %c0_102, %c0_103] : memref<2x10x10x32xf32, #tpu.memory_space<vmem>>, vector<2x8x8x32xf32>
    %c0_104 = arith.constant 0 : index
    %c6 = arith.constant 6 : index
    %c0_105 = arith.constant 0 : index
    %119 = vector.load %arg3[%c0_104, %c6, %c0_105] : memref<3x9x32xf32, #tpu.memory_space<vmem>>, vector<1x1x32xf32>
    %120 = vector.shape_cast %119 : vector<1x1x32xf32> to vector<32xf32>
    %121 = vector.shape_cast %120 : vector<32xf32> to vector<1x1x1x32xf32>
    %c1_106 = arith.constant 1 : index
    %c6_107 = arith.constant 6 : index
    %c0_108 = arith.constant 0 : index
    %122 = vector.load %arg3[%c1_106, %c6_107, %c0_108] : memref<3x9x32xf32, #tpu.memory_space<vmem>>, vector<1x1x32xf32>
    %123 = vector.shape_cast %122 : vector<1x1x32xf32> to vector<32xf32>
    %124 = vector.shape_cast %123 : vector<32xf32> to vector<1x1x1x32xf32>
    %c2_109 = arith.constant 2 : index
    %c6_110 = arith.constant 6 : index
    %c0_111 = arith.constant 0 : index
    %125 = vector.load %arg3[%c2_109, %c6_110, %c0_111] : memref<3x9x32xf32, #tpu.memory_space<vmem>>, vector<1x1x32xf32>
    %126 = vector.shape_cast %125 : vector<1x1x32xf32> to vector<32xf32>
    %127 = vector.shape_cast %126 : vector<32xf32> to vector<1x1x1x32xf32>
    %128 = vector.broadcast %121 : vector<1x1x1x32xf32> to vector<2x8x8x32xf32>
    %129 = arith.mulf %117, %128 : vector<2x8x8x32xf32>
    %130 = arith.addf %110, %129 : vector<2x8x8x32xf32>
    %131 = vector.broadcast %124 : vector<1x1x1x32xf32> to vector<2x8x8x32xf32>
    %132 = arith.mulf %118, %131 : vector<2x8x8x32xf32>
    %133 = arith.addf %113, %132 : vector<2x8x8x32xf32>
    %134 = vector.broadcast %127 : vector<1x1x1x32xf32> to vector<2x8x8x32xf32>
    %135 = arith.mulf %118, %134 : vector<2x8x8x32xf32>
    %136 = arith.addf %116, %135 : vector<2x8x8x32xf32>
    %c0_112 = arith.constant 0 : index
    %c2_113 = arith.constant 2 : index
    %c1_114 = arith.constant 1 : index
    %c0_115 = arith.constant 0 : index
    %137 = vector.load %arg1[%c0_112, %c2_113, %c1_114, %c0_115] : memref<2x10x10x32xf32, #tpu.memory_space<vmem>>, vector<2x8x8x32xf32>
    %c0_116 = arith.constant 0 : index
    %c2_117 = arith.constant 2 : index
    %c1_118 = arith.constant 1 : index
    %c0_119 = arith.constant 0 : index
    %138 = vector.load %arg2[%c0_116, %c2_117, %c1_118, %c0_119] : memref<2x10x10x32xf32, #tpu.memory_space<vmem>>, vector<2x8x8x32xf32>
    %c0_120 = arith.constant 0 : index
    %c7 = arith.constant 7 : index
    %c0_121 = arith.constant 0 : index
    %139 = vector.load %arg3[%c0_120, %c7, %c0_121] : memref<3x9x32xf32, #tpu.memory_space<vmem>>, vector<1x1x32xf32>
    %140 = vector.shape_cast %139 : vector<1x1x32xf32> to vector<32xf32>
    %141 = vector.shape_cast %140 : vector<32xf32> to vector<1x1x1x32xf32>
    %c1_122 = arith.constant 1 : index
    %c7_123 = arith.constant 7 : index
    %c0_124 = arith.constant 0 : index
    %142 = vector.load %arg3[%c1_122, %c7_123, %c0_124] : memref<3x9x32xf32, #tpu.memory_space<vmem>>, vector<1x1x32xf32>
    %143 = vector.shape_cast %142 : vector<1x1x32xf32> to vector<32xf32>
    %144 = vector.shape_cast %143 : vector<32xf32> to vector<1x1x1x32xf32>
    %c2_125 = arith.constant 2 : index
    %c7_126 = arith.constant 7 : index
    %c0_127 = arith.constant 0 : index
    %145 = vector.load %arg3[%c2_125, %c7_126, %c0_127] : memref<3x9x32xf32, #tpu.memory_space<vmem>>, vector<1x1x32xf32>
    %146 = vector.shape_cast %145 : vector<1x1x32xf32> to vector<32xf32>
    %147 = vector.shape_cast %146 : vector<32xf32> to vector<1x1x1x32xf32>
    %148 = vector.broadcast %141 : vector<1x1x1x32xf32> to vector<2x8x8x32xf32>
    %149 = arith.mulf %137, %148 : vector<2x8x8x32xf32>
    %150 = arith.addf %130, %149 : vector<2x8x8x32xf32>
    %151 = vector.broadcast %144 : vector<1x1x1x32xf32> to vector<2x8x8x32xf32>
    %152 = arith.mulf %138, %151 : vector<2x8x8x32xf32>
    %153 = arith.addf %133, %152 : vector<2x8x8x32xf32>
    %154 = vector.broadcast %147 : vector<1x1x1x32xf32> to vector<2x8x8x32xf32>
    %155 = arith.mulf %138, %154 : vector<2x8x8x32xf32>
    %156 = arith.addf %136, %155 : vector<2x8x8x32xf32>
    %c0_128 = arith.constant 0 : index
    %c2_129 = arith.constant 2 : index
    %c2_130 = arith.constant 2 : index
    %c0_131 = arith.constant 0 : index
    %157 = vector.load %arg1[%c0_128, %c2_129, %c2_130, %c0_131] : memref<2x10x10x32xf32, #tpu.memory_space<vmem>>, vector<2x8x8x32xf32>
    %c0_132 = arith.constant 0 : index
    %c2_133 = arith.constant 2 : index
    %c2_134 = arith.constant 2 : index
    %c0_135 = arith.constant 0 : index
    %158 = vector.load %arg2[%c0_132, %c2_133, %c2_134, %c0_135] : memref<2x10x10x32xf32, #tpu.memory_space<vmem>>, vector<2x8x8x32xf32>
    %c0_136 = arith.constant 0 : index
    %c8 = arith.constant 8 : index
    %c0_137 = arith.constant 0 : index
    %159 = vector.load %arg3[%c0_136, %c8, %c0_137] : memref<3x9x32xf32, #tpu.memory_space<vmem>>, vector<1x1x32xf32>
    %160 = vector.shape_cast %159 : vector<1x1x32xf32> to vector<32xf32>
    %161 = vector.shape_cast %160 : vector<32xf32> to vector<1x1x1x32xf32>
    %c1_138 = arith.constant 1 : index
    %c8_139 = arith.constant 8 : index
    %c0_140 = arith.constant 0 : index
    %162 = vector.load %arg3[%c1_138, %c8_139, %c0_140] : memref<3x9x32xf32, #tpu.memory_space<vmem>>, vector<1x1x32xf32>
    %163 = vector.shape_cast %162 : vector<1x1x32xf32> to vector<32xf32>
    %164 = vector.shape_cast %163 : vector<32xf32> to vector<1x1x1x32xf32>
    %c2_141 = arith.constant 2 : index
    %c8_142 = arith.constant 8 : index
    %c0_143 = arith.constant 0 : index
    %165 = vector.load %arg3[%c2_141, %c8_142, %c0_143] : memref<3x9x32xf32, #tpu.memory_space<vmem>>, vector<1x1x32xf32>
    %166 = vector.shape_cast %165 : vector<1x1x32xf32> to vector<32xf32>
    %167 = vector.shape_cast %166 : vector<32xf32> to vector<1x1x1x32xf32>
    %168 = vector.broadcast %161 : vector<1x1x1x32xf32> to vector<2x8x8x32xf32>
    %169 = arith.mulf %157, %168 : vector<2x8x8x32xf32>
    %170 = arith.addf %150, %169 : vector<2x8x8x32xf32>
    %171 = vector.broadcast %164 : vector<1x1x1x32xf32> to vector<2x8x8x32xf32>
    %172 = arith.mulf %158, %171 : vector<2x8x8x32xf32>
    %173 = arith.addf %153, %172 : vector<2x8x8x32xf32>
    %174 = vector.broadcast %167 : vector<1x1x1x32xf32> to vector<2x8x8x32xf32>
    %175 = arith.mulf %158, %174 : vector<2x8x8x32xf32>
    %176 = arith.addf %156, %175 : vector<2x8x8x32xf32>
    %177 = vector.shape_cast %170 : vector<2x8x8x32xf32> to vector<128x32xf32>
    %178 = arith.truncf %177 : vector<128x32xf32> to vector<128x32xbf16>
    %c0_144 = arith.constant 0 : index
    %c0_145 = arith.constant 0 : index
    %c0_146 = arith.constant 0 : index
    %179 = vector.load %arg4[%c0_144, %c0_145, %c0_146] : memref<3x32x32xbf16, #tpu.memory_space<vmem>>, vector<1x32x32xbf16>
    %180 = vector.shape_cast %179 : vector<1x32x32xbf16> to vector<32x32xbf16>
    %cst = arith.constant dense<0.000000e+00> : vector<128x32xf32>
    %181 = tpu.matmul %178, %180, %cst {dimension_numbers = #tpu.dot_dimension_numbers<[1], [0], [0], [1], [0, 0, 1, 1], [], []>} : vector<128x32xbf16>, vector<32x32xbf16>, vector<128x32xf32> -> vector<128x32xf32>
    %c0_147 = arith.constant 0 : index
    %c0_148 = arith.constant 0 : index
    %c0_149 = arith.constant 0 : index
    %182 = vector.load %arg5[%c0_147, %c0_148, %c0_149] : memref<3x1x32xf32, #tpu.memory_space<vmem>>, vector<1x1x32xf32>
    %183 = vector.shape_cast %182 : vector<1x1x32xf32> to vector<1x32xf32>
    %184 = vector.broadcast %183 : vector<1x32xf32> to vector<128x32xf32>
    %185 = arith.addf %181, %184 : vector<128x32xf32>
    %186 = vector.shape_cast %173 : vector<2x8x8x32xf32> to vector<128x32xf32>
    %187 = arith.truncf %186 : vector<128x32xf32> to vector<128x32xbf16>
    %c1_150 = arith.constant 1 : index
    %c0_151 = arith.constant 0 : index
    %c0_152 = arith.constant 0 : index
    %188 = vector.load %arg4[%c1_150, %c0_151, %c0_152] : memref<3x32x32xbf16, #tpu.memory_space<vmem>>, vector<1x32x32xbf16>
    %189 = vector.shape_cast %188 : vector<1x32x32xbf16> to vector<32x32xbf16>
    %cst_153 = arith.constant dense<0.000000e+00> : vector<128x32xf32>
    %190 = tpu.matmul %187, %189, %cst_153 {dimension_numbers = #tpu.dot_dimension_numbers<[1], [0], [0], [1], [0, 0, 1, 1], [], []>} : vector<128x32xbf16>, vector<32x32xbf16>, vector<128x32xf32> -> vector<128x32xf32>
    %c1_154 = arith.constant 1 : index
    %c0_155 = arith.constant 0 : index
    %c0_156 = arith.constant 0 : index
    %191 = vector.load %arg5[%c1_154, %c0_155, %c0_156] : memref<3x1x32xf32, #tpu.memory_space<vmem>>, vector<1x1x32xf32>
    %192 = vector.shape_cast %191 : vector<1x1x32xf32> to vector<1x32xf32>
    %193 = vector.broadcast %192 : vector<1x32xf32> to vector<128x32xf32>
    %194 = arith.addf %190, %193 : vector<128x32xf32>
    %195 = vector.shape_cast %176 : vector<2x8x8x32xf32> to vector<128x32xf32>
    %196 = arith.truncf %195 : vector<128x32xf32> to vector<128x32xbf16>
    %c2_157 = arith.constant 2 : index
    %c0_158 = arith.constant 0 : index
    %c0_159 = arith.constant 0 : index
    %197 = vector.load %arg4[%c2_157, %c0_158, %c0_159] : memref<3x32x32xbf16, #tpu.memory_space<vmem>>, vector<1x32x32xbf16>
    %198 = vector.shape_cast %197 : vector<1x32x32xbf16> to vector<32x32xbf16>
    %cst_160 = arith.constant dense<0.000000e+00> : vector<128x32xf32>
    %199 = tpu.matmul %196, %198, %cst_160 {dimension_numbers = #tpu.dot_dimension_numbers<[1], [0], [0], [1], [0, 0, 1, 1], [], []>} : vector<128x32xbf16>, vector<32x32xbf16>, vector<128x32xf32> -> vector<128x32xf32>
    %c2_161 = arith.constant 2 : index
    %c0_162 = arith.constant 0 : index
    %c0_163 = arith.constant 0 : index
    %200 = vector.load %arg5[%c2_161, %c0_162, %c0_163] : memref<3x1x32xf32, #tpu.memory_space<vmem>>, vector<1x1x32xf32>
    %201 = vector.shape_cast %200 : vector<1x1x32xf32> to vector<1x32xf32>
    %202 = vector.broadcast %201 : vector<1x32xf32> to vector<128x32xf32>
    %203 = arith.addf %199, %202 : vector<128x32xf32>
    %204 = vector.shape_cast %185 : vector<128x32xf32> to vector<2x64x4x8xf32>
    %205 = tpu.transpose %204, [0, 2, 1, 3] : vector<2x64x4x8xf32> -> vector<2x4x64x8xf32>
    %206 = vector.shape_cast %205 : vector<2x4x64x8xf32> to vector<8x64x8xf32>
    %207 = arith.truncf %206 : vector<8x64x8xf32> to vector<8x64x8xbf16>
    %208 = vector.shape_cast %194 : vector<128x32xf32> to vector<2x64x4x8xf32>
    %209 = tpu.transpose %208, [0, 2, 1, 3] : vector<2x64x4x8xf32> -> vector<2x4x64x8xf32>
    %210 = vector.shape_cast %209 : vector<2x4x64x8xf32> to vector<8x64x8xf32>
    %211 = arith.truncf %210 : vector<8x64x8xf32> to vector<8x64x8xbf16>
    %212 = vector.shape_cast %203 : vector<128x32xf32> to vector<2x64x4x8xf32>
    %213 = tpu.transpose %212, [0, 2, 1, 3] : vector<2x64x4x8xf32> -> vector<2x4x64x8xf32>
    %214 = vector.shape_cast %213 : vector<2x4x64x8xf32> to vector<8x64x8xf32>
    %215 = arith.truncf %214 : vector<8x64x8xf32> to vector<8x64x8xbf16>
    "tpu.trace_start"() <{level = 10 : i32, message = "gqd,gkd->gqk"}> : () -> ()
    %cst_164 = arith.constant dense<0.000000e+00> : vector<8x64x64xf32>
    %216 = tpu.matmul %207, %211, %cst_164 {dimension_numbers = #tpu.dot_dimension_numbers<[2], [2], [1], [1], [0, 0, 0, 1, 1, 1], [0], [0]>} : vector<8x64x8xbf16>, vector<8x64x8xbf16>, vector<8x64x64xf32> -> vector<8x64x64xf32>
    "tpu.trace_stop"() : () -> ()
    %cst_165 = arith.constant dense<0xFF800000> : vector<8x64xf32>
    %217 = vector.multi_reduction <maximumf>, %216, %cst_165 [2] : vector<8x64x64xf32> to vector<8x64xf32>
    %218 = vector.shape_cast %217 : vector<8x64xf32> to vector<8x64x1xf32>
    %219 = vector.broadcast %218 : vector<8x64x1xf32> to vector<8x64x64xf32>
    %220 = arith.subf %216, %219 : vector<8x64x64xf32>
    %221 = math.exp %220 : vector<8x64x64xf32>
    %cst_166 = arith.constant dense<0.000000e+00> : vector<8x64xf32>
    %222 = vector.multi_reduction <add>, %221, %cst_166 [2] : vector<8x64x64xf32> to vector<8x64xf32>
    %223 = vector.shape_cast %222 : vector<8x64xf32> to vector<8x64x1xf32>
    %224 = tpu.reciprocal %223 {approx = true} : vector<8x64x1xf32> -> vector<8x64x1xf32>
    %225 = vector.broadcast %224 : vector<8x64x1xf32> to vector<8x64x64xf32>
    %226 = arith.mulf %221, %225 : vector<8x64x64xf32>
    %227 = arith.truncf %226 : vector<8x64x64xf32> to vector<8x64x64xbf16>
    "tpu.trace_start"() <{level = 10 : i32, message = "gqk,gkd->gqd"}> : () -> ()
    %cst_167 = arith.constant dense<0.000000e+00> : vector<8x64x8xf32>
    %228 = tpu.matmul %227, %215, %cst_167 {dimension_numbers = #tpu.dot_dimension_numbers<[2], [1], [1], [2], [0, 0, 0, 1, 1, 2], [0], [0]>} : vector<8x64x64xbf16>, vector<8x64x8xbf16>, vector<8x64x8xf32> -> vector<8x64x8xf32>
    "tpu.trace_stop"() : () -> ()
    %229 = vector.shape_cast %228 : vector<8x64x8xf32> to vector<2x4x64x8xf32>
    %230 = tpu.transpose %229, [0, 1, 3, 2] : vector<2x4x64x8xf32> -> vector<2x4x8x64xf32>
    %231 = vector.shape_cast %230 : vector<2x4x8x64xf32> to vector<2x32x64xf32>
    %c0_168 = arith.constant 0 : index
    %c0_169 = arith.constant 0 : index
    %c0_170 = arith.constant 0 : index
    %232 = vector.load %arg6[%c0_168, %c0_169, %c0_170] : memref<2x32x64xf32, #tpu.memory_space<vmem>>, vector<2x32x64xf32>
    tpu.vector_store %arg6[%c0_168, %c0_169, %c0_170], %231 {strides = array<i32>} : memref<2x32x64xf32, #tpu.memory_space<vmem>>, vector<2x32x64xf32>,
    return
  }
  func.func @transform_0(%arg0: i32) -> (i32, i32, i32, i32) {
    %c0_i32 = arith.constant 0 : i32
    %c0_i32_0 = arith.constant 0 : i32
    %c0_i32_1 = arith.constant 0 : i32
    %c0_i32_2 = arith.constant 0 : i32
    return %arg0, %c0_i32, %c0_i32_0, %c0_i32_1 : i32, i32, i32, i32
  }
  func.func @transform_1(%arg0: i32) -> (i32, i32, i32, i32) {
    %c0_i32 = arith.constant 0 : i32
    %c0_i32_0 = arith.constant 0 : i32
    %c0_i32_1 = arith.constant 0 : i32
    %c0_i32_2 = arith.constant 0 : i32
    return %arg0, %c0_i32, %c0_i32_0, %c0_i32_1 : i32, i32, i32, i32
  }
  func.func @transform_2(%arg0: i32) -> (i32, i32, i32) {
    %c0_i32 = arith.constant 0 : i32
    %c0_i32_0 = arith.constant 0 : i32
    %c0_i32_1 = arith.constant 0 : i32
    %c0_i32_2 = arith.constant 0 : i32
    return %c0_i32, %c0_i32_0, %c0_i32_1 : i32, i32, i32
  }
  func.func @transform_3(%arg0: i32) -> (i32, i32, i32) {
    %c0_i32 = arith.constant 0 : i32
    %c0_i32_0 = arith.constant 0 : i32
    %c0_i32_1 = arith.constant 0 : i32
    %c0_i32_2 = arith.constant 0 : i32
    return %c0_i32, %c0_i32_0, %c0_i32_1 : i32, i32, i32
  }
  func.func @transform_4(%arg0: i32) -> (i32, i32, i32) {
    %c0_i32 = arith.constant 0 : i32
    %c0_i32_0 = arith.constant 0 : i32
    %c0_i32_1 = arith.constant 0 : i32
    %c0_i32_2 = arith.constant 0 : i32
    return %c0_i32, %c0_i32_0, %c0_i32_1 : i32, i32, i32
  }
  func.func @transform_5(%arg0: i32) -> (i32, i32, i32) {
    %c0_i32 = arith.constant 0 : i32
    %c0_i32_0 = arith.constant 0 : i32
    %c0_i32_1 = arith.constant 0 : i32
    return %arg0, %c0_i32, %c0_i32_0 : i32, i32, i32
  }
}

</mosaic_0001>

<bundles_post_ra>
// kernel: cross_attention_block.1
= control target key start
LH: loop header
LB: loop body
LE: loop exit
PB: predicated region body
PF: predicated region fallthrough
CT: control target
= control target key end

     0   :  { %10 = vsyncpa [#allocation3], 0  ;;  %s18233_s0 = inlined_call_operand.vmem [shape: f32[4,10,10,32], index: 0, kind: input, shape index: {}]   ;;  %s18234_s1 = inlined_call_operand.vmem [shape: f32[4,10,10,32], index: 1, kind: input, shape index: {}]   ;;  %s18235_s2 = inlined_call_operand.vmem [shape: f32[3,9,32], index: 2, kind: input, shape index: {}]   ;;  %s18236_s3 = inlined_call_operand.vmem [shape: bf16[3,32,32], index: 3, kind: input, shape index: {}]   ;;  %s18237_s4 = inlined_call_operand.vmem [shape: f32[3,1,32], index: 4, kind: input, shape index: {}]   ;;  %s18238_s5 = inlined_call_operand.hbm [shape: f32[4,32,64], index: 5, kind: output, shape index: {}]  }
   0x1   :  { %12 = vsyncpa [#allocation3 + $0x1], 0  ;;  %s12905_s18 = smov 0   ;;  %s12907_s19 = smov 0  }
   0x2   :  { %s12909_s20 = smov 0   ;;  %s12911_s21 = smov 0  }
   0x3 LB: > { %s12926_s22 = sadd.s32 4294967295, %s12865_s21   ;;  %s11484_s23 = sadd.s32 4294967294, %s12865_s21   ;;  %s12865_s21 = sphi %s12911_s21, %s18935_s21   ;;  %s12861_s20 = sphi %s12909_s20, %s18934_s20   ;;  %s12857_s19 = sphi %s12907_s19, %s18933_s19   ;;  %s12853_s18 = sphi %s12905_s18, %s18932_s18  }
   0x4   : > { %s12930_s24 = sadd.s32 1, %s12865_s21   ;;  %s140_s25 = sadd.s32 1, %s12861_s20 }
   0x5   : > { %s137_s26 = ssub.s32 %s12865_s21, %s12930_s24  ;;  %p150_p0 = scmp.ne.s32.totalorder %s12861_s20, %s12857_s19 }
   0x6   : > { %p138_p1 = scmp.eq.s32.totalorder %s137_s26, 0  ;;  %p151_p2 = scmp.eq.s32.totalorder %s12926_s22, 1 }
   0x7   : > { %p156_p3 = scmp.ne.s32.totalorder %s12857_s19, %s12853_s18  ;;  %p157_p4 = scmp.eq.s32.totalorder %s11484_s23, 1 }
   0x8   : > { %s12941_s27 = scalar_select %p138_p1, %s12861_s20, %s140_s25  }
   0x9   : > { %p12943_p5 = por %p151_p2, %p150_p0  ;;  %p12947_p6 = por %p157_p4, %p156_p3 }
   0xa   : > { %p11487_p7 = scmp.ge.s32.totalorder %s12865_s21, 1  ;;  %p204_p8 = scmp.lt.s32.totalorder %s12865_s21, 3 }
   0xc   : > { %p205_p9 = pnand %p11487_p7, %p204_p8 }
   0xe   : > { %208 = sbr.rel (%p205_p9) target bundleno = 1656 (0x678), region = 40 }
  0x15   : > { %v12495_v0 = vld [vmem:[%s18236_s3 + $0x10] sm:$0xff]   ;;  %s11489_s7 = sshll.u32 %s12926_s22, 1  ;;  %v12496_v1 = vld [vmem:[%s18236_s3 + $0x18] sm:$0xff]   ;;  %v12497_v3 = vld [vmem:[%s18236_s3] sm:$0xff]   ;;  %vm1531_vm0 = vcmask 261120   ;;  %s12867_s26 = smov 120  }
  0x16   : > { %p240_p10 = scmp.lt.s32.totalorder %s11489_s7, 3  ;;  %12119 = vmatprep.subr.bf16.mxu1 %v12495_v0  ;;  %v12966_v2 = vld [vmem:[%s18235_s2 + $0x10] ss:$0 sm:$0xff]  ;;  %v12974_v4 = vld [vmem:[%s18235_s2 + $0x20] ss:$0 sm:$0xff]  ;;  %12099 = vmatprep.subr.bf16.mxu0 %v12497_v3  ;;  %s12868_s30 = smov 112  }
  0x17   : > { %12120 = vmatpush3.bf16.msra.mxu1 %v12495_v0  ;;  %v12979_v5 = vld [vmem:[%s18235_s2 + $0x11] ss:$0 sm:$0xff]  ;;  %v12984_v6 = vld [vmem:[%s18235_s2 + $0x21] ss:$0 sm:$0xff]  ;;  %v12996_v7 = vld [vmem:[%s18235_s2 + $0x12] ss:$0 sm:$0xff]  ;;  %12100 = vmatpush3.bf16.msra.mxu0 %v12497_v3 }
  0x18   : > { %s18937_s7 = smov (!%p240_p10, %s11489_s7), 3  ;;  %12121 = vmatprep.subr.bf16.mxu1 %v12496_v1  ;;  %v13001_v8 = vld [vmem:[%s18235_s2 + $0x22] ss:$0 sm:$0xff]  ;;  %v13006_v9 = vld [vmem:[%s18235_s2 + $0x13] ss:$0 sm:$0xff]  ;;  %v12498_v0 = vld [vmem:[%s18236_s3 + $0x8] sm:$0xff]  }
  0x19   : > { %s12447_s10 = smul.u32 160, %s18937_s7  ;;  %v13033_v24 = vld [vmem:[%s18235_s2 + $0x23] ss:$0 sm:$0xff]  ;;  %v13038_v25 = vld [vmem:[%s18235_s2 + $0x14] ss:$0 sm:$0xff]  ;;  %12101 = vmatprep.subr.bf16.mxu0 %v12498_v0  ;;  %s12869_s6 = smov 104  }
  0x1a   : > { %v13043_v26 = vld [vmem:[%s18235_s2 + $0x24] ss:$0 sm:$0xff]  ;;  %v13057_v32 = vld [vmem:[%s18235_s2 + $0x15] ss:$0 sm:$0xff]  ;;  %v13062_v33 = vld [vmem:[%s18235_s2 + $0x25] ss:$0 sm:$0xff] }
  0x1b   : > { %12122 = vmatpush3.bf16.msra.mxu1 %v12496_v1  ;;  %s12991_s8 = scalar_lea.vmem %s18234_s1, %s12447_s10  ;;  %v13070_v39 = vld [vmem:[%s18235_s2 + $0x16] ss:$0 sm:$0xff]  ;;  %v13075_v40 = vld [vmem:[%s18235_s2 + $0x26] ss:$0 sm:$0xff]  ;;  %v13089_v46 = vld [vmem:[%s18235_s2 + $0x17] ss:$0 sm:$0xff]  ;;  %12102 = vmatpush3.bf16.msra.mxu0 %v12498_v0  ;;  %s13209_s16 = scalar_lea.vmem %s18233_s0, %s12447_s10 }
  0x1c   : > { %v271_v10 = vld [vmem:[%s12991_s8] sm:$0xff]  ;;  %v272_v11 = vld [vmem:[%s12991_s8 + $0x10] sm:$0xff]  ;;  %v13119_v62 = vld [vmem:[%s18235_s2 + $0x18] ss:$0 sm:$0xff]  ;;  %vm9065_vm1 = vcmask 64512   ;;  %vm9778_vm2 = vcmask 523264  }
  0x1d   : > { %v368_v12 = vld [vmem:[%s12991_s8 + $0x1] sm:$0xff]  ;;  %v316_v13 = vmul.f32 %v12966_v2, %v271_v10  ;;  %v317_v14 = vmul.f32 %v12966_v2, %v272_v11  ;;  %v13014_v15 = vmul.f32 %v12974_v4, %v271_v10  ;;  %v13017_v16 = vmul.f32 %v12974_v4, %v272_v11  ;;  %v369_v17 = vld [vmem:[%s12991_s8 + $0x11] sm:$0xff]  ;;  %s236_s7 = sand.u32 1, %s12857_s19   ;;  %s11940_s17 = sshll.u32 %s12926_s22, 10 }
  0x1e   : > { %v511_v18 = vld [vmem:[%s12991_s8 + $0x2] sm:$0xff]  ;;  %v512_v19 = vld [vmem:[%s12991_s8 + $0x12] sm:$0xff]  ;;  %v427_v20 = vmul.f32 %v12979_v5, %v368_v12  ;;  %v428_v21 = vmul.f32 %v12979_v5, %v369_v17  ;;  %v13025_v22 = vmul.f32 %v12984_v6, %v368_v12  ;;  %v13028_v23 = vmul.f32 %v12984_v6, %v369_v17  ;;  %s11488_s10 = sshll.u32 %s236_s7, 6 }
  0x1f   : > { %v570_v27 = vmul.f32 %v12996_v7, %v511_v18  ;;  %v571_v28 = vmul.f32 %v12996_v7, %v512_v19  ;;  %v13048_v29 = vmul.f32 %v13001_v8, %v511_v18  ;;  %v13051_v30 = vmul.f32 %v13001_v8, %v512_v19  ;;  %v11525_v31 = vld [vmem:[%s12991_s8 + $0x20] sm:$0xff]  ;;  %v11636_v52 = vld [vmem:[%s12991_s8 + $0x30] sm:$0xff]  ;;  %v13124_v63 = vld [vmem:[%s18235_s2 + $0x28] ss:$0 sm:$0xff] }
  0x20   : > { %v443_v34 = vadd.f32 %v427_v20, %v316_v13  ;;  %v444_v35 = vadd.f32 %v428_v21, %v317_v14  ;;  %v715_v36 = vmul.f32 %v13006_v9, %v272_v11  ;;  %v716_v37 = vmul.f32 %v13006_v9, %v11525_v31  ;;  %v11562_v38 = vld [vmem:[%s12991_s8 + $0x21] sm:$0xff]  ;;  %v13104_v53 = vld [vmem:[%s12991_s8 + $0x31] sm:$0xff] }
  0x21   : > { %18479 = vst [vmem:[#allocation5_spill] sm:$0xff] %v13048_v29  ;;  %18480 = vst [vmem:[#allocation6_spill] sm:$0xff] %v13051_v30  ;;  %v13078_v41 = vmul.f32 %v13033_v24, %v272_v11  ;;  %v13081_v42 = vmul.f32 %v13033_v24, %v11525_v31  ;;  %v858_v43 = vmul.f32 %v13038_v25, %v369_v17  ;;  %v11599_v45 = vld [vmem:[%s12991_s8 + $0x22] sm:$0xff]  ;;  %v11710_v18 = vld [vmem:[%s12991_s8 + $0x32] sm:$0xff] }
  0x22   : > { %v859_v44 = vmul.f32 %v13038_v25, %v11562_v38  ;;  %v13094_v47 = vld [vmem:[%s18235_s2 + $0x27] ss:$0 sm:$0xff]  ;;  %v586_v48 = vadd.f32 %v570_v27, %v443_v34  ;;  %v587_v49 = vadd.f32 %v571_v28, %v444_v35  ;;  %v13097_v50 = vmul.f32 %v13043_v26, %v369_v17  ;;  %v13343_v29 = vld [vmem:[%s13209_s16 + $0x51] sm:$0xff] }
  0x23   : > { %18481 = vst [vmem:[#allocation7_spill] sm:$0xff] %v13078_v41  ;;  %18482 = vst [vmem:[#allocation8_spill] sm:$0xff] %v13081_v42  ;;  %v13100_v51 = vmul.f32 %v13043_v26, %v11562_v38  ;;  %v1001_v54 = vmul.f32 %v13057_v32, %v512_v19  ;;  %v1002_v55 = vmul.f32 %v13057_v32, %v11599_v45  ;;  %v13331_v42 = vld [vmem:[%s13209_s16 + $0x42] sm:$0xff] }
  0x24   : > { %18483 = vst [vmem:[#allocation9_spill] sm:$0xff] %v13097_v50  ;;  %v13109_v56 = vmul.f32 %v13062_v33, %v512_v19  ;;  %v13112_v57 = vmul.f32 %v13062_v33, %v11599_v45  ;;  %v731_v58 = vadd.f32 %v715_v36, %v586_v48  ;;  %v732_v59 = vadd.f32 %v716_v37, %v587_v49 }
  0x25   : > { %18484 = vst [vmem:[#allocation10_spill] sm:$0xff] %v13100_v51  ;;  %v1146_v60 = vmul.f32 %v13070_v39, %v11525_v31  ;;  %v1147_v61 = vmul.f32 %v13070_v39, %v11636_v52  ;;  %v13130_v1 = vmul.f32 %v13075_v40, %v11525_v31  ;;  %v13133_v3 = vmul.f32 %v13075_v40, %v11636_v52 }
  0x26   : > { %18485 = vst [vmem:[#allocation11_spill] sm:$0xff] %v13109_v56  ;;  %18486 = vst [vmem:[#allocation12_spill] sm:$0xff] %v13112_v57  ;;  %v1289_v10 = vmul.f32 %v13089_v46, %v11562_v38  ;;  %v1290_v11 = vmul.f32 %v13089_v46, %v13104_v53  ;;  %v874_v12 = vadd.f32 %v858_v43, %v731_v58 }
  0x27   : > { %18487 = vst [vmem:[#allocation13_spill] sm:$0xff] %v13130_v1  ;;  %18488 = vst [vmem:[#allocation14_spill] sm:$0xff] %v13133_v3  ;;  %v875_v13 = vadd.f32 %v859_v44, %v732_v59  ;;  %v13139_v14 = vmul.f32 %v13094_v47, %v11562_v38  ;;  %v13143_v17 = vmul.f32 %v13094_v47, %v13104_v53  ;;  %v13324_v1 = vld [vmem:[%s13209_s16 + $0x41] sm:$0xff] }
  0x28   : > { %v1432_v19 = vmul.f32 %v13119_v62, %v11599_v45  ;;  %v1433_v20 = vmul.f32 %v13119_v62, %v11710_v18  ;;  %v13149_v21 = vmul.f32 %v13124_v63, %v11599_v45  ;;  %v13152_v27 = vmul.f32 %v13124_v63, %v11710_v18 }
  0x29   : > { %18489 = vst [vmem:[#allocation15_spill] sm:$0xff] %v13139_v14  ;;  %18490 = vst [vmem:[#allocation16_spill] sm:$0xff] %v13143_v17  ;;  %v1017_v28 = vadd.f32 %v1001_v54, %v874_v12  ;;  %v1018_v34 = vadd.f32 %v1002_v55, %v875_v13  ;;  %v318_v35 = vmul.f32 %v11525_v31, %v12966_v2 }
  0x2a   : > { %18491 = vst [vmem:[#allocation17_spill] sm:$0xff] %v13149_v21  ;;  %18492 = vst [vmem:[#allocation18_spill] sm:$0xff] %v13152_v27  ;;  %v319_v36 = vmul.f32 %v11636_v52, %v12966_v2  ;;  %v338_v37 = vmul.f32 %v11525_v31, %v12974_v4  ;;  %v339_v43 = vmul.f32 %v11636_v52, %v12974_v4  ;;  %v13167_v4 = vld [vmem:[%s12991_s8 + $0x40] sm:$0xff] }
  0x2b   : > { %v429_v44 = vmul.f32 %v11562_v38, %v12979_v5  ;;  %v430_v48 = vmul.f32 %v13104_v53, %v12979_v5  ;;  %v1162_v49 = vadd.f32 %v1146_v60, %v1017_v28  ;;  %v1163_v58 = vadd.f32 %v1147_v61, %v1018_v34 }
  0x2c   : > { %v465_v59 = vmul.f32 %v11562_v38, %v12984_v6  ;;  %v466_v54 = vmul.f32 %v13104_v53, %v12984_v6  ;;  %v572_v12 = vmul.f32 %v11599_v45, %v12996_v7  ;;  %v573_v31 = vmul.f32 %v11710_v18, %v12996_v7 }
  0x2d   : > { %v445_v55 = vadd.f32 %v429_v44, %v318_v35  ;;  %v446_v0 = vadd.f32 %v430_v48, %v319_v36  ;;  %v1305_v13 = vadd.f32 %v1289_v10, %v1162_v49  ;;  %v1306_v27 = vadd.f32 %v1290_v11, %v1163_v58  ;;  %v13175_v48 = vld [vmem:[%s12991_s8 + $0x41] sm:$0xff] }
  0x2e   : > { %v481_v21 = vadd.f32 %v465_v59, %v338_v37  ;;  %v482_v60 = vadd.f32 %v466_v54, %v339_v43  ;;  %v608_v38 = vmul.f32 %v11599_v45, %v13001_v8  ;;  %v609_v6 = vmul.f32 %v11710_v18, %v13001_v8  ;;  %v13181_v45 = vld [vmem:[%s12991_s8 + $0x42] sm:$0xff]  ;;  %v13190_v59 = vld [vmem:[%s12991_s8 + $0x50] sm:$0xff] }
  0x2f   : > { %v588_v61 = vadd.f32 %v572_v12, %v445_v55  ;;  %v589_v28 = vadd.f32 %v573_v31, %v446_v0  ;;  %v1448_v34 = vadd.f32 %v1432_v19, %v1305_v13  ;;  %v1449_v35 = vadd.f32 %v1433_v20, %v1306_v27 }
  0x30   : > { %v717_v36 = vmul.f32 %v11636_v52, %v13006_v9  ;;  %v718_v44 = vmul.f32 %v13006_v9, %v13167_v4  ;;  %v624_v10 = vadd.f32 %v608_v38, %v481_v21  ;;  %v625_v11 = vadd.f32 %v609_v6, %v482_v60  ;;  %v13202_v60 = vld [vmem:[%s12991_s8 + $0x51] sm:$0xff] }
  0x31   : > { %v753_v37 = vmul.f32 %v11636_v52, %v13033_v24  ;;  %v754_v43 = vmul.f32 %v13033_v24, %v13167_v4  ;;  %v1653_v8 = vpack.c.bf16 %v1449_v35, %v1448_v34  ;;  %v860_v27 = vmul.f32 %v13104_v53, %v13038_v25  ;;  %v13220_v35 = vld [vmem:[%s12991_s8 + $0x52] sm:$0xff] }
  0x32   : > { %v733_v19 = vadd.f32 %v717_v36, %v588_v61  ;;  %v734_v20 = vadd.f32 %v718_v44, %v589_v28  ;;  %v861_v21 = vmul.f32 %v13038_v25, %v13175_v48  ;;  %v896_v52 = vmul.f32 %v13104_v53, %v13043_v26 }
  0x33   : > { %v769_v49 = vadd.f32 %v753_v37, %v624_v10  ;;  %v770_v58 = vadd.f32 %v754_v43, %v625_v11  ;;  %12123 = vmatprep.mubr.msk.bf16.mxu1 %vm1531_vm0, %v1653_v8  ;;  %v897_v54 = vmul.f32 %v13043_v26, %v13175_v48  ;;  %v1003_v55 = vmul.f32 %v11710_v18, %v13057_v32  ;;  %v255_v37 = vld [vmem:[%s13209_s16] sm:$0xff] }
  0x34   : > { %v876_v24 = vadd.f32 %v860_v27, %v733_v19  ;;  %v1004_v0 = vmul.f32 %v13057_v32, %v13181_v45  ;;  %v877_v12 = vadd.f32 %v861_v21, %v734_v20  ;;  %v1039_v13 = vmul.f32 %v11710_v18, %v13062_v33  ;;  %v256_v20 = vld [vmem:[%s13209_s16 + $0x10] sm:$0xff]  ;;  %v13235_v27 = vld [vmem:[%s18235_s2] ss:$0 sm:$0xff] }
  0x35   : > { %v912_v31 = vadd.f32 %v896_v52, %v769_v49  ;;  %v1040_v53 = vmul.f32 %v13062_v33, %v13181_v45  ;;  %v913_v26 = vadd.f32 %v897_v54, %v770_v58  ;;  %v1148_v28 = vmul.f32 %v13070_v39, %v13167_v4  ;;  %v352_v49 = vld [vmem:[%s13209_s16 + $0x1] sm:$0xff]  ;;  %v353_v54 = vld [vmem:[%s13209_s16 + $0x11] sm:$0xff] }
  0x36   : > { %v1019_v61 = vadd.f32 %v1003_v55, %v876_v24  ;;  %v1149_v18 = vmul.f32 %v13070_v39, %v13190_v59  ;;  %v1020_v38 = vadd.f32 %v1004_v0, %v877_v12  ;;  %v1184_v6 = vmul.f32 %v13075_v40, %v13167_v4  ;;  %v495_v55 = vld [vmem:[%s13209_s16 + $0x2] sm:$0xff] }
  0x37   : > { %v1055_v33 = vadd.f32 %v1039_v13, %v912_v31  ;;  %v1185_v34 = vmul.f32 %v13075_v40, %v13190_v59  ;;  %v1056_v36 = vadd.f32 %v1040_v53, %v913_v26  ;;  %v1291_v10 = vmul.f32 %v13089_v46, %v13175_v48  ;;  %v496_v53 = vld [vmem:[%s13209_s16 + $0x12] sm:$0xff]  ;;  %v13257_v26 = vld [vmem:[%s18235_s2 + $0x2] ss:$0 sm:$0xff] }
  0x38   : > { %v1164_v44 = vadd.f32 %v1148_v28, %v1019_v61  ;;  %v1292_v11 = vmul.f32 %v13089_v46, %v13202_v60  ;;  %v1165_v43 = vadd.f32 %v1149_v18, %v1020_v38  ;;  %v1327_v19 = vmul.f32 %v13094_v47, %v13175_v48  ;;  %v13262_v61 = vld [vmem:[%s18235_s2 + $0x3] ss:$0 sm:$0xff] }
  0x39   : > { %v1200_v8 = vadd.f32 %v1184_v6, %v1055_v33  ;;  %v1328_v40 = vmul.f32 %v13094_v47, %v13202_v60  ;;  %v1201_v58 = vadd.f32 %v1185_v34, %v1056_v36  ;;  %v1434_v52 = vmul.f32 %v13119_v62, %v13181_v45  ;;  %v13246_v47 = vld [vmem:[%s18235_s2 + $0x1] ss:$0 sm:$0xff] }
  0x3a   : > { %v1307_v21 = vadd.f32 %v1291_v10, %v1164_v44  ;;  %v1435_v24 = vmul.f32 %v13119_v62, %v13220_v35  ;;  %v1308_v0 = vadd.f32 %v1292_v11, %v1165_v43  ;;  %v1470_v31 = vmul.f32 %v13124_v63, %v13181_v45  ;;  %v13273_v44 = vld [vmem:[%s18235_s2 + $0x4] ss:$0 sm:$0xff]  ;;  %v13278_v10 = vld [vmem:[%s18235_s2 + $0x5] ss:$0 sm:$0xff] }
  0x3b   : > { %v1343_v12 = vadd.f32 %v1327_v19, %v1200_v8  ;;  %v1471_v13 = vmul.f32 %v13124_v63, %v13220_v35  ;;  %v1344_v28 = vadd.f32 %v1328_v40, %v1201_v58  ;;  %v296_v38 = vmul.f32 %v13235_v27, %v255_v37  ;;  %v11509_v8 = vld [vmem:[%s13209_s16 + $0x20] sm:$0xff] }
  0x3c   : > { %v1450_v18 = vadd.f32 %v1434_v52, %v1307_v21  ;;  %v297_v33 = vmul.f32 %v13235_v27, %v256_v20  ;;  %v1451_v63 = vadd.f32 %v1435_v24, %v1308_v0  ;;  %v391_v34 = vmul.f32 %v13246_v47, %v352_v49  ;;  %v11546_v40 = vld [vmem:[%s13209_s16 + $0x21] sm:$0xff] }
  0x3d   : > { %v13266_v6 = vadd.f32 %v1470_v31, %v1343_v12  ;;  %v392_v36 = vmul.f32 %v13246_v47, %v353_v54  ;;  %v13280_v11 = vadd.f32 %v1471_v13, %v1344_v28  ;;  %v534_v37 = vmul.f32 %v13257_v26, %v495_v55  ;;  %v13290_v49 = vld [vmem:[%s18235_s2 + $0x6] ss:$0 sm:$0xff]  ;;  %v13297_v0 = vld [vmem:[%s18235_s2 + $0x7] ss:$0 sm:$0xff] }
  0x3e   : > { %v535_v43 = vmul.f32 %v13257_v26, %v496_v53  ;;  %v679_v19 = vmul.f32 %v13262_v61, %v256_v20  ;;  %v1654_v58 = vpack.c.bf16 %v1451_v63, %v1450_v18  ;;  %v407_v21 = vadd.f32 %v391_v34, %v296_v38  ;;  %v11583_v55 = vld [vmem:[%s13209_s16 + $0x22] sm:$0xff]  ;;  %v11620_v18 = vld [vmem:[%s13209_s16 + $0x30] sm:$0xff] }
  0x3f   : > { %18493 = vst [vmem:[#allocation19_spill] sm:$0xff] %v13266_v6  ;;  %18494 = vst [vmem:[#allocation20_spill] sm:$0xff] %v13280_v11  ;;  %v408_v52 = vadd.f32 %v392_v36, %v297_v33  ;;  %v680_v24 = vmul.f32 %v13262_v61, %v11509_v8  ;;  %v13302_v20 = vld [vmem:[%s18235_s2 + $0x8] ss:$0 sm:$0xff]  ;;  %v822_v12 = vmul.f32 %v13273_v44, %v353_v54  ;;  %v11657_v36 = vld [vmem:[%s13209_s16 + $0x31] sm:$0xff] }
  0x40   : > { %v823_v31 = vmul.f32 %v13273_v44, %v11546_v40  ;;  %v965_v13 = vmul.f32 %v13278_v10, %v496_v53  ;;  %v966_v28 = vmul.f32 %v13278_v10, %v11583_v55  ;;  %12124 = vmatmul.mubr.msk.bf16.vlgmr.msra.gmra.mrb[0].mxu1 %vm1531_vm0, %v1654_v58  ;;  %v550_v38 = vadd.f32 %v534_v37, %v407_v21  ;;  %v11694_v54 = vld [vmem:[%s13209_s16 + $0x32] sm:$0xff]  ;;  %v13319_v58 = vld [vmem:[%s13209_s16 + $0x40] sm:$0xff] }
  0x41   : > { %v551_v33 = vadd.f32 %v535_v43, %v408_v52  ;;  %v1110_v63 = vmul.f32 %v13290_v49, %v11509_v8  ;;  %v1111_v34 = vmul.f32 %v13290_v49, %v11620_v18  ;;  %v1253_v17 = vmul.f32 %v13297_v0, %v11546_v40 }
  0x42   : > { %v1254_v14 = vmul.f32 %v13297_v0, %v11657_v36  ;;  %v1396_v53 = vmul.f32 %v13302_v20, %v11583_v55  ;;  %v1397_v3 = vmul.f32 %v13302_v20, %v11694_v54  ;;  %v695_v37 = vadd.f32 %v679_v19, %v550_v38 }
  0x43   : > { %v696_v43 = vadd.f32 %v680_v24, %v551_v33  ;;  %v298_v21 = vmul.f32 %v11509_v8, %v13235_v27  ;;  %v299_v52 = vmul.f32 %v11620_v18, %v13235_v27  ;;  %v393_v57 = vmul.f32 %v11546_v40, %v13246_v47  ;;  %v13337_v33 = vld [vmem:[%s13209_s16 + $0x50] sm:$0xff] }
  0x44   : > { %v394_v56 = vmul.f32 %v11657_v36, %v13246_v47  ;;  %v536_v51 = vmul.f32 %v11583_v55, %v13257_v26  ;;  %v537_v50 = vmul.f32 %v11694_v54, %v13257_v26  ;;  %v838_v19 = vadd.f32 %v822_v12, %v695_v37 }
  0x45   : > { %v839_v24 = vadd.f32 %v823_v31, %v696_v43  ;;  %v681_v8 = vmul.f32 %v11620_v18, %v13262_v61  ;;  %v682_v38 = vmul.f32 %v13262_v61, %v13319_v58  ;;  %v409_v41 = vadd.f32 %v393_v57, %v298_v21  ;;  %v13349_v18 = vld [vmem:[%s13209_s16 + $0x52] sm:$0xff] }
  0x46   : > { %v410_v40 = vadd.f32 %v394_v56, %v299_v52  ;;  %v824_v30 = vmul.f32 %v11657_v36, %v13273_v44  ;;  %v825_v55 = vmul.f32 %v13273_v44, %v13324_v1  ;;  %v981_v11 = vadd.f32 %v965_v13, %v838_v19 }
  0x47   : > { %v982_v6 = vadd.f32 %v966_v28, %v839_v24  ;;  %v967_v12 = vmul.f32 %v11694_v54, %v13278_v10  ;;  %v968_v31 = vmul.f32 %v13278_v10, %v13331_v42  ;;  %v552_v37 = vadd.f32 %v536_v51, %v409_v41 }
  0x48   : > { %v553_v43 = vadd.f32 %v537_v50, %v410_v40  ;;  %v1112_v56 = vmul.f32 %v13290_v49, %v13319_v58  ;;  %v1113_v57 = vmul.f32 %v13290_v49, %v13337_v33  ;;  %v1126_v36 = vadd.f32 %v1110_v63, %v981_v11 }
  0x49   : > { %v1127_v21 = vadd.f32 %v1111_v34, %v982_v6  ;;  %v1255_v13 = vmul.f32 %v13297_v0, %v13324_v1  ;;  %v1256_v28 = vmul.f32 %v13297_v0, %v13343_v29  ;;  %v697_v54 = vadd.f32 %v681_v8, %v552_v37 }
  0x4a   : > { %v698_v52 = vadd.f32 %v682_v38, %v553_v43  ;;  %v1398_v41 = vmul.f32 %v13302_v20, %v13331_v42  ;;  %v1399_v50 = vmul.f32 %v13302_v20, %v13349_v18  ;;  %v1269_v51 = vadd.f32 %v1253_v17, %v1126_v36  ;;  %v13374_v17 = vld [vmem:[%s18236_s3 + $0x20] sm:$0xff]  }
  0x4b   : > { %v1270_v19 = vadd.f32 %v1254_v14, %v1127_v21  ;;  %v320_v6 = vmul.f32 %v13167_v4, %v12966_v2  ;;  %v321_v11 = vmul.f32 %v13190_v59, %v12966_v2  ;;  %v840_v63 = vadd.f32 %v824_v30, %v697_v54  ;;  %v11529_v43 = vld [vmem:[%s12991_s8 + $0x60] sm:$0xff]  ;;  %12139 = vmatprep.subr.bf16.mxu0 %v13374_v17 }
  0x4c   : > { %v841_v34 = vadd.f32 %v825_v55, %v698_v52  ;;  %v431_v24 = vmul.f32 %v13175_v48, %v12979_v5  ;;  %v432_v8 = vmul.f32 %v13202_v60, %v12979_v5  ;;  %v1412_v14 = vadd.f32 %v1396_v53, %v1269_v51  ;;  %v11566_v52 = vld [vmem:[%s12991_s8 + $0x61] sm:$0xff] }
  0x4d   : > { %v1413_v38 = vadd.f32 %v1397_v3, %v1270_v19  ;;  %v574_v4 = vmul.f32 %v13181_v45, %v12996_v7  ;;  %v575_v30 = vmul.f32 %v13220_v35, %v12996_v7  ;;  %v983_v40 = vadd.f32 %v967_v12, %v840_v63  ;;  %v11603_v51 = vld [vmem:[%s12991_s8 + $0x62] sm:$0xff] }
  0x4e   : > { %v984_v48 = vadd.f32 %v968_v31, %v841_v34  ;;  %v447_v55 = vadd.f32 %v431_v24, %v320_v6  ;;  %v448_v37 = vadd.f32 %v432_v8, %v321_v11  ;;  %v719_v53 = vmul.f32 %v13190_v59, %v13006_v9  ;;  %v11640_v34 = vld [vmem:[%s12991_s8 + $0x70] sm:$0xff] }
  0x4f   : > { %v1500_v36 = vpack.c.bf16 %v1413_v38, %v1412_v14  ;;  %v720_v3 = vmul.f32 %v13006_v9, %v11529_v43  ;;  %v862_v45 = vmul.f32 %v13202_v60, %v13038_v25  ;;  %v1128_v21 = vadd.f32 %v1112_v56, %v983_v40  ;;  %v11677_v24 = vld [vmem:[%s12991_s8 + $0x71] sm:$0xff] }
  0x50   : > { %v1129_v54 = vadd.f32 %v1113_v57, %v984_v48  ;;  %v590_v12 = vadd.f32 %v574_v4, %v447_v55  ;;  %v591_v31 = vadd.f32 %v575_v30, %v448_v37  ;;  %v863_v19 = vmul.f32 %v13038_v25, %v11566_v52 }
  0x51   : > { %12103 = vmatprep.mubr.msk.bf16.mxu0 %vm1531_vm0, %v1500_v36  ;;  %v1005_v59 = vmul.f32 %v13220_v35, %v13057_v32  ;;  %v1006_v6 = vmul.f32 %v13057_v32, %v11603_v51  ;;  %v1150_v60 = vmul.f32 %v13070_v39, %v11529_v43  ;;  %v1271_v11 = vadd.f32 %v1255_v13, %v1128_v21  ;;  %v11714_v13 = vld [vmem:[%s12991_s8 + $0x72] sm:$0xff] }
  0x52   : > { %v1272_v56 = vadd.f32 %v1256_v28, %v1129_v54  ;;  %v735_v63 = vadd.f32 %v719_v53, %v590_v12  ;;  %v736_v57 = vadd.f32 %v720_v3, %v591_v31  ;;  %v1151_v8 = vmul.f32 %v13070_v39, %v11640_v34  ;;  %v11531_v53 = vld [vmem:[%s12991_s8 + $0x80] sm:$0xff] }
  0x53   : > { %v1293_v14 = vmul.f32 %v13089_v46, %v11566_v52  ;;  %v1294_v38 = vmul.f32 %v13089_v46, %v11677_v24  ;;  %v1436_v35 = vmul.f32 %v13119_v62, %v11603_v51  ;;  %v1414_v4 = vadd.f32 %v1398_v41, %v1271_v11 }
  0x54   : > { %v1415_v30 = vadd.f32 %v1399_v50, %v1272_v56  ;;  %v878_v40 = vadd.f32 %v862_v45, %v735_v63  ;;  %v879_v48 = vadd.f32 %v863_v19, %v736_v57  ;;  %v1437_v28 = vmul.f32 %v13119_v62, %v11714_v13  ;;  %v11568_v50 = vld [vmem:[%s12991_s8 + $0x81] sm:$0xff]  ;;  %v11642_v63 = vld [vmem:[%s12991_s8 + $0x90] sm:$0xff] }
  0x55   : > { %v322_v55 = vmul.f32 %v11529_v43, %v12966_v2  ;;  %v323_v37 = vmul.f32 %v11640_v34, %v12966_v2  ;;  %v433_v36 = vmul.f32 %v11566_v52, %v12979_v5  ;;  %v434_v41 = vmul.f32 %v11677_v24, %v12979_v5  ;;  %v12500_v45 = vld [vmem:[%s18236_s3 + $0x28] sm:$0xff]  }
  0x56   : > { %v1501_v3 = vpack.c.bf16 %v1415_v30, %v1414_v4  ;;  %v1021_v21 = vadd.f32 %v1005_v59, %v878_v40  ;;  %v1022_v54 = vadd.f32 %v1006_v6, %v879_v48  ;;  %v576_v43 = vmul.f32 %v11603_v51, %v12996_v7  ;;  %v11605_v19 = vld [vmem:[%s12991_s8 + $0x82] sm:$0xff]  ;;  %v11679_v40 = vld [vmem:[%s12991_s8 + $0x91] sm:$0xff] }
  0x57   : > { %v449_v12 = vadd.f32 %v433_v36, %v322_v55  ;;  %v577_v31 = vmul.f32 %v11714_v13, %v12996_v7  ;;  %v721_v52 = vmul.f32 %v11640_v34, %v13006_v9  ;;  %v450_v11 = vadd.f32 %v434_v41, %v323_v37 }
  0x58   : > { %12104 = vmatmul.mubr.msk.bf16.vlgmr.msra.gmra.mrb[0].mxu0 %vm1531_vm0, %v1501_v3  ;;  %v1166_v59 = vadd.f32 %v1150_v60, %v1021_v21  ;;  %v1167_v6 = vadd.f32 %v1151_v8, %v1022_v54  ;;  %v722_v56 = vmul.f32 %v13006_v9, %v11531_v53  ;;  %v864_v4 = vmul.f32 %v11677_v24, %v13038_v25  ;;  %v11716_v8 = vld [vmem:[%s12991_s8 + $0x92] sm:$0xff] }
  0x59   : > { %v592_v57 = vadd.f32 %v576_v43, %v449_v12  ;;  %v865_v30 = vmul.f32 %v13038_v25, %v11568_v50  ;;  %v1007_v51 = vmul.f32 %v11714_v13, %v13057_v32  ;;  %12140 = vmatpush3.bf16.msra.mxu0 %v13374_v17  ;;  %v593_v55 = vadd.f32 %v577_v31, %v450_v11  ;;  %v11550_v11 = vld [vmem:[%s13209_s16 + $0x61] sm:$0xff] }
  0x5a   : > { %v1309_v34 = vadd.f32 %v1293_v14, %v1166_v59  ;;  %v1310_v48 = vadd.f32 %v1294_v38, %v1167_v6  ;;  %v1008_v60 = vmul.f32 %v13057_v32, %v11605_v19  ;;  %12141 = vmatprep.subr.bf16.mxu0 %v12500_v45  ;;  %v1152_v36 = vmul.f32 %v13070_v39, %v11531_v53 }
  0x5b   : > { %v737_v37 = vadd.f32 %v721_v52, %v592_v57  ;;  %v1153_v3 = vmul.f32 %v13070_v39, %v11642_v63  ;;  %v1295_v24 = vmul.f32 %v13089_v46, %v11568_v50  ;;  %v738_v13 = vadd.f32 %v722_v56, %v593_v55 }
  0x5c   : > { %v1452_v21 = vadd.f32 %v1436_v35, %v1309_v34  ;;  %v1453_v54 = vadd.f32 %v1437_v28, %v1310_v48  ;;  %v1296_v17 = vmul.f32 %v13089_v46, %v11679_v40  ;;  %v1438_v38 = vmul.f32 %v13119_v62, %v11605_v19  ;;  %v11624_v34 = vld [vmem:[%s13209_s16 + $0x70] sm:$0xff] }
  0x5d   : > { %v880_v14 = vadd.f32 %v864_v4, %v737_v37  ;;  %v1439_v41 = vmul.f32 %v13119_v62, %v11716_v8  ;;  %v300_v12 = vmul.f32 %v13319_v58, %v13235_v27  ;;  %12142 = vmatpush3.bf16.msra.mxu0 %v12500_v45  ;;  %v881_v43 = vadd.f32 %v865_v30, %v738_v13  ;;  %v11513_v45 = vld [vmem:[%s13209_s16 + $0x60] sm:$0xff] }
  0x5e   : > { %v1655_v53 = vpack.c.bf16 %v1453_v54, %v1452_v21  ;;  %v301_v35 = vmul.f32 %v13337_v33, %v13235_v27  ;;  %v395_v28 = vmul.f32 %v13324_v1, %v13246_v47  ;;  %v396_v31 = vmul.f32 %v13343_v29, %v13246_v47  ;;  %v11587_v4 = vld [vmem:[%s13209_s16 + $0x62] sm:$0xff]  ;;  %v11698_v54 = vld [vmem:[%s13209_s16 + $0x72] sm:$0xff] }
  0x5f   : > { %v1023_v50 = vadd.f32 %v1007_v51, %v880_v14  ;;  %v538_v52 = vmul.f32 %v13331_v42, %v13257_v26  ;;  %v539_v58 = vmul.f32 %v13349_v18, %v13257_v26  ;;  %v1024_v19 = vadd.f32 %v1008_v60, %v881_v43 }
  0x60   : > { %12127 = vmatprep.mubr.msk.bf16.mxu1 %vm1531_vm0, %v1655_v53  ;;  %v411_v59 = vadd.f32 %v395_v28, %v300_v12  ;;  %v683_v1 = vmul.f32 %v13337_v33, %v13262_v61  ;;  %v684_v6 = vmul.f32 %v13262_v61, %v11513_v45  ;;  %v412_v63 = vadd.f32 %v396_v31, %v301_v35  ;;  %v11515_v35 = vld [vmem:[%s13209_s16 + $0x80] sm:$0xff] }
  0x61   : > { %v1168_v56 = vadd.f32 %v1152_v36, %v1023_v50  ;;  %v826_v42 = vmul.f32 %v13343_v29, %v13273_v44  ;;  %v827_v57 = vmul.f32 %v13273_v44, %v11550_v11  ;;  %v1169_v30 = vadd.f32 %v1153_v3, %v1024_v19  ;;  %v11661_v29 = vld [vmem:[%s13209_s16 + $0x71] sm:$0xff] }
  0x62   : > { %v554_v51 = vadd.f32 %v538_v52, %v411_v59  ;;  %v969_v40 = vmul.f32 %v13349_v18, %v13278_v10  ;;  %v970_v33 = vmul.f32 %v13278_v10, %v11587_v4  ;;  %v555_v55 = vadd.f32 %v539_v58, %v412_v63  ;;  %v11552_v52 = vld [vmem:[%s13209_s16 + $0x81] sm:$0xff]  ;;  %v11626_v63 = vld [vmem:[%s13209_s16 + $0x90] sm:$0xff] }
  0x63   : > { %v1311_v48 = vadd.f32 %v1295_v24, %v1168_v56  ;;  %v1114_v60 = vmul.f32 %v13290_v49, %v11513_v45  ;;  %v1115_v8 = vmul.f32 %v13290_v49, %v11624_v34  ;;  %v1312_v37 = vadd.f32 %v1296_v17, %v1169_v30 }
  0x64   : > { %v699_v36 = vadd.f32 %v683_v1, %v554_v51  ;;  %v1257_v21 = vmul.f32 %v13297_v0, %v11550_v11  ;;  %v1258_v3 = vmul.f32 %v13297_v0, %v11661_v29  ;;  %v700_v13 = vadd.f32 %v684_v6, %v555_v55  ;;  %v11663_v51 = vld [vmem:[%s13209_s16 + $0x91] sm:$0xff] }
  0x65   : > { %v1454_v18 = vadd.f32 %v1438_v38, %v1311_v48  ;;  %v1400_v14 = vmul.f32 %v13302_v20, %v11587_v4  ;;  %v1401_v24 = vmul.f32 %v13302_v20, %v11698_v54  ;;  %v1455_v12 = vadd.f32 %v1439_v41, %v1312_v37  ;;  %v11700_v55 = vld [vmem:[%s13209_s16 + $0x92] sm:$0xff]  ;;  %v13486_v37 = vld [vmem:[%s12991_s8 + $0xa0] sm:$0xff] }
  0x66   : > { %v842_v53 = vadd.f32 %v826_v42, %v699_v36  ;;  %v302_v43 = vmul.f32 %v11513_v45, %v13235_v27  ;;  %v303_v17 = vmul.f32 %v11624_v34, %v13235_v27  ;;  %v843_v28 = vadd.f32 %v827_v57, %v700_v13  ;;  %v11589_v45 = vld [vmem:[%s13209_s16 + $0x82] sm:$0xff] }
  0x67   : > { %v397_v50 = vmul.f32 %v11550_v11, %v13246_v47  ;;  %v398_v31 = vmul.f32 %v11661_v29, %v13246_v47  ;;  %v540_v38 = vmul.f32 %v11587_v4, %v13257_v26  ;;  %v1656_v58 = vpack.c.bf16 %v1455_v12, %v1454_v18 }
  0x68   : > { %v985_v19 = vadd.f32 %v969_v40, %v842_v53  ;;  %v541_v41 = vmul.f32 %v11698_v54, %v13257_v26  ;;  %v685_v59 = vmul.f32 %v11624_v34, %v13262_v61  ;;  %v986_v1 = vadd.f32 %v970_v33, %v843_v28  ;;  %v13502_v28 = vld [vmem:[%s12991_s8 + $0xa2] sm:$0xff] }
  0x69   : > { %v413_v6 = vadd.f32 %v397_v50, %v302_v43  ;;  %v414_v56 = vadd.f32 %v398_v31, %v303_v17  ;;  %v686_v11 = vmul.f32 %v13262_v61, %v11515_v35  ;;  %12128 = vmatmul.mubr.msk.bf16.gmra.mrb[4].mxu1 %vm1531_vm0, %v1656_v58  ;;  %v828_v57 = vmul.f32 %v11661_v29, %v13273_v44  ;;  %v13499_v17 = vld [vmem:[%s12991_s8 + $0xb1] sm:$0xff] }
  0x6a   : > { %v1130_v42 = vadd.f32 %v1114_v60, %v985_v19  ;;  %v829_v4 = vmul.f32 %v13273_v44, %v11552_v52  ;;  %v971_v30 = vmul.f32 %v11698_v54, %v13278_v10  ;;  %v1131_v40 = vadd.f32 %v1115_v8, %v986_v1  ;;  %v13492_v54 = vld [vmem:[%s12991_s8 + $0xb0] sm:$0xff]  ;;  %v13495_v8 = vld [vmem:[%s12991_s8 + $0xa1] sm:$0xff] }
  0x6b   : > { %v556_v33 = vadd.f32 %v540_v38, %v413_v6  ;;  %v557_v34 = vadd.f32 %v541_v41, %v414_v56  ;;  %v972_v48 = vmul.f32 %v13278_v10, %v11589_v45  ;;  %v1116_v36 = vmul.f32 %v13290_v49, %v11515_v35  ;;  %v13522_v56 = vld [vmem:[%s12991_s8 + $0xc0] sm:$0xff] }
  0x6c   : > { %v1273_v60 = vadd.f32 %v1257_v21, %v1130_v42  ;;  %v1117_v29 = vmul.f32 %v13290_v49, %v11626_v63  ;;  %v1259_v18 = vmul.f32 %v13297_v0, %v11552_v52  ;;  %v1274_v13 = vadd.f32 %v1258_v3, %v1131_v40  ;;  %v13505_v21 = vld [vmem:[%s12991_s8 + $0xb2] sm:$0xff] }
  0x6d   : > { %v701_v12 = vadd.f32 %v685_v59, %v556_v33  ;;  %v702_v53 = vadd.f32 %v686_v11, %v557_v34  ;;  %v1260_v43 = vmul.f32 %v13297_v0, %v11663_v51  ;;  %v1402_v50 = vmul.f32 %v13302_v20, %v11589_v45  ;;  %v13537_v34 = vld [vmem:[%s12991_s8 + $0xc2] sm:$0xff] }
  0x6e   : > { %v1416_v35 = vadd.f32 %v1400_v14, %v1273_v60  ;;  %v1403_v31 = vmul.f32 %v13302_v20, %v11700_v55  ;;  %v324_v38 = vmul.f32 %v12966_v2, %v13486_v37  ;;  %v1417_v3 = vadd.f32 %v1401_v24, %v1274_v13 }
  0x6f   : > { %v844_v52 = vadd.f32 %v828_v57, %v701_v12  ;;  %v845_v58 = vadd.f32 %v829_v4, %v702_v53  ;;  %v325_v19 = vmul.f32 %v12966_v2, %v13492_v54  ;;  %v435_v41 = vmul.f32 %v12979_v5, %v13495_v8  ;;  %v13529_v4 = vld [vmem:[%s12991_s8 + $0xc1] sm:$0xff]  ;;  %v13544_v12 = vld [vmem:[%s12991_s8 + $0xd0] sm:$0xff] }
  0x70   : > { %v436_v14 = vmul.f32 %v12979_v5, %v13499_v17  ;;  %v578_v59 = vmul.f32 %v12996_v7, %v13502_v28  ;;  %v579_v45 = vmul.f32 %v12996_v7, %v13505_v21  ;;  %v1502_v24 = vpack.c.bf16 %v1417_v3, %v1416_v35 }
  0x71   : > { %v987_v1 = vadd.f32 %v971_v30, %v844_v52  ;;  %v988_v6 = vadd.f32 %v972_v48, %v845_v58  ;;  %v723_v11 = vmul.f32 %v13006_v9, %v13492_v54  ;;  %v451_v63 = vadd.f32 %v435_v41, %v324_v38  ;;  %v13551_v38 = vld [vmem:[%s12991_s8 + $0xd1] sm:$0xff] }
  0x72   : > { %v452_v42 = vadd.f32 %v436_v14, %v325_v19  ;;  %v724_v57 = vmul.f32 %v13006_v9, %v13522_v56  ;;  %v866_v51 = vmul.f32 %v13038_v25, %v13499_v17  ;;  %12107 = vmatprep.mubr.msk.bf16.mxu0 %vm1531_vm0, %v1502_v24  ;;  %v867_v33 = vmul.f32 %v13038_v25, %v13529_v4  ;;  %v13558_v41 = vld [vmem:[%s12991_s8 + $0xd2] sm:$0xff] }
  0x73   : > { %v1132_v30 = vadd.f32 %v1116_v36, %v987_v1  ;;  %v1133_v40 = vadd.f32 %v1117_v29, %v988_v6  ;;  %v1009_v48 = vmul.f32 %v13057_v32, %v13505_v21  ;;  %v594_v55 = vadd.f32 %v578_v59, %v451_v63  ;;  %18495 = vst [vmem:[#allocation21_spill] sm:$0xff] %v13558_v41  ;;  %v13571_v63 = vld [vmem:[%s12991_s8 + $0xe0] sm:$0xff] }
  0x74   : > { %v595_v60 = vadd.f32 %v579_v45, %v452_v42  ;;  %v1010_v13 = vmul.f32 %v13057_v32, %v13537_v34  ;;  %v1154_v36 = vmul.f32 %v13070_v39, %v13522_v56  ;;  %v1155_v35 = vmul.f32 %v13070_v39, %v13544_v12 }
  0x75   : > { %v1275_v29 = vadd.f32 %v1259_v18, %v1132_v30  ;;  %v1276_v53 = vadd.f32 %v1260_v43, %v1133_v40  ;;  %v1297_v3 = vmul.f32 %v13089_v46, %v13529_v4  ;;  %v739_v52 = vadd.f32 %v723_v11, %v594_v55  ;;  %v13585_v55 = vld [vmem:[%s12991_s8 + $0xe2] sm:$0xff] }
  0x76   : > { %v740_v58 = vadd.f32 %v724_v57, %v595_v60  ;;  %v1298_v19 = vmul.f32 %v13089_v46, %v13551_v38  ;;  %v1440_v18 = vmul.f32 %v13119_v62, %v13537_v34  ;;  %v1441_v59 = vmul.f32 %v13119_v62, %v13558_v41  ;;  %18496 = vst [vmem:[#allocation22_spill] sm:$0xff] %v13585_v55  ;;  %v13588_v60 = vld [vmem:[%s12991_s8 + $0xf0] sm:$0xff] }
  0x77   : > { %v1418_v43 = vadd.f32 %v1402_v50, %v1275_v29  ;;  %v1419_v14 = vadd.f32 %v1403_v31, %v1276_v53  ;;  %v326_v45 = vmul.f32 %v13522_v56, %v12966_v2  ;;  %v882_v24 = vadd.f32 %v866_v51, %v739_v52  ;;  %v13574_v50 = vld [vmem:[%s12991_s8 + $0xe1] sm:$0xff]  ;;  %18497 = vst [vmem:[#allocation23_spill] sm:$0xff] %v13588_v60 }
  0x78   : > { %v883_v1 = vadd.f32 %v867_v33, %v740_v58  ;;  %v327_v6 = vmul.f32 %v13544_v12, %v12966_v2  ;;  %v437_v11 = vmul.f32 %v13529_v4, %v12979_v5  ;;  %v438_v42 = vmul.f32 %v13551_v38, %v12979_v5 }
  0x79   : > { %v1503_v31 = vpack.c.bf16 %v1419_v14, %v1418_v43  ;;  %v580_v57 = vmul.f32 %v13537_v34, %v12996_v7  ;;  %v581_v51 = vmul.f32 %v13558_v41, %v12996_v7  ;;  %v1025_v30 = vadd.f32 %v1009_v48, %v882_v24  ;;  %v13600_v43 = vld [vmem:[%s12991_s8 + $0xf1] sm:$0xff] }
  0x7a   : > { %v1026_v2 = vadd.f32 %v1010_v13, %v883_v1  ;;  %v453_v40 = vadd.f32 %v437_v11, %v326_v45  ;;  %v725_v33 = vmul.f32 %v13544_v12, %v13006_v9  ;;  %v454_v5 = vadd.f32 %v438_v42, %v327_v6  ;;  %18498 = vst [vmem:[#allocation24_spill] sm:$0xff] %v13600_v43  ;;  %v13603_v14 = vld [vmem:[%s12991_s8 + $0xf2] sm:$0xff]  ;;  %v360_v42 = vld [vmem:[%s13209_s16 + $0xa1] sm:$0xff] }
  0x7b   : > { %12108 = vmatmul.mubr.msk.bf16.gmra.mrb[4].mxu0 %vm1531_vm0, %v1503_v31  ;;  %v726_v29 = vmul.f32 %v13006_v9, %v13571_v63  ;;  %v868_v7 = vmul.f32 %v13551_v38, %v13038_v25  ;;  %v869_v48 = vmul.f32 %v13038_v25, %v13574_v50  ;;  %v1170_v13 = vadd.f32 %v1154_v36, %v1025_v30  ;;  %v264_v31 = vld [vmem:[%s13209_s16 + $0xb0] sm:$0xff] }
  0x7c   : > { %v1171_v53 = vadd.f32 %v1155_v35, %v1026_v2  ;;  %v596_v52 = vadd.f32 %v580_v57, %v453_v40  ;;  %v1011_v58 = vmul.f32 %v13558_v41, %v13057_v32  ;;  %18499 = vst [vmem:[#allocation25_spill] sm:$0xff] %v13603_v14  ;;  %v597_v9 = vadd.f32 %v581_v51, %v454_v5  ;;  %v263_v35 = vld [vmem:[%s13209_s16 + $0xa0] sm:$0xff]  ;;  %v361_v57 = vld [vmem:[%s13209_s16 + $0xb1] sm:$0xff] }
  0x7d   : > { %v1012_v45 = vmul.f32 %v13057_v32, %v13585_v55  ;;  %v1156_v25 = vmul.f32 %v13070_v39, %v13571_v63  ;;  %v1157_v36 = vmul.f32 %v13070_v39, %v13588_v60  ;;  %v1313_v24 = vadd.f32 %v1297_v3, %v1170_v13  ;;  %v503_v2 = vld [vmem:[%s13209_s16 + $0xa2] sm:$0xff]  ;;  %v504_v3 = vld [vmem:[%s13209_s16 + $0xb2] sm:$0xff] }
  0x7e   : > { %v1314_v1 = vadd.f32 %v1298_v19, %v1171_v53  ;;  %v741_v6 = vadd.f32 %v725_v33, %v596_v52  ;;  %v1299_v11 = vmul.f32 %v13089_v46, %v13574_v50  ;;  %v742_v51 = vadd.f32 %v726_v29, %v597_v9 }
  0x7f   : > { %v1300_v32 = vmul.f32 %v13089_v46, %v13600_v43  ;;  %v1442_v30 = vmul.f32 %v13119_v62, %v13585_v55  ;;  %v1443_v39 = vmul.f32 %v13119_v62, %v13603_v14  ;;  %v1456_v19 = vadd.f32 %v1440_v18, %v1313_v24  ;;  %v11517_v24 = vld [vmem:[%s13209_s16 + $0xc0] sm:$0xff] }
  0x80   : > { %v1457_v40 = vadd.f32 %v1441_v59, %v1314_v1  ;;  %v884_v33 = vadd.f32 %v868_v7, %v741_v6  ;;  %v304_v5 = vmul.f32 %v13235_v27, %v263_v35  ;;  %v885_v13 = vadd.f32 %v869_v48, %v742_v51  ;;  %v11554_v35 = vld [vmem:[%s13209_s16 + $0xc1] sm:$0xff] }
  0x81   : > { %v305_v29 = vmul.f32 %v13235_v27, %v264_v31  ;;  %v399_v46 = vmul.f32 %v13246_v47, %v360_v42  ;;  %v400_v53 = vmul.f32 %v13246_v47, %v361_v57  ;;  %v542_v62 = vmul.f32 %v13257_v26, %v503_v2 }
  0x82   : > { %v1657_v52 = vpack.c.bf16 %v1457_v40, %v1456_v19  ;;  %v1027_v9 = vadd.f32 %v1011_v58, %v884_v33  ;;  %v543_v41 = vmul.f32 %v13257_v26, %v504_v3  ;;  %v1028_v18 = vadd.f32 %v1012_v45, %v885_v13  ;;  %v11591_v19 = vld [vmem:[%s13209_s16 + $0xc2] sm:$0xff]  ;;  %v11628_v33 = vld [vmem:[%s13209_s16 + $0xd0] sm:$0xff] }
  0x83   : > { %v415_v59 = vadd.f32 %v399_v46, %v304_v5  ;;  %v416_v7 = vadd.f32 %v400_v53, %v305_v29  ;;  %v687_v48 = vmul.f32 %v13262_v61, %v264_v31  ;;  %v688_v6 = vmul.f32 %v13262_v61, %v11517_v24  ;;  %v11665_v53 = vld [vmem:[%s13209_s16 + $0xd1] sm:$0xff] }
  0x84   : > { %12131 = vmatprep.mubr.msk.bf16.mxu1 %vm1531_vm0, %v1657_v52  ;;  %v1172_v1 = vadd.f32 %v1156_v25, %v1027_v9  ;;  %v830_v58 = vmul.f32 %v13273_v44, %v361_v57  ;;  %v831_v42 = vmul.f32 %v13273_v44, %v11554_v35  ;;  %v1173_v51 = vadd.f32 %v1157_v36, %v1028_v18 }
  0x85   : > { %v558_v45 = vadd.f32 %v542_v62, %v415_v59  ;;  %v559_v2 = vadd.f32 %v543_v41, %v416_v7  ;;  %v973_v40 = vmul.f32 %v13278_v10, %v504_v3  ;;  %v974_v5 = vmul.f32 %v13278_v10, %v11591_v19  ;;  %v11702_v41 = vld [vmem:[%s13209_s16 + $0xd2] sm:$0xff]  ;;  %v13652_v7 = vld [vmem:[%s13209_s16 + $0xe0] sm:$0xff] }
  0x86   : > { %v1315_v31 = vadd.f32 %v1299_v11, %v1172_v1  ;;  %v1118_v25 = vmul.f32 %v13290_v49, %v11517_v24  ;;  %v1119_v13 = vmul.f32 %v13290_v49, %v11628_v33  ;;  %v1316_v29 = vadd.f32 %v1300_v32, %v1173_v51  ;;  %v13659_v51 = vld [vmem:[%s13209_s16 + $0xe1] sm:$0xff] }
  0x87   : > { %v703_v57 = vadd.f32 %v687_v48, %v558_v45  ;;  %v704_v46 = vadd.f32 %v688_v6, %v559_v2  ;;  %v1261_v36 = vmul.f32 %v13297_v0, %v11554_v35  ;;  %v1262_v3 = vmul.f32 %v13297_v0, %v11665_v53 }
  0x88   : > { %v1458_v52 = vadd.f32 %v1442_v30, %v1315_v31  ;;  %v1404_v11 = vmul.f32 %v13302_v20, %v11591_v19  ;;  %v1405_v9 = vmul.f32 %v13302_v20, %v11702_v41  ;;  %v1459_v62 = vadd.f32 %v1443_v39, %v1316_v29 }
  0x89   : > { %v846_v18 = vadd.f32 %v830_v58, %v703_v57  ;;  %v847_v59 = vadd.f32 %v831_v42, %v704_v46  ;;  %v306_v32 = vmul.f32 %v11517_v24, %v13235_v27  ;;  %v307_v48 = vmul.f32 %v11628_v33, %v13235_v27  ;;  %v13663_v24 = vld [vmem:[%s13209_s16 + $0xe2] sm:$0xff] }
  0x8a   : > { %v401_v1 = vmul.f32 %v11554_v35, %v13246_v47  ;;  %v402_v30 = vmul.f32 %v11665_v53, %v13246_v47  ;;  %v544_v6 = vmul.f32 %v11591_v19, %v13257_v26  ;;  %v1658_v45 = vpack.c.bf16 %v1459_v62, %v1458_v52  ;;  %v13669_v35 = vld [vmem:[%s13209_s16 + $0xf0] sm:$0xff] }
  0x8b   : > { %v989_v39 = vadd.f32 %v973_v40, %v846_v18  ;;  %v990_v58 = vadd.f32 %v974_v5, %v847_v59  ;;  %v545_v42 = vmul.f32 %v11702_v41, %v13257_v26  ;;  %v689_v27 = vmul.f32 %v11628_v33, %v13262_v61  ;;  %v13676_v5 = vld [vmem:[%s13209_s16 + $0xf1] sm:$0xff] }
  0x8c   : > { %v417_v2 = vadd.f32 %v401_v1, %v306_v32  ;;  %v418_v31 = vadd.f32 %v402_v30, %v307_v48  ;;  %v690_v47 = vmul.f32 %v13262_v61, %v13652_v7  ;;  %12132 = vmatmul.mubr.msk.bf16.gmra.mrb[8].mxu1 %vm1531_vm0, %v1658_v45  ;;  %v832_v40 = vmul.f32 %v11665_v53, %v13273_v44  ;;  %v13682_v52 = vld [vmem:[%s13209_s16 + $0xf2] sm:$0xff] }
  0x8d   : > { %v1134_v19 = vadd.f32 %v1118_v25, %v989_v39  ;;  %v1135_v29 = vadd.f32 %v1119_v13, %v990_v58  ;;  %v833_v26 = vmul.f32 %v13273_v44, %v13659_v51  ;;  %v975_v33 = vmul.f32 %v11702_v41, %v13278_v10  ;;  %v12759_v45 = vld [vmem:[%s18235_s2 + $0x12] ss:$0 sm:$0xff] }
  0x8e   : > { %v560_v57 = vadd.f32 %v544_v6, %v417_v2  ;;  %v561_v46 = vadd.f32 %v545_v42, %v418_v31  ;;  %v976_v61 = vmul.f32 %v13278_v10, %v13663_v24  ;;  %v1120_v25 = vmul.f32 %v13290_v49, %v13652_v7  ;;  %v13712_v31 = vld [vmem:[%s12991_s8 + $0x100] sm:$0xff] }
  0x8f   : > { %v1277_v62 = vadd.f32 %v1261_v36, %v1134_v19  ;;  %v1278_v18 = vadd.f32 %v1262_v3, %v1135_v29  ;;  %v1121_v13 = vmul.f32 %v13290_v49, %v13669_v35  ;;  %v1263_v59 = vmul.f32 %v13297_v0, %v13659_v51  ;;  %v12757_v49 = vld [vmem:[%s18235_s2 + $0x10] ss:$0 sm:$0xff]  ;;  %18500 = vst [vmem:[#allocation26_spill] sm:$0xff] %v13712_v31 }
  0x90   : > { %v705_v44 = vadd.f32 %v689_v27, %v560_v57  ;;  %v706_v53 = vadd.f32 %v690_v47, %v561_v46  ;;  %v1264_v41 = vmul.f32 %v13297_v0, %v13676_v5  ;;  %v1406_v36 = vmul.f32 %v13302_v20, %v13663_v24  ;;  %v12760_v27 = vld [vmem:[%s18235_s2 + $0x13] ss:$0 sm:$0xff]  ;;  %v12761_v57 = vld [vmem:[%s18235_s2 + $0x14] ss:$0 sm:$0xff] }
  0x91   : > { %v1420_v32 = vadd.f32 %v1404_v11, %v1277_v62  ;;  %v1421_v10 = vadd.f32 %v1405_v9, %v1278_v18  ;;  %v1407_v3 = vmul.f32 %v13302_v20, %v13682_v52  ;;  %v328_v30 = vmul.f32 %v12757_v49, %v13571_v63  ;;  %v12758_v11 = vld [vmem:[%s18235_s2 + $0x11] ss:$0 sm:$0xff]  ;;  %v13729_v18 = vld [vmem:[%s12991_s8 + $0x102] sm:$0xff] }
  0x92   : > { %v848_v48 = vadd.f32 %v832_v40, %v705_v44  ;;  %v849_v1 = vadd.f32 %v833_v26, %v706_v53  ;;  %v329_v6 = vmul.f32 %v12757_v49, %v13588_v60  ;;  %v439_v9 = vmul.f32 %v12758_v11, %v13574_v50  ;;  %v13721_v26 = vld [vmem:[%s12991_s8 + $0x101] sm:$0xff]  ;;  %18502 = vst [vmem:[#allocation28_spill] sm:$0xff] %v13729_v18  ;;  %v12762_v44 = vld [vmem:[%s18235_s2 + $0x15] ss:$0 sm:$0xff] }
  0x93   : > { %v1504_v0 = vpack.c.bf16 %v1421_v10, %v1420_v32  ;;  %v440_v20 = vmul.f32 %v12758_v11, %v13600_v43  ;;  %v582_v39 = vmul.f32 %v12759_v45, %v13585_v55  ;;  %v583_v2 = vmul.f32 %v12759_v45, %v13603_v14  ;;  %18501 = vst [vmem:[#allocation27_spill] sm:$0xff] %v13721_v26 }
  0x94   : > { %v991_v58 = vadd.f32 %v975_v33, %v848_v48  ;;  %v992_v42 = vadd.f32 %v976_v61, %v849_v1  ;;  %v727_v47 = vmul.f32 %v12760_v27, %v13588_v60  ;;  %v455_v19 = vadd.f32 %v439_v9, %v328_v30  ;;  %v13737_v1 = vld [vmem:[%s12991_s8 + $0x110] sm:$0xff]  ;;  %v13767_v60 = vld [vmem:[%s12991_s8 + $0x121] sm:$0xff] }
  0x95   : > { %12111 = vmatprep.mubr.msk.bf16.mxu0 %vm1531_vm0, %v1504_v0  ;;  %v456_v29 = vadd.f32 %v440_v20, %v329_v6  ;;  %v728_v40 = vmul.f32 %v12760_v27, %v13712_v31  ;;  %v870_v46 = vmul.f32 %v12761_v57, %v13600_v43  ;;  %v871_v62 = vmul.f32 %v12761_v57, %v13721_v26  ;;  %v13745_v9 = vld [vmem:[%s12991_s8 + $0x111] sm:$0xff]  ;;  %v13764_v43 = vld [vmem:[%s12991_s8 + $0x120] sm:$0xff] }
  0x96   : > { %v1136_v33 = vadd.f32 %v1120_v25, %v991_v58  ;;  %v1137_v61 = vadd.f32 %v1121_v13, %v992_v42  ;;  %v1013_v53 = vmul.f32 %v12762_v44, %v13603_v14  ;;  %v598_v32 = vadd.f32 %v582_v39, %v455_v19  ;;  %18503 = vst [vmem:[#allocation29_spill] sm:$0xff] %v13737_v1  ;;  %v12763_v25 = vld [vmem:[%s18235_s2 + $0x16] ss:$0 sm:$0xff]  ;;  %v12764_v20 = vld [vmem:[%s18235_s2 + $0x17] ss:$0 sm:$0xff] }
  0x97   : > { %v599_v10 = vadd.f32 %v583_v2, %v456_v29  ;;  %v1014_v48 = vmul.f32 %v12762_v44, %v13729_v18  ;;  %v1158_v13 = vmul.f32 %v12763_v25, %v13712_v31  ;;  %v1159_v0 = vmul.f32 %v12763_v25, %v13737_v1  ;;  %18504 = vst [vmem:[#allocation30_spill] sm:$0xff] %v13745_v9  ;;  %v13753_v19 = vld [vmem:[%s12991_s8 + $0x112] sm:$0xff] }
  0x98   : > { %v1279_v30 = vadd.f32 %v1263_v59, %v1136_v33  ;;  %v1280_v6 = vadd.f32 %v1264_v41, %v1137_v61  ;;  %v1301_v39 = vmul.f32 %v12764_v20, %v13721_v26  ;;  %v743_v58 = vadd.f32 %v727_v47, %v598_v32  ;;  %18505 = vst [vmem:[#allocation31_spill] sm:$0xff] %v13753_v19  ;;  %v12765_v59 = vld [vmem:[%s18235_s2 + $0x18] ss:$0 sm:$0xff] }
  0x99   : > { %v744_v42 = vadd.f32 %v728_v40, %v599_v10  ;;  %v1302_v2 = vmul.f32 %v12764_v20, %v13745_v9  ;;  %v1444_v41 = vmul.f32 %v12765_v59, %v13729_v18  ;;  %v1445_v61 = vmul.f32 %v12765_v59, %v13753_v19  ;;  %18506 = vst [vmem:[#allocation32_spill] sm:$0xff] %v13764_v43 }
  0x9a   : > { %v1422_v29 = vadd.f32 %v1406_v36, %v1279_v30  ;;  %v1423_v33 = vadd.f32 %v1407_v3, %v1280_v6  ;;  %v330_v14 = vmul.f32 %v12757_v49, %v13712_v31  ;;  %v886_v47 = vadd.f32 %v870_v46, %v743_v58  ;;  %18507 = vst [vmem:[#allocation33_spill] sm:$0xff] %v13767_v60  ;;  %v13774_v58 = vld [vmem:[%s12991_s8 + $0x122] sm:$0xff] }
  0x9b   : > { %v887_v40 = vadd.f32 %v871_v62, %v744_v42  ;;  %v331_v32 = vmul.f32 %v12757_v49, %v13737_v1  ;;  %v441_v10 = vmul.f32 %v12758_v11, %v13721_v26  ;;  %v442_v36 = vmul.f32 %v12758_v11, %v13745_v9  ;;  %18508 = vst [vmem:[#allocation34_spill] sm:$0xff] %v13774_v58  ;;  %v13777_v42 = vld [vmem:[%s12991_s8 + $0x130] sm:$0xff] }
  0x9c   : > { %v1505_v55 = vpack.c.bf16 %v1423_v33, %v1422_v29  ;;  %v584_v3 = vmul.f32 %v12759_v45, %v13729_v18  ;;  %v585_v30 = vmul.f32 %v12759_v45, %v13753_v19  ;;  %v1029_v6 = vadd.f32 %v1013_v53, %v886_v47  ;;  %18509 = vst [vmem:[#allocation35_spill] sm:$0xff] %v13777_v42 }
  0x9d   : > { %v1030_v46 = vadd.f32 %v1014_v48, %v887_v40  ;;  %v457_v62 = vadd.f32 %v441_v10, %v330_v14  ;;  %v729_v49 = vmul.f32 %v12760_v27, %v13737_v1  ;;  %v458_v29 = vadd.f32 %v442_v36, %v331_v32  ;;  %v13785_v48 = vld [vmem:[%s12991_s8 + $0x131] sm:$0xff] }
  0x9e   : > { %12112 = vmatmul.mubr.msk.bf16.gmra.mrb[8].mxu0 %vm1531_vm0, %v1505_v55  ;;  %v730_v11 = vmul.f32 %v12760_v27, %v13764_v43  ;;  %v872_v33 = vmul.f32 %v12761_v57, %v13745_v9  ;;  %v873_v45 = vmul.f32 %v12761_v57, %v13767_v60  ;;  %v1174_v18 = vadd.f32 %v1158_v13, %v1029_v6  ;;  %v13788_v40 = vld [vmem:[%s12991_s8 + $0x132] sm:$0xff] }
  0x9f   : > { %v1175_v53 = vadd.f32 %v1159_v0, %v1030_v46  ;;  %v600_v47 = vadd.f32 %v584_v3, %v457_v62  ;;  %v1015_v14 = vmul.f32 %v12762_v44, %v13753_v19  ;;  %18510 = vst [vmem:[#allocation36_spill] sm:$0xff] %v13785_v48  ;;  %18511 = vst [vmem:[#allocation37_spill] sm:$0xff] %v13788_v40  ;;  %v11597_v19 = vld [vmem:[%s13209_s16 + $0x122] sm:$0xff] }
  0xa0   : > { %v601_v10 = vadd.f32 %v585_v30, %v458_v29  ;;  %v1016_v1 = vmul.f32 %v12762_v44, %v13774_v58  ;;  %v1160_v55 = vmul.f32 %v12763_v25, %v13764_v43  ;;  %v1161_v27 = vmul.f32 %v12763_v25, %v13777_v42  ;;  %v12766_v44 = vld [vmem:[%s18235_s2] ss:$0 sm:$0xff] }
  0xa1   : > { %v1317_v32 = vadd.f32 %v1301_v39, %v1174_v18  ;;  %v1318_v36 = vadd.f32 %v1302_v2, %v1175_v53  ;;  %v745_v9 = vadd.f32 %v729_v49, %v600_v47  ;;  %v1303_v57 = vmul.f32 %v12764_v20, %v13767_v60  ;;  %v11558_v47 = vld [vmem:[%s13209_s16 + $0x101] sm:$0xff] }
  0xa2   : > { %v746_v13 = vadd.f32 %v730_v11, %v601_v10  ;;  %v1304_v0 = vmul.f32 %v12764_v20, %v13785_v48  ;;  %v1446_v3 = vmul.f32 %v12765_v59, %v13774_v58  ;;  %v1447_v6 = vmul.f32 %v12765_v59, %v13788_v40  ;;  %v12767_v20 = vld [vmem:[%s18235_s2 + $0x1] ss:$0 sm:$0xff] }
  0xa3   : > { %v1460_v46 = vadd.f32 %v1444_v41, %v1317_v32  ;;  %v1461_v30 = vadd.f32 %v1445_v61, %v1318_v36  ;;  %v888_v62 = vadd.f32 %v872_v33, %v745_v9  ;;  %v308_v18 = vmul.f32 %v12766_v44, %v13652_v7  ;;  %v12768_v61 = vld [vmem:[%s18235_s2 + $0x2] ss:$0 sm:$0xff] }
  0xa4   : > { %v889_v25 = vadd.f32 %v873_v45, %v746_v13  ;;  %v309_v39 = vmul.f32 %v12766_v44, %v13669_v35  ;;  %v403_v2 = vmul.f32 %v12767_v20, %v13659_v51  ;;  %v404_v59 = vmul.f32 %v12767_v20, %v13676_v5  ;;  %v11521_v45 = vld [vmem:[%s13209_s16 + $0x100] sm:$0xff] }
  0xa5   : > { %v1659_v9 = vpack.c.bf16 %v1461_v30, %v1460_v46  ;;  %v1031_v41 = vadd.f32 %v1015_v14, %v888_v62  ;;  %v546_v7 = vmul.f32 %v12768_v61, %v13663_v24  ;;  %v547_v49 = vmul.f32 %v12768_v61, %v13682_v52  ;;  %v12769_v51 = vld [vmem:[%s18235_s2 + $0x3] ss:$0 sm:$0xff]  ;;  %v12770_v24 = vld [vmem:[%s18235_s2 + $0x4] ss:$0 sm:$0xff]  ;;  %v11632_v62 = vld [vmem:[%s13209_s16 + $0x110] sm:$0xff] }
  0xa6   : > { %v1032_v29 = vadd.f32 %v1016_v1, %v889_v25  ;;  %v419_v11 = vadd.f32 %v403_v2, %v308_v18  ;;  %v420_v33 = vadd.f32 %v404_v59, %v309_v39  ;;  %v691_v53 = vmul.f32 %v12769_v51, %v13669_v35  ;;  %v11595_v30 = vld [vmem:[%s13209_s16 + $0x102] sm:$0xff] }
  0xa7   : > { %12135 = vmatprep.mubr.msk.bf16.mxu1 %vm1531_vm0, %v1659_v9  ;;  %v1176_v14 = vadd.f32 %v1160_v55, %v1031_v41  ;;  %v692_v10 = vmul.f32 %v12769_v51, %v11521_v45  ;;  %v834_v1 = vmul.f32 %v12770_v24, %v13676_v5  ;;  %v835_v32 = vmul.f32 %v12770_v24, %v11558_v47  ;;  %v12771_v35 = vld [vmem:[%s18235_s2 + $0x5] ss:$0 sm:$0xff]  ;;  %v12772_v5 = vld [vmem:[%s18235_s2 + $0x6] ss:$0 sm:$0xff]  ;;  %v11669_v41 = vld [vmem:[%s13209_s16 + $0x111] sm:$0xff] }
  0xa8   : > { %v1177_v36 = vadd.f32 %v1161_v27, %v1032_v29  ;;  %v562_v13 = vadd.f32 %v546_v7, %v419_v11  ;;  %v563_v46 = vadd.f32 %v547_v49, %v420_v33  ;;  %v977_v55 = vmul.f32 %v12771_v35, %v13682_v52  ;;  %v12773_v7 = vld [vmem:[%s18235_s2 + $0x7] ss:$0 sm:$0xff]  ;;  %v11706_v52 = vld [vmem:[%s13209_s16 + $0x112] sm:$0xff]  ;;  %v12774_v11 = vld [vmem:[%s18235_s2 + $0x8] ss:$0 sm:$0xff] }
  0xa9   : > { %v1319_v18 = vadd.f32 %v1303_v57, %v1176_v14  ;;  %v978_v25 = vmul.f32 %v12771_v35, %v11595_v30  ;;  %v1122_v39 = vmul.f32 %v12772_v5, %v11521_v45  ;;  %v1123_v2 = vmul.f32 %v12772_v5, %v11632_v62  ;;  %v11560_v58 = vld [vmem:[%s13209_s16 + $0x121] sm:$0xff] }
  0xaa   : > { %v1320_v27 = vadd.f32 %v1304_v0, %v1177_v36  ;;  %v707_v59 = vadd.f32 %v691_v53, %v562_v13  ;;  %v708_v9 = vadd.f32 %v692_v10, %v563_v46  ;;  %v1265_v49 = vmul.f32 %v12773_v7, %v11558_v47  ;;  %v11523_v13 = vld [vmem:[%s13209_s16 + $0x120] sm:$0xff] }
  0xab   : > { %v1462_v57 = vadd.f32 %v1446_v3, %v1319_v18  ;;  %v1266_v29 = vmul.f32 %v12773_v7, %v11669_v41  ;;  %v1408_v33 = vmul.f32 %v12774_v11, %v11595_v30  ;;  %v1409_v0 = vmul.f32 %v12774_v11, %v11706_v52 }
  0xac   : > { %v1463_v14 = vadd.f32 %v1447_v6, %v1320_v27  ;;  %v850_v53 = vadd.f32 %v834_v1, %v707_v59  ;;  %v851_v10 = vadd.f32 %v835_v32, %v708_v9  ;;  %v310_v36 = vmul.f32 %v12766_v44, %v11521_v45  ;;  %v11634_v32 = vld [vmem:[%s13209_s16 + $0x130] sm:$0xff] }
  0xad   : > { %v311_v46 = vmul.f32 %v12766_v44, %v11632_v62  ;;  %v405_v40 = vmul.f32 %v12767_v20, %v11558_v47  ;;  %v406_v48 = vmul.f32 %v12767_v20, %v11669_v41  ;;  %v548_v42 = vmul.f32 %v12768_v61, %v11595_v30  ;;  %v11671_v30 = vld [vmem:[%s13209_s16 + $0x131] sm:$0xff] }
  0xae   : > { %v1660_v3 = vpack.c.bf16 %v1463_v14, %v1462_v57  ;;  %v993_v18 = vadd.f32 %v977_v55, %v850_v53  ;;  %v994_v60 = vadd.f32 %v978_v25, %v851_v10  ;;  %v549_v43 = vmul.f32 %v12768_v61, %v11706_v52  ;;  %v11708_v25 = vld [vmem:[%s13209_s16 + $0x132] sm:$0xff]  ;;  %v12779_v10 = vld [vmem:[%s12991_s8 + $0x41] sm:$0xff]  ;;  %s18163_s16 = scalar_lea.vmem [#allocation2], %s11488_s10 }
  0xaf   : > { %v421_v26 = vadd.f32 %v405_v40, %v310_v36  ;;  %v422_v31 = vadd.f32 %v406_v48, %v311_v46  ;;  %v693_v6 = vmul.f32 %v12769_v51, %v11632_v62  ;;  %v694_v1 = vmul.f32 %v12769_v51, %v11523_v13  ;;  %s11410_s23 = sshll.u32 %s18163_s16, 4  ;;  %s18186_s23 = int_to_ptr.vmem [resolvable:$true] %s11410_s23 }
  0xb0   : > { %12136 = vmatmul.mubr.msk.bf16.gmra.mrb[12].mxu1 %vm1531_vm0, %v1660_v3  ;;  %v1138_v45 = vadd.f32 %v1122_v39, %v993_v18  ;;  %v1139_v44 = vadd.f32 %v1123_v2, %v994_v60  ;;  %v836_v47 = vmul.f32 %v12770_v24, %v11669_v41  ;;  %v837_v20 = vmul.f32 %v12770_v24, %v11560_v58  ;;  %v13877_v3 = vld [vmem:[%s18235_s2 + $0x22] ss:$0 sm:$0xff]  ;;  %s12803_s22 = scalar_lea.vmem %s18186_s23, 1024 }
  0xb1   : > { %v564_v27 = vadd.f32 %v548_v42, %v421_v26  ;;  %v565_v59 = vadd.f32 %v549_v43, %v422_v31  ;;  %v979_v9 = vmul.f32 %v12771_v35, %v11706_v52  ;;  %v980_v55 = vmul.f32 %v12771_v35, %v11597_v19  ;;  %v18512_v35 = vld [vmem:[#allocation19_spill] sm:$0xff]  ;;  %v12782_v18 = vld [vmem:[%s12991_s8 + $0x42] sm:$0xff]  ;;  %p12804_p11 = scmp.ne.s32.totalorder %s18186_s23, %s12803_s22 }
  0xb2   : > { %v1281_v61 = vadd.f32 %v1265_v49, %v1138_v45  ;;  %v1282_v57 = vadd.f32 %v1266_v29, %v1139_v44  ;;  %v1124_v14 = vmul.f32 %v12772_v5, %v11523_v13  ;;  %v1125_v40 = vmul.f32 %v12772_v5, %v11634_v32  ;;  %v18513_v5 = vld [vmem:[#allocation20_spill] sm:$0xff]  ;;  %v12777_v52 = vld [vmem:[%s12991_s8 + $0x50] sm:$0xff] }
  0xb3   : > { %v709_v48 = vadd.f32 %v693_v6, %v564_v27  ;;  %v710_v51 = vadd.f32 %v694_v1, %v565_v59  ;;  %v1267_v62 = vmul.f32 %v12773_v7, %v11560_v58  ;;  %v1268_v53 = vmul.f32 %v12773_v7, %v11671_v30  ;;  %v13856_v58 = vld [vmem:[%s18235_s2 + $0x20] ss:$0 sm:$0xff]  ;;  %v12780_v13 = vld [vmem:[%s12991_s8 + $0x51] sm:$0xff]  ;;  %p12805_p12 = pnand %p12804_p11, %p12943_p5 }
  0xb4   : > { %v1424_v39 = vadd.f32 %v1408_v33, %v1281_v61  ;;  %v1425_v60 = vadd.f32 %v1409_v0, %v1282_v57  ;;  %v1410_v2 = vmul.f32 %v12774_v11, %v11597_v19  ;;  %v1411_v24 = vmul.f32 %v12774_v11, %v11708_v25  ;;  %v12776_v19 = vld [vmem:[%s12991_s8 + $0x40] sm:$0xff]  ;;  %v18515_v11 = vld [vmem:[#allocation6_spill] sm:$0xff]  ;;  %v12783_v1 = vld [vmem:[%s12991_s8 + $0x52] sm:$0xff] }
  0xb5   : > { %v852_v41 = vadd.f32 %v836_v47, %v709_v48  ;;  %v853_v26 = vadd.f32 %v837_v20, %v710_v51  ;;  %v479_v43 = vadd.f32 %v13025_v22, %v13014_v15  ;;  %v480_v31 = vadd.f32 %v13028_v23, %v13017_v16  ;;  %v18514_v23 = vld [vmem:[#allocation5_spill] sm:$0xff]  ;;  %v18516_v47 = vld [vmem:[#allocation7_spill] sm:$0xff]  ;;  %v18517_v30 = vld [vmem:[#allocation8_spill] sm:$0xff]  ;;  %p12806_p13 = pneg %p12805_p12 }
  0xb6   : > { %v1506_v42 = vpack.c.bf16 %v1425_v60, %v1424_v39  ;;  %v1808_v49 = vpack.c.bf16 %v18513_v5, %v18512_v35  ;;  %v340_v7 = vmul.f32 %v12776_v19, %v13856_v58  ;;  %v341_v15 = vmul.f32 %v12777_v52, %v13856_v58  ;;  %v13868_v0 = vld [vmem:[%s18235_s2 + $0x21] ss:$0 sm:$0xff]  ;;  %v18519_v39 = vld [vmem:[#allocation10_spill] sm:$0xff] }
  0xb7   : > { %v995_v22 = vadd.f32 %v979_v9, %v852_v41  ;;  %v996_v16 = vadd.f32 %v980_v55, %v853_v26  ;;  %v622_v29 = vadd.f32 %v18514_v23, %v479_v43  ;;  %v623_v33 = vadd.f32 %v18515_v11, %v480_v31  ;;  %v13888_v55 = vld [vmem:[%s18235_s2 + $0x23] ss:$0 sm:$0xff]  ;;  %v13898_v43 = vld [vmem:[%s18235_s2 + $0x24] ss:$0 sm:$0xff] }
  0xb8   : > { %12115 = vmatprep.mubr.msk.bf16.mxu0 %vm1531_vm0, %v1506_v42  ;;  %v467_v36 = vmul.f32 %v12779_v10, %v13868_v0  ;;  %v468_v46 = vmul.f32 %v12780_v13, %v13868_v0  ;;  %v610_v6 = vmul.f32 %v12782_v18, %v13877_v3  ;;  %v611_v32 = vmul.f32 %v12783_v1, %v13877_v3  ;;  %v12785_v61 = vld [vmem:[%s12991_s8 + $0x60] sm:$0xff] }
  0xb9   : > { %v1140_v45 = vadd.f32 %v1124_v14, %v995_v22  ;;  %v1141_v44 = vadd.f32 %v1125_v40, %v996_v16  ;;  %v767_v20 = vadd.f32 %v18516_v47, %v622_v29  ;;  %v768_v27 = vadd.f32 %v18517_v30, %v623_v33  ;;  %v18518_v40 = vld [vmem:[#allocation9_spill] sm:$0xff]  ;;  %v18524_v30 = vld [vmem:[#allocation15_spill] sm:$0xff] }
  0xba   : > { %v483_v59 = vadd.f32 %v467_v36, %v340_v7  ;;  %v484_v9 = vadd.f32 %v468_v46, %v341_v15  ;;  %v755_v25 = vmul.f32 %v13888_v55, %v12777_v52  ;;  %v756_v57 = vmul.f32 %v12785_v61, %v13888_v55  ;;  %v12787_v42 = vld [vmem:[%s12991_s8 + $0x61] sm:$0xff]  ;;  %v18521_v15 = vld [vmem:[#allocation12_spill] sm:$0xff] }
  0xbb   : > { %v1283_v48 = vadd.f32 %v1267_v62, %v1140_v45  ;;  %v1284_v14 = vadd.f32 %v1268_v53, %v1141_v44  ;;  %v910_v51 = vadd.f32 %v18518_v40, %v767_v20  ;;  %v911_v60 = vadd.f32 %v18519_v39, %v768_v27  ;;  %v18520_v53 = vld [vmem:[#allocation11_spill] sm:$0xff]  ;;  %v13908_v29 = vld [vmem:[%s18235_s2 + $0x25] ss:$0 sm:$0xff]  ;;  %v13918_v18 = vld [vmem:[%s18235_s2 + $0x26] ss:$0 sm:$0xff] }
  0xbc   : > { %v626_v41 = vadd.f32 %v610_v6, %v483_v59  ;;  %v627_v26 = vadd.f32 %v611_v32, %v484_v9  ;;  %v898_v31 = vmul.f32 %v13898_v43, %v12780_v13  ;;  %v899_v19 = vmul.f32 %v12787_v42, %v13898_v43  ;;  %v12789_v33 = vld [vmem:[%s12991_s8 + $0x62] sm:$0xff]  ;;  %v18525_v59 = vld [vmem:[#allocation16_spill] sm:$0xff] }
  0xbd   : > { %v1426_v7 = vadd.f32 %v1410_v2, %v1283_v48  ;;  %v1427_v62 = vadd.f32 %v1411_v24, %v1284_v14  ;;  %v1053_v52 = vadd.f32 %v18520_v53, %v910_v51  ;;  %v1054_v22 = vadd.f32 %v18521_v15, %v911_v60  ;;  %v18522_v24 = vld [vmem:[#allocation13_spill] sm:$0xff]  ;;  %v18523_v13 = vld [vmem:[#allocation14_spill] sm:$0xff]  ;;  %v12795_v39 = vld [vmem:[%s12991_s8 + $0x72] sm:$0xff] }
  0xbe   : > { %v771_v16 = vadd.f32 %v755_v25, %v626_v41  ;;  %v772_v23 = vadd.f32 %v756_v57, %v627_v26  ;;  %v1041_v11 = vmul.f32 %v13908_v29, %v12783_v1  ;;  %v1042_v10 = vmul.f32 %v12789_v33, %v13908_v29  ;;  %v12791_v1 = vld [vmem:[%s12991_s8 + $0x70] sm:$0xff]  ;;  %v13926_v47 = vld [vmem:[%s18235_s2 + $0x27] ss:$0 sm:$0xff]  ;;  %v13937_v48 = vld [vmem:[%s18235_s2 + $0x28] ss:$0 sm:$0xff] }
  0xbf   : > { %v1507_v2 = vpack.c.bf16 %v1427_v62, %v1426_v7  ;;  %v1198_v36 = vadd.f32 %v18522_v24, %v1053_v52  ;;  %v1199_v46 = vadd.f32 %v18523_v13, %v1054_v22  ;;  %v1186_v6 = vmul.f32 %v13918_v18, %v12785_v61  ;;  %v12793_v25 = vld [vmem:[%s12991_s8 + $0x71] sm:$0xff]  ;;  %v18526_v26 = vld [vmem:[#allocation17_spill] sm:$0xff] }
  0xc0   : > { %v914_v32 = vadd.f32 %v898_v31, %v771_v16  ;;  %v915_v45 = vadd.f32 %v899_v19, %v772_v23  ;;  %v1187_v44 = vmul.f32 %v12791_v1, %v13918_v18  ;;  %v1329_v20 = vmul.f32 %v13926_v47, %v12787_v42  ;;  %v18527_v19 = vld [vmem:[#allocation18_spill] sm:$0xff]  ;;  %v12796_v13 = vld [vmem:[%s12991_s8 + $0x80] sm:$0xff] }
  0xc1   : > { %12116 = vmatmul.mubr.msk.bf16.gmra.mrb[12].mxu0 %vm1531_vm0, %v1507_v2  ;;  %v1341_v27 = vadd.f32 %v18524_v30, %v1198_v36  ;;  %v1342_v9 = vadd.f32 %v18525_v59, %v1199_v46  ;;  %v1330_v57 = vmul.f32 %v12793_v25, %v13926_v47  ;;  %v1472_v14 = vmul.f32 %v13937_v48, %v12789_v33 }
  0xc2   : > { %v1057_v40 = vadd.f32 %v1041_v11, %v914_v32  ;;  %v1058_v51 = vadd.f32 %v1042_v10, %v915_v45  ;;  %v1473_v60 = vmul.f32 %v12795_v39, %v13937_v48  ;;  %v342_v41 = vmul.f32 %v12785_v61, %v13856_v58 }
  0xc3   : > { %v1484_v31 = vadd.f32 %v18526_v26, %v1341_v27  ;;  %v1485_v7 = vadd.f32 %v18527_v19, %v1342_v9  ;;  %v343_v62 = vmul.f32 %v12791_v1, %v13856_v58  ;;  %v469_v53 = vmul.f32 %v12787_v42, %v13868_v0  ;;  %v12798_v27 = vld [vmem:[%s12991_s8 + $0x82] sm:$0xff] }
  0xc4   : > { %v1202_v52 = vadd.f32 %v1186_v6, %v1057_v40  ;;  %v1203_v15 = vadd.f32 %v1187_v44, %v1058_v51  ;;  %v470_v22 = vmul.f32 %v12793_v25, %v13868_v0  ;;  %v612_v16 = vmul.f32 %v12789_v33, %v13877_v3  ;;  %v12797_v33 = vld [vmem:[%s12991_s8 + $0x81] sm:$0xff] }
  0xc5   : > { %v1807_v23 = vpack.c.bf16 %v1485_v7, %v1484_v31  ;;  %v485_v11 = vadd.f32 %v469_v53, %v342_v41  ;;  %v613_v61 = vmul.f32 %v12795_v39, %v13877_v3  ;;  %v757_v10 = vmul.f32 %v12791_v1, %v13888_v55  ;;  %v12801_v53 = vld [vmem:[%s12991_s8 + $0x92] sm:$0xff] }
  0xc6   : > { %v1345_v2 = vadd.f32 %v1329_v20, %v1202_v52  ;;  %v1346_v24 = vadd.f32 %v1330_v57, %v1203_v15  ;;  %v486_v36 = vadd.f32 %v470_v22, %v343_v62  ;;  %v758_v42 = vmul.f32 %v12796_v13, %v13888_v55 }
  0xc7   : > { %12143 = vmatprep.mubr.msk.bf16.mxu0 %vm1531_vm0, %v1807_v23  ;;  %v628_v46 = vadd.f32 %v612_v16, %v485_v11  ;;  %v900_v6 = vmul.f32 %v12793_v25, %v13898_v43  ;;  %v901_v32 = vmul.f32 %v12797_v33, %v13898_v43  ;;  %v1043_v20 = vmul.f32 %v12795_v39, %v13908_v29  ;;  %v12799_v25 = vld [vmem:[%s12991_s8 + $0x90] sm:$0xff] }
  0xc8   : > { %v1488_v45 = vadd.f32 %v1472_v14, %v1345_v2  ;;  %v1489_v44 = vadd.f32 %v1473_v60, %v1346_v24  ;;  %v629_v1 = vadd.f32 %v613_v61, %v486_v36  ;;  %v1044_v59 = vmul.f32 %v12798_v27, %v13908_v29  ;;  %v12800_v39 = vld [vmem:[%s12991_s8 + $0x91] sm:$0xff] }
  0xc9   : > { %12144 = vmatmul.mubr.msk.bf16.vlgmr.msra.gmra.mrb[16].mxu0 %vm1531_vm0, %v1808_v49  ;;  %v773_v30 = vadd.f32 %v757_v10, %v628_v46  ;;  %v1188_v9 = vmul.f32 %v12796_v13, %v13918_v18  ;;  %v1189_v57 = vmul.f32 %v12799_v25, %v13918_v18  ;;  %v1331_v51 = vmul.f32 %v12797_v33, %v13926_v47 }
  0xca   : > { %v1809_v14 = vpack.c.bf16 %v1489_v44, %v1488_v45  ;;  %v774_v40 = vadd.f32 %v758_v42, %v629_v1  ;;  %v1332_v60 = vmul.f32 %v12800_v39, %v13926_v47  ;;  %v1474_v5 = vmul.f32 %v12798_v27, %v13937_v48 }
  0xcb   : > { %v916_v35 = vadd.f32 %v900_v6, %v773_v30  ;;  %v344_v49 = vmul.f32 %v13856_v58, %v13486_v37  ;;  %v345_v41 = vmul.f32 %v13856_v58, %v13492_v54  ;;  %v471_v31 = vmul.f32 %v13868_v0, %v13495_v8 }
  0xcc   : > { %12147 = vmatprep.mubr.msk.bf16.mxu0 %vm1531_vm0, %v1809_v14  ;;  %v917_v26 = vadd.f32 %v901_v32, %v774_v40  ;;  %v472_v19 = vmul.f32 %v13868_v0, %v13499_v17  ;;  %v614_v7 = vmul.f32 %v13877_v3, %v13502_v28  ;;  %v1475_v52 = vmul.f32 %v12801_v53, %v13937_v48  ;;  %v18528_v14 = vld [vmem:[#allocation21_spill] sm:$0xff] }
  0xcd   : > { %v1059_v62 = vadd.f32 %v1043_v20, %v916_v35  ;;  %v615_v37 = vmul.f32 %v13877_v3, %v13505_v21  ;;  %v759_v15 = vmul.f32 %v13888_v55, %v13492_v54  ;;  %v487_v16 = vadd.f32 %v471_v31, %v344_v49 }
  0xce   : > { %v1060_v22 = vadd.f32 %v1044_v59, %v917_v26  ;;  %v488_v23 = vadd.f32 %v472_v19, %v345_v41  ;;  %v760_v8 = vmul.f32 %v13888_v55, %v13522_v56  ;;  %v902_v28 = vmul.f32 %v13898_v43, %v13499_v17 }
  0xcf   : > { %v1204_v11 = vadd.f32 %v1188_v9, %v1059_v62  ;;  %v903_v61 = vmul.f32 %v13898_v43, %v13529_v4  ;;  %v1045_v10 = vmul.f32 %v13908_v29, %v13505_v21  ;;  %v630_v24 = vadd.f32 %v614_v7, %v487_v16  ;;  %v18529_v62 = vld [vmem:[#allocation22_spill] sm:$0xff] }
  0xd0   : > { %v1205_v2 = vadd.f32 %v1189_v57, %v1060_v22  ;;  %v631_v36 = vadd.f32 %v615_v37, %v488_v23  ;;  %v1046_v54 = vmul.f32 %v13908_v29, %v13537_v34  ;;  %v1190_v42 = vmul.f32 %v13918_v18, %v13522_v56  ;;  %v18530_v22 = vld [vmem:[#allocation23_spill] sm:$0xff] }
  0xd1   : > { %v1347_v13 = vadd.f32 %v1331_v51, %v1204_v11  ;;  %v1191_v46 = vmul.f32 %v13918_v18, %v13544_v12  ;;  %v1333_v17 = vmul.f32 %v13926_v47, %v13529_v4  ;;  %v775_v33 = vadd.f32 %v759_v15, %v630_v24  ;;  %v18531_v11 = vld [vmem:[#allocation24_spill] sm:$0xff] }
  0xd2   : > { %v1348_v6 = vadd.f32 %v1332_v60, %v1205_v2  ;;  %v776_v32 = vadd.f32 %v760_v8, %v631_v36  ;;  %v1334_v21 = vmul.f32 %v13926_v47, %v13551_v38  ;;  %v1476_v44 = vmul.f32 %v13937_v48, %v13537_v34 }
  0xd3   : > { %v1490_v45 = vadd.f32 %v1474_v5, %v1347_v13  ;;  %v346_v1 = vmul.f32 %v13856_v58, %v13522_v56  ;;  %v347_v20 = vmul.f32 %v13856_v58, %v13544_v12  ;;  %v918_v27 = vadd.f32 %v902_v28, %v775_v33 }
  0xd4   : > { %v1491_v30 = vadd.f32 %v1475_v52, %v1348_v6  ;;  %v919_v59 = vadd.f32 %v903_v61, %v776_v32  ;;  %v473_v9 = vmul.f32 %v13868_v0, %v13529_v4  ;;  %v474_v25 = vmul.f32 %v13868_v0, %v13551_v38  ;;  %v18532_v32 = vld [vmem:[#allocation25_spill] sm:$0xff] }
  0xd5   : > { %v616_v57 = vmul.f32 %v13877_v3, %v13537_v34  ;;  %v617_v40 = vmul.f32 %v13877_v3, %v18528_v14  ;;  %v761_v56 = vmul.f32 %v13888_v55, %v13544_v12  ;;  %v1061_v39 = vadd.f32 %v1045_v10, %v918_v27 }
  0xd6   : > { %v1810_v51 = vpack.c.bf16 %v1491_v30, %v1490_v45  ;;  %v1062_v60 = vadd.f32 %v1046_v54, %v919_v59  ;;  %v489_v35 = vadd.f32 %v473_v9, %v346_v1  ;;  %v1477_v5 = vmul.f32 %v13937_v48, %v18528_v14  ;;  %v18533_v30 = vld [vmem:[#allocation26_spill] sm:$0xff] }
  0xd7   : > { %v490_v4 = vadd.f32 %v474_v25, %v347_v20  ;;  %v762_v49 = vmul.f32 %v13888_v55, %v13571_v63  ;;  %v904_v34 = vmul.f32 %v13898_v43, %v13551_v38  ;;  %v1206_v41 = vadd.f32 %v1190_v42, %v1061_v39  ;;  %v18535_v39 = vld [vmem:[#allocation28_spill] sm:$0xff] }
  0xd8   : > { %12148 = vmatmul.mubr.msk.bf16.gmra.mrb[20].mxu0 %vm1531_vm0, %v1810_v51  ;;  %v1207_v26 = vadd.f32 %v1191_v46, %v1062_v60  ;;  %v632_v31 = vadd.f32 %v616_v57, %v489_v35  ;;  %v905_v12 = vmul.f32 %v13898_v43, %v13574_v50  ;;  %v1047_v7 = vmul.f32 %v13908_v29, %v18528_v14  ;;  %v18534_v14 = vld [vmem:[#allocation27_spill] sm:$0xff] }
  0xd9   : > { %v633_v19 = vadd.f32 %v617_v40, %v490_v4  ;;  %v1048_v53 = vmul.f32 %v13908_v29, %v18529_v62  ;;  %v1192_v52 = vmul.f32 %v13918_v18, %v13571_v63  ;;  %v1349_v37 = vadd.f32 %v1333_v17, %v1206_v41  ;;  %v18536_v41 = vld [vmem:[#allocation29_spill] sm:$0xff] }
  0xda   : > { %v1350_v38 = vadd.f32 %v1334_v21, %v1207_v26  ;;  %v777_v15 = vadd.f32 %v761_v56, %v632_v31  ;;  %v1193_v16 = vmul.f32 %v13918_v18, %v18530_v22  ;;  %v1335_v8 = vmul.f32 %v13926_v47, %v13574_v50 }
  0xdb   : > { %v778_v23 = vadd.f32 %v762_v49, %v633_v19  ;;  %v1336_v28 = vmul.f32 %v13926_v47, %v18531_v11  ;;  %v1478_v61 = vmul.f32 %v13937_v48, %v18529_v62  ;;  %v1492_v10 = vadd.f32 %v1476_v44, %v1349_v37 }
  0xdc   : > { %v1493_v2 = vadd.f32 %v1477_v5, %v1350_v38  ;;  %v920_v24 = vadd.f32 %v904_v34, %v777_v15  ;;  %v348_v36 = vmul.f32 %v13856_v58, %v13571_v63  ;;  %v349_v13 = vmul.f32 %v13856_v58, %v18530_v22 }
  0xdd   : > { %v921_v54 = vadd.f32 %v905_v12, %v778_v23  ;;  %v475_v42 = vmul.f32 %v13868_v0, %v13574_v50  ;;  %v476_v46 = vmul.f32 %v13868_v0, %v18531_v11  ;;  %v618_v33 = vmul.f32 %v13877_v3, %v18529_v62  ;;  %v18537_v12 = vld [vmem:[#allocation30_spill] sm:$0xff] }
  0xde   : > { %v1811_v17 = vpack.c.bf16 %v1493_v2, %v1492_v10  ;;  %v1063_v6 = vadd.f32 %v1047_v7, %v920_v24  ;;  %v619_v21 = vmul.f32 %v13877_v3, %v18532_v32  ;;  %v763_v1 = vmul.f32 %v13888_v55, %v18530_v22  ;;  %v18539_v2 = vld [vmem:[#allocation32_spill] sm:$0xff] }
  0xdf   : > { %v1064_v45 = vadd.f32 %v1048_v53, %v921_v54  ;;  %v491_v63 = vadd.f32 %v475_v42, %v348_v36  ;;  %v492_v44 = vadd.f32 %v476_v46, %v349_v13  ;;  %v1479_v20 = vmul.f32 %v13937_v48, %v18532_v32 }
  0xe0   : > { %12151 = vmatprep.mubr.msk.bf16.mxu0 %vm1531_vm0, %v1811_v17  ;;  %v1208_v50 = vadd.f32 %v1192_v52, %v1063_v6  ;;  %v764_v27 = vmul.f32 %v13888_v55, %v18533_v30  ;;  %v906_v59 = vmul.f32 %v13898_v43, %v18531_v11  ;;  %v907_v40 = vmul.f32 %v13898_v43, %v18534_v14  ;;  %v18538_v11 = vld [vmem:[#allocation31_spill] sm:$0xff]  ;;  %v18540_v17 = vld [vmem:[#allocation33_spill] sm:$0xff] }
  0xe1   : > { %v1209_v9 = vadd.f32 %v1193_v16, %v1064_v45  ;;  %v634_v25 = vadd.f32 %v618_v33, %v491_v63  ;;  %v635_v57 = vadd.f32 %v619_v21, %v492_v44  ;;  %v1049_v51 = vmul.f32 %v13908_v29, %v18532_v32  ;;  %v18541_v63 = vld [vmem:[#allocation34_spill] sm:$0xff] }
  0xe2   : > { %v1351_v56 = vadd.f32 %v1335_v8, %v1208_v50  ;;  %v1050_v60 = vmul.f32 %v13908_v29, %v18535_v39  ;;  %v1194_v49 = vmul.f32 %v13918_v18, %v18533_v30  ;;  %v1195_v26 = vmul.f32 %v13918_v18, %v18536_v41 }
  0xe3   : > { %v1352_v35 = vadd.f32 %v1336_v28, %v1209_v9  ;;  %v779_v5 = vadd.f32 %v763_v1, %v634_v25  ;;  %v780_v4 = vadd.f32 %v764_v27, %v635_v57  ;;  %v1337_v31 = vmul.f32 %v13926_v47, %v18534_v14 }
  0xe4   : > { %v1494_v34 = vadd.f32 %v1478_v61, %v1351_v56  ;;  %v1338_v19 = vmul.f32 %v13926_v47, %v18537_v12  ;;  %v350_v52 = vmul.f32 %v13856_v58, %v18533_v30  ;;  %v351_v37 = vmul.f32 %v13856_v58, %v18536_v41 }
  0xe5   : > { %v1495_v7 = vadd.f32 %v1479_v20, %v1352_v35  ;;  %v922_v62 = vadd.f32 %v906_v59, %v779_v5  ;;  %v923_v53 = vadd.f32 %v907_v40, %v780_v4  ;;  %v477_v38 = vmul.f32 %v13868_v0, %v18534_v14  ;;  %v18542_v59 = vld [vmem:[#allocation35_spill] sm:$0xff]  ;;  %v18543_v40 = vld [vmem:[#allocation36_spill] sm:$0xff] }
  0xe6   : > { %v478_v15 = vmul.f32 %v13868_v0, %v18537_v12  ;;  %v620_v22 = vmul.f32 %v13877_v3, %v18535_v39  ;;  %v621_v28 = vmul.f32 %v13877_v3, %v18538_v11  ;;  %v765_v58 = vmul.f32 %v13888_v55, %v18536_v41 }
  0xe7   : > { %v1812_v16 = vpack.c.bf16 %v1495_v7, %v1494_v34  ;;  %v1065_v23 = vadd.f32 %v1049_v51, %v922_v62  ;;  %v1066_v8 = vadd.f32 %v1050_v60, %v923_v53  ;;  %v493_v61 = vadd.f32 %v477_v38, %v350_v52  ;;  %v18544_v60 = vld [vmem:[#allocation37_spill] sm:$0xff] }
  0xe8   : > { %v494_v10 = vadd.f32 %v478_v15, %v351_v37  ;;  %v766_v24 = vmul.f32 %v13888_v55, %v18539_v2  ;;  %v1480_v54 = vmul.f32 %v13937_v48, %v18535_v39  ;;  %v1481_v13 = vmul.f32 %v13937_v48, %v18538_v11  ;;  %v14154_v62 = vld [vmem:[%s18237_s4] ss:$0 sm:$0xff] }
  0xe9   : > { %12152 = vmatmul.mubr.msk.bf16.gmra.mrb[24].mxu0 %vm1531_vm0, %v1812_v16  ;;  %v1210_v0 = vadd.f32 %v1194_v49, %v1065_v23  ;;  %v1211_v36 = vadd.f32 %v1195_v26, %v1066_v8  ;;  %v636_v42 = vadd.f32 %v620_v22, %v493_v61  ;;  %v908_v46 = vmul.f32 %v13898_v43, %v18537_v12 }
  0xea   : > { %v637_v3 = vadd.f32 %v621_v28, %v494_v10  ;;  %v909_v6 = vmul.f32 %v13898_v43, %v18540_v17  ;;  %v1051_v45 = vmul.f32 %v13908_v29, %v18538_v11  ;;  %v1052_v44 = vmul.f32 %v13908_v29, %v18541_v63 }
  0xeb   : > { %v1353_v33 = vadd.f32 %v1337_v31, %v1210_v0  ;;  %v1354_v55 = vadd.f32 %v1338_v19, %v1211_v36  ;;  %v781_v32 = vadd.f32 %v765_v58, %v636_v42  ;;  %v1196_v27 = vmul.f32 %v13918_v18, %v18539_v2 }
  0xec   : > { %v782_v21 = vadd.f32 %v766_v24, %v637_v3  ;;  %v1197_v43 = vmul.f32 %v13918_v18, %v18542_v59  ;;  %v1339_v14 = vmul.f32 %v13926_v47, %v18540_v17  ;;  %v1340_v56 = vmul.f32 %v13926_v47, %v18543_v40  ;;  %v14126_v47 = vld [vmem:[%s18237_s4 + $0x1] ss:$0 sm:$0xff] }
  0xed   : > { %v1496_v1 = vadd.f32 %v1480_v54, %v1353_v33  ;;  %v1497_v50 = vadd.f32 %v1481_v13, %v1354_v55  ;;  %v924_v20 = vadd.f32 %v908_v46, %v781_v32  ;;  %v1482_v39 = vmul.f32 %v13937_v48, %v18541_v63 }
  0xee   : > { %v925_v30 = vadd.f32 %v909_v6, %v782_v21  ;;  %v1483_v35 = vmul.f32 %v13937_v48, %v18544_v60  ;;  %v2126_v40 = vlaneseq }
  0xef   : > { %v1813_v9 = vpack.c.bf16 %v1497_v50, %v1496_v1  ;;  %v1067_v25 = vadd.f32 %v1051_v45, %v924_v20 }
  0xf0   : > { %v1068_v57 = vadd.f32 %v1052_v44, %v925_v30 }
  0xf1   : > { %12155 = vmatprep.mubr.msk.bf16.mxu0 %vm1531_vm0, %v1813_v9  ;;  %v1212_v29 = vadd.f32 %v1196_v27, %v1067_v25 }
  0xf2   : > { %v1213_v51 = vadd.f32 %v1197_v43, %v1068_v57  ;;  %v12870_v57 = vmov 1983009808  }
  0xf3   : > { %v1355_v18 = vadd.f32 %v1339_v14, %v1212_v29  ;;  %v2124_v14 = vunpack.c.l.s4 %v12870_v57  ;;  %v12871_v29 = vmov 1934713408  }
  0xf4   : > { %v1356_v5 = vadd.f32 %v1340_v56, %v1213_v51  ;;  %v2156_v51 = vunpack.c.l.s4 %v12871_v29 }
  0xf5   : > { %v1498_v4 = vadd.f32 %v1482_v39, %v1355_v18  ;;  %v2127_v18 = vshrl.u32 %v2126_v40, 7 }
  0xf6   : > { %v1499_v49 = vadd.f32 %v1483_v35, %v1356_v5  ;;  %v2125_v35 = vunpack.c.0.s8 %v2124_v14 }
  0xf8   : > { %v1814_v34 = vpack.c.bf16 %v1499_v49, %v1498_v4  ;;  %v2157_v4 = vunpack.c.0.s8 %v2156_v51 }
  0xfa   : > { %12156 = vmatmul.mubr.msk.bf16.gmra.mrb[28].mxu0 %vm1531_vm0, %v1814_v34 }
 0x113   : > { %v12125_v41 = vpop.f32.mrb[0].mxu1 }
 0x114   : > { %v14129_v26 = vadd.f32 %v12125_v41, %v14126_v47  ;;  %v1744_v31 = vpop.f32.mrb[1].mxu1 }
 0x115   : > { %v14132_v12 = vadd.f32 %v14126_v47, %v1744_v31  ;;  %v12126_v48 = vpop.f32.mrb[2].mxu1  ;;  %v14327_v31 = vsub.s32 %v2125_v35, %v2127_v18 }
 0x116   : > { %4349 = vrot.lane.b32.xlu0 %v14129_v26, %s12867_s26  ;;  %v1747_v19 = vpop.f32.mrb[3].mxu1  ;;  %v14139_v7 = vadd.f32 %v12126_v48, %v14126_v47 }
 0x117   : > { %4393 = vrot.lane.b32.xlu1 %v14132_v12, %s12868_s30  ;;  %v14175_v16 = vadd.f32 %v14126_v47, %v1747_v19  ;;  %18547 = vst [vmem:[#allocation5_spill] sm:$0xff] %v14327_v31 }
 0x11a   : > { %4397 = vrot.lane.b32.xlu0 %v14129_v26, %s12868_s30 }
 0x11b   : > { %4351 = vrot.lane.b32.xlu1 %v14139_v7, %s12867_s26 }
 0x11e   : > { %4445 = vrot.lane.b32.xlu0 %v14129_v26, %s12869_s6 }
 0x11f   : > { %4399 = vrot.lane.b32.xlu1 %v14139_v7, %s12868_s30 }
 0x123   : > { %4447 = vrot.lane.b32.xlu1 %v14139_v7, %s12869_s6 }
 0x12b   : > { %v12105_v53 = vpop.f32.mrb[0].mxu0 }
 0x12c   : > { %v14157_v52 = vadd.f32 %v12105_v53, %v14154_v62  ;;  %v1590_v37 = vpop.f32.mrb[1].mxu0 }
 0x12d   : > { %v12106_v38 = vpop.f32.mrb[2].mxu0  ;;  %v14184_v28 = vadd.f32 %v14154_v62, %v1590_v37  ;;  %v14329_v37 = vsub.s32 %v2157_v4, %v2127_v18 }
 0x12e   : > { %v14160_v15 = vadd.f32 %v12106_v38, %v14154_v62  ;;  %v1593_v22 = vpop.f32.mrb[3].mxu0  ;;  %1981 = vrot.lane.b32.xlu0 %v14157_v52, %s12867_s26 }
 0x12f   : > { %v14189_v10 = vadd.f32 %v14154_v62, %v1593_v22  ;;  %18548 = vst [vmem:[#allocation6_spill] sm:$0xff] %v14329_v37 }
 0x130   : > { %1983 = vrot.lane.b32.xlu1 %v14160_v15, %s12867_s26 }
 0x132   : > { %2029 = vrot.lane.b32.xlu0 %v14157_v52, %s12868_s30 }
 0x134   : > { %2031 = vrot.lane.b32.xlu1 %v14160_v15, %s12868_s30 }
 0x136   : > { %2077 = vrot.lane.b32.xlu0 %v14157_v52, %s12869_s6 }
 0x138   : > { %2079 = vrot.lane.b32.xlu1 %v14160_v15, %s12869_s6 }
 0x13a   : > { %4345 = vrot.lane.b32.xlu0 %v14132_v12, %s12867_s26 }
 0x13c   : > { %4395 = vrot.lane.b32.xlu1 %v14175_v16, %s12868_s30  ;;  %v12129_v23 = vpop.f32.mrb[4].mxu1 }
 0x13d   : > { %v1760_v8 = vpop.f32.mrb[5].mxu1  ;;  %v14204_v58 = vadd.f32 %v12129_v23, %v14126_v47 }
 0x13e   : > { %4441 = vrot.lane.b32.xlu0 %v14132_v12, %s12869_s6  ;;  %v12130_v11 = vpop.f32.mrb[6].mxu1  ;;  %v14245_v55 = vadd.f32 %v14126_v47, %v1760_v8 }
 0x13f   : > { %v1763_v61 = vpop.f32.mrb[7].mxu1  ;;  %v14207_v2 = vadd.f32 %v12130_v11, %v14126_v47 }
 0x140   : > { %4443 = vrot.lane.b32.xlu1 %v14175_v16, %s12869_s6  ;;  %v14240_v33 = vadd.f32 %v14126_v47, %v1763_v61 }
 0x142   : > { %1977 = vrot.lane.b32.xlu0 %v14184_v28, %s12867_s26 }
 0x144   : > { %1979 = vrot.lane.b32.xlu1 %v14189_v10, %s12867_s26 }
 0x146   : > { %2025 = vrot.lane.b32.xlu0 %v14184_v28, %s12868_s30 }
 0x148   : > { %2027 = vrot.lane.b32.xlu1 %v14189_v10, %s12868_s30 }
 0x14a   : > { %2073 = vrot.lane.b32.xlu0 %v14184_v28, %s12869_s6 }
 0x14c   : > { %2075 = vrot.lane.b32.xlu1 %v14189_v10, %s12869_s6 }
 0x14e   : > { %4347 = vrot.lane.b32.xlu0 %v14175_v16, %s12867_s26  ;;  %v12109_v24 = vpop.f32.mrb[4].mxu0 }
 0x14f   : > { %v1606_v0 = vpop.f32.mrb[5].mxu0  ;;  %v14222_v13 = vadd.f32 %v12109_v24, %v14154_v62 }
 0x150   : > { %4359 = vrot.lane.b32.xlu1 %v14207_v2, %s12867_s26  ;;  %v12110_v36 = vpop.f32.mrb[6].mxu0  ;;  %v14269_v44 = vadd.f32 %v14154_v62, %v1606_v0 }
 0x151   : > { %v1609_v54 = vpop.f32.mrb[7].mxu0  ;;  %v14225_v42 = vadd.f32 %v12110_v36, %v14154_v62 }
 0x152   : > { %4357 = vrot.lane.b32.xlu0 %v14204_v58, %s12867_s26  ;;  %v14260_v21 = vadd.f32 %v14154_v62, %v1609_v54 }
 0x154   : > { %4407 = vrot.lane.b32.xlu1 %v14207_v2, %s12868_s30 }
 0x156   : > { %4405 = vrot.lane.b32.xlu0 %v14204_v58, %s12868_s30 }
 0x158   : > { %4455 = vrot.lane.b32.xlu1 %v14207_v2, %s12869_s6 }
 0x15a   : > { %4453 = vrot.lane.b32.xlu0 %v14204_v58, %s12869_s6 }
 0x15c   : > { %1991 = vrot.lane.b32.xlu1 %v14225_v42, %s12867_s26 }
 0x15e   : > { %1989 = vrot.lane.b32.xlu0 %v14222_v13, %s12867_s26 }
 0x15f   : > { %v12133_v3 = vpop.f32.mrb[8].mxu1 }
 0x160   : > { %2039 = vrot.lane.b32.xlu1 %v14225_v42, %s12868_s30  ;;  %v1776_v46 = vpop.f32.mrb[9].mxu1  ;;  %v14282_v50 = vadd.f32 %v12133_v3, %v14126_v47 }
 0x161   : > { %v12134_v17 = vpop.f32.mrb[10].mxu1  ;;  %v14315_v39 = vadd.f32 %v14126_v47, %v1776_v46 }
 0x162   : > { %2037 = vrot.lane.b32.xlu0 %v14222_v13, %s12868_s30  ;;  %v1779_v6 = vpop.f32.mrb[11].mxu1  ;;  %v14285_v20 = vadd.f32 %v12134_v17, %v14126_v47 }
 0x163   : > { %v14308_v25 = vadd.f32 %v14126_v47, %v1779_v6  ;;  %18546 = vst [vmem:[#allocation20_spill] sm:$0xff] %v14315_v39 }
 0x164   : > { %2087 = vrot.lane.b32.xlu1 %v14225_v42, %s12869_s6 }
 0x165   : > { %18545 = vst [vmem:[#allocation19_spill] sm:$0xff] %v14308_v25 }
 0x166   : > { %2085 = vrot.lane.b32.xlu0 %v14222_v13, %s12869_s6 }
 0x168   : > { %4355 = vrot.lane.b32.xlu1 %v14240_v33, %s12867_s26 }
 0x16a   : > { %4353 = vrot.lane.b32.xlu0 %v14245_v55, %s12867_s26 }
 0x16c   : > { %4403 = vrot.lane.b32.xlu1 %v14240_v33, %s12868_s30 }
 0x16e   : > { %4401 = vrot.lane.b32.xlu0 %v14245_v55, %s12868_s30 }
 0x170   : > { %4451 = vrot.lane.b32.xlu1 %v14240_v33, %s12869_s6 }
 0x171   : > { %v14257_v32 = vpop.f32.mrb[8].mxu0 }
 0x172   : > { %4449 = vrot.lane.b32.xlu0 %v14245_v55, %s12869_s6  ;;  %v14264_v45 = vpop.f32.mrb[9].mxu0 }
 0x173   : > { %v14266_v63 = vpop.f32.mrb[10].mxu0 }
 0x174   : > { %1987 = vrot.lane.b32.xlu1 %v14260_v21, %s12867_s26  ;;  %v1625_v1 = vpop.f32.mrb[11].mxu0 }
 0x175   : > { %v14340_v11 = vadd.f32 %v14154_v62, %v1625_v1  ;;  %v14352_v1 = vadd.f32 %v14154_v62, %v14264_v45 }
 0x176   : > { %1985 = vrot.lane.b32.xlu0 %v14269_v44, %s12867_s26 }
 0x177   : > { %18549 = vst [vmem:[#allocation7_spill] sm:$0xff] %v14340_v11  ;;  %18550 = vst [vmem:[#allocation8_spill] sm:$0xff] %v14352_v1 }
 0x178   : > { %2035 = vrot.lane.b32.xlu1 %v14260_v21, %s12868_s30 }
 0x17a   : > { %2033 = vrot.lane.b32.xlu0 %v14269_v44, %s12868_s30 }
 0x17c   : > { %2083 = vrot.lane.b32.xlu1 %v14260_v21, %s12869_s6 }
 0x17e   : > { %2081 = vrot.lane.b32.xlu0 %v14269_v44, %s12869_s6 }
 0x180   : > { %4367 = vrot.lane.b32.xlu1 %v14285_v20, %s12867_s26 }
 0x182   : > { %4365 = vrot.lane.b32.xlu0 %v14282_v50, %s12867_s26 }
 0x183   : > { %v14293_v30 = vpop.f32.mrb[12].mxu1 }
 0x184   : > { %4415 = vrot.lane.b32.xlu1 %v14285_v20, %s12868_s30  ;;  %v14297_v27 = vpop.f32.mrb[13].mxu1 }
 0x185   : > { %v14299_v59 = vpop.f32.mrb[14].mxu1 }
 0x186   : > { %4413 = vrot.lane.b32.xlu0 %v14282_v50, %s12868_s30  ;;  %v14303_v43 = vpop.f32.mrb[15].mxu1 }
 0x188   : > { %4463 = vrot.lane.b32.xlu1 %v14285_v20, %s12869_s6  ;;  %v4350_v9 = vpop.permute.xlu0 %4349 }
 0x189   : > { %v14312_v56 = vpop.permute.xlu1 %4393 }
 0x18a   : > { %4461 = vrot.lane.b32.xlu0 %v14282_v50, %s12869_s6 }
 0x18c   : > { %4363 = vrot.lane.b32.xlu1 %v14308_v25, %s12867_s26  ;;  %v4398_v60 = vpop.permute.xlu0 %4397 }
 0x18d   : > { %v4352_v5 = vpop.permute.xlu1 %4351  ;;  %v4625_v49 = vcombine.low %v14129_v26, %v4398_v60  ;;  %v4626_v34 = vcombine.high %v14129_v26, %v4398_v60 }
 0x18e   : > { %4361 = vrot.lane.b32.xlu0 %v14315_v39, %s12867_s26 }
 0x18f   : > { %v4633_v38 = vrot.slane %v4625_v49, %v14327_v31  ;;  %v4640_v22 = vrot.slane %v4626_v34, %v14327_v31 }
 0x190   : > { %4411 = vrot.lane.b32.xlu1 %v14308_v25, %s12868_s30  ;;  %v4446_v41 = vpop.permute.xlu0 %4445 }
 0x191   : > { %v4641_v48 = vcombine.low %v4350_v9, %v4446_v41  ;;  %v4642_v19 = vcombine.high %v4350_v9, %v4446_v41  ;;  %v4400_v53 = vpop.permute.xlu1 %4399 }
 0x192   : > { %4409 = vrot.lane.b32.xlu0 %v14315_v39, %s12868_s30  ;;  %v4693_v61 = vcombine.low %v14139_v7, %v4400_v53  ;;  %v4694_v24 = vcombine.high %v14139_v7, %v4400_v53 }
 0x193   : > { %v4649_v26 = vrot.slane %v4641_v48, %v14327_v31  ;;  %v4656_v23 = vrot.slane %v4642_v19, %v14327_v31 }
 0x194   : > { %4459 = vrot.lane.b32.xlu1 %v14308_v25, %s12869_s6  ;;  %v14337_v8 = vpop.f32.mrb[12].mxu0  ;;  %v4701_v60 = vrot.slane %v4693_v61, %v14327_v31  ;;  %v4708_v45 = vrot.slane %v4694_v24, %v14327_v31 }
 0x195   : > { %v14344_v0 = vpop.f32.mrb[13].mxu0  ;;  %v4657_v36 = vcombine.low %v4633_v38, %v4649_v26  ;;  %v4658_v54 = vcombine.high %v4633_v38, %v4649_v26  ;;  %v4673_v3 = vcombine.low %v4640_v22, %v4656_v23  ;;  %v4674_v46 = vcombine.high %v4640_v22, %v4656_v23  ;;  %v4448_v17 = vpop.permute.xlu1 %4447 }
 0x196   : > { %4457 = vrot.lane.b32.xlu0 %v14315_v39, %s12869_s6  ;;  %v14348_v6 = vpop.f32.mrb[14].mxu0  ;;  %v4709_v9 = vcombine.low %v4352_v5, %v4448_v17  ;;  %v4710_v57 = vcombine.high %v4352_v5, %v4448_v17  ;;  %v14370_v38 = vadd.f32 %v14293_v30, %v14126_v47  ;;  %v14374_v22 = vadd.f32 %v14299_v59, %v14126_v47 }
 0x197   : > { %v14354_v14 = vpop.f32.mrb[15].mxu0  ;;  %v4665_v7 = vrot.slane %v4657_v36, %v14329_v37  ;;  %v4672_v40 = vrot.slane %v4658_v54, %v14329_v37  ;;  %v4681_v29 = vrot.slane %v4673_v3, %v14329_v37  ;;  %v4688_v51 = vrot.slane %v4674_v46, %v14329_v37 }
 0x198   : > { %1995 = vrot.lane.b32.xlu1 %v14340_v11, %s12867_s26  ;;  %v4717_v35 = vrot.slane %v4709_v9, %v14327_v31  ;;  %v4724_v18 = vrot.slane %v4710_v57, %v14327_v31  ;;  %18551 = vst [vmem:[#allocation9_spill] sm:$0xff] %v14370_v38  ;;  %18552 = vst [vmem:[#allocation10_spill] sm:$0xff] %v14374_v22 }
 0x199   : > { %v5713_v5 = vcombine.low %v4665_v7, %v4672_v40  ;;  %v11809_v4 = vcombine.high %v4665_v7, %v4672_v40  ;;  %v5729_v49 = vcombine.low %v4681_v29, %v4688_v51  ;;  %v11810_v34 = vcombine.high %v4681_v29, %v4688_v51 }
 0x19a   : > { %1993 = vrot.lane.b32.xlu0 %v14352_v1, %s12867_s26  ;;  %v4725_v41 = vcombine.low %v4701_v60, %v4717_v35  ;;  %v4726_v48 = vcombine.high %v4701_v60, %v4717_v35  ;;  %v4741_v19 = vcombine.low %v4708_v45, %v4724_v18  ;;  %v4742_v53 = vcombine.high %v4708_v45, %v4724_v18 }
 0x19b   : > { %v14387_v30 = vrot.slane %v5713_v5, %v14327_v31  ;;  %v14390_v59 = vrot.slane %v11809_v4, %v14327_v31  ;;  %v14393_v3 = vrot.slane %v5729_v49, %v14327_v31  ;;  %v14396_v46 = vrot.slane %v11810_v34, %v14327_v31 }
 0x19c   : > { %2043 = vrot.lane.b32.xlu1 %v14340_v11, %s12868_s30  ;;  %v14378_v26 = vpop.f32.mrb[16].mxu0  ;;  %v4733_v23 = vrot.slane %v4725_v41, %v14329_v37  ;;  %v4740_v61 = vrot.slane %v4726_v48, %v14329_v37  ;;  %v4749_v24 = vrot.slane %v4741_v19, %v14329_v37  ;;  %v4756_v36 = vrot.slane %v4742_v53, %v14329_v37 }
 0x19d   : > { %v14384_v54 = vpop.f32.mrb[17].mxu0  ;;  %v5746_v4 = vcombine.high %v14387_v30, %v14390_v59  ;;  %v5762_v49 = vcombine.high %v14393_v3, %v14396_v46 }
 0x19e   : > { %2041 = vrot.lane.b32.xlu0 %v14352_v1, %s12868_s30  ;;  %v14400_v17 = vpop.f32.mrb[18].mxu0  ;;  %v5781_v9 = vcombine.low %v4733_v23, %v4740_v61  ;;  %v11811_v57 = vcombine.high %v4733_v23, %v4740_v61  ;;  %v5797_v7 = vcombine.low %v4749_v24, %v4756_v36  ;;  %v11812_v40 = vcombine.high %v4749_v24, %v4756_v36 }
 0x19f   : > { %v14402_v29 = vpop.f32.mrb[19].mxu0  ;;  %v5760_v19 = vrot.slane %v5746_v4, %v14329_v37  ;;  %v5776_v53 = vrot.slane %v5762_v49, %v14329_v37  ;;  %v14444_v4 = vadd.f32 %v14266_v63, %v14154_v62  ;;  %v14452_v49 = vadd.f32 %v14126_v47, %v14303_v43 }
 0x1a0   : > { %v1982_v51 = vpop.permute.xlu0 %1981  ;;  %4375 = vrot.lane.b32.xlu1 %v14374_v22, %s12867_s26  ;;  %v14407_v60 = vrot.slane %v5781_v9, %v14327_v31  ;;  %v14410_v45 = vrot.slane %v11811_v57, %v14327_v31  ;;  %v14413_v35 = vrot.slane %v5797_v7, %v14327_v31  ;;  %v14416_v18 = vrot.slane %v11812_v40, %v14327_v31 }
 0x1a1   : > { %v5779_v36 = vcombine.low %v5760_v19, %v5776_v53  ;;  %v5780_v7 = vcombine.high %v5760_v19, %v5776_v53  ;;  %v14440_v40 = vadd.f32 %v14257_v32, %v14154_v62  ;;  %18554 = vst [vmem:[#allocation12_spill] sm:$0xff] %v14444_v4  ;;  %18556 = vst [vmem:[#allocation14_spill] sm:$0xff] %v14452_v49 }
 0x1a2   : > { %4373 = vrot.lane.b32.xlu0 %v14370_v38, %s12867_s26  ;;  %v1984_v5 = vpop.permute.xlu1 %1983  ;;  %v5814_v34 = vcombine.high %v14407_v60, %v14410_v45  ;;  %v5830_v41 = vcombine.high %v14413_v35, %v14416_v18 }
 0x1a3   : > { %18553 = vst [vmem:[#allocation11_spill] sm:$0xff] %v14440_v40 }
 0x1a4   : > { %v2030_v48 = vpop.permute.xlu0 %2029  ;;  %4423 = vrot.lane.b32.xlu1 %v14374_v22, %s12868_s30  ;;  %v5828_v9 = vrot.slane %v5814_v34, %v14329_v37  ;;  %v5844_v57 = vrot.slane %v5830_v41, %v14329_v37 }
 0x1a5   : > { %v2257_v23 = vcombine.low %v14157_v52, %v2030_v48  ;;  %v2258_v61 = vcombine.high %v14157_v52, %v2030_v48  ;;  %v14448_v52 = vadd.f32 %v14126_v47, %v14297_v27 }
 0x1a6   : > { %4421 = vrot.lane.b32.xlu0 %v14370_v38, %s12868_s30  ;;  %v2032_v24 = vpop.permute.xlu1 %2031  ;;  %v5847_v41 = vcombine.low %v5828_v9, %v5844_v57  ;;  %v5848_v48 = vcombine.high %v5828_v9, %v5844_v57 }
 0x1a7   : > { %18555 = vst [vmem:[#allocation13_spill] sm:$0xff] %v14448_v52  ;;  %v2265_v32 = vrot.slane %v2257_v23, %v14327_v31  ;;  %v2272_v19 = vrot.slane %v2258_v61, %v14327_v31  ;;  %v2325_v25 = vcombine.low %v14160_v15, %v2032_v24  ;;  %v2326_v27 = vcombine.high %v14160_v15, %v2032_v24 }
 0x1a8   : > { %v2078_v34 = vpop.permute.xlu0 %2077  ;;  %4471 = vrot.lane.b32.xlu1 %v14374_v22, %s12869_s6  ;;  %v14462_v43 = vpack.c.bf16 %v5847_v41, %v5779_v36  ;;  %v14464_v39 = vpack.c.bf16 %v5848_v48, %v5780_v7  ;;  %v4490_v15 = vcombine.high %v14132_v12, %v14312_v56  ;;  %v5813_v36 = vcombine.low %v14407_v60, %v14410_v45 }
 0x1a9   : > { %v2273_v63 = vcombine.low %v1982_v51, %v2078_v34  ;;  %v2274_v53 = vcombine.high %v1982_v51, %v2078_v34  ;;  %v4489_v51 = vcombine.low %v14132_v12, %v14312_v56  ;;  %v5829_v7 = vcombine.low %v14413_v35, %v14416_v18 }
 0x1aa   : > { %4469 = vrot.lane.b32.xlu0 %v14370_v38, %s12869_s6  ;;  %v2080_v47 = vpop.permute.xlu1 %2079  ;;  %18557 = vst [vmem:[#allocation15_spill] sm:$0xff] %v14462_v43  ;;  %18558 = vst [vmem:[#allocation16_spill] sm:$0xff] %v14464_v39  ;;  %v2333_v12 = vrot.slane %v2325_v25, %v14327_v31  ;;  %v2340_v56 = vrot.slane %v2326_v27, %v14327_v31 }
 0x1ab   : > { %v2281_v9 = vrot.slane %v2273_v63, %v14327_v31  ;;  %v2288_v23 = vrot.slane %v2274_v53, %v14327_v31  ;;  %v2341_v57 = vcombine.low %v1984_v5, %v2080_v47  ;;  %v2342_v61 = vcombine.high %v1984_v5, %v2080_v47  ;;  %v14468_v22 = vpop.f32.mrb[20].mxu0 }
 0x1ac   : > { %v14474_v24 = vpop.permute.xlu0 %4345  ;;  %4371 = vrot.lane.b32.xlu1 %v14452_v49, %s12867_s26  ;;  %v14482_v5 = vpop.f32.mrb[21].mxu0 }
 0x1ad   : > { %v2289_v34 = vcombine.low %v2265_v32, %v2281_v9  ;;  %v2290_v41 = vcombine.high %v2265_v32, %v2281_v9  ;;  %v2305_v48 = vcombine.low %v2272_v19, %v2288_v23  ;;  %v2306_v63 = vcombine.high %v2272_v19, %v2288_v23  ;;  %v14484_v53 = vpop.f32.mrb[22].mxu0 }
 0x1ae   : > { %v2349_v47 = vrot.slane %v2341_v57, %v14327_v31  ;;  %v2356_v38 = vrot.slane %v2342_v61, %v14327_v31  ;;  %4369 = vrot.lane.b32.xlu0 %v14448_v52, %s12867_s26  ;;  %v14492_v60 = vpop.permute.xlu1 %4395  ;;  %v14494_v45 = vpop.f32.mrb[23].mxu0 }
 0x1af   : > { %v2297_v35 = vrot.slane %v2289_v34, %v14329_v37  ;;  %v2304_v18 = vrot.slane %v2290_v41, %v14329_v37  ;;  %v2313_v32 = vrot.slane %v2305_v48, %v14329_v37  ;;  %v2320_v25 = vrot.slane %v2306_v63, %v14329_v37 }
 0x1b0   : > { %v2357_v19 = vcombine.low %v2333_v12, %v2349_v47  ;;  %v2358_v27 = vcombine.high %v2333_v12, %v2349_v47  ;;  %v2373_v9 = vcombine.low %v2340_v56, %v2356_v38  ;;  %v2374_v23 = vcombine.high %v2340_v56, %v2356_v38  ;;  %v14500_v57 = vpop.permute.xlu0 %4441  ;;  %4419 = vrot.lane.b32.xlu1 %v14452_v49, %s12868_s30 }
 0x1b1   : > { %v3345_v61 = vcombine.low %v2297_v35, %v2304_v18  ;;  %v11777_v39 = vcombine.high %v2297_v35, %v2304_v18  ;;  %v5745_v34 = vcombine.low %v14387_v30, %v14390_v59  ;;  %v5761_v41 = vcombine.low %v14393_v3, %v14396_v46 }
 0x1b2   : > { %v14509_v48 = vrot.slane %v4489_v51, %v14327_v31  ;;  %v14512_v63 = vrot.slane %v4490_v15, %v14327_v31  ;;  %v2365_v38 = vrot.slane %v2357_v19, %v14329_v37  ;;  %v2372_v12 = vrot.slane %v2358_v27, %v14329_v37  ;;  %4417 = vrot.lane.b32.xlu0 %v14448_v52, %s12868_s30  ;;  %v14518_v56 = vpop.permute.xlu1 %4443 }
 0x1b3   : > { %v2381_v30 = vrot.slane %v2373_v9, %v14329_v37  ;;  %v2388_v59 = vrot.slane %v2374_v23, %v14329_v37  ;;  %v5821_v3 = vrot.slane %v5813_v36, %v14329_v37  ;;  %v5837_v46 = vrot.slane %v5829_v7, %v14329_v37  ;;  %v14539_v36 = vld [vmem:[%s18237_s4 + $0x2] ss:$0 sm:$0xff] }
 0x1b4   : > { %v3361_v51 = vcombine.low %v2313_v32, %v2320_v25  ;;  %v11778_v15 = vcombine.high %v2313_v32, %v2320_v25  ;;  %v14524_v47 = vpop.permute.xlu0 %1977  ;;  %4467 = vrot.lane.b32.xlu1 %v14452_v49, %s12869_s6  ;;  %v14530_v35 = vadd.f32 %v14337_v8, %v14154_v62  ;;  %v14534_v18 = vadd.f32 %v14154_v62, %v14344_v0 }
 0x1b5   : > { %v3352_v7 = vrot.slane %v3345_v61, %v14327_v31  ;;  %v3360_v32 = vrot.slane %v11777_v39, %v14327_v31  ;;  %v5753_v25 = vrot.slane %v5745_v34, %v14329_v37  ;;  %v5769_v19 = vrot.slane %v5761_v41, %v14329_v37 }
 0x1b6   : > { %18559 = vst [vmem:[#allocation17_spill] sm:$0xff] %v14530_v35  ;;  %18560 = vst [vmem:[#allocation18_spill] sm:$0xff] %v14534_v18  ;;  %v3413_v27 = vcombine.low %v2365_v38, %v2372_v12  ;;  %v11779_v8 = vcombine.high %v2365_v38, %v2372_v12  ;;  %4465 = vrot.lane.b32.xlu0 %v14448_v52, %s12869_s6  ;;  %v14547_v0 = vpop.permute.xlu1 %1979  ;;  %v14551_v9 = vadd.f32 %v14348_v6, %v14154_v62 }
 0x1b7   : > { %v14555_v23 = vadd.f32 %v14154_v62, %v14354_v14  ;;  %v3429_v39 = vcombine.low %v2381_v30, %v2388_v59  ;;  %v11780_v61 = vcombine.high %v2381_v30, %v2388_v59  ;;  %v5845_v34 = vcombine.low %v5821_v3, %v5837_v46 }
 0x1b8   : > { %18561 = vst [vmem:[#allocation21_spill] sm:$0xff] %v14551_v9  ;;  %v14559_v41 = vadd.f32 %v14378_v26, %v14539_v36  ;;  %v3368_v38 = vrot.slane %v3361_v51, %v14327_v31  ;;  %v3376_v12 = vrot.slane %v11778_v15, %v14327_v31  ;;  %v14563_v49 = vpop.permute.xlu0 %2025  ;;  %2091 = vrot.lane.b32.xlu1 %v14340_v11, %s12869_s6 }
 0x1b9   : > { %18562 = vst [vmem:[#allocation22_spill] sm:$0xff] %v14555_v23  ;;  %v5846_v6 = vcombine.high %v5821_v3, %v5837_v46  ;;  %v14569_v62 = vadd.f32 %v14539_v36, %v14384_v54  ;;  %v3377_v14 = vcombine.low %v3352_v7, %v3360_v32  ;;  %v5777_v30 = vcombine.low %v5753_v25, %v5769_v19 }
 0x1ba   : > { %18563 = vst [vmem:[#allocation23_spill] sm:$0xff] %v14559_v41  ;;  %v14573_v26 = vadd.f32 %v14400_v17, %v14539_v36  ;;  %v14577_v59 = vadd.f32 %v14539_v36, %v14402_v29  ;;  %v3420_v51 = vrot.slane %v3413_v27, %v14327_v31  ;;  %v3428_v15 = vrot.slane %v11779_v8, %v14327_v31  ;;  %v14585_v54 = vpop.permute.xlu1 %2027 }
 0x1bb   : > { %18564 = vst [vmem:[#allocation24_spill] sm:$0xff] %v14569_v62  ;;  %v4505_v3 = vcombine.low %v14474_v24, %v14500_v57  ;;  %2089 = vrot.lane.b32.xlu0 %v14352_v1, %s12869_s6  ;;  %v5778_v46 = vcombine.high %v5753_v25, %v5769_v19  ;;  %v3378_v52 = vcombine.high %v3352_v7, %v3360_v32 }
 0x1bc   : > { %18565 = vst [vmem:[#allocation25_spill] sm:$0xff] %v14573_v26  ;;  %18566 = vst [vmem:[#allocation26_spill] sm:$0xff] %v14577_v59  ;;  %v14588_v17 = vrot.slane %v3429_v39, %v14327_v31  ;;  %v14591_v29 = vrot.slane %v11780_v61, %v14327_v31  ;;  %v14593_v11 = vpack.c.bf16 %v5845_v34, %v5777_v30  ;;  %v2074_v43 = vpop.permute.xlu0 %2073  ;;  %1999 = vrot.lane.b32.xlu1 %v14444_v4, %s12867_s26  ;;  %v14605_v32 = vpop.f32.mrb[24].mxu0 }
 0x1bd   : > { %v3393_v27 = vcombine.low %v3368_v38, %v3376_v12  ;;  %v4506_v8 = vcombine.high %v14474_v24, %v14500_v57  ;;  %v14599_v1 = vpack.c.bf16 %v5846_v6, %v5778_v46  ;;  %v14603_v7 = vadd.f32 %v14468_v22, %v14539_v36  ;;  %18568 = vst [vmem:[#allocation28_spill] sm:$0xff] %v14605_v32  ;;  %v14618_v57 = vpop.f32.mrb[25].mxu0 }
 0x1be   : > { %v14608_v25 = vrot.slane %v3377_v14, %v14329_v37  ;;  %v3394_v19 = vcombine.high %v3368_v38, %v3376_v12  ;;  %v14612_v39 = vadd.f32 %v14539_v36, %v14482_v5  ;;  %v14616_v24 = vadd.f32 %v14484_v53, %v14539_v36  ;;  %18572 = vst [vmem:[#allocation32_spill] sm:$0xff] %v14618_v57  ;;  %v2076_v38 = vpop.permute.xlu1 %2075  ;;  %v14626_v5 = vpop.f32.mrb[26].mxu0 }
 0x1bf   : > { %18567 = vst [vmem:[#allocation27_spill] sm:$0xff] %v14603_v7  ;;  %v3445_v61 = vcombine.low %v3420_v51, %v3428_v15  ;;  %v4513_v22 = vrot.slane %v4505_v3, %v14327_v31  ;;  %v2121_v34 = vcombine.low %v14184_v28, %v14563_v49  ;;  %v2137_v6 = vcombine.low %v14524_v47, %v2074_v43  ;;  %v14634_v3 = vpop.f32.mrb[27].mxu0 }
 0x1c0   : > { %18569 = vst [vmem:[#allocation29_spill] sm:$0xff] %v14608_v25  ;;  %18570 = vst [vmem:[#allocation30_spill] sm:$0xff] %v14612_v39  ;;  %1997 = vrot.lane.b32.xlu0 %v14440_v40, %s12867_s26  ;;  %v14629_v12 = vrot.slane %v3378_v52, %v14329_v37  ;;  %v3446_v53 = vcombine.high %v3420_v51, %v3428_v15  ;;  %v3461_v14 = vcombine.low %v14588_v17, %v14591_v29  ;;  %v4348_v52 = vpop.permute.xlu0 %4347 }
 0x1c1   : > { %18571 = vst [vmem:[#allocation31_spill] sm:$0xff] %v14616_v24  ;;  %18573 = vst [vmem:[#allocation33_spill] sm:$0xff] %v14626_v5  ;;  %v2138_v30 = vcombine.high %v14524_v47, %v2074_v43  ;;  %v14637_v46 = vrot.slane %v3393_v27, %v14329_v37  ;;  %v4520_v25 = vrot.slane %v4506_v8, %v14327_v31  ;;  %2047 = vrot.lane.b32.xlu1 %v14444_v4, %s12868_s30 }
 0x1c2   : > { %18574 = vst [vmem:[#allocation34_spill] sm:$0xff] %v14629_v12  ;;  %18575 = vst [vmem:[#allocation35_spill] sm:$0xff] %v14634_v3  ;;  %v2122_v32 = vcombine.high %v14184_v28, %v14563_v49  ;;  %v2145_v5 = vrot.slane %v2137_v6, %v14327_v31  ;;  %v14646_v51 = vrot.slane %v3394_v19, %v14329_v37  ;;  %v14662_v19 = vpop.permute.xlu1 %4359 }
 0x1c3   : > { %18576 = vst [vmem:[#allocation36_spill] sm:$0xff] %v14637_v46  ;;  %v3462_v43 = vcombine.high %v14588_v17, %v14591_v29  ;;  %v4557_v47 = vcombine.low %v14175_v16, %v14492_v60  ;;  %v4558_v15 = vcombine.high %v14175_v16, %v14492_v60  ;;  %v14655_v28 = vrot.slane %v3445_v61, %v14329_v37 }
 0x1c4   : > { %18577 = vst [vmem:[#allocation37_spill] sm:$0xff] %v14646_v51  ;;  %v4521_v49 = vcombine.low %v14509_v48, %v4513_v22  ;;  %v4522_v27 = vcombine.high %v14509_v48, %v4513_v22  ;;  %v2129_v8 = vrot.slane %v2121_v34, %v14327_v31  ;;  %2045 = vrot.lane.b32.xlu0 %v14440_v40, %s12868_s30  ;;  %v14676_v6 = vpop.permute.xlu0 %4357 }
 0x1c5   : > { %18578 = vst [vmem:[#allocation38_spill] sm:$0xff] %v14655_v28  ;;  %v14665_v17 = vrot.slane %v3446_v53, %v14329_v37  ;;  %v14668_v29 = vrot.slane %v3461_v14, %v14329_v37  ;;  %v2152_v16 = vrot.slane %v2138_v30, %v14327_v31  ;;  %v2189_v60 = vcombine.low %v14189_v10, %v14585_v54 }
 0x1c6   : > { %v4537_v48 = vcombine.low %v14512_v63, %v4520_v25  ;;  %v4538_v61 = vcombine.high %v14512_v63, %v4520_v25  ;;  %v2136_v22 = vrot.slane %v2122_v32, %v14327_v31  ;;  %v2153_v34 = vcombine.low %v2129_v8, %v2145_v5  ;;  %2095 = vrot.lane.b32.xlu1 %v14444_v4, %s12869_s6  ;;  %v14690_v25 = vpop.permute.xlu1 %4407 }
 0x1c7   : > { %18579 = vst [vmem:[#allocation39_spill] sm:$0xff] %v14665_v17  ;;  %18580 = vst [vmem:[#allocation40_spill] sm:$0xff] %v14668_v29  ;;  %v2154_v53 = vcombine.high %v2129_v8, %v2145_v5  ;;  %v4573_v14 = vcombine.low %v4348_v52, %v14518_v56  ;;  %v4574_v30 = vcombine.high %v4348_v52, %v14518_v56 }
 0x1c8   : > { %v2205_v12 = vcombine.low %v14547_v0, %v2076_v38  ;;  %v4529_v51 = vrot.slane %v4521_v49, %v14329_v37  ;;  %v4536_v17 = vrot.slane %v4522_v27, %v14329_v37  ;;  %v2190_v63 = vcombine.high %v14189_v10, %v14585_v54  ;;  %2093 = vrot.lane.b32.xlu0 %v14440_v40, %s12869_s6  ;;  %v14700_v54 = vpop.permute.xlu0 %4405 }
 0x1c9   : > { %v2206_v32 = vcombine.high %v14547_v0, %v2076_v38  ;;  %v14693_v5 = vrot.slane %v3462_v43, %v14329_v37  ;;  %v2169_v56 = vcombine.low %v2136_v22, %v2152_v16  ;;  %v2170_v52 = vcombine.high %v2136_v22, %v2152_v16 }
 0x1ca   : > { %v4581_v8 = vrot.slane %v4573_v14, %v14327_v31  ;;  %v4545_v49 = vrot.slane %v4537_v48, %v14329_v37  ;;  %v4552_v27 = vrot.slane %v4538_v61, %v14329_v37  ;;  %v4565_v10 = vrot.slane %v4557_v47, %v14327_v31  ;;  %2007 = vrot.lane.b32.xlu1 %v14551_v9, %s12867_s26 }
 0x1cb   : > { %18581 = vst [vmem:[#allocation41_spill] sm:$0xff] %v14693_v5  ;;  %v4588_v0 = vrot.slane %v4574_v30, %v14327_v31  ;;  %v4572_v38 = vrot.slane %v4558_v15, %v14327_v31  ;;  %v2161_v43 = vrot.slane %v2153_v34, %v14329_v37  ;;  %v2168_v16 = vrot.slane %v2154_v53, %v14329_v37  ;;  %v14713_v30 = vpop.permute.xlu1 %4455 }
 0x1cc   : > { %v2213_v22 = vrot.slane %v2205_v12, %v14327_v31  ;;  %v5577_v48 = vcombine.low %v4529_v51, %v4536_v17  ;;  %v2197_v61 = vrot.slane %v2189_v60, %v14327_v31  ;;  %v2204_v47 = vrot.slane %v2190_v63, %v14327_v31  ;;  %2001 = vrot.lane.b32.xlu0 %v14534_v18, %s12867_s26  ;;  %v4454_v60 = vpop.permute.xlu0 %4453 }
 0x1cd   : > { %v2220_v14 = vrot.slane %v2206_v32, %v14327_v31  ;;  %v2177_v15 = vrot.slane %v2169_v56, %v14329_v37  ;;  %v2184_v34 = vrot.slane %v2170_v52, %v14329_v37  ;;  %v4589_v4 = vcombine.low %v4565_v10, %v4581_v8  ;;  %v14719_v29 = vpop.f32.mrb[28].mxu0 }
 0x1ce   : > { %v4590_v53 = vcombine.high %v4565_v10, %v4581_v8  ;;  %v11805_v40 = vcombine.high %v4529_v51, %v4536_v17  ;;  %v5593_v12 = vcombine.low %v4545_v49, %v4552_v27  ;;  %v4605_v5 = vcombine.low %v4572_v38, %v4588_v0  ;;  %2055 = vrot.lane.b32.xlu1 %v14551_v9, %s12868_s30  ;;  %v14728_v17 = vpop.f32.mrb[29].mxu0 }
 0x1cf   : > { %v4606_v3 = vcombine.high %v4572_v38, %v4588_v0  ;;  %v11806_v63 = vcombine.high %v4545_v49, %v4552_v27  ;;  %v3209_v32 = vcombine.low %v2161_v43, %v2168_v16  ;;  %v2221_v46 = vcombine.low %v2197_v61, %v2213_v22  ;;  %18582 = vst [vmem:[#allocation42_spill] sm:$0xff] %v14719_v29  ;;  %v14726_v51 = vpop.permute.xlu1 %1991  ;;  %v14732_v38 = vpop.f32.mrb[30].mxu0 }
 0x1d0   : > { %v2222_v28 = vcombine.high %v2197_v61, %v2213_v22  ;;  %v14722_v56 = vrot.slane %v5577_v48, %v14327_v31  ;;  %v11773_v52 = vcombine.high %v2161_v43, %v2168_v16  ;;  %v2237_v57 = vcombine.low %v2204_v47, %v2220_v14  ;;  %2049 = vrot.lane.b32.xlu0 %v14534_v18, %s12868_s30  ;;  %v14742_v61 = vpop.permute.xlu0 %1989 }
 0x1d1   : > { %v2238_v8 = vcombine.high %v2204_v47, %v2220_v14  ;;  %18583 = vst [vmem:[#allocation43_spill] sm:$0xff] %v14728_v17  ;;  %v3225_v10 = vcombine.low %v2177_v15, %v2184_v34  ;;  %v11774_v49 = vcombine.high %v2177_v15, %v2184_v34  ;;  %v4597_v27 = vrot.slane %v4589_v4, %v14329_v37  ;;  %v14754_v15 = vpop.f32.mrb[31].mxu0 }
 0x1d2   : > { %v4604_v0 = vrot.slane %v4590_v53, %v14329_v37  ;;  %18584 = vst [vmem:[#allocation44_spill] sm:$0xff] %v14732_v38  ;;  %v14735_v22 = vrot.slane %v11805_v40, %v14327_v31  ;;  %v14738_v43 = vrot.slane %v5593_v12, %v14327_v31  ;;  %v4613_v16 = vrot.slane %v4605_v5, %v14329_v37 }
 0x1d3   : > { %v4620_v48 = vrot.slane %v4606_v3, %v14329_v37  ;;  %2003 = vrot.lane.b32.xlu1 %v14555_v23, %s12867_s26  ;;  %v14747_v4 = vrot.slane %v11806_v63, %v14327_v31  ;;  %v14750_v47 = vrot.slane %v3209_v32, %v14327_v31  ;;  %v2229_v40 = vrot.slane %v2221_v46, %v14329_v37  ;;  %v14762_v12 = vpop.permute.xlu1 %2039 }
 0x1d4   : > { %18585 = vst [vmem:[#allocation45_spill] sm:$0xff] %v14738_v43  ;;  %v2236_v14 = vrot.slane %v2222_v28, %v14329_v37  ;;  %18587 = vst [vmem:[#allocation47_spill] sm:$0xff] %v14754_v15  ;;  %v2245_v5 = vrot.slane %v2237_v57, %v14329_v37  ;;  %v2252_v3 = vrot.slane %v2238_v8, %v14329_v37  ;;  %2097 = vrot.lane.b32.xlu0 %v14534_v18, %s12869_s6  ;;  %v14777_v18 = vpop.permute.xlu0 %2037 }
 0x1d5   : > { %18586 = vst [vmem:[#allocation46_spill] sm:$0xff] %v14750_v47  ;;  %v4913_v34 = vcombine.low %v14676_v6, %v4454_v60  ;;  %v4914_v53 = vcombine.high %v14676_v6, %v4454_v60  ;;  %v14765_v63 = vrot.slane %v11773_v52, %v14327_v31  ;;  %v14768_v46 = vrot.slane %v3225_v10, %v14327_v31 }
 0x1d6   : > { %v14771_v28 = vrot.slane %v11774_v49, %v14327_v31  ;;  %v5645_v57 = vcombine.low %v4597_v27, %v4604_v0  ;;  %v11807_v32 = vcombine.high %v4597_v27, %v4604_v0  ;;  %v5661_v8 = vcombine.low %v4613_v16, %v4620_v48 }
 0x1d7   : > { %18588 = vst [vmem:[#allocation48_spill] sm:$0xff] %v14765_v63  ;;  %18589 = vst [vmem:[#allocation49_spill] sm:$0xff] %v14768_v46  ;;  %v4897_v6 = vcombine.low %v14204_v58, %v14700_v54  ;;  %v4898_v60 = vcombine.high %v14204_v58, %v14700_v54  ;;  %2051 = vrot.lane.b32.xlu1 %v14555_v23, %s12868_s30  ;;  %v11808_v52 = vcombine.high %v4613_v16, %v4620_v48  ;;  %v14789_v58 = vpop.permute.xlu1 %2087 }
 0x1d8   : > { %18590 = vst [vmem:[#allocation50_spill] sm:$0xff] %v14771_v28  ;;  %v3277_v10 = vcombine.low %v2229_v40, %v2236_v14  ;;  %v4981_v49 = vcombine.low %v14662_v19, %v14713_v30  ;;  %v4982_v27 = vcombine.high %v14662_v19, %v14713_v30  ;;  %v11775_v0 = vcombine.high %v2229_v40, %v2236_v14 }
 0x1d9   : > { %v3293_v38 = vcombine.low %v2245_v5, %v2252_v3  ;;  %v4921_v29 = vrot.slane %v4913_v34, %v14327_v31  ;;  %v4928_v17 = vrot.slane %v4914_v53, %v14327_v31  ;;  %2005 = vrot.lane.b32.xlu0 %v14530_v35, %s12867_s26  ;;  %v14792_v54 = vrot.slane %v5645_v57, %v14327_v31  ;;  %v14806_v53 = vpop.permute.xlu0 %2085 }
 0x1da   : > { %v11776_v16 = vcombine.high %v2245_v5, %v2252_v3  ;;  %v4965_v48 = vcombine.low %v14207_v2, %v14690_v25  ;;  %v4966_v19 = vcombine.high %v14207_v2, %v14690_v25  ;;  %v14799_v30 = vrot.slane %v11807_v32, %v14327_v31 }
 0x1db   : > { %18591 = vst [vmem:[#allocation51_spill] sm:$0xff] %v14792_v54  ;;  %v14802_v40 = vrot.slane %v5661_v8, %v14327_v31  ;;  %v4905_v14 = vrot.slane %v4897_v6, %v14327_v31  ;;  %v4912_v34 = vrot.slane %v4898_v60, %v14327_v31  ;;  %2099 = vrot.lane.b32.xlu1 %v14555_v23, %s12869_s6  ;;  %v14832_v23 = vpop.permute.xlu1 %4355 }
 0x1dc   : > { %18592 = vst [vmem:[#allocation52_spill] sm:$0xff] %v14799_v30  ;;  %v14811_v5 = vrot.slane %v11808_v52, %v14327_v31  ;;  %v14814_v2 = vrot.slane %v3277_v10, %v14327_v31  ;;  %v14817_v25 = vrot.slane %v4981_v49, %v14327_v31  ;;  %v14820_v3 = vrot.slane %v4982_v27, %v14327_v31 }
 0x1dd   : > { %18593 = vst [vmem:[#allocation53_spill] sm:$0xff] %v14802_v40  ;;  %v4929_v57 = vcombine.low %v4905_v14, %v4921_v29  ;;  %v4930_v32 = vcombine.high %v4905_v14, %v4921_v29  ;;  %v4945_v8 = vcombine.low %v4912_v34, %v4928_v17  ;;  %v4946_v6 = vcombine.high %v4912_v34, %v4928_v17 }
 0x1de   : > { %18594 = vst [vmem:[#allocation54_spill] sm:$0xff] %v14811_v5  ;;  %18595 = vst [vmem:[#allocation55_spill] sm:$0xff] %v14814_v2  ;;  %2053 = vrot.lane.b32.xlu0 %v14530_v35, %s12868_s30  ;;  %v14825_v60 = vrot.slane %v11775_v0, %v14327_v31  ;;  %v14828_v52 = vrot.slane %v3293_v38, %v14327_v31  ;;  %v4973_v10 = vrot.slane %v4965_v48, %v14327_v31  ;;  %v14843_v38 = vpop.permute.xlu0 %4353 }
 0x1df   : > { %v4980_v49 = vrot.slane %v4966_v19, %v14327_v31  ;;  %v14835_v27 = vrot.slane %v11776_v16, %v14327_v31  ;;  %2103 = vrot.lane.b32.xlu1 %v14551_v9, %s12869_s6  ;;  %v14852_v34 = vrot.slane %v4929_v57, %v14329_v37  ;;  %v14855_v17 = vrot.slane %v4930_v32, %v14329_v37 }
 0x1e0   : > { %18596 = vst [vmem:[#allocation56_spill] sm:$0xff] %v14825_v60  ;;  %18597 = vst [vmem:[#allocation57_spill] sm:$0xff] %v14828_v52  ;;  %v4997_v48 = vcombine.low %v4973_v10, %v14817_v25  ;;  %v4998_v19 = vcombine.high %v4973_v10, %v14817_v25  ;;  %v14858_v0 = vrot.slane %v4945_v8, %v14329_v37 }
 0x1e1   : > { %18598 = vst [vmem:[#allocation58_spill] sm:$0xff] %v14835_v27  ;;  %v5013_v16 = vcombine.low %v4980_v49, %v14820_v3  ;;  %v5014_v14 = vcombine.high %v4980_v49, %v14820_v3  ;;  %v14861_v29 = vrot.slane %v4946_v6, %v14329_v37  ;;  %v5609_v25 = vcombine.low %v14722_v56, %v14735_v22 }
 0x1e2   : > { %2101 = vrot.lane.b32.xlu0 %v14530_v35, %s12869_s6  ;;  %v5625_v3 = vcombine.low %v14738_v43, %v14747_v4  ;;  %v5677_v57 = vcombine.low %v14792_v54, %v14799_v30  ;;  %v5693_v32 = vcombine.low %v14802_v40, %v14811_v5  ;;  %v3241_v8 = vcombine.low %v14750_v47, %v14765_v63  ;;  %v14881_v35 = vpop.permute.xlu0 %4401 }
 0x1e3   : > { %v3257_v6 = vcombine.low %v14768_v46, %v14771_v28  ;;  %v3309_v10 = vcombine.low %v14814_v2, %v14825_v60  ;;  %v3325_v49 = vcombine.low %v14828_v52, %v14835_v27  ;;  %6761 = vrot.lane.b32.xlu1 %v14569_v62, %s12868_s30  ;;  %v5617_v9 = vrot.slane %v5609_v25, %v14329_v37  ;;  %v14889_v46 = vpop.permute.xlu1 %4403 }
 0x1e4   : > { %v5633_v15 = vrot.slane %v5625_v3, %v14329_v37  ;;  %v5685_v47 = vrot.slane %v5677_v57, %v14329_v37  ;;  %v5701_v63 = vrot.slane %v5693_v32, %v14329_v37  ;;  %v3249_v2 = vrot.slane %v3241_v8, %v14329_v37 }
 0x1e5   : > { %v3265_v60 = vrot.slane %v3257_v6, %v14329_v37  ;;  %v3317_v52 = vrot.slane %v3309_v10, %v14329_v37  ;;  %v3333_v27 = vrot.slane %v3325_v49, %v14329_v37  ;;  %v5005_v8 = vrot.slane %v4997_v48, %v14329_v37 }
 0x1e6   : > { %6717 = vrot.lane.b32.xlu0 %v14559_v41, %s12867_s26  ;;  %v5641_v25 = vcombine.low %v5617_v9, %v5633_v15  ;;  %v5709_v28 = vcombine.low %v5685_v47, %v5701_v63  ;;  %v5642_v3 = vcombine.high %v5617_v9, %v5633_v15  ;;  %v5710_v40 = vcombine.high %v5685_v47, %v5701_v63  ;;  %v14897_v30 = vpop.permute.xlu0 %4449 }
 0x1e7   : > { %v3273_v57 = vcombine.low %v3249_v2, %v3265_v60  ;;  %v3341_v5 = vcombine.low %v3317_v52, %v3333_v27  ;;  %v3274_v32 = vcombine.high %v3249_v2, %v3265_v60  ;;  %v3342_v54 = vcombine.high %v3317_v52, %v3333_v27  ;;  %6809 = vrot.lane.b32.xlu1 %v14569_v62, %s12869_s6  ;;  %v14915_v60 = vpop.permute.xlu1 %4451 }
 0x1e8   : > { %v6665_v6 = vpack.c.bf16 %v5709_v28, %v5641_v25  ;;  %v6669_v10 = vpack.c.bf16 %v5710_v40, %v5642_v3  ;;  %v2545_v49 = vcombine.low %v14742_v61, %v14806_v53  ;;  %v5012_v43 = vrot.slane %v4998_v19, %v14329_v37 }
 0x1e9   : > { %v5021_v9 = vrot.slane %v5013_v16, %v14329_v37  ;;  %v4297_v47 = vpack.c.bf16 %v3341_v5, %v3273_v57  ;;  %v4301_v15 = vpack.c.bf16 %v3342_v54, %v3274_v32  ;;  %v5028_v63 = vrot.slane %v5014_v14, %v14329_v37 }
 0x1ea   : > { %6765 = vrot.lane.b32.xlu0 %v14559_v41, %s12868_s30  ;;  %12415 = vmatprep.subr.msk.bf16.mxu1 %vm9065_vm1, %v6665_v6  ;;  %v9079_v28 = vsel %vm9065_vm1, %v6665_v6, 0  ;;  %v9168_v40 = vsel %vm9065_vm1, %v6669_v10, 0  ;;  %v2546_v2 = vcombine.high %v14742_v61, %v14806_v53  ;;  %v5985_v54 = vcombine.low %v14852_v34, %v14855_v17  ;;  %v14932_v48 = vpop.permute.xlu0 %1985 }
 0x1eb   : > { %12419 = vmatprep.subr.msk.bf16.mxu0 %vm9065_vm1, %v6669_v10  ;;  %v11817_v5 = vcombine.high %v14852_v34, %v14855_v17  ;;  %12160 = vmatpush3.bf16.xpose.msra.mxu1 %v9079_v28  ;;  %v2613_v52 = vcombine.low %v14726_v51, %v14789_v58  ;;  %v2598_v27 = vcombine.high %v14225_v42, %v14762_v12  ;;  %v9082_v17 = vsel %vm9065_vm1, %v14593_v11, 0 }
 0x1ec   : > { %12167 = vmatprep.mubr.msk.bf16.mxu1 %vm9065_vm1, %v4297_v47  ;;  %12176 = vmatpush3.bf16.xpose.msra.mxu0 %v9168_v40  ;;  %v2553_v61 = vrot.slane %v2545_v49, %v14327_v31  ;;  %v2614_v53 = vcombine.high %v14726_v51, %v14789_v58  ;;  %v6001_v19 = vcombine.low %v14858_v0, %v14861_v29  ;;  %v9171_v51 = vsel %vm9065_vm1, %v14599_v1, 0  ;;  %v14965_v49 = vpop.permute.xlu1 %1987 }
 0x1ed   : > { %12183 = vmatprep.mubr.msk.bf16.mxu0 %vm9065_vm1, %v4301_v15  ;;  %v11818_v16 = vcombine.high %v14858_v0, %v14861_v29  ;;  %v6053_v14 = vcombine.low %v5005_v8, %v5012_v43  ;;  %12416 = vmatprep.subr.msk.bf16.mxu1 %vm9065_vm1, %v14593_v11  ;;  %v11819_v58 = vcombine.high %v5005_v8, %v5012_v43 }
 0x1ee   : > { %12420 = vmatprep.subr.msk.bf16.mxu0 %vm9065_vm1, %v14599_v1  ;;  %v6069_v34 = vcombine.low %v5021_v9, %v5028_v63  ;;  %v18599_v25 = vcombine.low %v14222_v13, %v14777_v18  ;;  %v2560_v57 = vrot.slane %v2546_v2, %v14327_v31  ;;  %6813 = vrot.lane.b32.xlu0 %v14559_v41, %s12869_s6 }
 0x1ef   : > { %v14952_v11 = vrot.slane %v5985_v54, %v14327_v31  ;;  %v14955_v29 = vrot.slane %v11817_v5, %v14327_v31  ;;  %v11820_v0 = vcombine.high %v5021_v9, %v5028_v63  ;;  %v2621_v1 = vrot.slane %v2613_v52, %v14327_v31  ;;  %6719 = vrot.lane.b32.xlu1 %v14573_v26, %s12867_s26  ;;  %v14984_v54 = vpop.permute.xlu0 %2033 }
 0x1f0   : > { %v2537_v3 = vrot.slane %v18599_v25, %v14327_v31  ;;  %v18600_v43 = vcombine.high %v14222_v13, %v14777_v18  ;;  %v2628_v10 = vrot.slane %v2614_v53, %v14327_v31  ;;  %v14968_v47 = vrot.slane %v6001_v19, %v14327_v31 }
 0x1f1   : > { %v14971_v9 = vrot.slane %v11818_v16, %v14327_v31  ;;  %v14974_v15 = vrot.slane %v6053_v14, %v14327_v31  ;;  %v18602_v13 = vcombine.low %v14225_v42, %v14762_v12  ;;  %v14981_v63 = vrot.slane %v11819_v58, %v14327_v31 }
 0x1f2   : > { %v2544_v32 = vrot.slane %v18600_v43, %v14327_v31  ;;  %v2561_v8 = vcombine.low %v2537_v3, %v2553_v61  ;;  %v2562_v6 = vcombine.high %v2537_v3, %v2553_v61  ;;  %v2612_v28 = vrot.slane %v2598_v27, %v14327_v31  ;;  %6713 = vrot.lane.b32.xlu0 %v14569_v62, %s12867_s26 }
 0x1f3   : > { %18601 = vst [vmem:[#allocation59_spill] sm:$0xff] %v14974_v15  ;;  %v2605_v18 = vrot.slane %v18602_v13, %v14327_v31  ;;  %18603 = vst [vmem:[#allocation60_spill] sm:$0xff] %v14981_v63  ;;  %v14989_v5 = vrot.slane %v6069_v34, %v14327_v31  ;;  %v14992_v52 = vrot.slane %v11820_v0, %v14327_v31  ;;  %12162 = vmatpush3.bf16.xpose.msra.mxu1 %v9082_v17  ;;  %v15026_v43 = vpop.permute.xlu0 %2081 }
 0x1f4   : > { %v2577_v40 = vcombine.low %v2544_v32, %v2560_v57  ;;  %v2578_v2 = vcombine.high %v2544_v32, %v2560_v57  ;;  %v4761_v12 = vcombine.low %v14245_v55, %v14881_v35  ;;  %v2569_v27 = vrot.slane %v2561_v8, %v14329_v37  ;;  %12178 = vmatpush3.bf16.xpose.msra.mxu0 %v9171_v51 }
 0x1f5   : > { %18604 = vst [vmem:[#allocation61_spill] sm:$0xff] %v14989_v5  ;;  %18605 = vst [vmem:[#allocation62_spill] sm:$0xff] %v14992_v52  ;;  %v2629_v42 = vcombine.low %v2605_v18, %v2621_v1  ;;  %v2576_v61 = vrot.slane %v2562_v6, %v14329_v37  ;;  %v2630_v53 = vcombine.high %v2605_v18, %v2621_v1  ;;  %6767 = vrot.lane.b32.xlu1 %v14573_v26, %s12868_s30 }
 0x1f6   : > { %v2645_v19 = vcombine.low %v2612_v28, %v2628_v10  ;;  %v2646_v16 = vcombine.high %v2612_v28, %v2628_v10  ;;  %v4762_v14 = vcombine.high %v14245_v55, %v14881_v35  ;;  %v4777_v58 = vcombine.low %v14843_v38, %v14897_v30  ;;  %v15012_v55 = vpop.permute.xlu1 %2035  ;;  %6763 = vrot.lane.b32.xlu0 %v14577_v59, %s12868_s30 }
 0x1f7   : > { %v4778_v17 = vcombine.high %v14843_v38, %v14897_v30  ;;  %v2585_v34 = vrot.slane %v2577_v40, %v14329_v37  ;;  %v2592_v25 = vrot.slane %v2578_v2, %v14329_v37  ;;  %v4845_v51 = vcombine.low %v14832_v23, %v14915_v60 }
 0x1f8   : > { %v4846_v3 = vcombine.high %v14832_v23, %v14915_v60  ;;  %v4829_v35 = vcombine.low %v14240_v33, %v14889_v46  ;;  %v4830_v30 = vcombine.high %v14240_v33, %v14889_v46  ;;  %v4785_v38 = vrot.slane %v4777_v58, %v14327_v31 }
 0x1f9   : > { %v4792_v57 = vrot.slane %v4778_v17, %v14327_v31  ;;  %v2637_v0 = vrot.slane %v2629_v42, %v14329_v37  ;;  %v2644_v1 = vrot.slane %v2630_v53, %v14329_v37  ;;  %v2653_v23 = vrot.slane %v2645_v19, %v14329_v37  ;;  %6815 = vrot.lane.b32.xlu1 %v14573_v26, %s12869_s6 }
 0x1fa   : > { %v4769_v60 = vrot.slane %v4761_v12, %v14327_v31  ;;  %v2660_v32 = vrot.slane %v2646_v16, %v14329_v37  ;;  %v4776_v8 = vrot.slane %v4762_v14, %v14327_v31  ;;  %v4853_v33 = vrot.slane %v4845_v51, %v14327_v31  ;;  %6725 = vrot.lane.b32.xlu0 %v14603_v7, %s12867_s26  ;;  %v15038_v14 = vpop.permute.xlu1 %2083 }
 0x1fb   : > { %v4860_v46 = vrot.slane %v4846_v3, %v14327_v31  ;;  %v3617_v6 = vcombine.low %v2569_v27, %v2576_v61  ;;  %v11785_v10 = vcombine.high %v2569_v27, %v2576_v61  ;;  %v4837_v28 = vrot.slane %v4829_v35, %v14327_v31 }
 0x1fc   : > { %v4793_v13 = vcombine.low %v4769_v60, %v4785_v38  ;;  %v4794_v18 = vcombine.high %v4769_v60, %v4785_v38  ;;  %v4844_v40 = vrot.slane %v4830_v30, %v14327_v31  ;;  %v4809_v2 = vcombine.low %v4776_v8, %v4792_v57 }
 0x1fd   : > { %v4810_v42 = vcombine.high %v4776_v8, %v4792_v57  ;;  %v3633_v12 = vcombine.low %v2585_v34, %v2592_v25  ;;  %v11786_v53 = vcombine.high %v2585_v34, %v2592_v25  ;;  %v3685_v19 = vcombine.low %v2637_v0, %v2644_v1  ;;  %6715 = vrot.lane.b32.xlu1 %v14577_v59, %s12867_s26  ;;  %v15047_v34 = vpop.permute.xlu0 %4365 }
 0x1fe   : > { %v11787_v16 = vcombine.high %v2637_v0, %v2644_v1  ;;  %v3701_v58 = vcombine.low %v2653_v23, %v2660_v32  ;;  %v4861_v17 = vcombine.low %v4837_v28, %v4853_v33  ;;  %v4862_v27 = vcombine.high %v4837_v28, %v4853_v33  ;;  %6773 = vrot.lane.b32.xlu0 %v14603_v7, %s12868_s30 }
 0x1ff   : > { %v4877_v61 = vcombine.low %v4844_v40, %v4860_v46  ;;  %v15043_v51 = vrot.slane %v3617_v6, %v14327_v31  ;;  %v4801_v3 = vrot.slane %v4793_v13, %v14329_v37  ;;  %v4808_v35 = vrot.slane %v4794_v18, %v14329_v37 }
 0x200   : > { %v4878_v30 = vcombine.high %v4844_v40, %v4860_v46  ;;  %v15052_v25 = vrot.slane %v11785_v10, %v14327_v31  ;;  %v11788_v38 = vcombine.high %v2653_v23, %v2660_v32  ;;  %v4817_v57 = vrot.slane %v4809_v2, %v14329_v37  ;;  %v15079_v40 = vpop.permute.xlu1 %4367 }
 0x201   : > { %v4824_v0 = vrot.slane %v4810_v42, %v14329_v37  ;;  %v15057_v1 = vrot.slane %v3633_v12, %v14327_v31  ;;  %v15060_v60 = vrot.slane %v11786_v53, %v14327_v31  ;;  %v15063_v8 = vrot.slane %v3685_v19, %v14327_v31  ;;  %6811 = vrot.lane.b32.xlu1 %v14577_v59, %s12869_s6 }
 0x202   : > { %v15066_v33 = vrot.slane %v11787_v16, %v14327_v31  ;;  %v15069_v46 = vrot.slane %v3701_v58, %v14327_v31  ;;  %v4869_v23 = vrot.slane %v4861_v17, %v14329_v37  ;;  %v4876_v32 = vrot.slane %v4862_v27, %v14329_v37  ;;  %6821 = vrot.lane.b32.xlu0 %v14603_v7, %s12869_s6  ;;  %v4414_v27 = vpop.permute.xlu0 %4413 }
 0x203   : > { %18606 = vst [vmem:[#allocation63_spill] sm:$0xff] %v15057_v1  ;;  %18607 = vst [vmem:[#allocation64_spill] sm:$0xff] %v15060_v60  ;;  %v4885_v6 = vrot.slane %v4877_v61, %v14329_v37  ;;  %v5849_v10 = vcombine.low %v4801_v3, %v4808_v35  ;;  %v11813_v13 = vcombine.high %v4801_v3, %v4808_v35 }
 0x204   : > { %18608 = vst [vmem:[#allocation65_spill] sm:$0xff] %v15063_v8  ;;  %18609 = vst [vmem:[#allocation66_spill] sm:$0xff] %v15066_v33  ;;  %v4892_v18 = vrot.slane %v4878_v30, %v14329_v37  ;;  %v2409_v28 = vcombine.low %v14932_v48, %v15026_v43  ;;  %v15084_v2 = vrot.slane %v11788_v38, %v14327_v31 }
 0x205   : > { %18610 = vst [vmem:[#allocation67_spill] sm:$0xff] %v15069_v46  ;;  %v5865_v42 = vcombine.low %v4817_v57, %v4824_v0  ;;  %v2393_v12 = vcombine.low %v14269_v44, %v14984_v54  ;;  %v2394_v53 = vcombine.high %v14269_v44, %v14984_v54  ;;  %v11814_v19 = vcombine.high %v4817_v57, %v4824_v0 }
 0x206   : > { %18611 = vst [vmem:[#allocation68_spill] sm:$0xff] %v15084_v2  ;;  %v2461_v16 = vcombine.low %v14260_v21, %v15012_v55  ;;  %v2410_v58 = vcombine.high %v14932_v48, %v15026_v43  ;;  %v2477_v17 = vcombine.low %v14965_v49, %v15038_v14  ;;  %v5917_v61 = vcombine.low %v4869_v23, %v4876_v32  ;;  %v4462_v62 = vpop.permute.xlu0 %4461 }
 0x207   : > { %v11815_v3 = vcombine.high %v4869_v23, %v4876_v32  ;;  %v2417_v35 = vrot.slane %v2409_v28, %v14327_v31  ;;  %v2478_v30 = vcombine.high %v14965_v49, %v15038_v14  ;;  %6769 = vrot.lane.b32.xlu1 %v14612_v39, %s12868_s30  ;;  %v15102_v44 = vrot.slane %v5849_v10, %v14327_v31  ;;  %v15122_v10 = vpop.permute.xlu1 %4415 }
 0x208   : > { %v15105_v54 = vrot.slane %v11813_v13, %v14327_v31  ;;  %v5933_v48 = vcombine.low %v4885_v6, %v4892_v18  ;;  %v11816_v43 = vcombine.high %v4885_v6, %v4892_v18  ;;  %6721 = vrot.lane.b32.xlu0 %v14612_v39, %s12867_s26  ;;  %v15110_v38 = vrot.slane %v5865_v42, %v14327_v31 }
 0x209   : > { %v2401_v57 = vrot.slane %v2393_v12, %v14327_v31  ;;  %v2462_v49 = vcombine.high %v14260_v21, %v15012_v55  ;;  %v5169_v14 = vcombine.low %v14282_v50, %v4414_v27  ;;  %v15117_v0 = vrot.slane %v11814_v19, %v14327_v31 }
 0x20a   : > { %v2424_v23 = vrot.slane %v2410_v58, %v14327_v31  ;;  %v2485_v32 = vrot.slane %v2477_v17, %v14327_v31  ;;  %v5170_v6 = vcombine.high %v14282_v50, %v4414_v27  ;;  %v15125_v13 = vrot.slane %v5917_v61, %v14327_v31 }
 0x20b   : > { %v15128_v18 = vrot.slane %v11815_v3, %v14327_v31  ;;  %v2425_v21 = vcombine.low %v2401_v57, %v2417_v35  ;;  %v2492_v55 = vrot.slane %v2478_v30, %v14327_v31  ;;  %6817 = vrot.lane.b32.xlu1 %v14612_v39, %s12869_s6  ;;  %v15134_v28 = vrot.slane %v5933_v48, %v14327_v31 }
 0x20c   : > { %v2408_v42 = vrot.slane %v2394_v53, %v14327_v31  ;;  %v2469_v50 = vrot.slane %v2461_v16, %v14327_v31  ;;  %v2426_v12 = vcombine.high %v2401_v57, %v2417_v35  ;;  %v15139_v19 = vrot.slane %v11816_v43, %v14327_v31 }
 0x20d   : > { %v2476_v58 = vrot.slane %v2462_v49, %v14327_v31  ;;  %v15143_v17 = vrot.slane %v5169_v14, %v14327_v31  ;;  %v15148_v48 = vrot.slane %v5170_v6, %v14327_v31  ;;  %v15151_v53 = vrot.slane %v2425_v21, %v14329_v37 }
 0x20e   : > { %v2441_v61 = vcombine.low %v2408_v42, %v2424_v23  ;;  %v2442_v3 = vcombine.high %v2408_v42, %v2424_v23  ;;  %v2493_v30 = vcombine.low %v2469_v50, %v2485_v32  ;;  %v2494_v16 = vcombine.high %v2469_v50, %v2485_v32 }
 0x20f   : > { %v2509_v35 = vcombine.low %v2476_v58, %v2492_v55  ;;  %v2510_v43 = vcombine.high %v2476_v58, %v2492_v55  ;;  %6727 = vrot.lane.b32.xlu1 %v14616_v24, %s12867_s26  ;;  %v15156_v57 = vrot.slane %v2426_v12, %v14329_v37  ;;  %v5881_v49 = vcombine.low %v15102_v44, %v15105_v54 }
 0x210   : > { %v5897_v14 = vcombine.low %v15110_v38, %v15117_v0  ;;  %v5949_v23 = vcombine.low %v15125_v13, %v15128_v18  ;;  %v5965_v32 = vcombine.low %v15134_v28, %v15139_v19  ;;  %v6017_v6 = vcombine.low %v14952_v11, %v14955_v29 }
 0x211   : > { %v6033_v21 = vcombine.low %v14968_v47, %v14971_v9  ;;  %v6085_v55 = vcombine.low %v14974_v15, %v14981_v63  ;;  %v5889_v42 = vrot.slane %v5881_v49, %v14329_v37  ;;  %v6101_v58 = vcombine.low %v14989_v5, %v14992_v52  ;;  %v4464_v63 = vpop.permute.xlu1 %4463 }
 0x212   : > { %v5905_v50 = vrot.slane %v5897_v14, %v14329_v37  ;;  %v5957_v12 = vrot.slane %v5949_v23, %v14329_v37  ;;  %v5973_v27 = vrot.slane %v5965_v32, %v14329_v37  ;;  %v6025_v39 = vrot.slane %v6017_v6, %v14329_v37 }
 0x213   : > { %v6041_v7 = vrot.slane %v6033_v21, %v14329_v37  ;;  %v6093_v59 = vrot.slane %v6085_v55, %v14329_v37  ;;  %6775 = vrot.lane.b32.xlu1 %v14616_v24, %s12868_s30  ;;  %v15184_v49 = vrot.slane %v2441_v61, %v14329_v37  ;;  %v6109_v23 = vrot.slane %v6101_v58, %v14329_v37 }
 0x214   : > { %v5913_v14 = vcombine.low %v5889_v42, %v5905_v50  ;;  %v5914_v26 = vcombine.high %v5889_v42, %v5905_v50  ;;  %v5981_v41 = vcombine.low %v5957_v12, %v5973_v27  ;;  %v5982_v5 = vcombine.high %v5957_v12, %v5973_v27 }
 0x215   : > { %v6049_v32 = vcombine.low %v6025_v39, %v6041_v7  ;;  %v6050_v52 = vcombine.high %v6025_v39, %v6041_v7  ;;  %v15188_v6 = vrot.slane %v2442_v3, %v14329_v37  ;;  %v15191_v21 = vrot.slane %v2493_v30, %v14329_v37 }
 0x216   : > { %v6117_v55 = vcombine.low %v6093_v59, %v6109_v23  ;;  %v6118_v15 = vcombine.high %v6093_v59, %v6109_v23  ;;  %v15194_v61 = vrot.slane %v2494_v16, %v14329_v37  ;;  %v6667_v42 = vpack.c.bf16 %v5981_v41, %v5913_v14 }
 0x217   : > { %v6671_v50 = vpack.c.bf16 %v5982_v5, %v5914_v26  ;;  %v5185_v58 = vcombine.low %v15047_v34, %v4462_v62  ;;  %6823 = vrot.lane.b32.xlu1 %v14616_v24, %s12869_s6  ;;  %v3481_v7 = vcombine.low %v15151_v53, %v15156_v57  ;;  %v15202_v39 = vrot.slane %v2509_v35, %v14329_v37  ;;  %v18636_v24 = vld [vmem:[#allocation36_spill] sm:$0xff] }
 0x218   : > { %v15205_v27 = vrot.slane %v2510_v43, %v14329_v37  ;;  %v5186_v59 = vcombine.high %v15047_v34, %v4462_v62  ;;  %12417 = vmatprep.subr.msk.bf16.mxu1 %vm9065_vm1, %v6667_v42  ;;  %v9085_v41 = vsel %vm9065_vm1, %v6667_v42, 0  ;;  %v6668_v5 = vpack.c.bf16 %v6117_v55, %v6049_v32 }
 0x219   : > { %12421 = vmatprep.subr.msk.bf16.mxu0 %vm9065_vm1, %v6671_v50  ;;  %v9174_v26 = vsel %vm9065_vm1, %v6671_v50, 0  ;;  %v6672_v3 = vpack.c.bf16 %v6118_v15, %v6050_v52  ;;  %v11781_v30 = vcombine.high %v15151_v53, %v15156_v57  ;;  %12164 = vmatpush3.bf16.xpose.msra.mxu1 %v9085_v41  ;;  %v5253_v16 = vcombine.low %v15079_v40, %v4464_v63  ;;  %v15223_v52 = vpop.permute.xlu0 %4361  ;;  %v15232_v57 = vpop.permute.xlu1 %4363 }
 0x21a   : > { %12180 = vmatpush3.bf16.xpose.msra.mxu0 %v9174_v26  ;;  %v5254_v35 = vcombine.high %v15079_v40, %v4464_v63  ;;  %v3497_v62 = vcombine.low %v15184_v49, %v15188_v6  ;;  %v5238_v34 = vcombine.high %v14285_v20, %v15122_v10  ;;  %12418 = vmatprep.subr.msk.bf16.mxu1 %vm9065_vm1, %v6668_v5  ;;  %v18615_v26 = vld [vmem:[#allocation52_spill] sm:$0xff] }
 0x21b   : > { %12422 = vmatprep.subr.msk.bf16.mxu0 %vm9065_vm1, %v6672_v3  ;;  %v5193_v15 = vrot.slane %v5185_v58, %v14327_v31  ;;  %v11782_v53 = vcombine.high %v15184_v49, %v15188_v6  ;;  %v18612_v63 = vcombine.low %v14285_v20, %v15122_v10  ;;  %v5200_v43 = vrot.slane %v5186_v59, %v14327_v31  ;;  %v18614_v59 = vld [vmem:[#allocation45_spill] sm:$0xff] }
 0x21c   : > { %v15236_v12 = vadd.f32 %v14539_v36, %v14494_v45  ;;  %v3549_v14 = vcombine.low %v15191_v21, %v15194_v61  ;;  %v11783_v23 = vcombine.high %v15191_v21, %v15194_v61  ;;  %v3565_v49 = vcombine.low %v15202_v39, %v15205_v27 }
 0x21d   : > { %v5245_v40 = vrot.slane %v18612_v63, %v14327_v31  ;;  %v11784_v20 = vcombine.high %v15202_v39, %v15205_v27  ;;  %v15247_v10 = vrot.slane %v3481_v7, %v14327_v31  ;;  %v15250_v32 = vrot.slane %v11781_v30, %v14327_v31  ;;  %v15275_v30 = vpop.permute.xlu0 %4409 }
 0x21e   : > { %18613 = vst [vmem:[#allocation69_spill] sm:$0xff] %v15236_v12  ;;  %v5261_v45 = vrot.slane %v5253_v16, %v14327_v31  ;;  %v5268_v36 = vrot.slane %v5254_v35, %v14327_v31  ;;  %6771 = vrot.lane.b32.xlu0 %v15236_v12, %s12868_s30  ;;  %v15257_v6 = vrot.slane %v3497_v62, %v14327_v31  ;;  %v9088_v7 = vsel %vm9065_vm1, %v6668_v5, 0 }
 0x21f   : > { %v5252_v21 = vrot.slane %v5238_v34, %v14327_v31  ;;  %v5201_v55 = vcombine.low %v15143_v17, %v5193_v15  ;;  %v5610_v61 = vcombine.high %v14722_v56, %v14735_v22  ;;  %6723 = vrot.lane.b32.xlu1 %v15236_v12, %s12867_s26  ;;  %v5202_v42 = vcombine.high %v15143_v17, %v5193_v15  ;;  %v18616_v56 = vld [vmem:[#allocation51_spill] sm:$0xff]  ;;  %v18617_v34 = vld [vmem:[#allocation54_spill] sm:$0xff]  ;;  %v18618_v15 = vld [vmem:[#allocation53_spill] sm:$0xff] }
 0x220   : > { %v5217_v50 = vcombine.low %v15148_v48, %v5200_v43  ;;  %v5218_v58 = vcombine.high %v15148_v48, %v5200_v43  ;;  %v9177_v39 = vsel %vm9065_vm1, %v6672_v3, 0  ;;  %v5626_v41 = vcombine.high %v18614_v59, %v14747_v4  ;;  %v15277_v48 = vpop.permute.xlu1 %4411 }
 0x221   : > { %v5624_v27 = vrot.slane %v5610_v61, %v14329_v37  ;;  %v5678_v22 = vcombine.high %v18616_v56, %v18615_v26  ;;  %v5269_v16 = vcombine.low %v5245_v40, %v5261_v45  ;;  %v5270_v17 = vcombine.high %v5245_v40, %v5261_v45  ;;  %12166 = vmatpush3.bf16.xpose.msra.mxu1 %v9088_v7  ;;  %v4458_v26 = vpop.permute.xlu0 %4457 }
 0x222   : > { %v5285_v35 = vcombine.low %v5252_v21, %v5268_v36  ;;  %12182 = vmatpush3.bf16.xpose.msra.mxu0 %v9177_v39  ;;  %v5286_v5 = vcombine.high %v5252_v21, %v5268_v36  ;;  %v5640_v3 = vrot.slane %v5626_v41, %v14329_v37  ;;  %v5694_v4 = vcombine.high %v18618_v15, %v18617_v34 }
 0x223   : > { %v5692_v62 = vrot.slane %v5678_v22, %v14329_v37  ;;  %6819 = vrot.lane.b32.xlu1 %v15236_v12, %s12869_s6  ;;  %v15286_v63 = vrot.slane %v11782_v53, %v14327_v31  ;;  %v5209_v40 = vrot.slane %v5201_v55, %v14329_v37  ;;  %v5216_v43 = vrot.slane %v5202_v42, %v14329_v37  ;;  %v18637_v12 = vld [vmem:[#allocation29_spill] sm:$0xff] }
 0x224   : > { %v5225_v45 = vrot.slane %v5217_v50, %v14329_v37  ;;  %v5232_v36 = vrot.slane %v5218_v58, %v14329_v37  ;;  %v5643_v21 = vcombine.low %v5624_v27, %v5640_v3  ;;  %v5708_v61 = vrot.slane %v5694_v4, %v14329_v37  ;;  %v15307_v58 = vld [vmem:[%s18237_s4 + $0x2] ss:$0 sm:$0xff] }
 0x225   : > { %v5644_v7 = vcombine.high %v5624_v27, %v5640_v3  ;;  %v15294_v39 = vrot.slane %v3549_v14, %v14327_v31  ;;  %v5277_v59 = vrot.slane %v5269_v16, %v14329_v37  ;;  %v5284_v53 = vrot.slane %v5270_v17, %v14329_v37  ;;  %v18619_v27 = vld [vmem:[#allocation32_spill] sm:$0xff] }
 0x226   : > { %v15299_v41 = vrot.slane %v5285_v35, %v14329_v37  ;;  %v15302_v55 = vrot.slane %v5286_v5, %v14329_v37  ;;  %v5711_v42 = vcombine.low %v5692_v62, %v5708_v61  ;;  %v5712_v50 = vcombine.high %v5692_v62, %v5708_v61  ;;  %v4460_v35 = vpop.permute.xlu1 %4459 }
 0x227   : > { %v15311_v14 = vadd.f32 %v15307_v58, %v18619_v27  ;;  %v15314_v56 = vrot.slane %v11783_v23, %v14327_v31  ;;  %v15317_v22 = vrot.slane %v3565_v49, %v14327_v31  ;;  %v6257_v16 = vcombine.low %v5209_v40, %v5216_v43 }
 0x228   : > { %v11825_v17 = vcombine.high %v5209_v40, %v5216_v43  ;;  %v15320_v5 = vrot.slane %v11784_v20, %v14327_v31  ;;  %v6273_v3 = vcombine.low %v5225_v45, %v5232_v36  ;;  %v6673_v62 = vpack.c.bf16 %v5711_v42, %v5643_v21 }
 0x229   : > { %18620 = vst [vmem:[#allocation45_spill] sm:$0xff] %v15311_v14  ;;  %v15322_v34 = vpack.c.bf16 %v5712_v50, %v5644_v7  ;;  %6825 = vrot.lane.b32.xlu0 %v15311_v14, %s12869_s6  ;;  %v11826_v15 = vcombine.high %v5225_v45, %v5232_v36  ;;  %v6325_v4 = vcombine.low %v5277_v59, %v5284_v53  ;;  %v18622_v36 = vld [vmem:[#allocation20_spill] sm:$0xff] }
 0x22a   : > { %v11827_v23 = vcombine.high %v5277_v59, %v5284_v53  ;;  %v5049_v61 = vcombine.low %v15223_v52, %v4458_v26  ;;  %6729 = vrot.lane.b32.xlu1 %v15311_v14, %s12867_s26  ;;  %v6341_v49 = vcombine.low %v15299_v41, %v15302_v55  ;;  %12423 = vmatprep.subr.msk.bf16.mxu1 %vm9065_vm1, %v6673_v62  ;;  %v18624_v53 = vld [vmem:[#allocation19_spill] sm:$0xff] }
 0x22b   : > { %12427 = vmatprep.subr.msk.bf16.mxu0 %vm9065_vm1, %v15322_v34  ;;  %v5050_v20 = vcombine.high %v15223_v52, %v4458_v26  ;;  %v5117_v40 = vcombine.low %v15232_v57, %v4460_v35  ;;  %v15337_v43 = vrot.slane %v6257_v16, %v14327_v31  ;;  %v15340_v45 = vrot.slane %v11825_v17, %v14327_v31 }
 0x22c   : > { %v5033_v21 = vcombine.low %v18622_v36, %v15275_v30  ;;  %v5034_v7 = vcombine.high %v18622_v36, %v15275_v30  ;;  %v15347_v59 = vrot.slane %v6273_v3, %v14327_v31  ;;  %v5101_v52 = vcombine.low %v18624_v53, %v15277_v48  ;;  %v18631_v36 = vld [vmem:[#allocation40_spill] sm:$0xff] }
 0x22d   : > { %18621 = vst [vmem:[#allocation52_spill] sm:$0xff] %v15337_v43  ;;  %v5102_v42 = vcombine.high %v18624_v53, %v15277_v48  ;;  %v5118_v50 = vcombine.high %v15232_v57, %v4460_v35  ;;  %v15355_v27 = vrot.slane %v11826_v15, %v14327_v31  ;;  %v15358_v26 = vrot.slane %v6325_v4, %v14327_v31  ;;  %v18629_v4 = vld [vmem:[#allocation28_spill] sm:$0xff]  ;;  %v18632_v53 = vld [vmem:[#allocation38_spill] sm:$0xff] }
 0x22e   : > { %18623 = vst [vmem:[#allocation51_spill] sm:$0xff] %v15347_v59  ;;  %v5057_v16 = vrot.slane %v5049_v61, %v14327_v31  ;;  %6777 = vrot.lane.b32.xlu1 %v15311_v14, %s12868_s30  ;;  %v15366_v17 = vrot.slane %v11827_v23, %v14327_v31  ;;  %v15369_v48 = vrot.slane %v6341_v49, %v14327_v31  ;;  %v15381_v23 = vpop.permute.xlu0 %1993 }
 0x22f   : > { %18625 = vst [vmem:[#allocation54_spill] sm:$0xff] %v15355_v27  ;;  %18626 = vst [vmem:[#allocation53_spill] sm:$0xff] %v15358_v26  ;;  %v5064_v57 = vrot.slane %v5050_v20, %v14327_v31  ;;  %v5125_v35 = vrot.slane %v5117_v40, %v14327_v31  ;;  %v5041_v3 = vrot.slane %v5033_v21, %v14327_v31  ;;  %v18634_v40 = vld [vmem:[#allocation33_spill] sm:$0xff]  ;;  %v15398_v26 = vpop.permute.xlu1 %1995 }
 0x230   : > { %18627 = vst [vmem:[#allocation32_spill] sm:$0xff] %v15366_v17  ;;  %18628 = vst [vmem:[#allocation20_spill] sm:$0xff] %v15369_v48  ;;  %v5048_v15 = vrot.slane %v5034_v7, %v14327_v31  ;;  %v15377_v61 = vadd.f32 %v15307_v58, %v18629_v4  ;;  %v3477_v30 = vcombine.low %v18632_v53, %v18631_v36 }
 0x231   : > { %18633 = vst [vmem:[#allocation28_spill] sm:$0xff] %v15381_v23  ;;  %v5109_v49 = vrot.slane %v5101_v52, %v14327_v31  ;;  %v15385_v14 = vrot.slane %v5102_v42, %v14327_v31  ;;  %v15388_v20 = vrot.slane %v5118_v50, %v14327_v31  ;;  %v15392_v21 = vadd.f32 %v15307_v58, %v18634_v40  ;;  %v18638_v40 = vld [vmem:[#allocation35_spill] sm:$0xff] }
 0x232   : > { %18630 = vst [vmem:[#allocation19_spill] sm:$0xff] %v15377_v61  ;;  %v5065_v7 = vcombine.low %v5041_v3, %v5057_v16  ;;  %v5066_v4 = vcombine.high %v5041_v3, %v5057_v16  ;;  %v3409_v48 = vcombine.low %v18637_v12, %v18636_v24  ;;  %v3410_v23 = vcombine.high %v18637_v12, %v18636_v24 }
 0x233   : > { %18635 = vst [vmem:[#allocation40_spill] sm:$0xff] %v15392_v21  ;;  %v5081_v52 = vcombine.low %v5048_v15, %v5064_v57  ;;  %v5082_v42 = vcombine.high %v5048_v15, %v5064_v57  ;;  %v5133_v17 = vcombine.low %v5109_v49, %v5125_v35  ;;  %v5134_v59 = vcombine.high %v5109_v49, %v5125_v35 }
 0x234   : > { %v4298_v50 = vpack.c.bf16 %v3477_v30, %v3409_v48  ;;  %v3478_v27 = vcombine.high %v18632_v53, %v18631_v36  ;;  %v15404_v43 = vadd.f32 %v15307_v58, %v18638_v40  ;;  %v3513_v16 = vcombine.low %v15247_v10, %v15250_v32  ;;  %v15423_v36 = vpop.permute.xlu0 %2041 }
 0x235   : > { %v5149_v24 = vcombine.low %v15385_v14, %v15388_v20  ;;  %v3529_v12 = vcombine.low %v15257_v6, %v15286_v63  ;;  %v3581_v57 = vcombine.low %v15294_v39, %v15314_v56  ;;  %v3597_v30 = vcombine.low %v15317_v22, %v15320_v5 }
 0x236   : > { %18639 = vst [vmem:[#allocation38_spill] sm:$0xff] %v15404_v43  ;;  %v5150_v48 = vcombine.high %v15385_v14, %v15388_v20  ;;  %12168 = vmatmul.mubr.msk.bf16.vlgmr.msra.gmra.mrb[16].mxu1 %vm9065_vm1, %v4298_v50  ;;  %v4302_v35 = vpack.c.bf16 %v3478_v27, %v3410_v23  ;;  %v3521_v3 = vrot.slane %v3513_v16, %v14329_v37  ;;  %v9257_v15 = vsel %vm9065_vm1, %v6673_v62, 0  ;;  %v15445_v50 = vpop.permute.xlu1 %2043 }
 0x237   : > { %6731 = vrot.lane.b32.xlu0 %v15404_v43, %s12867_s26  ;;  %v15426_v53 = vrot.slane %v5065_v7, %v14329_v37  ;;  %v3537_v49 = vrot.slane %v3529_v12, %v14329_v37  ;;  %v3589_v40 = vrot.slane %v3581_v57, %v14329_v37  ;;  %v3605_v14 = vrot.slane %v3597_v30, %v14329_v37  ;;  %v18640_v7 = vld [vmem:[#allocation15_spill] sm:$0xff] }
 0x238   : > { %12192 = vmatpush3.bf16.xpose.msra.mxu1 %v9257_v15  ;;  %v15432_v27 = vrot.slane %v5066_v4, %v14329_v37  ;;  %v15435_v62 = vrot.slane %v5081_v52, %v14329_v37  ;;  %v15438_v23 = vrot.slane %v5082_v42, %v14329_v37  ;;  %12184 = vmatmul.mubr.msk.bf16.vlgmr.msra.gmra.mrb[32].mxu0 %vm9065_vm1, %v4302_v35  ;;  %v9346_v20 = vsel %vm9065_vm1, %v15322_v34, 0  ;;  %v18641_v34 = vld [vmem:[#allocation16_spill] sm:$0xff] }
 0x239   : > { %12424 = vmatprep.subr.msk.bf16.mxu1 %vm9065_vm1, %v18640_v7  ;;  %v3545_v16 = vcombine.low %v3521_v3, %v3537_v49  ;;  %v3613_v12 = vcombine.low %v3589_v40, %v3605_v14  ;;  %v3546_v4 = vcombine.high %v3521_v3, %v3537_v49  ;;  %v3614_v57 = vcombine.high %v3589_v40, %v3605_v14  ;;  %v18642_v40 = vld [vmem:[#allocation48_spill] sm:$0xff]  ;;  %v18643_v14 = vld [vmem:[#allocation46_spill] sm:$0xff] }
 0x23a   : > { %12208 = vmatpush3.bf16.xpose.msra.mxu0 %v9346_v20  ;;  %v15448_v52 = vrot.slane %v5133_v17, %v14329_v37  ;;  %v15451_v42 = vrot.slane %v5134_v59, %v14329_v37  ;;  %v15454_v30 = vrot.slane %v5149_v24, %v14329_v37  ;;  %v9260_v35 = vsel %vm9065_vm1, %v18640_v7, 0  ;;  %6779 = vrot.lane.b32.xlu1 %v15404_v43, %s12868_s30  ;;  %v18644_v7 = vld [vmem:[#allocation50_spill] sm:$0xff] }
 0x23b   : > { %12428 = vmatprep.subr.msk.bf16.mxu0 %vm9065_vm1, %v18641_v34  ;;  %6733 = vrot.lane.b32.xlu0 %v15377_v61, %s12867_s26  ;;  %v4299_v3 = vpack.c.bf16 %v3613_v12, %v3545_v16  ;;  %v4303_v15 = vpack.c.bf16 %v3614_v57, %v3546_v4  ;;  %v3649_v17 = vcombine.low %v15043_v51, %v15052_v25  ;;  %v18645_v16 = vld [vmem:[#allocation49_spill] sm:$0xff]  ;;  %v15476_v4 = vpop.permute.xlu0 %4373 }
 0x23c   : > { %v3665_v59 = vcombine.low %v15057_v1, %v15060_v60  ;;  %v3717_v24 = vcombine.low %v15063_v8, %v15066_v33  ;;  %v3733_v49 = vcombine.low %v15069_v46, %v15084_v2  ;;  %v3242_v20 = vcombine.high %v18643_v14, %v18642_v40  ;;  %v18646_v8 = vld [vmem:[#allocation56_spill] sm:$0xff]  ;;  %v18647_v33 = vld [vmem:[#allocation55_spill] sm:$0xff] }
 0x23d   : > { %v3258_v12 = vcombine.high %v18645_v16, %v18644_v7  ;;  %12171 = vmatprep.mubr.msk.bf16.mxu1 %vm9065_vm1, %v4299_v3  ;;  %12187 = vmatprep.mubr.msk.bf16.mxu0 %vm9065_vm1, %v4303_v15  ;;  %v3657_v57 = vrot.slane %v3649_v17, %v14329_v37  ;;  %v3310_v60 = vcombine.high %v18647_v33, %v18646_v8  ;;  %v9349_v46 = vsel %vm9065_vm1, %v18641_v34, 0  ;;  %v15490_v16 = vpop.permute.xlu1 %4375  ;;  %v18648_v33 = vld [vmem:[#allocation58_spill] sm:$0xff]  ;;  %v18649_v34 = vld [vmem:[#allocation57_spill] sm:$0xff] }
 0x23e   : > { %v3673_v1 = vrot.slane %v3665_v59, %v14329_v37  ;;  %v3725_v40 = vrot.slane %v3717_v24, %v14329_v37  ;;  %v3741_v14 = vrot.slane %v3733_v49, %v14329_v37  ;;  %v3256_v7 = vrot.slane %v3242_v20, %v14329_v37  ;;  %6827 = vrot.lane.b32.xlu1 %v15404_v43, %s12869_s6 }
 0x23f   : > { %v3272_v3 = vrot.slane %v3258_v12, %v14329_v37  ;;  %6781 = vrot.lane.b32.xlu0 %v15377_v61, %s12868_s30  ;;  %v3324_v8 = vrot.slane %v3310_v60, %v14329_v37  ;;  %v3326_v59 = vcombine.high %v18649_v34, %v18648_v33  ;;  %v15498_v24 = vrot.slane %v5150_v48, %v14329_v37 }
 0x240   : > { %v3681_v15 = vcombine.low %v3657_v57, %v3673_v1  ;;  %v3682_v17 = vcombine.high %v3657_v57, %v3673_v1  ;;  %12194 = vmatpush3.bf16.xpose.msra.mxu1 %v9260_v35  ;;  %v3749_v49 = vcombine.low %v3725_v40, %v3741_v14  ;;  %v3750_v20 = vcombine.high %v3725_v40, %v3741_v14  ;;  %v15511_v14 = vpop.permute.xlu0 %4421 }
 0x241   : > { %v3275_v2 = vcombine.low %v3256_v7, %v3272_v3  ;;  %v3340_v12 = vrot.slane %v3326_v59, %v14329_v37  ;;  %v5882_v1 = vcombine.high %v15102_v44, %v15105_v54  ;;  %v5898_v60 = vcombine.high %v15110_v38, %v15117_v0 }
 0x242   : > { %12210 = vmatpush3.bf16.xpose.msra.mxu0 %v9349_v46  ;;  %v5950_v35 = vcombine.high %v15125_v13, %v15128_v18  ;;  %v4300_v48 = vpack.c.bf16 %v3749_v49, %v3681_v15  ;;  %v4304_v57 = vpack.c.bf16 %v3750_v20, %v3682_v17  ;;  %v3276_v33 = vcombine.high %v3256_v7, %v3272_v3  ;;  %v15523_v18 = vpop.permute.xlu1 %4423 }
 0x243   : > { %v5966_v40 = vcombine.high %v15134_v28, %v15139_v19  ;;  %6829 = vrot.lane.b32.xlu0 %v15377_v61, %s12869_s6  ;;  %v3343_v46 = vcombine.low %v3324_v8, %v3340_v12  ;;  %v3344_v34 = vcombine.high %v3324_v8, %v3340_v12  ;;  %v5896_v44 = vrot.slane %v5882_v1, %v14329_v37 }
 0x244   : > { %v5912_v54 = vrot.slane %v5898_v60, %v14329_v37  ;;  %v6121_v38 = vcombine.low %v15426_v53, %v15432_v27  ;;  %12172 = vmatmul.mubr.msk.bf16.gmra.mrb[20].mxu1 %vm9065_vm1, %v4300_v48  ;;  %12188 = vmatmul.mubr.msk.bf16.gmra.mrb[36].mxu0 %vm9065_vm1, %v4304_v57  ;;  %v5964_v0 = vrot.slane %v5950_v35, %v14329_v37  ;;  %v4470_v1 = vpop.permute.xlu0 %4469  ;;  %v18652_v48 = vld [vmem:[#allocation60_spill] sm:$0xff]  ;;  %v18653_v57 = vld [vmem:[#allocation59_spill] sm:$0xff] }
 0x245   : > { %v5980_v13 = vrot.slane %v5966_v40, %v14329_v37  ;;  %v4305_v28 = vpack.c.bf16 %v3343_v46, %v3275_v2  ;;  %v4309_v19 = vpack.c.bf16 %v3344_v34, %v3276_v33  ;;  %6735 = vrot.lane.b32.xlu1 %v15392_v21, %s12867_s26  ;;  %v18650_v15 = vcombine.high %v15299_v41, %v15302_v55  ;;  %v18655_v33 = vld [vmem:[#allocation61_spill] sm:$0xff] }
 0x246   : > { %v5915_v7 = vcombine.low %v5896_v44, %v5912_v54  ;;  %v5916_v3 = vcombine.high %v5896_v44, %v5912_v54  ;;  %v11821_v8 = vcombine.high %v15426_v53, %v15432_v27  ;;  %v6137_v2 = vcombine.low %v15435_v62, %v15438_v23  ;;  %v18656_v54 = vld [vmem:[#allocation47_spill] sm:$0xff] }
 0x247   : > { %v15531_v17 = vrot.slane %v18650_v15, %v14327_v31  ;;  %v5983_v59 = vcombine.low %v5964_v0, %v5980_v13  ;;  %v5984_v49 = vcombine.high %v5964_v0, %v5980_v13  ;;  %v11822_v20 = vcombine.high %v15435_v62, %v15438_v23  ;;  %12199 = vmatprep.mubr.msk.bf16.mxu1 %vm9065_vm1, %v4305_v28 }
 0x248   : > { %v6189_v12 = vcombine.low %v15448_v52, %v15451_v42  ;;  %12215 = vmatprep.mubr.msk.bf16.mxu0 %vm9065_vm1, %v4309_v19  ;;  %v11823_v41 = vcombine.high %v15448_v52, %v15451_v42  ;;  %v6205_v55 = vcombine.low %v15454_v30, %v15498_v24  ;;  %v15548_v60 = vrot.slane %v6121_v38, %v14327_v31 }
 0x249   : > { %18651 = vst [vmem:[#allocation33_spill] sm:$0xff] %v15531_v17  ;;  %v6675_v53 = vpack.c.bf16 %v5983_v59, %v5915_v7  ;;  %v6679_v27 = vpack.c.bf16 %v5984_v49, %v5916_v3  ;;  %v11824_v62 = vcombine.high %v15454_v30, %v15498_v24  ;;  %v6018_v23 = vcombine.high %v14952_v11, %v14955_v29  ;;  %v18654_v24 = vld [vmem:[#allocation62_spill] sm:$0xff]  ;;  %v15566_v29 = vpop.permute.xlu1 %4471  ;;  %v18658_v7 = vld [vmem:[#allocation9_spill] sm:$0xff]  ;;  %v15593_v49 = vpop.permute.xlu0 %4369 }
 0x24a   : > { %v6034_v35 = vcombine.high %v14968_v47, %v14971_v9  ;;  %6783 = vrot.lane.b32.xlu1 %v15392_v21, %s12868_s30  ;;  %v6086_v30 = vcombine.high %v18653_v57, %v18652_v48  ;;  %v6102_v11 = vcombine.high %v18655_v33, %v18654_v24  ;;  %v15569_v47 = vrot.slane %v11821_v8, %v14327_v31 }
 0x24b   : > { %12425 = vmatprep.subr.msk.bf16.mxu1 %vm9065_vm1, %v6675_v53  ;;  %12429 = vmatprep.subr.msk.bf16.mxu0 %vm9065_vm1, %v6679_v27  ;;  %v9263_v52 = vsel %vm9065_vm1, %v6675_v53, 0  ;;  %v9352_v42 = vsel %vm9065_vm1, %v6679_v27, 0  ;;  %v6032_v9 = vrot.slane %v6018_v23, %v14329_v37  ;;  %v5457_v44 = vcombine.low %v15476_v4, %v4470_v1  ;;  %v18660_v23 = vld [vmem:[#allocation43_spill] sm:$0xff] }
 0x24c   : > { %12196 = vmatpush3.bf16.xpose.msra.mxu1 %v9263_v52  ;;  %12212 = vmatpush3.bf16.xpose.msra.mxu0 %v9352_v42  ;;  %v6048_v40 = vrot.slane %v6034_v35, %v14329_v37  ;;  %v6100_v46 = vrot.slane %v6086_v30, %v14329_v37  ;;  %v6116_v34 = vrot.slane %v6102_v11, %v14329_v37  ;;  %v18662_v30 = vld [vmem:[#allocation7_spill] sm:$0xff]  ;;  %v18663_v11 = vld [vmem:[#allocation10_spill] sm:$0xff] }
 0x24d   : > { %v15578_v38 = vadd.f32 %v15307_v58, %v18656_v54  ;;  %v15581_v0 = vrot.slane %v6137_v2, %v14327_v31  ;;  %v15584_v13 = vrot.slane %v11822_v20, %v14327_v31  ;;  %v5441_v3 = vcombine.low %v18658_v7, %v15511_v14  ;;  %v18659_v20 = vld [vmem:[#allocation8_spill] sm:$0xff]  ;;  %v15609_v48 = vpop.permute.xlu1 %4371  ;;  %v18664_v54 = vld [vmem:[#allocation42_spill] sm:$0xff] }
 0x24e   : > { %v6051_v28 = vcombine.low %v6032_v9, %v6048_v40  ;;  %v6052_v19 = vcombine.high %v6032_v9, %v6048_v40  ;;  %6831 = vrot.lane.b32.xlu1 %v15392_v21, %s12869_s6  ;;  %v6119_v15 = vcombine.low %v6100_v46, %v6116_v34  ;;  %v6120_v8 = vcombine.high %v6100_v46, %v6116_v34 }
 0x24f   : > { %18657 = vst [vmem:[#allocation36_spill] sm:$0xff] %v15578_v38  ;;  %v5458_v59 = vcombine.high %v15476_v4, %v4470_v1  ;;  %6739 = vrot.lane.b32.xlu0 %v15578_v38, %s12867_s26  ;;  %v15596_v2 = vrot.slane %v6189_v12, %v14327_v31  ;;  %v2665_v53 = vcombine.low %v18659_v20, %v15423_v36 }
 0x250   : > { %v5442_v27 = vcombine.high %v18658_v7, %v15511_v14  ;;  %v15604_v35 = vadd.f32 %v15307_v58, %v18660_v23  ;;  %v6676_v52 = vpack.c.bf16 %v6119_v15, %v6051_v28  ;;  %v6680_v4 = vpack.c.bf16 %v6120_v8, %v6052_v19  ;;  %v15648_v7 = vpop.permute.xlu0 %4417 }
 0x251   : > { %v5465_v1 = vrot.slane %v5457_v44, %v14327_v31  ;;  %v5525_v42 = vcombine.low %v15490_v16, %v15566_v29  ;;  %v15612_v12 = vrot.slane %v11823_v41, %v14327_v31  ;;  %v15615_v57 = vrot.slane %v6205_v55, %v14327_v31  ;;  %v15664_v23 = vpop.permute.xlu1 %4419 }
 0x252   : > { %18661 = vst [vmem:[#allocation29_spill] sm:$0xff] %v15604_v35  ;;  %v2666_v14 = vcombine.high %v18659_v20, %v15423_v36  ;;  %v2733_v24 = vcombine.low %v18662_v30, %v15445_v50  ;;  %6737 = vrot.lane.b32.xlu1 %v15604_v35, %s12867_s26  ;;  %v5449_v33 = vrot.slane %v5441_v3, %v14327_v31  ;;  %v9266_v55 = vsel %vm9065_vm1, %v6676_v52, 0 }
 0x253   : > { %v5509_v9 = vcombine.low %v18663_v11, %v15523_v18  ;;  %12426 = vmatprep.subr.msk.bf16.mxu1 %vm9065_vm1, %v6676_v52  ;;  %12430 = vmatprep.subr.msk.bf16.mxu0 %vm9065_vm1, %v6680_v4  ;;  %v5472_v41 = vrot.slane %v5458_v59, %v14327_v31  ;;  %v15631_v36 = vrot.slane %v11824_v62, %v14327_v31  ;;  %v9355_v8 = vsel %vm9065_vm1, %v6680_v4, 0 }
 0x254   : > { %v15634_v40 = vrot.slane %v2665_v53, %v14327_v31  ;;  %v2734_v46 = vcombine.high %v18662_v30, %v15445_v50  ;;  %12198 = vmatpush3.bf16.xpose.msra.mxu1 %v9266_v55  ;;  %v6153_v34 = vcombine.low %v15548_v60, %v15569_v47  ;;  %v5456_v44 = vrot.slane %v5442_v27, %v14327_v31  ;;  %v18666_v55 = vld [vmem:[#allocation44_spill] sm:$0xff] }
 0x255   : > { %v15643_v28 = vadd.f32 %v15307_v58, %v18664_v54  ;;  %v5473_v19 = vcombine.low %v5449_v33, %v5465_v1  ;;  %v5533_v62 = vrot.slane %v5525_v42, %v14327_v31  ;;  %6833 = vrot.lane.b32.xlu0 %v15604_v35, %s12869_s6  ;;  %v15651_v50 = vrot.slane %v2666_v14, %v14327_v31  ;;  %v4466_v54 = vpop.permute.xlu0 %4465 }
 0x256   : > { %v5474_v3 = vcombine.high %v5449_v33, %v5465_v1  ;;  %v5526_v15 = vcombine.high %v15490_v16, %v15566_v29  ;;  %6785 = vrot.lane.b32.xlu1 %v15604_v35, %s12868_s30  ;;  %v15659_v59 = vrot.slane %v2733_v24, %v14327_v31  ;;  %v5510_v20 = vcombine.high %v18663_v11, %v15523_v18 }
 0x257   : > { %18665 = vst [vmem:[#allocation35_spill] sm:$0xff] %v15643_v28  ;;  %v5517_v53 = vrot.slane %v5509_v9, %v14327_v31  ;;  %v5489_v27 = vcombine.low %v5456_v44, %v5472_v41  ;;  %12214 = vmatpush3.bf16.xpose.msra.mxu0 %v9355_v8  ;;  %v5490_v52 = vcombine.high %v5456_v44, %v5472_v41 }
 0x258   : > { %v6161_v16 = vrot.slane %v6153_v34, %v14329_v37  ;;  %v6169_v29 = vcombine.low %v15581_v0, %v15584_v13  ;;  %v6221_v4 = vcombine.low %v15596_v2, %v15612_v12  ;;  %v5481_v1 = vrot.slane %v5473_v19, %v14329_v37 }
 0x259   : > { %v5541_v42 = vcombine.low %v5517_v53, %v5533_v62  ;;  %v5542_v14 = vcombine.high %v5517_v53, %v5533_v62  ;;  %v6237_v18 = vcombine.low %v15615_v57, %v15631_v36  ;;  %6741 = vrot.lane.b32.xlu0 %v15643_v28, %s12867_s26  ;;  %v5488_v30 = vrot.slane %v5474_v3, %v14329_v37 }
 0x25a   : > { %v5540_v24 = vrot.slane %v5526_v15, %v14327_v31  ;;  %v6177_v33 = vrot.slane %v6169_v29, %v14329_v37  ;;  %v6229_v11 = vrot.slane %v6221_v4, %v14329_v37  ;;  %6787 = vrot.lane.b32.xlu1 %v15578_v38, %s12868_s30  ;;  %v15683_v9 = vrot.slane %v2734_v46, %v14327_v31  ;;  %v4468_v29 = vpop.permute.xlu1 %4467 }
 0x25b   : > { %v5524_v41 = vrot.slane %v5510_v20, %v14327_v31  ;;  %v15688_v34 = vadd.f32 %v15307_v58, %v18666_v55  ;;  %v6245_v44 = vrot.slane %v6237_v18, %v14329_v37  ;;  %v5497_v19 = vrot.slane %v5489_v27, %v14329_v37 }
 0x25c   : > { %v5504_v62 = vrot.slane %v5490_v52, %v14329_v37  ;;  %v6185_v3 = vcombine.low %v6161_v16, %v6177_v33  ;;  %v6186_v15 = vcombine.high %v6161_v16, %v6177_v33  ;;  %v15694_v8 = vrot.slane %v5541_v42, %v14329_v37 }
 0x25d   : > { %18667 = vst [vmem:[#allocation15_spill] sm:$0xff] %v15688_v34  ;;  %v15697_v46 = vrot.slane %v5542_v14, %v14329_v37  ;;  %v6253_v20 = vcombine.low %v6229_v11, %v6245_v44  ;;  %v6254_v53 = vcombine.high %v6229_v11, %v6245_v44  ;;  %6789 = vrot.lane.b32.xlu0 %v15643_v28, %s12868_s30  ;;  %v18668_v14 = vld [vmem:[#allocation13_spill] sm:$0xff] }
 0x25e   : > { %v6529_v58 = vcombine.low %v5481_v1, %v5488_v30  ;;  %v5557_v4 = vcombine.low %v5524_v41, %v5540_v24  ;;  %v5558_v18 = vcombine.high %v5524_v41, %v5540_v24  ;;  %v5321_v27 = vcombine.low %v15593_v49, %v4466_v54  ;;  %6835 = vrot.lane.b32.xlu1 %v15578_v38, %s12869_s6 }
 0x25f   : > { %v11833_v52 = vcombine.high %v5481_v1, %v5488_v30  ;;  %v6681_v16 = vpack.c.bf16 %v6253_v20, %v6185_v3  ;;  %v6685_v42 = vpack.c.bf16 %v6254_v53, %v6186_v15  ;;  %v5305_v33 = vcombine.low %v18668_v14, %v15648_v7 }
 0x260   : > { %v6545_v55 = vcombine.low %v5497_v19, %v5504_v62  ;;  %v11834_v11 = vcombine.high %v5497_v19, %v5504_v62  ;;  %v5322_v44 = vcombine.high %v15593_v49, %v4466_v54  ;;  %v5389_v35 = vcombine.low %v15609_v48, %v4468_v29  ;;  %v18669_v54 = vld [vmem:[#allocation14_spill] sm:$0xff] }
 0x261   : > { %v6597_v24 = vcombine.low %v15694_v8, %v15697_v46  ;;  %12431 = vmatprep.subr.msk.bf16.mxu1 %vm9065_vm1, %v6681_v16  ;;  %12435 = vmatprep.subr.msk.bf16.mxu0 %vm9065_vm1, %v6685_v42  ;;  %v15713_v1 = vrot.slane %v5321_v27, %v14327_v31  ;;  %v5390_v30 = vcombine.high %v15609_v48, %v4468_v29  ;;  %v9435_v38 = vsel %vm9065_vm1, %v6681_v16, 0 }
 0x262   : > { %v15717_v41 = vrot.slane %v5557_v4, %v14329_v37  ;;  %v15720_v19 = vrot.slane %v5558_v18, %v14329_v37  ;;  %v5306_v49 = vcombine.high %v18668_v14, %v15648_v7  ;;  %v5373_v62 = vcombine.low %v18669_v54, %v15664_v23  ;;  %6837 = vrot.lane.b32.xlu0 %v15643_v28, %s12869_s6 }
 0x263   : > { %v15729_v3 = vrot.slane %v6529_v58, %v14327_v31  ;;  %v15732_v48 = vrot.slane %v11833_v52, %v14327_v31  ;;  %v5313_v15 = vrot.slane %v5305_v33, %v14327_v31  ;;  %v5374_v20 = vcombine.high %v18669_v54, %v15664_v23  ;;  %6743 = vrot.lane.b32.xlu1 %v15688_v34, %s12867_s26  ;;  %v18677_v54 = vld [vmem:[#allocation34_spill] sm:$0xff]  ;;  %s18184_s26 = scalar_lea.hbm %s18238_s5, %s11940_s17 }
 0x264   : > { %v15740_v7 = vrot.slane %v6545_v55, %v14327_v31  ;;  %v15743_v53 = vrot.slane %v11834_v11, %v14327_v31  ;;  %v5336_v29 = vrot.slane %v5322_v44, %v14327_v31  ;;  %v5397_v58 = vrot.slane %v5389_v35, %v14327_v31  ;;  %v18674_v55 = vld [vmem:[#allocation41_spill] sm:$0xff]  ;;  %v18675_v35 = vld [vmem:[#allocation39_spill] sm:$0xff] }
 0x265   : > { %18670 = vst [vmem:[#allocation16_spill] sm:$0xff] %v15729_v3  ;;  %v15748_v4 = vrot.slane %v6597_v24, %v14327_v31  ;;  %v5337_v23 = vcombine.low %v5313_v15, %v15713_v1  ;;  %v15754_v27 = vrot.slane %v5390_v30, %v14327_v31  ;;  %v5320_v14 = vrot.slane %v5306_v49, %v14327_v31  ;;  %v18676_v24 = vld [vmem:[#allocation37_spill] sm:$0xff] }
 0x266   : > { %18671 = vst [vmem:[#allocation48_spill] sm:$0xff] %v15740_v7  ;;  %18672 = vst [vmem:[#allocation46_spill] sm:$0xff] %v15743_v53  ;;  %v5381_v33 = vrot.slane %v5373_v62, %v14327_v31  ;;  %v3479_v11 = vcombine.low %v18675_v35, %v18674_v55  ;;  %v15763_v44 = vrot.slane %v5374_v20, %v14327_v31 }
 0x267   : > { %18673 = vst [vmem:[#allocation50_spill] sm:$0xff] %v15748_v4  ;;  %v3411_v18 = vcombine.low %v18677_v54, %v18676_v24  ;;  %v3412_v30 = vcombine.high %v18677_v54, %v18676_v24  ;;  %6791 = vrot.lane.b32.xlu1 %v15688_v34, %s12868_s30  ;;  %v5338_v49 = vcombine.high %v5313_v15, %v15713_v1  ;;  %s18192_s30 = scalar_lea.sflag [#allocation3], %s236_s7 }
 0x268   : > { %v5353_v62 = vcombine.low %v5320_v14, %v5336_v29  ;;  %v5354_v52 = vcombine.high %v5320_v14, %v5336_v29  ;;  %v5405_v21 = vcombine.low %v5381_v33, %v5397_v58  ;;  %v15774_v28 = vrot.slane %v5337_v23, %v14329_v37  ;;  %v2090_v14 = vpop.permute.xlu0 %2089 }
 0x269   : > { %v5406_v20 = vcombine.high %v5381_v33, %v5397_v58  ;;  %v5421_v61 = vcombine.low %v15763_v44, %v15754_v27  ;;  %v5422_v24 = vcombine.high %v15763_v44, %v15754_v27  ;;  %v4306_v54 = vpack.c.bf16 %v3479_v11, %v3411_v18  ;;  %v18678_v27 = vld [vmem:[#allocation52_spill] sm:$0xff]  ;;  %v15805_v11 = vpop.permute.xlu1 %2091 }
 0x26a   : > { %v3480_v16 = vcombine.high %v18675_v35, %v18674_v55  ;;  %v3514_v1 = vcombine.high %v15247_v10, %v15250_v32  ;;  %v3530_v15 = vcombine.high %v15257_v6, %v15286_v63  ;;  %v3582_v29 = vcombine.high %v15294_v39, %v15314_v56  ;;  %v18679_v63 = vld [vmem:[#allocation54_spill] sm:$0xff]  ;;  %v18680_v39 = vld [vmem:[#allocation51_spill] sm:$0xff]  ;;  %v18681_v33 = vld [vmem:[#allocation32_spill] sm:$0xff] }
 0x26b   : > { %v3598_v58 = vcombine.high %v15317_v22, %v15320_v5  ;;  %v9524_v23 = vsel %vm9065_vm1, %v6685_v42, 0  ;;  %v6289_v18 = vcombine.low %v18678_v27, %v15340_v45  ;;  %6839 = vrot.lane.b32.xlu1 %v15688_v34, %s12869_s6  ;;  %12200 = vmatmul.mubr.msk.bf16.vlgmr.msra.gmra.mrb[24].mxu1 %vm9065_vm1, %v4306_v54  ;;  %v6305_v56 = vcombine.low %v18680_v39, %v18679_v63  ;;  %v18682_v55 = vld [vmem:[#allocation53_spill] sm:$0xff]  ;;  %s12872_s6 = smov [#allocation2]  }
 0x26c   : > { %v4310_v10 = vpack.c.bf16 %v3480_v16, %v3412_v30  ;;  %v3528_v32 = vrot.slane %v3514_v1, %v14329_v37  ;;  %v3544_v6 = vrot.slane %v3530_v15, %v14329_v37  ;;  %v3596_v22 = vrot.slane %v3582_v29, %v14329_v37  ;;  %12224 = vmatpush3.bf16.xpose.msra.mxu1 %v9435_v38  ;;  %v18683_v16 = vld [vmem:[#allocation20_spill] sm:$0xff]  ;;  %s12807_s9 = sshll.u32 %s12872_s6, 4  ;;  %s12808_s9 = int_to_ptr.vmem [resolvable:$false] %s12807_s9 }
 0x26d   : > { %v3612_v5 = vrot.slane %v3598_v58, %v14329_v37  ;;  %v6297_v42 = vrot.slane %v6289_v18, %v14329_v37  ;;  %v6357_v35 = vcombine.low %v18682_v55, %v18681_v33  ;;  %v6313_v54 = vrot.slane %v6305_v56, %v14329_v37  ;;  %s12809_s11 = scalar_lea.vmem %s12808_s9, 2048  ;;  %p12810_p0 = scmp.lt.s32.totalorder %s18186_s23, %s12808_s9 }
 0x26e   : > { %12216 = vmatmul.mubr.msk.bf16.vlgmr.msra.gmra.mrb[40].mxu0 %vm9065_vm1, %v4310_v10  ;;  %v3547_v44 = vcombine.low %v3528_v32, %v3544_v6  ;;  %v3548_v30 = vcombine.high %v3528_v32, %v3544_v6  ;;  %v6373_v1 = vcombine.low %v18683_v16, %v15531_v17  ;;  %v5352_v15 = vrot.slane %v5338_v49, %v14329_v37  ;;  %p12811_p1 = scmp.lt.s32.totalorder %s12809_s11, %s12803_s22 }
 0x26f   : > { %v3615_v29 = vcombine.low %v3596_v22, %v3612_v5  ;;  %v3616_v38 = vcombine.high %v3596_v22, %v3612_v5  ;;  %12240 = vmatpush3.bf16.xpose.msra.mxu0 %v9524_v23  ;;  %v6365_v58 = vrot.slane %v6357_v35, %v14329_v37  ;;  %v5361_v18 = vrot.slane %v5353_v62, %v14329_v37  ;;  %v18684_v22 = vld [vmem:[#allocation28_spill] sm:$0xff]  ;;  %v15819_v5 = vpop.permute.xlu0 %1997 }
 0x270   : > { %v6321_v34 = vcombine.low %v6297_v42, %v6313_v54  ;;  %v6381_v43 = vrot.slane %v6373_v1, %v14329_v37  ;;  %v6322_v10 = vcombine.high %v6297_v42, %v6313_v54  ;;  %v5368_v32 = vrot.slane %v5354_v52, %v14329_v37  ;;  %v15827_v52 = vpop.permute.xlu1 %1999  ;;  %p12812_p2 = por %p12811_p1, %p12810_p0 }
 0x271   : > { %v5413_v6 = vrot.slane %v5405_v21, %v14329_v37  ;;  %v4307_v56 = vpack.c.bf16 %v3615_v29, %v3547_v44  ;;  %v4311_v55 = vpack.c.bf16 %v3616_v38, %v3548_v30  ;;  %v5420_v16 = vrot.slane %v5406_v20, %v14329_v37 }
 0x272   : > { %v6389_v49 = vcombine.low %v6365_v58, %v6381_v43  ;;  %v6390_v17 = vcombine.high %v6365_v58, %v6381_v43  ;;  %v2681_v23 = vcombine.low %v18684_v22, %v2090_v14  ;;  %v11836_v62 = vcombine.high %v15717_v41, %v15720_v19  ;;  %p12813_p3 = pnand %p12812_p2, %p12806_p13 }
 0x273   : > { %v5429_v35 = vrot.slane %v5421_v61, %v14329_v37  ;;  %12203 = vmatprep.mubr.msk.bf16.mxu1 %vm9065_vm1, %v4307_v56  ;;  %12219 = vmatprep.mubr.msk.bf16.mxu0 %vm9065_vm1, %v4311_v55  ;;  %v2682_v21 = vcombine.high %v18684_v22, %v2090_v14  ;;  %v6393_v20 = vcombine.low %v15774_v28, %v5352_v15 }
 0x274   : > { %v5436_v43 = vrot.slane %v5422_v24, %v14329_v37  ;;  %v6682_v42 = vpack.c.bf16 %v6389_v49, %v6321_v34  ;;  %v6686_v44 = vpack.c.bf16 %v6390_v17, %v6322_v10  ;;  %v18685_v30 = vcombine.high %v15694_v8, %v15697_v46  ;;  %v15870_v56 = vpop.permute.xlu1 %2047 }
 0x275   : > { %v11829_v61 = vcombine.high %v15774_v28, %v5352_v15  ;;  %v6409_v1 = vcombine.low %v5361_v18, %v5368_v32  ;;  %v11830_v55 = vcombine.high %v5361_v18, %v5368_v32  ;;  %v6461_v29 = vcombine.low %v5413_v6, %v5420_v16  ;;  %v2046_v32 = vpop.permute.xlu0 %2045 }
 0x276   : > { %v15835_v54 = vrot.slane %v18685_v30, %v14327_v31  ;;  %12432 = vmatprep.subr.msk.bf16.mxu1 %vm9065_vm1, %v6682_v42  ;;  %12436 = vmatprep.subr.msk.bf16.mxu0 %vm9065_vm1, %v6686_v44  ;;  %v2689_v14 = vrot.slane %v2681_v23, %v14327_v31  ;;  %v2749_v17 = vcombine.low %v15398_v26, %v15805_v11  ;;  %v9438_v34 = vsel %vm9065_vm1, %v6682_v42, 0 }
 0x277   : > { %v18687_v8 = vcombine.low %v15717_v41, %v15720_v19  ;;  %v15851_v28 = vrot.slane %v11836_v62, %v14327_v31  ;;  %v11831_v24 = vcombine.high %v5413_v6, %v5420_v16  ;;  %v2696_v15 = vrot.slane %v2682_v21, %v14327_v31  ;;  %12226 = vmatpush3.bf16.xpose.msra.mxu1 %v9438_v34  ;;  %v18691_v21 = vld [vmem:[#allocation63_spill] sm:$0xff] }
 0x278   : > { %18686 = vst [vmem:[#allocation49_spill] sm:$0xff] %v15835_v54  ;;  %v15855_v38 = vrot.slane %v6393_v20, %v14327_v31  ;;  %v6477_v58 = vcombine.low %v5429_v35, %v5436_v43  ;;  %v11832_v18 = vcombine.high %v5429_v35, %v5436_v43  ;;  %v2750_v10 = vcombine.high %v15398_v26, %v15805_v11  ;;  %v18690_v35 = vld [vmem:[#allocation64_spill] sm:$0xff]  ;;  %v18692_v43 = vld [vmem:[#allocation66_spill] sm:$0xff] }
 0x279   : > { %v15848_v46 = vrot.slane %v18687_v8, %v14327_v31  ;;  %18689 = vst [vmem:[#allocation55_spill] sm:$0xff] %v15851_v28  ;;  %v15860_v41 = vrot.slane %v11829_v61, %v14327_v31  ;;  %v15863_v19 = vrot.slane %v6409_v1, %v14327_v31  ;;  %v15866_v16 = vrot.slane %v11830_v55, %v14327_v31  ;;  %v18694_v61 = vld [vmem:[#allocation68_spill] sm:$0xff]  ;;  %v18695_v1 = vld [vmem:[#allocation67_spill] sm:$0xff] }
 0x27a   : > { %v3650_v6 = vcombine.high %v15043_v51, %v15052_v25  ;;  %v15873_v49 = vrot.slane %v6461_v29, %v14327_v31  ;;  %v2697_v26 = vcombine.low %v15634_v40, %v2689_v14  ;;  %v2698_v11 = vcombine.high %v15634_v40, %v2689_v14  ;;  %v18693_v51 = vld [vmem:[#allocation65_spill] sm:$0xff] }
 0x27b   : > { %18688 = vst [vmem:[#allocation56_spill] sm:$0xff] %v15848_v46  ;;  %v2757_v22 = vrot.slane %v2749_v17, %v14327_v31  ;;  %v2713_v23 = vcombine.low %v15651_v50, %v2696_v15  ;;  %v3666_v20 = vcombine.high %v18691_v21, %v18690_v35  ;;  %v3718_v25 = vcombine.high %v18693_v51, %v18692_v43  ;;  %v2096_v43 = vpop.permute.xlu1 %2095 }
 0x27c   : > { %v3664_v62 = vrot.slane %v3650_v6, %v14329_v37  ;;  %v15885_v42 = vrot.slane %v11831_v24, %v14327_v31  ;;  %v15888_v30 = vrot.slane %v6477_v58, %v14327_v31  ;;  %v2764_v40 = vrot.slane %v2750_v10, %v14327_v31  ;;  %v2094_v6 = vpop.permute.xlu0 %2093 }
 0x27d   : > { %v3734_v55 = vcombine.high %v18695_v1, %v18694_v61  ;;  %v15894_v29 = vrot.slane %v11832_v18, %v14327_v31  ;;  %v3680_v14 = vrot.slane %v3666_v20, %v14329_v37  ;;  %v3732_v17 = vrot.slane %v3718_v25, %v14329_v37 }
 0x27e   : > { %v9527_v34 = vsel %vm9065_vm1, %v6686_v44, 0  ;;  %v2705_v8 = vrot.slane %v2697_v26, %v14329_v37  ;;  %v2712_v24 = vrot.slane %v2698_v11, %v14329_v37  ;;  %v2714_v58 = vcombine.high %v15651_v50, %v2696_v15  ;;  %v18696_v50 = vld [vmem:[#allocation11_spill] sm:$0xff] }
 0x27f   : > { %v3748_v10 = vrot.slane %v3734_v55, %v14329_v37  ;;  %12242 = vmatpush3.bf16.xpose.msra.mxu0 %v9527_v34  ;;  %v2721_v35 = vrot.slane %v2713_v23, %v14329_v37  ;;  %v2765_v18 = vcombine.low %v15659_v59, %v2757_v22  ;;  %v3683_v21 = vcombine.low %v3664_v62, %v3680_v14 }
 0x280   : > { %v3684_v20 = vcombine.high %v3664_v62, %v3680_v14  ;;  %v2766_v51 = vcombine.high %v15659_v59, %v2757_v22  ;;  %v2781_v44 = vcombine.low %v15683_v9, %v2764_v40  ;;  %v2782_v11 = vcombine.high %v15683_v9, %v2764_v40  ;;  %v18697_v9 = vld [vmem:[#allocation12_spill] sm:$0xff] }
 0x281   : > { %v3751_v26 = vcombine.low %v3732_v17, %v3748_v10  ;;  %v3752_v25 = vcombine.high %v3732_v17, %v3748_v10  ;;  %v2801_v15 = vcombine.low %v18696_v50, %v2046_v32  ;;  %v2817_v61 = vcombine.low %v15819_v5, %v2094_v6 }
 0x282   : > { %v2818_v1 = vcombine.high %v15819_v5, %v2094_v6  ;;  %v2802_v34 = vcombine.high %v18696_v50, %v2046_v32  ;;  %v2885_v62 = vcombine.low %v15827_v52, %v2096_v43  ;;  %v2728_v59 = vrot.slane %v2714_v58, %v14329_v37 }
 0x283   : > { %v4308_v23 = vpack.c.bf16 %v3751_v26, %v3683_v21  ;;  %v4312_v55 = vpack.c.bf16 %v3752_v25, %v3684_v20  ;;  %v3753_v22 = vcombine.low %v2705_v8, %v2712_v24  ;;  %v11789_v14 = vcombine.high %v2705_v8, %v2712_v24 }
 0x284   : > { %v2825_v17 = vrot.slane %v2817_v61, %v14327_v31  ;;  %v2869_v40 = vcombine.low %v18697_v9, %v15870_v56  ;;  %v2832_v5 = vrot.slane %v2818_v1, %v14327_v31  ;;  %v2886_v10 = vcombine.high %v15827_v52, %v2096_v43 }
 0x285   : > { %12204 = vmatmul.mubr.msk.bf16.gmra.mrb[28].mxu1 %vm9065_vm1, %v4308_v23  ;;  %12220 = vmatmul.mubr.msk.bf16.gmra.mrb[44].mxu0 %vm9065_vm1, %v4312_v55  ;;  %v2773_v32 = vrot.slane %v2765_v18, %v14329_v37  ;;  %v2780_v6 = vrot.slane %v2766_v51, %v14329_v37  ;;  %v2789_v58 = vrot.slane %v2781_v44, %v14329_v37 }
 0x286   : > { %v2809_v8 = vrot.slane %v2801_v15, %v14327_v31  ;;  %v2796_v24 = vrot.slane %v2782_v11, %v14329_v37  ;;  %v2816_v21 = vrot.slane %v2802_v34, %v14327_v31  ;;  %v2870_v20 = vcombine.high %v18697_v9, %v15870_v56 }
 0x287   : > { %v2893_v26 = vrot.slane %v2885_v62, %v14327_v31  ;;  %v3769_v25 = vcombine.low %v2721_v35, %v2728_v59  ;;  %v11790_v50 = vcombine.high %v2721_v35, %v2728_v59  ;;  %v2877_v18 = vrot.slane %v2869_v40, %v14327_v31 }
 0x288   : > { %v2833_v52 = vcombine.low %v2809_v8, %v2825_v17  ;;  %v2834_v43 = vcombine.high %v2809_v8, %v2825_v17  ;;  %v2849_v51 = vcombine.low %v2816_v21, %v2832_v5  ;;  %v2850_v61 = vcombine.high %v2816_v21, %v2832_v5 }
 0x289   : > { %v2900_v44 = vrot.slane %v2886_v10, %v14327_v31  ;;  %v15933_v15 = vrot.slane %v3753_v22, %v14327_v31  ;;  %v15936_v11 = vrot.slane %v11789_v14, %v14327_v31  ;;  %v3821_v1 = vcombine.low %v2773_v32, %v2780_v6 }
 0x28a   : > { %v11791_v56 = vcombine.high %v2773_v32, %v2780_v6  ;;  %v3837_v23 = vcombine.low %v2789_v58, %v2796_v24  ;;  %v2884_v55 = vrot.slane %v2870_v20, %v14327_v31  ;;  %v2901_v35 = vcombine.low %v2877_v18, %v2893_v26 }
 0x28b   : > { %v2902_v34 = vcombine.high %v2877_v18, %v2893_v26  ;;  %v11792_v62 = vcombine.high %v2789_v58, %v2796_v24  ;;  %v2841_v59 = vrot.slane %v2833_v52, %v14329_v37  ;;  %v2848_v17 = vrot.slane %v2834_v43, %v14329_v37  ;;  %v15969_v52 = vpop.permute.xlu1 %2007 }
 0x28c   : > { %v6425_v9 = vcombine.low %v15855_v38, %v15860_v41  ;;  %v15944_v22 = vrot.slane %v3769_v25, %v14327_v31  ;;  %v2857_v14 = vrot.slane %v2849_v51, %v14329_v37  ;;  %v2864_v40 = vrot.slane %v2850_v61, %v14329_v37 }
 0x28d   : > { %v2917_v5 = vcombine.low %v2884_v55, %v2900_v44  ;;  %v15949_v10 = vrot.slane %v11790_v50, %v14327_v31  ;;  %v15952_v32 = vrot.slane %v3821_v1, %v14327_v31  ;;  %v6441_v6 = vcombine.low %v15863_v19, %v15866_v16 }
 0x28e   : > { %v6493_v58 = vcombine.low %v15873_v49, %v15885_v42  ;;  %v15959_v8 = vrot.slane %v11791_v56, %v14327_v31  ;;  %v2909_v24 = vrot.slane %v2901_v35, %v14329_v37  ;;  %v2916_v21 = vrot.slane %v2902_v34, %v14329_v37 }
 0x28f   : > { %v2918_v20 = vcombine.high %v2884_v55, %v2900_v44  ;;  %v15964_v26 = vrot.slane %v3837_v23, %v14327_v31  ;;  %v15967_v25 = vrot.slane %v11792_v62, %v14327_v31  ;;  %v3889_v50 = vcombine.low %v2841_v59, %v2848_v17 }
 0x290   : > { %v6433_v43 = vrot.slane %v6425_v9, %v14329_v37  ;;  %v11793_v18 = vcombine.high %v2841_v59, %v2848_v17  ;;  %v3905_v51 = vcombine.low %v2857_v14, %v2864_v40  ;;  %v11794_v61 = vcombine.high %v2857_v14, %v2864_v40  ;;  %v15984_v17 = vpop.permute.xlu0 %2001 }
 0x291   : > { %v2925_v1 = vrot.slane %v2917_v5, %v14329_v37  ;;  %v6449_v56 = vrot.slane %v6441_v6, %v14329_v37  ;;  %v6501_v44 = vrot.slane %v6493_v58, %v14329_v37  ;;  %v6509_v23 = vcombine.low %v15888_v30, %v15894_v29 }
 0x292   : > { %v6561_v55 = vcombine.low %v15729_v3, %v15732_v48  ;;  %v2932_v35 = vrot.slane %v2918_v20, %v14329_v37  ;;  %v3957_v34 = vcombine.low %v2909_v24, %v2916_v21  ;;  %v6577_v62 = vcombine.low %v15740_v7, %v15743_v53 }
 0x293   : > { %v6629_v59 = vcombine.low %v15748_v4, %v15835_v54  ;;  %v6457_v9 = vcombine.low %v6433_v43, %v6449_v56  ;;  %v6517_v14 = vrot.slane %v6509_v23, %v14329_v37  ;;  %v6458_v40 = vcombine.high %v6433_v43, %v6449_v56  ;;  %v15998_v23 = vpop.permute.xlu1 %2055 }
 0x294   : > { %v6569_v5 = vrot.slane %v6561_v55, %v14329_v37  ;;  %v11795_v6 = vcombine.high %v2909_v24, %v2916_v21  ;;  %v6585_v58 = vrot.slane %v6577_v62, %v14329_v37  ;;  %v6645_v3 = vcombine.low %v15848_v46, %v15851_v28 }
 0x295   : > { %v6637_v20 = vrot.slane %v6629_v59, %v14329_v37  ;;  %v15993_v7 = vrot.slane %v3889_v50, %v14327_v31  ;;  %v15996_v4 = vrot.slane %v11793_v18, %v14327_v31  ;;  %v6525_v54 = vcombine.low %v6501_v44, %v6517_v14 }
 0x296   : > { %v6526_v53 = vcombine.high %v6501_v44, %v6517_v14  ;;  %v16001_v43 = vrot.slane %v3905_v51, %v14327_v31  ;;  %v6593_v24 = vcombine.low %v6569_v5, %v6585_v58  ;;  %v6653_v21 = vrot.slane %v6645_v3, %v14329_v37 }
 0x297   : > { %v6594_v56 = vcombine.high %v6569_v5, %v6585_v58  ;;  %v16005_v55 = vrot.slane %v11794_v61, %v14327_v31  ;;  %v3973_v62 = vcombine.low %v2925_v1, %v2932_v35  ;;  %v6683_v50 = vpack.c.bf16 %v6525_v54, %v6457_v9  ;;  %v16016_v61 = vpop.permute.xlu0 %2049  ;;  %v16029_v58 = vpop.permute.xlu1 %2003 }
 0x298   : > { %v6687_v59 = vpack.c.bf16 %v6526_v53, %v6458_v40  ;;  %v11796_v46 = vcombine.high %v2925_v1, %v2932_v35  ;;  %v6661_v18 = vcombine.low %v6637_v20, %v6653_v21  ;;  %v6662_v28 = vcombine.high %v6637_v20, %v6653_v21 }
 0x299   : > { %v3785_v44 = vcombine.low %v15933_v15, %v15936_v11  ;;  %v16010_v14 = vrot.slane %v3957_v34, %v14327_v31  ;;  %12433 = vmatprep.subr.msk.bf16.mxu1 %vm9065_vm1, %v6683_v50  ;;  %v9441_v3 = vsel %vm9065_vm1, %v6683_v50, 0  ;;  %v3801_v53 = vcombine.low %v15944_v22, %v15949_v10 }
 0x29a   : > { %12437 = vmatprep.subr.msk.bf16.mxu0 %vm9065_vm1, %v6687_v59  ;;  %v9530_v51 = vsel %vm9065_vm1, %v6687_v59, 0  ;;  %12228 = vmatpush3.bf16.xpose.msra.mxu1 %v9441_v3  ;;  %v6684_v54 = vpack.c.bf16 %v6661_v18, %v6593_v24  ;;  %v6688_v1 = vpack.c.bf16 %v6662_v28, %v6594_v56  ;;  %v16022_v34 = vrot.slane %v11795_v6, %v14327_v31 }
 0x29b   : > { %12244 = vmatpush3.bf16.xpose.msra.mxu0 %v9530_v51  ;;  %v3793_v35 = vrot.slane %v3785_v44, %v14329_v37  ;;  %v3809_v9 = vrot.slane %v3801_v53, %v14329_v37  ;;  %v3853_v40 = vcombine.low %v15952_v32, %v15959_v8  ;;  %v3869_v5 = vcombine.low %v15964_v26, %v15967_v25  ;;  %v2098_v3 = vpop.permute.xlu0 %2097 }
 0x29c   : > { %v16032_v20 = vrot.slane %v3973_v62, %v14327_v31  ;;  %v16035_v28 = vrot.slane %v11796_v46, %v14327_v31  ;;  %12434 = vmatprep.subr.msk.bf16.mxu1 %vm9065_vm1, %v6684_v54  ;;  %12438 = vmatprep.subr.msk.bf16.mxu0 %vm9065_vm1, %v6688_v1  ;;  %v6154_v6 = vcombine.high %v15548_v60, %v15569_v47 }
 0x29d   : > { %v3817_v24 = vcombine.low %v3793_v35, %v3809_v9  ;;  %v3861_v21 = vrot.slane %v3853_v40, %v14329_v37  ;;  %v3877_v56 = vrot.slane %v3869_v5, %v14329_v37  ;;  %v3818_v50 = vcombine.high %v3793_v35, %v3809_v9 }
 0x29e   : > { %v3921_v62 = vcombine.low %v15993_v7, %v15996_v4  ;;  %v6168_v59 = vrot.slane %v6154_v6, %v14329_v37  ;;  %v6170_v46 = vcombine.high %v15581_v0, %v15584_v13  ;;  %v6222_v60 = vcombine.high %v15596_v2, %v15612_v12  ;;  %v16061_v12 = vpop.permute.xlu1 %2051 }
 0x29f   : > { %v3885_v18 = vcombine.low %v3861_v21, %v3877_v56  ;;  %v3886_v44 = vcombine.high %v3861_v21, %v3877_v56  ;;  %v6238_v47 = vcombine.high %v15615_v57, %v15631_v36  ;;  %v3937_v51 = vcombine.low %v16001_v43, %v16005_v55  ;;  %v18698_v56 = vld [vmem:[#allocation18_spill] sm:$0xff] }
 0x2a0   : > { %v3989_v53 = vcombine.low %v16010_v14, %v16022_v34  ;;  %v4005_v35 = vcombine.low %v16032_v20, %v16035_v28  ;;  %v9444_v0 = vsel %vm9065_vm1, %v6684_v54, 0  ;;  %v6184_v40 = vrot.slane %v6170_v46, %v14329_v37 }
 0x2a1   : > { %v4313_v13 = vpack.c.bf16 %v3885_v18, %v3817_v24  ;;  %v4317_v9 = vpack.c.bf16 %v3886_v44, %v3818_v50  ;;  %v6236_v2 = vrot.slane %v6222_v60, %v14329_v37  ;;  %v2953_v57 = vcombine.low %v15984_v17, %v2098_v3 }
 0x2a2   : > { %12230 = vmatpush3.bf16.xpose.msra.mxu1 %v9444_v0  ;;  %v9533_v36 = vsel %vm9065_vm1, %v6688_v1, 0  ;;  %v6187_v5 = vcombine.low %v6168_v59, %v6184_v40  ;;  %v6252_v54 = vrot.slane %v6238_v47, %v14329_v37  ;;  %v6188_v6 = vcombine.high %v6168_v59, %v6184_v40 }
 0x2a3   : > { %12231 = vmatprep.mubr.msk.bf16.mxu1 %vm9065_vm1, %v4313_v13  ;;  %12247 = vmatprep.mubr.msk.bf16.mxu0 %vm9065_vm1, %v4317_v9  ;;  %v3929_v24 = vrot.slane %v3921_v62, %v14329_v37  ;;  %v3945_v21 = vrot.slane %v3937_v51, %v14329_v37  ;;  %v2937_v50 = vcombine.low %v18698_v56, %v16016_v61  ;;  %v2100_v51 = vpop.permute.xlu1 %2099 }
 0x2a4   : > { %12246 = vmatpush3.bf16.xpose.msra.mxu0 %v9533_v36  ;;  %v3997_v46 = vrot.slane %v3989_v53, %v14329_v37  ;;  %v4013_v18 = vrot.slane %v4005_v35, %v14329_v37  ;;  %v6255_v44 = vcombine.low %v6236_v2, %v6252_v54  ;;  %v6256_v60 = vcombine.high %v6236_v2, %v6252_v54  ;;  %v16083_v2 = vpop.permute.xlu0 %2005 }
 0x2a5   : > { %v2938_v1 = vcombine.high %v18698_v56, %v16016_v61  ;;  %v2954_v47 = vcombine.high %v15984_v17, %v2098_v3  ;;  %v2961_v59 = vrot.slane %v2953_v57, %v14327_v31  ;;  %v2945_v13 = vrot.slane %v2937_v50, %v14327_v31 }
 0x2a6   : > { %v6689_v62 = vpack.c.bf16 %v6255_v44, %v6187_v5  ;;  %v6693_v0 = vpack.c.bf16 %v6256_v60, %v6188_v6  ;;  %v3953_v53 = vcombine.low %v3929_v24, %v3945_v21  ;;  %v4021_v35 = vcombine.low %v3997_v46, %v4013_v18  ;;  %v18699_v6 = vld [vmem:[#allocation22_spill] sm:$0xff] }
 0x2a7   : > { %v3954_v9 = vcombine.high %v3929_v24, %v3945_v21  ;;  %v2952_v40 = vrot.slane %v2938_v1, %v14327_v31  ;;  %v2968_v61 = vrot.slane %v2954_v47, %v14327_v31  ;;  %v3021_v17 = vcombine.low %v16029_v58, %v2100_v51 }
 0x2a8   : > { %12439 = vmatprep.subr.msk.bf16.mxu1 %vm9065_vm1, %v6689_v62  ;;  %12443 = vmatprep.subr.msk.bf16.mxu0 %vm9065_vm1, %v6693_v0  ;;  %v2969_v3 = vcombine.low %v2945_v13, %v2961_v59  ;;  %v4314_v57 = vpack.c.bf16 %v4021_v35, %v3953_v53  ;;  %v4022_v36 = vcombine.high %v3997_v46, %v4013_v18  ;;  %v9613_v21 = vsel %vm9065_vm1, %v6689_v62, 0  ;;  %v18700_v46 = vld [vmem:[#allocation53_spill] sm:$0xff]  ;;  %v2054_v53 = vpop.permute.xlu0 %2053 }
 0x2a9   : > { %v6290_v5 = vcombine.high %v18678_v27, %v15340_v45  ;;  %v2970_v54 = vcombine.high %v2945_v13, %v2961_v59  ;;  %v3005_v56 = vcombine.low %v18699_v6, %v16061_v12  ;;  %v3022_v24 = vcombine.high %v16029_v58, %v2100_v51 }
 0x2aa   : > { %12232 = vmatmul.mubr.msk.bf16.vlgmr.msra.gmra.mrb[32].mxu1 %vm9065_vm1, %v4314_v57  ;;  %v4318_v50 = vpack.c.bf16 %v4022_v36, %v3954_v9  ;;  %v6306_v60 = vcombine.high %v18680_v39, %v18679_v63  ;;  %v6358_v18 = vcombine.high %v18700_v46, %v18681_v33  ;;  %v2985_v45 = vcombine.low %v2952_v40, %v2968_v61  ;;  %v18701_v63 = vld [vmem:[#allocation33_spill] sm:$0xff]  ;;  %v18702_v39 = vld [vmem:[#allocation20_spill] sm:$0xff] }
 0x2ab   : > { %v6304_v44 = vrot.slane %v6290_v5, %v14329_v37  ;;  %v2986_v27 = vcombine.high %v2952_v40, %v2968_v61  ;;  %v3006_v1 = vcombine.high %v18699_v6, %v16061_v12  ;;  %v3029_v58 = vrot.slane %v3021_v17, %v14327_v31  ;;  %12256 = vmatpush3.bf16.xpose.msra.mxu1 %v9613_v21 }
 0x2ac   : > { %12248 = vmatmul.mubr.msk.bf16.vlgmr.msra.gmra.mrb[48].mxu0 %vm9065_vm1, %v4318_v50  ;;  %v9702_v47 = vsel %vm9065_vm1, %v6693_v0, 0  ;;  %v6320_v59 = vrot.slane %v6306_v60, %v14329_v37  ;;  %v6372_v62 = vrot.slane %v6358_v18, %v14329_v37  ;;  %v6374_v51 = vcombine.high %v18702_v39, %v18701_v63  ;;  %v16111_v0 = vpop.permute.xlu1 %2103  ;;  %v18704_v39 = vld [vmem:[#allocation17_spill] sm:$0xff] }
 0x2ad   : > { %v2977_v33 = vrot.slane %v2969_v3, %v14329_v37  ;;  %v3013_v13 = vrot.slane %v3005_v56, %v14327_v31  ;;  %12272 = vmatpush3.bf16.xpose.msra.mxu0 %v9702_v47  ;;  %v3036_v12 = vrot.slane %v3022_v24, %v14327_v31  ;;  %v2984_v61 = vrot.slane %v2970_v54, %v14329_v37  ;;  %v2102_v47 = vpop.permute.xlu0 %2101 }
 0x2ae   : > { %v6323_v35 = vcombine.low %v6304_v44, %v6320_v59  ;;  %v6388_v9 = vrot.slane %v6374_v51, %v14329_v37  ;;  %v6324_v40 = vcombine.high %v6304_v44, %v6320_v59  ;;  %v2993_v17 = vrot.slane %v2985_v45, %v14329_v37  ;;  %v18703_v44 = vld [vmem:[#allocation21_spill] sm:$0xff] }
 0x2af   : > { %v3000_v57 = vrot.slane %v2986_v27, %v14329_v37  ;;  %v3020_v3 = vrot.slane %v3006_v1, %v14327_v31  ;;  %v3037_v36 = vcombine.low %v3013_v13, %v3029_v58  ;;  %v3038_v5 = vcombine.high %v3013_v13, %v3029_v58 }
 0x2b0   : > { %v6391_v6 = vcombine.low %v6372_v62, %v6388_v9  ;;  %v6392_v56 = vcombine.high %v6372_v62, %v6388_v9  ;;  %v3141_v46 = vcombine.low %v18703_v44, %v15998_v23  ;;  %v3142_v54 = vcombine.high %v18703_v44, %v15998_v23  ;;  %v16125_v59 = vpop.permute.xlu1 %6761 }
 0x2b1   : > { %v3053_v21 = vcombine.low %v3020_v3, %v3036_v12  ;;  %v3054_v24 = vcombine.high %v3020_v3, %v3036_v12  ;;  %v4025_v18 = vcombine.low %v2977_v33, %v2984_v61  ;;  %v11797_v45 = vcombine.high %v2977_v33, %v2984_v61 }
 0x2b2   : > { %v6690_v50 = vpack.c.bf16 %v6391_v6, %v6323_v35  ;;  %v6694_v60 = vpack.c.bf16 %v6392_v56, %v6324_v40  ;;  %v4041_v27 = vcombine.low %v2993_v17, %v3000_v57  ;;  %v3045_v1 = vrot.slane %v3037_v36, %v14329_v37 }
 0x2b3   : > { %v3052_v58 = vrot.slane %v3038_v5, %v14329_v37  ;;  %v3922_v63 = vcombine.high %v15993_v7, %v15996_v4  ;;  %v11798_v23 = vcombine.high %v2993_v17, %v3000_v57  ;;  %v3073_v51 = vcombine.low %v18704_v39, %v2054_v53 }
 0x2b4   : > { %12440 = vmatprep.subr.msk.bf16.mxu1 %vm9065_vm1, %v6690_v50  ;;  %12444 = vmatprep.subr.msk.bf16.mxu0 %vm9065_vm1, %v6694_v60  ;;  %v9616_v62 = vsel %vm9065_vm1, %v6690_v50, 0  ;;  %v3074_v33 = vcombine.high %v18704_v39, %v2054_v53  ;;  %v16133_v13 = vrot.slane %v3053_v21, %v14329_v37  ;;  %v16136_v12 = vrot.slane %v3054_v24, %v14329_v37 }
 0x2b5   : > { %12258 = vmatpush3.bf16.xpose.msra.mxu1 %v9616_v62  ;;  %v3089_v35 = vcombine.low %v16083_v2, %v2102_v47  ;;  %v3938_v9 = vcombine.high %v16001_v43, %v16005_v55  ;;  %v16142_v40 = vrot.slane %v3141_v46, %v14327_v31  ;;  %v16145_v61 = vrot.slane %v3142_v54, %v14327_v31  ;;  %v16168_v46 = vpop.permute.xlu1 %6809 }
 0x2b6   : > { %v3090_v17 = vcombine.high %v16083_v2, %v2102_v47  ;;  %v16149_v53 = vrot.slane %v4025_v18, %v14327_v31  ;;  %v16152_v57 = vrot.slane %v11797_v45, %v14327_v31  ;;  %v16155_v3 = vrot.slane %v4041_v27, %v14327_v31 }
 0x2b7   : > { %v4093_v36 = vcombine.low %v3045_v1, %v3052_v58  ;;  %v16158_v5 = vrot.slane %v11798_v23, %v14327_v31  ;;  %v3081_v6 = vrot.slane %v3073_v51, %v14327_v31  ;;  %v11799_v56 = vcombine.high %v3045_v1, %v3052_v58 }
 0x2b8   : > { %v3157_v21 = vcombine.low %v15969_v52, %v16111_v0  ;;  %v3088_v2 = vrot.slane %v3074_v33, %v14327_v31  ;;  %v4109_v24 = vcombine.low %v16133_v13, %v16136_v12  ;;  %v3097_v50 = vrot.slane %v3089_v35, %v14327_v31 }
 0x2b9   : > { %v9705_v44 = vsel %vm9065_vm1, %v6694_v60, 0  ;;  %v11800_v54 = vcombine.high %v16133_v13, %v16136_v12  ;;  %v3104_v18 = vrot.slane %v3090_v17, %v14327_v31  ;;  %v6426_v45 = vcombine.high %v15855_v38, %v15860_v41  ;;  %v16190_v41 = vpop.permute.xlu0 %6717  ;;  %v16200_v35 = vpop.permute.xlu1 %6719 }
 0x2ba   : > { %12274 = vmatpush3.bf16.xpose.msra.mxu0 %v9705_v44  ;;  %v6442_v47 = vcombine.high %v15863_v19, %v15866_v16  ;;  %v16178_v27 = vrot.slane %v4093_v36, %v14327_v31  ;;  %v3158_v60 = vcombine.high %v15969_v52, %v16111_v0  ;;  %v6494_v1 = vcombine.high %v15873_v49, %v15885_v42  ;;  %v18707_v44 = vld [vmem:[#allocation48_spill] sm:$0xff] }
 0x2bb   : > { %v6510_v58 = vcombine.high %v15888_v30, %v15894_v29  ;;  %v16187_v62 = vrot.slane %v11799_v56, %v14327_v31  ;;  %v3165_v38 = vrot.slane %v3157_v21, %v14327_v31  ;;  %v6440_v19 = vrot.slane %v6426_v45, %v14329_v37  ;;  %v18705_v56 = vld [vmem:[#allocation16_spill] sm:$0xff] }
 0x2bc   : > { %v6456_v16 = vrot.slane %v6442_v47, %v14329_v37  ;;  %v16195_v23 = vrot.slane %v4109_v24, %v14327_v31  ;;  %v3105_v52 = vcombine.low %v3081_v6, %v3097_v50  ;;  %v6508_v49 = vrot.slane %v6494_v1, %v14329_v37  ;;  %v18706_v24 = vld [vmem:[#allocation46_spill] sm:$0xff]  ;;  %v18708_v47 = vld [vmem:[#allocation49_spill] sm:$0xff]  ;;  %v18711_v1 = vld [vmem:[#allocation56_spill] sm:$0xff] }
 0x2bd   : > { %v6524_v42 = vrot.slane %v6510_v58, %v14329_v37  ;;  %v3106_v30 = vcombine.high %v3081_v6, %v3097_v50  ;;  %v3121_v29 = vcombine.low %v3088_v2, %v3104_v18  ;;  %v3122_v51 = vcombine.high %v3088_v2, %v3104_v18  ;;  %v18709_v2 = vld [vmem:[#allocation50_spill] sm:$0xff] }
 0x2be   : > { %v6459_v0 = vcombine.low %v6440_v19, %v6456_v16  ;;  %v6460_v39 = vcombine.high %v6440_v19, %v6456_v16  ;;  %v3172_v33 = vrot.slane %v3158_v60, %v14327_v31  ;;  %v3173_v17 = vcombine.low %v16142_v40, %v3165_v38  ;;  %v18710_v60 = vld [vmem:[#allocation55_spill] sm:$0xff] }
 0x2bf   : > { %v6527_v13 = vcombine.low %v6508_v49, %v6524_v42  ;;  %v6528_v12 = vcombine.high %v6508_v49, %v6524_v42  ;;  %v3174_v36 = vcombine.high %v16142_v40, %v3165_v38  ;;  %v6562_v21 = vcombine.high %v18705_v56, %v15732_v48  ;;  %v16214_v49 = vpop.permute.xlu0 %6765 }
 0x2c0   : > { %v6578_v6 = vcombine.high %v18707_v44, %v18706_v24  ;;  %v6630_v18 = vcombine.high %v18709_v2, %v18708_v47  ;;  %v6646_v58 = vcombine.high %v18711_v1, %v18710_v60  ;;  %v3113_v19 = vrot.slane %v3105_v52, %v14329_v37 }
 0x2c1   : > { %v6691_v50 = vpack.c.bf16 %v6527_v13, %v6459_v0  ;;  %v6695_v45 = vpack.c.bf16 %v6528_v12, %v6460_v39  ;;  %v3120_v16 = vrot.slane %v3106_v30, %v14329_v37  ;;  %v6576_v40 = vrot.slane %v6562_v21, %v14329_v37  ;;  %v16230_v21 = vpop.permute.xlu1 %6767 }
 0x2c2   : > { %v6592_v48 = vrot.slane %v6578_v6, %v14329_v37  ;;  %v3189_v38 = vcombine.low %v16145_v61, %v3172_v33  ;;  %v3190_v42 = vcombine.high %v16145_v61, %v3172_v33  ;;  %v3129_v30 = vrot.slane %v3121_v29, %v14329_v37 }
 0x2c3   : > { %12441 = vmatprep.subr.msk.bf16.mxu1 %vm9065_vm1, %v6691_v50  ;;  %12445 = vmatprep.subr.msk.bf16.mxu0 %vm9065_vm1, %v6695_v45  ;;  %v9619_v0 = vsel %vm9065_vm1, %v6691_v50, 0  ;;  %v9708_v52 = vsel %vm9065_vm1, %v6695_v45, 0  ;;  %v3136_v39 = vrot.slane %v3122_v51, %v14329_v37  ;;  %v3181_v13 = vrot.slane %v3173_v17, %v14329_v37  ;;  %v6814_v2 = vpop.permute.xlu0 %6813 }
 0x2c4   : > { %12260 = vmatpush3.bf16.xpose.msra.mxu1 %v9619_v0  ;;  %12276 = vmatpush3.bf16.xpose.msra.mxu0 %v9708_v52  ;;  %v3188_v12 = vrot.slane %v3174_v36, %v14329_v37  ;;  %v6595_v56 = vcombine.low %v6576_v40, %v6592_v48  ;;  %v6644_v61 = vrot.slane %v6630_v18, %v14329_v37 }
 0x2c5   : > { %v6660_v33 = vrot.slane %v6646_v58, %v14329_v37  ;;  %v16233_v24 = vrot.slane %v11800_v54, %v14327_v31  ;;  %v4161_v44 = vcombine.low %v3113_v19, %v3120_v16  ;;  %v11801_v29 = vcombine.high %v3113_v19, %v3120_v16  ;;  %v16258_v7 = vpop.permute.xlu1 %6815 }
 0x2c6   : > { %v6596_v6 = vcombine.high %v6576_v40, %v6592_v48  ;;  %v3197_v51 = vrot.slane %v3189_v38, %v14329_v37  ;;  %v3204_v17 = vrot.slane %v3190_v42, %v14329_v37  ;;  %v4177_v36 = vcombine.low %v3129_v30, %v3136_v39 }
 0x2c7   : > { %v6663_v50 = vcombine.low %v6644_v61, %v6660_v33  ;;  %v6664_v45 = vcombine.high %v6644_v61, %v6660_v33  ;;  %v11802_v47 = vcombine.high %v3129_v30, %v3136_v39  ;;  %v4057_v18 = vcombine.low %v16149_v53, %v16152_v57  ;;  %v18712_v61 = vld [vmem:[#allocation23_spill] sm:$0xff] }
 0x2c8   : > { %v4073_v60 = vcombine.low %v16155_v3, %v16158_v5  ;;  %v4229_v54 = vcombine.low %v3181_v13, %v3188_v12  ;;  %v11803_v1 = vcombine.high %v3181_v13, %v3188_v12  ;;  %v16245_v16 = vrot.slane %v3922_v63, %v14329_v37 }
 0x2c9   : > { %v6692_v58 = vpack.c.bf16 %v6663_v50, %v6595_v56  ;;  %v6696_v19 = vpack.c.bf16 %v6664_v45, %v6596_v6  ;;  %v3990_v40 = vcombine.high %v16010_v14, %v16022_v34  ;;  %v16250_v48 = vrot.slane %v4161_v44, %v14327_v31 }
 0x2ca   : > { %v16253_v38 = vrot.slane %v11801_v29, %v14327_v31  ;;  %v4245_v42 = vcombine.low %v3197_v51, %v3204_v17  ;;  %v11804_v0 = vcombine.high %v3197_v51, %v3204_v17  ;;  %v7009_v52 = vcombine.low %v16190_v41, %v6814_v2 }
 0x2cb   : > { %12442 = vmatprep.subr.msk.bf16.mxu1 %vm9065_vm1, %v6692_v58  ;;  %12446 = vmatprep.subr.msk.bf16.mxu0 %vm9065_vm1, %v6696_v19  ;;  %v9622_v4 = vsel %vm9065_vm1, %v6692_v58, 0  ;;  %v4065_v14 = vrot.slane %v4057_v18, %v14329_v37  ;;  %v4081_v34 = vrot.slane %v4073_v60, %v14329_v37  ;;  %v4125_v63 = vcombine.low %v16178_v27, %v16187_v62 }
 0x2cc   : > { %v4141_v30 = vcombine.low %v16195_v23, %v16233_v24  ;;  %12262 = vmatpush3.bf16.xpose.msra.mxu1 %v9622_v4  ;;  %v16268_v39 = vrot.slane %v4177_v36, %v14327_v31  ;;  %v16271_v13 = vrot.slane %v11802_v47, %v14327_v31  ;;  %v16274_v12 = vrot.slane %v4229_v54, %v14327_v31 }
 0x2cd   : > { %v16277_v56 = vrot.slane %v11803_v1, %v14327_v31  ;;  %v6993_v33 = vcombine.low %v18712_v61, %v16214_v49  ;;  %v7010_v44 = vcombine.high %v16190_v41, %v6814_v2  ;;  %v4133_v29 = vrot.slane %v4125_v63, %v14329_v37  ;;  %v16305_v1 = vpop.permute.xlu1 %6715 }
 0x2ce   : > { %v4149_v6 = vrot.slane %v4141_v30, %v14329_v37  ;;  %v16285_v51 = vrot.slane %v4245_v42, %v14327_v31  ;;  %v16288_v17 = vrot.slane %v11804_v0, %v14327_v31  ;;  %v6994_v50 = vcombine.high %v18712_v61, %v16214_v49 }
 0x2cf   : > { %v7017_v45 = vrot.slane %v7009_v52, %v14327_v31  ;;  %v4089_v36 = vcombine.low %v4065_v14, %v4081_v34  ;;  %v4090_v18 = vcombine.high %v4065_v14, %v4081_v34  ;;  %v16297_v41 = vrot.slane %v3938_v9, %v14329_v37 }
 0x2d0   : > { %v4157_v47 = vcombine.low %v4133_v29, %v4149_v6  ;;  %v4158_v60 = vcombine.high %v4133_v29, %v4149_v6  ;;  %v4006_v2 = vcombine.high %v16032_v20, %v16035_v28  ;;  %v4193_v54 = vcombine.low %v16250_v48, %v16253_v38 }
 0x2d1   : > { %v4209_v49 = vcombine.low %v16268_v39, %v16271_v13  ;;  %v7001_v58 = vrot.slane %v6993_v33, %v14327_v31  ;;  %v7024_v42 = vrot.slane %v7010_v44, %v14327_v31  ;;  %v4261_v20 = vcombine.low %v16274_v12, %v16277_v56 }
 0x2d2   : > { %v4315_v0 = vpack.c.bf16 %v4157_v47, %v4089_v36  ;;  %v4319_v52 = vpack.c.bf16 %v4158_v60, %v4090_v18  ;;  %v4201_v43 = vrot.slane %v4193_v54, %v14329_v37  ;;  %v4277_v28 = vcombine.low %v16285_v51, %v16288_v17  ;;  %v16331_v60 = vpop.permute.xlu1 %6811 }
 0x2d3   : > { %v4217_v55 = vrot.slane %v4209_v49, %v14329_v37  ;;  %v16316_v9 = vrot.slane %v3990_v40, %v14329_v37  ;;  %v7008_v4 = vrot.slane %v6994_v50, %v14327_v31  ;;  %v7025_v14 = vcombine.low %v7001_v58, %v7017_v45  ;;  %v18713_v40 = vld [vmem:[#allocation24_spill] sm:$0xff]  ;;  %v6714_v50 = vpop.permute.xlu0 %6713 }
 0x2d4   : > { %12235 = vmatprep.mubr.msk.bf16.mxu1 %vm9065_vm1, %v4315_v0  ;;  %12251 = vmatprep.mubr.msk.bf16.mxu0 %vm9065_vm1, %v4319_v52  ;;  %v9711_v34 = vsel %vm9065_vm1, %v6696_v19, 0  ;;  %v7026_v63 = vcombine.high %v7001_v58, %v7017_v45  ;;  %v4269_v61 = vrot.slane %v4261_v20, %v14329_v37  ;;  %v4285_v33 = vrot.slane %v4277_v28, %v14329_v37 }
 0x2d5   : > { %v4225_v30 = vcombine.low %v4201_v43, %v4217_v55  ;;  %12278 = vmatpush3.bf16.xpose.msra.mxu0 %v9711_v34  ;;  %v4020_v44 = vrot.slane %v4006_v2, %v14329_v37  ;;  %v6857_v29 = vcombine.low %v18713_v40, %v16125_v59  ;;  %v6858_v6 = vcombine.high %v18713_v40, %v16125_v59 }
 0x2d6   : > { %v4226_v36 = vcombine.high %v4201_v43, %v4217_v55  ;;  %v7041_v47 = vcombine.low %v7008_v4, %v7024_v42  ;;  %v4293_v18 = vcombine.low %v4269_v61, %v4285_v33  ;;  %v4294_v19 = vcombine.high %v4269_v61, %v4285_v33 }
 0x2d7   : > { %v3786_v45 = vcombine.high %v15933_v15, %v15936_v11  ;;  %v16334_v54 = vrot.slane %v7025_v14, %v14329_v37  ;;  %v7042_v2 = vcombine.high %v7008_v4, %v7024_v42  ;;  %v3802_v49 = vcombine.high %v15944_v22, %v15949_v10  ;;  %v18714_v14 = vld [vmem:[#allocation25_spill] sm:$0xff] }
 0x2d8   : > { %v3854_v59 = vcombine.high %v15952_v32, %v15959_v8  ;;  %v16341_v58 = vrot.slane %v7026_v63, %v14329_v37  ;;  %v6873_v0 = vcombine.low %v6714_v50, %v16168_v46  ;;  %v4316_v52 = vpack.c.bf16 %v4293_v18, %v4225_v30  ;;  %v16366_v63 = vpop.permute.xlu1 %6769 }
 0x2d9   : > { %v4320_v43 = vpack.c.bf16 %v4294_v19, %v4226_v36  ;;  %v3800_v15 = vrot.slane %v3786_v45, %v14329_v37  ;;  %v3816_v11 = vrot.slane %v3802_v49, %v14329_v37  ;;  %v3870_v42 = vcombine.high %v15964_v26, %v15967_v25  ;;  %v6764_v19 = vpop.permute.xlu0 %6763 }
 0x2da   : > { %v3868_v55 = vrot.slane %v3854_v59, %v14329_v37  ;;  %v6865_v22 = vrot.slane %v6857_v29, %v14327_v31  ;;  %v16351_v10 = vrot.slane %v7041_v47, %v14329_v37  ;;  %v6874_v32 = vcombine.high %v6714_v50, %v16168_v46  ;;  %12236 = vmatmul.mubr.msk.bf16.gmra.mrb[36].mxu1 %vm9065_vm1, %v4316_v52 }
 0x2db   : > { %12252 = vmatmul.mubr.msk.bf16.gmra.mrb[52].mxu0 %vm9065_vm1, %v4320_v43  ;;  %v16357_v8 = vrot.slane %v7042_v2, %v14329_v37  ;;  %v3819_v20 = vcombine.low %v3800_v15, %v3816_v11  ;;  %v3884_v28 = vrot.slane %v3870_v42, %v14329_v37  ;;  %v3820_v4 = vcombine.high %v3800_v15, %v3816_v11 }
 0x2dc   : > { %v6872_v26 = vrot.slane %v6858_v6, %v14327_v31  ;;  %v6881_v25 = vrot.slane %v6873_v0, %v14327_v31  ;;  %v7061_v34 = vcombine.low %v18714_v14, %v16230_v21  ;;  %v3955_v46 = vcombine.low %v16245_v16, %v16297_v41  ;;  %v16394_v15 = vpop.permute.xlu1 %6817 }
 0x2dd   : > { %v8081_v30 = vcombine.low %v16334_v54, %v16341_v58  ;;  %v3887_v61 = vcombine.low %v3868_v55, %v3884_v28  ;;  %v3888_v33 = vcombine.high %v3868_v55, %v3884_v28  ;;  %v4023_v40 = vcombine.low %v16316_v9, %v4020_v44  ;;  %v16410_v28 = vpop.permute.xlu0 %6725 }
 0x2de   : > { %v11841_v29 = vcombine.high %v16334_v54, %v16341_v58  ;;  %v6888_v6 = vrot.slane %v6874_v32, %v14327_v31  ;;  %v3956_v50 = vcombine.high %v16245_v16, %v16297_v41  ;;  %v4024_v36 = vcombine.high %v16316_v9, %v4020_v44 }
 0x2df   : > { %v8097_v47 = vcombine.low %v16351_v10, %v16357_v8  ;;  %v7062_v18 = vcombine.high %v18714_v14, %v16230_v21  ;;  %v4321_v45 = vpack.c.bf16 %v3887_v61, %v3819_v20  ;;  %v4325_v2 = vpack.c.bf16 %v3888_v33, %v3820_v4 }
 0x2e0   : > { %v6889_v49 = vcombine.low %v6865_v22, %v6881_v25  ;;  %v7069_v59 = vrot.slane %v7061_v34, %v14327_v31  ;;  %v4322_v0 = vpack.c.bf16 %v4023_v40, %v3955_v46  ;;  %v4326_v52 = vpack.c.bf16 %v4024_v36, %v3956_v50  ;;  %v16429_v33 = vpop.permute.xlu1 %6727 }
 0x2e1   : > { %v6890_v43 = vcombine.high %v6865_v22, %v6881_v25  ;;  %v7077_v16 = vcombine.low %v16200_v35, %v16258_v7  ;;  %12263 = vmatprep.mubr.msk.bf16.mxu1 %vm9065_vm1, %v4321_v45  ;;  %12279 = vmatprep.mubr.msk.bf16.mxu0 %vm9065_vm1, %v4325_v2  ;;  %v4058_v41 = vcombine.high %v16149_v53, %v16152_v57 }
 0x2e2   : > { %v6905_v21 = vcombine.low %v6872_v26, %v6888_v6  ;;  %v7078_v9 = vcombine.high %v16200_v35, %v16258_v7  ;;  %12264 = vmatmul.mubr.msk.bf16.vlgmr.msra.gmra.mrb[40].mxu1 %vm9065_vm1, %v4322_v0  ;;  %v4074_v44 = vcombine.high %v16155_v3, %v16158_v5  ;;  %v6906_v11 = vcombine.high %v6872_v26, %v6888_v6  ;;  %v18715_v5 = vld [vmem:[#allocation26_spill] sm:$0xff] }
 0x2e3   : > { %12280 = vmatmul.mubr.msk.bf16.vlgmr.msra.gmra.mrb[56].mxu0 %vm9065_vm1, %v4326_v52  ;;  %v6941_v55 = vcombine.low %v16305_v1, %v16331_v60  ;;  %v6942_v53 = vcombine.high %v16305_v1, %v16331_v60  ;;  %v4126_v57 = vcombine.high %v16178_v27, %v16187_v62  ;;  %v7076_v35 = vrot.slane %v7062_v18, %v14327_v31  ;;  %v16437_v52 = vpop.permute.xlu0 %6773 }
 0x2e4   : > { %v4072_v7 = vrot.slane %v4058_v41, %v14329_v37  ;;  %v4088_v42 = vrot.slane %v4074_v44, %v14329_v37  ;;  %v4142_v3 = vcombine.high %v16195_v23, %v16233_v24  ;;  %v6925_v22 = vcombine.low %v18715_v5, %v6764_v19 }
 0x2e5   : > { %v6926_v32 = vcombine.high %v18715_v5, %v6764_v19  ;;  %v7085_v20 = vrot.slane %v7077_v16, %v14327_v31  ;;  %v4140_v1 = vrot.slane %v4126_v57, %v14329_v37  ;;  %v16414_v27 = vrot.slane %v6889_v49, %v14329_v37 }
 0x2e6   : > { %v16417_v62 = vrot.slane %v6890_v43, %v14329_v37  ;;  %v7092_v60 = vrot.slane %v7078_v9, %v14327_v31  ;;  %v4156_v23 = vrot.slane %v4142_v3, %v14329_v37  ;;  %v16422_v24 = vrot.slane %v6905_v21, %v14329_v37 }
 0x2e7   : > { %v16425_v4 = vrot.slane %v6906_v11, %v14329_v37  ;;  %v6949_v26 = vrot.slane %v6941_v55, %v14327_v31  ;;  %v6956_v25 = vrot.slane %v6942_v53, %v14327_v31  ;;  %v4091_v14 = vcombine.low %v4072_v7, %v4088_v42 }
 0x2e8   : > { %v4159_v34 = vcombine.low %v4140_v1, %v4156_v23  ;;  %v4092_v46 = vcombine.high %v4072_v7, %v4088_v42  ;;  %v4160_v61 = vcombine.high %v4140_v1, %v4156_v23  ;;  %v6933_v40 = vrot.slane %v6925_v22, %v14327_v31  ;;  %v16463_v42 = vpop.permute.xlu1 %6775 }
 0x2e9   : > { %v6940_v6 = vrot.slane %v6926_v32, %v14327_v31  ;;  %v7093_v50 = vcombine.low %v7069_v59, %v7085_v20  ;;  %v7094_v36 = vcombine.high %v7069_v59, %v7085_v20  ;;  %v7109_v18 = vcombine.low %v7076_v35, %v7092_v60 }
 0x2ea   : > { %v7110_v19 = vcombine.high %v7076_v35, %v7092_v60  ;;  %v4323_v45 = vpack.c.bf16 %v4159_v34, %v4091_v14  ;;  %v4327_v2 = vpack.c.bf16 %v4160_v61, %v4092_v46  ;;  %v11842_v49 = vcombine.high %v16351_v10, %v16357_v8 }
 0x2eb   : > { %v7945_v0 = vcombine.low %v16414_v27, %v16417_v62  ;;  %v6957_v43 = vcombine.low %v6933_v40, %v6949_v26  ;;  %v6958_v16 = vcombine.high %v6933_v40, %v6949_v26  ;;  %v11837_v41 = vcombine.high %v16414_v27, %v16417_v62  ;;  %v6822_v27 = vpop.permute.xlu0 %6821 }
 0x2ec   : > { %v6973_v21 = vcombine.low %v6940_v6, %v6956_v25  ;;  %v6974_v9 = vcombine.high %v6940_v6, %v6956_v25  ;;  %12267 = vmatprep.mubr.msk.bf16.mxu1 %vm9065_vm1, %v4323_v45  ;;  %12283 = vmatprep.mubr.msk.bf16.mxu0 %vm9065_vm1, %v4327_v2  ;;  %v7961_v59 = vcombine.low %v16422_v24, %v16425_v4  ;;  %v16489_v40 = vpop.permute.xlu1 %6823  ;;  %v18717_v45 = vld [vmem:[#allocation30_spill] sm:$0xff] }
 0x2ed   : > { %v11838_v44 = vcombine.high %v16422_v24, %v16425_v4  ;;  %v16448_v11 = vrot.slane %v7093_v50, %v14329_v37  ;;  %v16451_v55 = vrot.slane %v7094_v36, %v14329_v37  ;;  %v16454_v53 = vrot.slane %v7109_v18, %v14329_v37 }
 0x2ee   : > { %v16457_v57 = vrot.slane %v7110_v19, %v14329_v37  ;;  %v4194_v35 = vcombine.high %v16250_v48, %v16253_v38  ;;  %v4210_v7 = vcombine.high %v16268_v39, %v16271_v13  ;;  %v6965_v3 = vrot.slane %v6957_v43, %v14329_v37 }
 0x2ef   : > { %v6972_v5 = vrot.slane %v6958_v16, %v14329_v37  ;;  %v4262_v22 = vcombine.high %v16274_v12, %v16277_v56  ;;  %v4278_v32 = vcombine.high %v16285_v51, %v16288_v17  ;;  %v6981_v20 = vrot.slane %v6973_v21, %v14329_v37  ;;  %v18716_v17 = vld [vmem:[#allocation27_spill] sm:$0xff]  ;;  %v16498_v16 = vpop.permute.xlu0 %6721 }
 0x2f0   : > { %v6988_v1 = vrot.slane %v6974_v9, %v14329_v37  ;;  %v4208_v48 = vrot.slane %v4194_v35, %v14329_v37  ;;  %v4224_v38 = vrot.slane %v4210_v7, %v14329_v37  ;;  %v8149_v39 = vcombine.low %v16448_v11, %v16451_v55 }
 0x2f1   : > { %v11843_v13 = vcombine.high %v16448_v11, %v16451_v55  ;;  %v4276_v12 = vrot.slane %v4262_v22, %v14329_v37  ;;  %v4292_v56 = vrot.slane %v4278_v32, %v14329_v37  ;;  %v8165_v51 = vcombine.low %v16454_v53, %v16457_v57 }
 0x2f2   : > { %v7265_v62 = vcombine.low %v18716_v17, %v16437_v52  ;;  %v4227_v60 = vcombine.low %v4208_v48, %v4224_v38  ;;  %v4228_v23 = vcombine.high %v4208_v48, %v4224_v38  ;;  %v7266_v24 = vcombine.high %v18716_v17, %v16437_v52 }
 0x2f3   : > { %v8013_v4 = vcombine.low %v6965_v3, %v6972_v5  ;;  %v4295_v26 = vcombine.low %v4276_v12, %v4292_v56  ;;  %v4296_v25 = vcombine.high %v4276_v12, %v4292_v56  ;;  %v11839_v14 = vcombine.high %v6965_v3, %v6972_v5 }
 0x2f4   : > { %v8029_v34 = vcombine.low %v6981_v20, %v6988_v1  ;;  %v7281_v46 = vcombine.low %v16410_v28, %v6822_v27  ;;  %v7282_v61 = vcombine.high %v16410_v28, %v6822_v27  ;;  %v7952_v36 = vrot.slane %v7945_v0, %v14327_v31 }
 0x2f5   : > { %v4324_v6 = vpack.c.bf16 %v4295_v26, %v4227_v60  ;;  %v4328_v50 = vpack.c.bf16 %v4296_v25, %v4228_v23  ;;  %v7960_v18 = vrot.slane %v11837_v41, %v14327_v31  ;;  %v11840_v19 = vcombine.high %v6981_v20, %v6988_v1  ;;  %v16531_v1 = vpop.permute.xlu1 %6723 }
 0x2f6   : > { %v7129_v2 = vcombine.low %v18717_v45, %v16366_v63  ;;  %v7130_v52 = vcombine.high %v18717_v45, %v16366_v63  ;;  %v7968_v43 = vrot.slane %v7961_v59, %v14327_v31  ;;  %v7976_v28 = vrot.slane %v11838_v44, %v14327_v31 }
 0x2f7   : > { %12268 = vmatmul.mubr.msk.bf16.gmra.mrb[44].mxu1 %vm9065_vm1, %v4324_v6  ;;  %12284 = vmatmul.mubr.msk.bf16.gmra.mrb[60].mxu0 %vm9065_vm1, %v4328_v50  ;;  %v7977_v0 = vcombine.low %v7952_v36, %v7960_v18  ;;  %v8020_v41 = vrot.slane %v8013_v4, %v14327_v31  ;;  %v11844_v21 = vcombine.high %v16454_v53, %v16457_v57 }
 0x2f8   : > { %v16507_v9 = vrot.slane %v7265_v62, %v14327_v31  ;;  %v16510_v63 = vrot.slane %v7281_v46, %v14327_v31  ;;  %v16513_v59 = vrot.slane %v7282_v61, %v14327_v31  ;;  %v7993_v7 = vcombine.low %v7968_v43, %v7976_v28 }
 0x2f9   : > { %v16516_v35 = vrot.slane %v7977_v0, %v14329_v37  ;;  %v8028_v44 = vrot.slane %v11839_v14, %v14327_v31  ;;  %v8036_v3 = vrot.slane %v8029_v34, %v14327_v31  ;;  %v16521_v5 = vrot.slane %v7266_v24, %v14327_v31  ;;  %v16585_v58 = vpop.permute.xlu1 %6819 }
 0x2fa   : > { %v16524_v22 = vrot.slane %v7129_v2, %v14327_v31  ;;  %v16527_v32 = vrot.slane %v7130_v52, %v14327_v31  ;;  %v7145_v20 = vcombine.low %v16498_v16, %v16394_v15  ;;  %v16534_v48 = vrot.slane %v7993_v7, %v14329_v37 }
 0x2fb   : > { %v8044_v38 = vrot.slane %v11840_v19, %v14327_v31  ;;  %v8045_v27 = vcombine.low %v8020_v41, %v8028_v44  ;;  %v7978_v12 = vcombine.high %v7952_v36, %v7960_v18  ;;  %v7297_v56 = vcombine.low %v16507_v9, %v16510_v63 }
 0x2fc   : > { %v7298_v17 = vcombine.high %v16507_v9, %v16510_v63  ;;  %v7313_v62 = vcombine.low %v16521_v5, %v16513_v59  ;;  %v7146_v60 = vcombine.high %v16498_v16, %v16394_v15  ;;  %v8009_v23 = vcombine.low %v16516_v35, %v16534_v48 }
 0x2fd   : > { %v16548_v24 = vrot.slane %v8045_v27, %v14329_v37  ;;  %v8061_v4 = vcombine.low %v8036_v3, %v8044_v38  ;;  %v16551_v26 = vrot.slane %v7978_v12, %v14329_v37  ;;  %v7994_v25 = vcombine.high %v7968_v43, %v7976_v28 }
 0x2fe   : > { %v8046_v14 = vcombine.high %v8020_v41, %v8028_v44  ;;  %v8062_v34 = vcombine.high %v8036_v3, %v8044_v38  ;;  %v8088_v46 = vrot.slane %v8081_v30, %v14327_v31  ;;  %v8096_v61 = vrot.slane %v11841_v29, %v14327_v31  ;;  %v16611_v41 = vpop.permute.xlu0 %6771 }
 0x2ff   : > { %18718 = vst [vmem:[#allocation58_spill] sm:$0xff] %v16551_v26  ;;  %v16558_v15 = vrot.slane %v8061_v4, %v14329_v37  ;;  %v8104_v6 = vrot.slane %v8097_v47, %v14327_v31  ;;  %v8112_v50 = vrot.slane %v11842_v49, %v14327_v31  ;;  %v16573_v30 = vrot.slane %v7994_v25, %v14329_v37 }
 0x300   : > { %v16576_v36 = vrot.slane %v8046_v14, %v14329_v37  ;;  %v16579_v18 = vrot.slane %v8062_v34, %v14329_v37  ;;  %v8156_v54 = vrot.slane %v8149_v39, %v14327_v31  ;;  %v8113_v8 = vcombine.low %v8088_v46, %v8096_v61 }
 0x301   : > { %18719 = vst [vmem:[#allocation57_spill] sm:$0xff] %v16573_v30  ;;  %v8077_v10 = vcombine.low %v16548_v24, %v16558_v15  ;;  %v8129_v29 = vcombine.low %v8104_v6, %v8112_v50  ;;  %v8164_v47 = vrot.slane %v11843_v13, %v14327_v31  ;;  %v8011_v49 = vcombine.low %v16551_v26, %v16573_v30 }
 0x302   : > { %18720 = vst [vmem:[#allocation60_spill] sm:$0xff] %v16576_v36  ;;  %18721 = vst [vmem:[#allocation59_spill] sm:$0xff] %v16579_v18  ;;  %v8079_v19 = vcombine.low %v16576_v36, %v16579_v18  ;;  %v8172_v39 = vrot.slane %v8165_v51, %v14327_v31  ;;  %v8180_v45 = vrot.slane %v11844_v21, %v14327_v31 }
 0x303   : > { %v9033_v2 = vpack.c.bf16 %v8077_v10, %v8009_v23  ;;  %v16603_v52 = vrot.slane %v8113_v8, %v14329_v37  ;;  %v16606_v11 = vrot.slane %v8129_v29, %v14329_v37  ;;  %v8181_v55 = vcombine.low %v8156_v54, %v8164_v47 }
 0x304   : > { %v9041_v13 = vpack.c.bf16 %v8079_v19, %v8011_v49  ;;  %v8197_v43 = vcombine.low %v8172_v39, %v8180_v45  ;;  %v8114_v16 = vcombine.high %v8088_v46, %v8096_v61  ;;  %v8130_v28 = vcombine.high %v8104_v6, %v8112_v50  ;;  %v18730_v46 = vld [vmem:[#allocation69_spill] sm:$0xff] }
 0x305   : > { %18722 = vst [vmem:[#allocation62_spill] sm:$0xff] %v16603_v52  ;;  %18723 = vst [vmem:[#allocation61_spill] sm:$0xff] %v16606_v11  ;;  %v16609_v0 = vrot.slane %v7145_v20, %v14327_v31  ;;  %12287 = vmatprep.subr.bf16.mxu1 %v9033_v2  ;;  %v16614_v53 = vrot.slane %v8181_v55, %v14329_v37  ;;  %v8182_v57 = vcombine.high %v8156_v54, %v8164_v47  ;;  %v16627_v20 = vpop.permute.xlu1 %6729  ;;  %v18731_v55 = vld [vmem:[#allocation31_spill] sm:$0xff] }
 0x306   : > { %v8198_v51 = vcombine.high %v8172_v39, %v8180_v45  ;;  %12319 = vmatprep.subr.bf16.mxu0 %v9041_v13  ;;  %12288 = vmatpush3.bf16.msra.mxu1 %v9033_v2  ;;  %v16619_v7 = vrot.slane %v8197_v43, %v14329_v37  ;;  %v16622_v44 = vrot.slane %v8114_v16, %v14329_v37 }
 0x307   : > { %18724 = vst [vmem:[#allocation47_spill] sm:$0xff] %v16614_v53  ;;  %v16625_v3 = vrot.slane %v8130_v28, %v14329_v37  ;;  %v7314_v12 = vcombine.high %v16521_v5, %v16513_v59  ;;  %v7160_v23 = vrot.slane %v7146_v60, %v14327_v31  ;;  %12320 = vmatpush3.bf16.msra.mxu0 %v9041_v13 }
 0x308   : > { %18725 = vst [vmem:[#allocation9_spill] sm:$0xff] %v16619_v7  ;;  %18726 = vst [vmem:[#allocation8_spill] sm:$0xff] %v16622_v44  ;;  %v16637_v4 = vrot.slane %v8182_v57, %v14329_v37  ;;  %v16640_v25 = vrot.slane %v8198_v51, %v14329_v37  ;;  %v7197_v61 = vcombine.low %v18730_v46, %v16611_v41 }
 0x309   : > { %v16616_v21 = vpop.f32.mrb[16].mxu1  ;;  %18727 = vst [vmem:[#allocation43_spill] sm:$0xff] %v16625_v3  ;;  %v8145_v6 = vcombine.low %v16603_v52, %v16606_v11  ;;  %v8213_v60 = vcombine.low %v16614_v53, %v16619_v7  ;;  %v7213_v50 = vcombine.low %v16531_v1, %v16585_v58  ;;  %v7349_v8 = vcombine.low %v16429_v33, %v16489_v40 }
 0x30a   : > { %v16629_v38 = vpop.f32.mrb[17].mxu1  ;;  %v9785_v27 = vsel %vm9778_vm2, %v16616_v21, -inf  ;;  %18728 = vst [vmem:[#allocation7_spill] sm:$0xff] %v16637_v4  ;;  %18729 = vst [vmem:[#allocation10_spill] sm:$0xff] %v16640_v25  ;;  %v7350_v29 = vcombine.high %v16429_v33, %v16489_v40  ;;  %v8147_v47 = vcombine.low %v16622_v44, %v16625_v3  ;;  %v8215_v49 = vcombine.low %v16637_v4, %v16640_v25 }
 0x30b   : > { %v16642_v14 = vpop.f32.mrb[32].mxu0  ;;  %v16644_v34 = vpop.f32.mrb[18].mxu1  ;;  %9786 = vmax.xlane.f32.xlu0 %v9785_v27  ;;  %v16672_v39 = vrot.slane %v7297_v56, %v14329_v37  ;;  %v7161_v45 = vcombine.low %v16524_v22, %v16609_v0  ;;  %v9034_v2 = vpack.c.bf16 %v8213_v60, %v8145_v6  ;;  %v7214_v33 = vcombine.high %v16531_v1, %v16585_v58 }
 0x30c   : > { %v16654_v54 = vpop.f32.mrb[33].mxu0  ;;  %v16656_v10 = vpop.f32.mrb[19].mxu1  ;;  %v7333_v13 = vcombine.low %v18731_v55, %v16463_v42  ;;  %v7334_v43 = vcombine.high %v18731_v55, %v16463_v42  ;;  %v9042_v16 = vpack.c.bf16 %v8215_v49, %v8147_v47  ;;  %v7221_v28 = vrot.slane %v7213_v50, %v14327_v31 }
 0x30d   : > { %v16666_v19 = vpop.f32.mrb[34].mxu0  ;;  %v7162_v56 = vcombine.high %v16524_v22, %v16609_v0  ;;  %v7177_v57 = vcombine.low %v16527_v32, %v7160_v23  ;;  %v7178_v51 = vcombine.high %v16527_v32, %v7160_v23  ;;  %v7198_v1 = vcombine.high %v18730_v46, %v16611_v41  ;;  %12289 = vmatprep.subr.bf16.mxu1 %v9034_v2  ;;  %v16691_v58 = vpop.permute.xlu1 %6777 }
 0x30e   : > { %v16678_v40 = vpop.f32.mrb[35].mxu0  ;;  %v7205_v27 = vrot.slane %v7197_v61, %v14327_v31  ;;  %v7357_v42 = vrot.slane %v7349_v8, %v14327_v31  ;;  %v7364_v6 = vrot.slane %v7350_v29, %v14327_v31  ;;  %12321 = vmatprep.subr.bf16.mxu0 %v9042_v16  ;;  %12290 = vmatpush3.bf16.msra.mxu1 %v9034_v2  ;;  %v9809_v22 = vsel %vm9778_vm2, %v16642_v14, -inf  ;;  %v6826_v47 = vpop.permute.xlu0 %6825 }
 0x30f   : > { %v16702_v32 = vrot.slane %v7298_v17, %v14329_v37  ;;  %v16708_v0 = vrot.slane %v7313_v62, %v14329_v37  ;;  %v7169_v41 = vrot.slane %v7161_v45, %v14329_v37  ;;  %12322 = vmatpush3.bf16.msra.mxu0 %v9042_v16  ;;  %v7228_v23 = vrot.slane %v7214_v33, %v14327_v31 }
 0x310   : > { %v7341_v46 = vrot.slane %v7333_v13, %v14327_v31  ;;  %v7348_v61 = vrot.slane %v7334_v43, %v14327_v31  ;;  %v7229_v60 = vcombine.low %v7205_v27, %v7221_v28  ;;  %v7230_v50 = vcombine.high %v7205_v27, %v7221_v28  ;;  %9810 = vmax.xlane.f32.xlu1 %v9809_v22 }
 0x311   : > { %v7176_v9 = vrot.slane %v7162_v56, %v14329_v37  ;;  %v7185_v63 = vrot.slane %v7177_v57, %v14329_v37  ;;  %v7192_v59 = vrot.slane %v7178_v51, %v14329_v37  ;;  %v7212_v5 = vrot.slane %v7198_v1, %v14327_v31  ;;  %v16721_v33 = vpop.permute.xlu1 %6779 }
 0x312   : > { %v16719_v17 = vrot.slane %v7314_v12, %v14329_v37  ;;  %v7365_v62 = vcombine.low %v7341_v46, %v7357_v42  ;;  %v7366_v8 = vcombine.high %v7341_v46, %v7357_v42  ;;  %v7381_v29 = vcombine.low %v7348_v61, %v7364_v6 }
 0x313   : > { %v7382_v49 = vcombine.high %v7348_v61, %v7364_v6  ;;  %v7245_v45 = vcombine.low %v7212_v5, %v7228_v23  ;;  %v7246_v2 = vcombine.high %v7212_v5, %v7228_v23  ;;  %v7237_v43 = vrot.slane %v7229_v60, %v14329_v37  ;;  %v18732_v6 = vld [vmem:[#allocation45_spill] sm:$0xff] }
 0x314   : > { %v7244_v12 = vrot.slane %v7230_v50, %v14329_v37  ;;  %v8217_v56 = vcombine.low %v7169_v41, %v7176_v9  ;;  %v11845_v57 = vcombine.high %v7169_v41, %v7176_v9  ;;  %v8233_v51 = vcombine.low %v7185_v63, %v7192_v59 }
 0x315   : > { %v11846_v1 = vcombine.high %v7185_v63, %v7192_v59  ;;  %v16740_v22 = vrot.slane %v7365_v62, %v14329_v37  ;;  %v16743_v23 = vrot.slane %v7366_v8, %v14329_v37  ;;  %v16746_v46 = vrot.slane %v7381_v29, %v14329_v37 }
 0x316   : > { %v16753_v60 = vrot.slane %v7382_v49, %v14329_v37  ;;  %v7253_v50 = vrot.slane %v7245_v45, %v14329_v37  ;;  %v7260_v9 = vrot.slane %v7246_v2, %v14329_v37  ;;  %v7417_v63 = vcombine.low %v16627_v20, %v6826_v47 }
 0x317   : > { %v16729_v16 = vpop.f32.mrb[20].mxu1  ;;  %v16731_v28 = vpop.f32.mrb[36].mxu0  ;;  %v8285_v62 = vcombine.low %v7237_v43, %v7244_v12  ;;  %v11847_v8 = vcombine.high %v7237_v43, %v7244_v12  ;;  %v7418_v29 = vcombine.high %v16627_v20, %v6826_v47  ;;  %v7401_v13 = vcombine.low %v18732_v6, %v16691_v58 }
 0x318   : > { %v16733_v27 = vpop.f32.mrb[21].mxu1  ;;  %v16735_v42 = vpop.f32.mrb[37].mxu0  ;;  %v8224_v49 = vrot.slane %v8217_v56, %v14327_v31  ;;  %v8232_v55 = vrot.slane %v11845_v57, %v14327_v31  ;;  %v8240_v45 = vrot.slane %v8233_v51, %v14327_v31  ;;  %v8248_v2 = vrot.slane %v11846_v1, %v14327_v31 }
 0x319   : > { %v16748_v61 = vpop.f32.mrb[22].mxu1  ;;  %v16750_v41 = vpop.f32.mrb[38].mxu0  ;;  %v11850_v44 = vcombine.high %v16708_v0, %v16719_v17  ;;  %v8421_v3 = vcombine.low %v16740_v22, %v16743_v23  ;;  %v11851_v20 = vcombine.high %v16740_v22, %v16743_v23  ;;  %v7402_v47 = vcombine.high %v18732_v6, %v16691_v58  ;;  %v18733_v58 = vld [vmem:[#allocation38_spill] sm:$0xff] }
 0x31a   : > { %v16758_v59 = vpop.f32.mrb[23].mxu1  ;;  %v16760_v5 = vpop.f32.mrb[39].mxu0  ;;  %v8437_v43 = vcombine.low %v16746_v46, %v16753_v60  ;;  %v11852_v12 = vcombine.high %v16746_v46, %v16753_v60  ;;  %v8301_v56 = vcombine.low %v7253_v50, %v7260_v9  ;;  %v11848_v57 = vcombine.high %v7253_v50, %v7260_v9 }
 0x31b   : > { %v16781_v51 = vpop.permute.xlu1 %6827  ;;  %v16784_v1 = vrot.slane %v7417_v63, %v14327_v31  ;;  %v16787_v4 = vrot.slane %v7418_v29, %v14327_v31  ;;  %v16790_v22 = vrot.slane %v7401_v13, %v14327_v31  ;;  %v7469_v6 = vcombine.low %v18733_v58, %v16721_v33  ;;  %v16794_v23 = vpop.permute.xlu0 %6731 }
 0x31c   : > { %v8249_v25 = vcombine.low %v8224_v49, %v8232_v55  ;;  %v8265_v46 = vcombine.low %v8240_v45, %v8248_v2  ;;  %v8292_v60 = vrot.slane %v8285_v62, %v14327_v31  ;;  %v8300_v50 = vrot.slane %v11847_v8, %v14327_v31 }
 0x31d   : > { %v16799_v9 = vrot.slane %v7402_v47, %v14327_v31  ;;  %v7470_v63 = vcombine.high %v18733_v58, %v16721_v33  ;;  %v7485_v13 = vcombine.low %v16794_v23, %v16781_v51  ;;  %v7486_v29 = vcombine.high %v16794_v23, %v16781_v51 }
 0x31e   : > { %v16808_v26 = vrot.slane %v8249_v25, %v14329_v37  ;;  %v16811_v30 = vrot.slane %v8265_v46, %v14329_v37  ;;  %v8308_v62 = vrot.slane %v8301_v56, %v14327_v31  ;;  %v8316_v8 = vrot.slane %v11848_v57, %v14327_v31 }
 0x31f   : > { %v8317_v47 = vcombine.low %v8292_v60, %v8300_v50  ;;  %v8250_v36 = vcombine.high %v8224_v49, %v8232_v55  ;;  %v8266_v18 = vcombine.high %v8240_v45, %v8248_v2  ;;  %v8318_v33 = vcombine.high %v8292_v60, %v8300_v50 }
 0x320   : > { %v7433_v58 = vcombine.low %v16790_v22, %v16784_v1  ;;  %v16818_v52 = vrot.slane %v7469_v6, %v14327_v31  ;;  %v8333_v51 = vcombine.low %v8308_v62, %v8316_v8  ;;  %v8334_v25 = vcombine.high %v8308_v62, %v8316_v8 }
 0x321   : > { %v16821_v23 = vrot.slane %v8317_v47, %v14329_v37  ;;  %v16824_v46 = vrot.slane %v8250_v36, %v14329_v37  ;;  %v16827_v56 = vrot.slane %v8266_v18, %v14329_v37  ;;  %v16830_v55 = vrot.slane %v8318_v33, %v14329_v37 }
 0x322   : > { %v7434_v49 = vcombine.high %v16790_v22, %v16784_v1  ;;  %v16835_v45 = vrot.slane %v7485_v13, %v14327_v31  ;;  %v16838_v2 = vrot.slane %v8333_v51, %v14329_v37  ;;  %v16841_v57 = vrot.slane %v8334_v25, %v14329_v37 }
 0x323   : > { %v8281_v36 = vcombine.low %v16808_v26, %v16811_v30  ;;  %v18734_v18 = vcombine.low %v16672_v39, %v16702_v32  ;;  %v18735_v1 = vcombine.high %v16672_v39, %v16702_v32  ;;  %v18736_v60 = vcombine.low %v16708_v0, %v16719_v17 }
 0x324   : > { %v8349_v13 = vcombine.low %v16821_v23, %v16838_v2  ;;  %v8283_v62 = vcombine.low %v16824_v46, %v16827_v56  ;;  %v8351_v8 = vcombine.low %v16830_v55, %v16841_v57  ;;  %v8384_v47 = vrot.slane %v11850_v44, %v14327_v31 }
 0x325   : > { %v8360_v6 = vrot.slane %v18734_v18, %v14327_v31  ;;  %v8368_v22 = vrot.slane %v18735_v1, %v14327_v31  ;;  %v8376_v50 = vrot.slane %v18736_v60, %v14327_v31  ;;  %v8428_v39 = vrot.slane %v8421_v3, %v14327_v31 }
 0x326   : > { %v8436_v32 = vrot.slane %v11851_v20, %v14327_v31  ;;  %v8444_v51 = vrot.slane %v8437_v43, %v14327_v31  ;;  %v9035_v0 = vpack.c.bf16 %v8349_v13, %v8281_v36  ;;  %v9043_v17 = vpack.c.bf16 %v8351_v8, %v8283_v62 }
 0x327   : > { %v8385_v33 = vcombine.low %v8360_v6, %v8368_v22  ;;  %v8401_v25 = vcombine.low %v8376_v50, %v8384_v47  ;;  %v8452_v18 = vrot.slane %v11852_v12, %v14327_v31  ;;  %v8386_v11 = vcombine.high %v8360_v6, %v8368_v22 }
 0x328   : > { %v8453_v60 = vcombine.low %v8428_v39, %v8436_v32  ;;  %v8402_v53 = vcombine.high %v8376_v50, %v8384_v47  ;;  %12291 = vmatprep.subr.bf16.mxu1 %v9035_v0  ;;  %12323 = vmatprep.subr.bf16.mxu0 %v9043_v17  ;;  %v8454_v20 = vcombine.high %v8428_v39, %v8436_v32  ;;  %v9803_v6 = vsel %vm9778_vm2, %v16654_v54, -inf }
 0x329   : > { %v16869_v1 = vrot.slane %v8385_v33, %v14329_v37  ;;  %v16872_v44 = vrot.slane %v8401_v25, %v14329_v37  ;;  %v8469_v3 = vcombine.low %v8444_v51, %v8452_v18  ;;  %12292 = vmatpush3.bf16.msra.mxu1 %v9035_v0  ;;  %12324 = vmatpush3.bf16.msra.mxu0 %v9043_v17  ;;  %v9779_v62 = vsel %vm9778_vm2, %v16629_v38, -inf }
 0x32a   : > { %v16875_v43 = vrot.slane %v8453_v60, %v14329_v37  ;;  %v16878_v12 = vrot.slane %v8386_v11, %v14329_v37  ;;  %v16881_v36 = vrot.slane %v8402_v53, %v14329_v37  ;;  %v16889_v50 = vrot.slane %v8454_v20, %v14329_v37  ;;  %9804 = vmax.xlane.f32.xlu1 %v9803_v6 }
 0x32b   : > { %v16886_v22 = vrot.slane %v8469_v3, %v14329_v37  ;;  %v8470_v13 = vcombine.high %v8444_v51, %v8452_v18  ;;  %v7449_v11 = vcombine.low %v16799_v9, %v16787_v4  ;;  %v7450_v53 = vcombine.high %v16799_v9, %v16787_v4  ;;  %9780 = vmax.xlane.f32.xlu0 %v9779_v62 }
 0x32c   : > { %v7484_v8 = vrot.slane %v7470_v63, %v14327_v31  ;;  %v7500_v47 = vrot.slane %v7486_v29, %v14327_v31  ;;  %v7441_v33 = vrot.slane %v7433_v58, %v14329_v37  ;;  %v8417_v39 = vcombine.low %v16869_v1, %v16872_v44 }
 0x32d   : > { %v8485_v32 = vcombine.low %v16875_v43, %v16886_v22  ;;  %v16905_v51 = vrot.slane %v8470_v13, %v14329_v37  ;;  %v7448_v0 = vrot.slane %v7434_v49, %v14329_v37  ;;  %v7501_v4 = vcombine.low %v16818_v52, %v16835_v45 }
 0x32e   : > { %v7502_v9 = vcombine.high %v16818_v52, %v16835_v45  ;;  %v8078_v63 = vcombine.high %v16548_v24, %v16558_v15  ;;  %v8419_v58 = vcombine.low %v16878_v12, %v16881_v36  ;;  %v8010_v25 = vcombine.high %v16516_v35, %v16534_v48 }
 0x32f   : > { %v9036_v29 = vpack.c.bf16 %v8485_v32, %v8417_v39  ;;  %v8487_v17 = vcombine.low %v16889_v50, %v16905_v51  ;;  %v7517_v49 = vcombine.low %v7484_v8, %v7500_v47  ;;  %v7518_v18 = vcombine.high %v7484_v8, %v7500_v47 }
 0x330   : > { %v16920_v3 = vpack.c.bf16 %v8078_v63, %v8010_v25  ;;  %v7457_v52 = vrot.slane %v7449_v11, %v14329_v37  ;;  %v7464_v24 = vrot.slane %v7450_v53, %v14329_v37  ;;  %v7509_v15 = vrot.slane %v7501_v4, %v14329_v37 }
 0x331   : > { %12293 = vmatprep.subr.bf16.mxu1 %v9036_v29  ;;  %v9044_v60 = vpack.c.bf16 %v8487_v17, %v8419_v58  ;;  %v7516_v45 = vrot.slane %v7502_v9, %v14329_v37  ;;  %v8489_v20 = vcombine.low %v7441_v33, %v7448_v0  ;;  %v11853_v35 = vcombine.high %v7441_v33, %v7448_v0 }
 0x332   : > { %18737 = vst [vmem:[#allocation42_spill] sm:$0xff] %v16920_v3  ;;  %12294 = vmatpush3.bf16.msra.mxu1 %v9036_v29  ;;  %v7525_v48 = vrot.slane %v7517_v49, %v14329_v37  ;;  %v7532_v6 = vrot.slane %v7518_v18, %v14329_v37  ;;  %v9782_v13 = vsel %vm9778_vm2, %v16656_v10, -inf  ;;  %v8505_v62 = vcombine.low %v7457_v52, %v7464_v24 }
 0x333   : > { %12325 = vmatprep.subr.bf16.mxu0 %v9044_v60  ;;  %12303 = vmatprep.subr.bf16.mxu1 %v16920_v3  ;;  %v11854_v11 = vcombine.high %v7457_v52, %v7464_v24  ;;  %v8557_v53 = vcombine.low %v7509_v15, %v7516_v45  ;;  %v11855_v8 = vcombine.high %v7509_v15, %v7516_v45 }
 0x334   : > { %12326 = vmatpush3.bf16.msra.mxu0 %v9044_v60  ;;  %9783 = vmax.xlane.f32.xlu1 %v9782_v13  ;;  %v8573_v47 = vcombine.low %v7525_v48, %v7532_v6  ;;  %v16932_v39 = vrot.slane %v8489_v20, %v14327_v31  ;;  %v16935_v32 = vrot.slane %v11853_v35, %v14327_v31 }
 0x335   : > { %v11856_v33 = vcombine.high %v7525_v48, %v7532_v6  ;;  %v16938_v0 = vrot.slane %v8505_v62, %v14327_v31  ;;  %v16941_v4 = vrot.slane %v11854_v11, %v14327_v31  ;;  %v16944_v9 = vrot.slane %v8557_v53, %v14327_v31 }
 0x336   : > { %v8521_v29 = vcombine.low %v16932_v39, %v16935_v32  ;;  %v16953_v17 = vrot.slane %v11855_v8, %v14327_v31  ;;  %v16956_v25 = vrot.slane %v8573_v47, %v14327_v31  ;;  %v9788_v47 = vsel %vm9778_vm2, %v16644_v34, -inf }
 0x337   : > { %v8537_v58 = vcombine.low %v16938_v0, %v16941_v4  ;;  %v16965_v52 = vrot.slane %v11856_v33, %v14327_v31  ;;  %9789 = vmax.xlane.f32.xlu0 %v9788_v47  ;;  %v8418_v47 = vcombine.high %v16869_v1, %v16872_v44 }
 0x338   : > { %v8589_v24 = vcombine.low %v16944_v9, %v16953_v17  ;;  %v8529_v35 = vrot.slane %v8521_v29, %v14329_v37  ;;  %v9812_v29 = vsel %vm9778_vm2, %v16666_v19, -inf }
 0x339   : > { %v8545_v48 = vrot.slane %v8537_v58, %v14329_v37  ;;  %v8605_v13 = vcombine.low %v16956_v25, %v16965_v52  ;;  %v9797_v58 = vsel %vm9778_vm2, %v16729_v16, -inf }
 0x33a   : > { %v8597_v6 = vrot.slane %v8589_v24, %v14329_v37  ;;  %9798 = vmax.xlane.f32.xlu1 %v9797_v58  ;;  %v9821_v24 = vsel %vm9778_vm2, %v16731_v28, -inf  ;;  %v9791_v58 = vsel %vm9778_vm2, %v16733_v27, -inf }
 0x33b   : > { %v8613_v11 = vrot.slane %v8605_v13, %v14329_v37  ;;  %v8553_v53 = vcombine.low %v8529_v35, %v8545_v48  ;;  %9813 = vmax.xlane.f32.xlu0 %v9812_v29  ;;  %v9806_v13 = vsel %vm9778_vm2, %v16678_v40, -inf  ;;  %v8486_v29 = vcombine.high %v16875_v43, %v16886_v22 }
 0x33d   : > { %v8621_v8 = vcombine.low %v8597_v6, %v8613_v11 }
 0x33e   : > { %v16946_v63 = vpop.f32.mrb[24].mxu1  ;;  %9822 = vmax.xlane.f32.xlu1 %v9821_v24 }
 0x33f   : > { %v16958_v49 = vpop.f32.mrb[25].mxu1  ;;  %v16985_v33 = vpack.c.bf16 %v8621_v8, %v8553_v53  ;;  %9807 = vmax.xlane.f32.xlu0 %v9806_v13  ;;  %v8282_v53 = vcombine.high %v16808_v26, %v16811_v30  ;;  %v8350_v8 = vcombine.high %v16821_v23, %v16838_v2  ;;  %v17014_v30 = vpack.c.bf16 %v8486_v29, %v8418_v47 }
 0x340   : > { %v16962_v60 = vpop.f32.mrb[26].mxu1  ;;  %v8284_v23 = vcombine.high %v16824_v46, %v16827_v56  ;;  %v8352_v2 = vcombine.high %v16830_v55, %v16841_v57  ;;  %v8488_v56 = vcombine.high %v16889_v50, %v16905_v51  ;;  %v9815_v55 = vsel %vm9778_vm2, %v16735_v42, -inf }
 0x341   : > { %v16960_v18 = vpop.f32.mrb[40].mxu0  ;;  %v16971_v45 = vpop.f32.mrb[27].mxu1  ;;  %18738 = vst [vmem:[#allocation44_spill] sm:$0xff] %v16985_v33  ;;  %12351 = vmatprep.subr.bf16.mxu0 %v16985_v33  ;;  %v9800_v33 = vsel %vm9778_vm2, %v16748_v61, -inf  ;;  %v17012_v26 = vpack.c.bf16 %v8350_v8, %v8282_v53  ;;  %18740 = vst [vmem:[#allocation14_spill] sm:$0xff] %v17014_v30  ;;  %v8420_v8 = vcombine.high %v16878_v12, %v16881_v36  ;;  %v9824_v57 = vsel %vm9778_vm2, %v16750_v41, -inf }
 0x342   : > { %v16969_v15 = vpop.f32.mrb[41].mxu0  ;;  %9792 = vmax.xlane.f32.xlu1 %v9791_v58  ;;  %v17028_v53 = vpack.c.bf16 %v8352_v2, %v8284_v23  ;;  %v9833_v12 = vsel %vm9778_vm2, %v16946_v63, -inf  ;;  %v8554_v36 = vcombine.high %v8529_v35, %v8545_v48  ;;  %v8622_v29 = vcombine.high %v8597_v6, %v8613_v11 }
 0x343   : > { %v16973_v20 = vpop.f32.mrb[42].mxu0  ;;  %18739 = vst [vmem:[#allocation13_spill] sm:$0xff] %v17012_v26  ;;  %9801 = vmax.xlane.f32.xlu0 %v9800_v33  ;;  %v17042_v33 = vpack.c.bf16 %v8488_v56, %v8420_v8  ;;  %v9794_v58 = vsel %vm9778_vm2, %v16758_v59, -inf  ;;  %v9818_v51 = vsel %vm9778_vm2, %v16760_v5, -inf  ;;  %v9857_v23 = vsel %vm9778_vm2, %v16960_v18, -inf }
 0x344   : > { %v16980_v62 = vpop.f32.mrb[43].mxu0  ;;  %18741 = vst [vmem:[#allocation41_spill] sm:$0xff] %v17028_v53  ;;  %v17048_v50 = vpack.c.bf16 %v8622_v29, %v8554_v36  ;;  %v9836_v2 = vsel %vm9778_vm2, %v16962_v60, -inf  ;;  %v9827_v35 = vsel %vm9778_vm2, %v16958_v49, -inf  ;;  %v8522_v48 = vcombine.high %v16932_v39, %v16935_v32 }
 0x345   : > { %18742 = vst [vmem:[#allocation39_spill] sm:$0xff] %v17042_v33  ;;  %v9860_v6 = vsel %vm9778_vm2, %v16973_v20, -inf  ;;  %v9851_v11 = vsel %vm9778_vm2, %v16969_v15, -inf  ;;  %v8538_v8 = vcombine.high %v16938_v0, %v16941_v4  ;;  %v8606_v39 = vcombine.high %v16956_v25, %v16965_v52 }
 0x346   : > { %9816 = vmax.xlane.f32.xlu1 %v9815_v55  ;;  %18743 = vst [vmem:[#allocation37_spill] sm:$0xff] %v17048_v50  ;;  %v8536_v56 = vrot.slane %v8522_v48, %v14329_v37  ;;  %v9830_v32 = vsel %vm9778_vm2, %v16971_v45, -inf }
 0x347   : > { %9825 = vmax.xlane.f32.xlu0 %v9824_v57  ;;  %v8552_v55 = vrot.slane %v8538_v8, %v14329_v37  ;;  %v8590_v57 = vcombine.high %v16944_v9, %v16953_v17  ;;  %v8620_v29 = vrot.slane %v8606_v39, %v14329_v37  ;;  %v9854_v9 = vsel %vm9778_vm2, %v16980_v62, -inf }
 0x349   : > { %v8555_v36 = vcombine.low %v8536_v56, %v8552_v55  ;;  %v8556_v0 = vcombine.high %v8536_v56, %v8552_v55  ;;  %v8604_v4 = vrot.slane %v8590_v57, %v14329_v37 }
 0x34a   : > { %9834 = vmax.xlane.f32.xlu1 %v9833_v12 }
 0x34b   : > { %9795 = vmax.xlane.f32.xlu0 %v9794_v58  ;;  %v8623_v58 = vcombine.low %v8604_v4, %v8620_v29 }
 0x34d   : > { %v17082_v25 = vpack.c.bf16 %v8623_v58, %v8555_v36  ;;  %v17120_v58 = vpop.permute.xlu1 %6735 }
 0x34e   : > { %9858 = vmax.xlane.f32.xlu1 %v9857_v23  ;;  %18746 = vst [vmem:[#allocation54_spill] sm:$0xff] %v17120_v58 }
 0x34f   : > { %9819 = vmax.xlane.f32.xlu0 %v9818_v51  ;;  %v8624_v51 = vcombine.high %v8604_v4, %v8620_v29  ;;  %18744 = vst [vmem:[#allocation34_spill] sm:$0xff] %v17082_v25 }
 0x351   : > { %v17084_v52 = vpack.c.bf16 %v8624_v51, %v8556_v0 }
 0x352   : > { %9828 = vmax.xlane.f32.xlu1 %v9827_v35 }
 0x353   : > { %9837 = vmax.xlane.f32.xlu0 %v9836_v2  ;;  %18745 = vst [vmem:[#allocation52_spill] sm:$0xff] %v17084_v52 }
 0x356   : > { %9852 = vmax.xlane.f32.xlu1 %v9851_v11 }
 0x357   : > { %9861 = vmax.xlane.f32.xlu0 %v9860_v6 }
 0x358   : > { %v17008_v24 = vpop.f32.mrb[28].mxu1  ;;  %v17010_v13 = vpop.f32.mrb[44].mxu0 }
 0x359   : > { %v17020_v1 = vpop.f32.mrb[29].mxu1  ;;  %v17022_v44 = vpop.f32.mrb[45].mxu0  ;;  %v9845_v12 = vsel %vm9778_vm2, %v17008_v24, -inf  ;;  %v9869_v17 = vsel %vm9778_vm2, %v17010_v13, -inf }
 0x35a   : > { %v17024_v43 = vpop.f32.mrb[46].mxu0  ;;  %v17026_v22 = vpop.f32.mrb[30].mxu1  ;;  %9846 = vmax.xlane.f32.xlu1 %v9845_v12  ;;  %v9839_v2 = vsel %vm9778_vm2, %v17020_v1, -inf  ;;  %v9863_v48 = vsel %vm9778_vm2, %v17022_v44, -inf }
 0x35b   : > { %v17032_v47 = vpop.f32.mrb[31].mxu1  ;;  %v17034_v46 = vpop.f32.mrb[47].mxu0  ;;  %9831 = vmax.xlane.f32.xlu0 %v9830_v32  ;;  %v9848_v23 = vsel %vm9778_vm2, %v17026_v22, -inf  ;;  %v9872_v35 = vsel %vm9778_vm2, %v17024_v43, -inf }
 0x35c   : > { %v9842_v6 = vsel %vm9778_vm2, %v17032_v47, -inf  ;;  %v9866_v39 = vsel %vm9778_vm2, %v17034_v46, -inf }
 0x35e   : > { %9870 = vmax.xlane.f32.xlu1 %v9869_v17  ;;  %v17126_v17 = vpop.permute.xlu1 %6783 }
 0x35f   : > { %9855 = vmax.xlane.f32.xlu0 %v9854_v9  ;;  %18747 = vst [vmem:[#allocation51_spill] sm:$0xff] %v17126_v17 }
 0x362   : > { %9840 = vmax.xlane.f32.xlu1 %v9839_v2 }
 0x363   : > { %9849 = vmax.xlane.f32.xlu0 %v9848_v23 }
 0x366   : > { %9864 = vmax.xlane.f32.xlu1 %v9863_v48 }
 0x367   : > { %9873 = vmax.xlane.f32.xlu0 %v9872_v35  ;;  %v17132_v35 = vpop.permute.xlu1 %6831 }
 0x368   : > { %18748 = vst [vmem:[#allocation32_spill] sm:$0xff] %v17132_v35 }
 0x36b   : > { %9843 = vmax.xlane.f32.xlu0 %v9842_v6  ;;  %v17136_v6 = vpop.permute.xlu0 %6733 }
 0x36c   : > { %18749 = vst [vmem:[#allocation28_spill] sm:$0xff] %v17136_v6 }
 0x36f   : > { %9867 = vmax.xlane.f32.xlu0 %v9866_v39  ;;  %v17140_v39 = vpop.permute.xlu0 %6781 }
 0x370   : > { %18751 = vst [vmem:[#allocation63_spill] sm:$0xff] %v17140_v39 }
 0x37d   : > { %v17096_v11 = vpop.f32.mrb[32].mxu1 }
 0x37e   : > { %v17098_v8 = vpop.f32.mrb[33].mxu1  ;;  %v9881_v56 = vsel %vm9778_vm2, %v17096_v11, -inf }
 0x37f   : > { %v17102_v55 = vpop.f32.mrb[48].mxu0  ;;  %9882 = vmax.xlane.f32.xlu1 %v9881_v56  ;;  %v17104_v57 = vpop.f32.mrb[34].mxu1  ;;  %v9875_v51 = vsel %vm9778_vm2, %v17098_v8, -inf }
 0x380   : > { %v17108_v32 = vpop.f32.mrb[49].mxu0  ;;  %v17110_v12 = vpop.f32.mrb[35].mxu1  ;;  %v9884_v4 = vsel %vm9778_vm2, %v17104_v57, -inf  ;;  %v9905_v29 = vsel %vm9778_vm2, %v17102_v55, -inf }
 0x381   : > { %v17112_v36 = vpop.f32.mrb[50].mxu0  ;;  %9885 = vmax.xlane.f32.xlu0 %v9884_v4  ;;  %v9899_v23 = vsel %vm9778_vm2, %v17108_v32, -inf  ;;  %v9878_v2 = vsel %vm9778_vm2, %v17110_v12, -inf  ;;  %v17138_v56 = vpop.permute.xlu1 %6737 }
 0x382   : > { %v17114_v0 = vpop.f32.mrb[51].mxu0  ;;  %v9908_v9 = vsel %vm9778_vm2, %v17112_v36, -inf  ;;  %18750 = vst [vmem:[#allocation64_spill] sm:$0xff] %v17138_v56 }
 0x383   : > { %9906 = vmax.xlane.f32.xlu1 %v9905_v29  ;;  %v9902_v48 = vsel %vm9778_vm2, %v17114_v0, -inf  ;;  %v17144_v29 = vpop.permute.xlu0 %6829 }
 0x384   : > { %18753 = vst [vmem:[#allocation65_spill] sm:$0xff] %v17144_v29 }
 0x385   : > { %9909 = vmax.xlane.f32.xlu0 %v9908_v9  ;;  %v17142_v4 = vpop.permute.xlu1 %6785 }
 0x386   : > { %18752 = vst [vmem:[#allocation66_spill] sm:$0xff] %v17142_v4 }
 0x387   : > { %9876 = vmax.xlane.f32.xlu1 %v9875_v51  ;;  %v17148_v9 = vpop.permute.xlu0 %6739 }
 0x388   : > { %18755 = vst [vmem:[#allocation67_spill] sm:$0xff] %v17148_v9 }
 0x389   : > { %9879 = vmax.xlane.f32.xlu0 %v9878_v2  ;;  %v17146_v51 = vpop.permute.xlu1 %6787 }
 0x38a   : > { %18754 = vst [vmem:[#allocation68_spill] sm:$0xff] %v17146_v51 }
 0x38b   : > { %9900 = vmax.xlane.f32.xlu1 %v9899_v23  ;;  %v17152_v2 = vpop.permute.xlu0 %6833 }
 0x38c   : > { %18757 = vst [vmem:[#allocation12_spill] sm:$0xff] %v17152_v2 }
 0x38d   : > { %9903 = vmax.xlane.f32.xlu0 %v9902_v48  ;;  %v17150_v23 = vpop.permute.xlu1 %6835 }
 0x38e   : > { %18756 = vst [vmem:[#allocation11_spill] sm:$0xff] %v17150_v23 }
 0x38f   : > { %v17178_v23 = vpop.permute.xlu0 %6741 }
 0x390   : > { %18762 = vst [vmem:[#allocation20_spill] sm:$0xff] %v17178_v23 }
 0x391   : > { %v17154_v52 = vpop.permute.xlu1 %6743 }
 0x392   : > { %18758 = vst [vmem:[#allocation18_spill] sm:$0xff] %v17154_v52 }
 0x393   : > { %v17204_v37 = vpop.permute.xlu0 %6789 }
 0x394   : > { %18772 = vst [vmem:[#allocation23_spill] sm:$0xff] %v17204_v37 }
 0x395   : > { %v17180_v7 = vpop.permute.xlu1 %6791 }
 0x396   : > { %18763 = vst [vmem:[#allocation21_spill] sm:$0xff] %v17180_v7 }
 0x397   : > { %v17214_v29 = vpop.permute.xlu0 %6837 }
 0x398   : > { %18774 = vst [vmem:[#allocation25_spill] sm:$0xff] %v17214_v29 }
 0x399   : > { %v17206_v23 = vpop.permute.xlu1 %6839 }
 0x39a   : > { %18773 = vst [vmem:[#allocation24_spill] sm:$0xff] %v17206_v23 }
 0x39d   : > { %v9811_v39 = vpop.xlane.xlu1 %9810 }
 0x3ad   : > { %v17156_v48 = vpop.f32.mrb[36].mxu1 }
 0x3ae   : > { %v17158_v25 = vpop.f32.mrb[52].mxu0  ;;  %v17160_v50 = vpop.f32.mrb[37].mxu1  ;;  %v9893_v53 = vsel %vm9778_vm2, %v17156_v48, -inf }
 0x3af   : > { %v17162_v33 = vpop.f32.mrb[53].mxu0  ;;  %9894 = vmax.xlane.f32.xlu1 %v9893_v53  ;;  %v17168_v26 = vpop.f32.mrb[38].mxu1  ;;  %v9917_v9 = vsel %vm9778_vm2, %v17158_v25, -inf }
 0x3b0   : > { %18759 = vst [vmem:[#allocation22_spill] sm:$0xff] %v17162_v33  ;;  %v17166_v30 = vpop.f32.mrb[54].mxu0  ;;  %v17170_v51 = vpop.f32.mrb[39].mxu1  ;;  %v9896_v52 = vsel %vm9778_vm2, %v17168_v26, -inf  ;;  %v9911_v31 = vsel %vm9778_vm2, %v17162_v33, -inf }
 0x3b1   : > { %18760 = vst [vmem:[#allocation53_spill] sm:$0xff] %v17166_v30  ;;  %v17172_v3 = vpop.f32.mrb[55].mxu0  ;;  %9897 = vmax.xlane.f32.xlu0 %v9896_v52  ;;  %v9920_v53 = vsel %vm9778_vm2, %v17166_v30, -inf  ;;  %v9887_v52 = vsel %vm9778_vm2, %v17160_v50, -inf }
 0x3b2   : > { %18761 = vst [vmem:[#allocation33_spill] sm:$0xff] %v17172_v3 }
 0x3b3   : > { %9918 = vmax.xlane.f32.xlu1 %v9917_v9 }
 0x3b5   : > { %9921 = vmax.xlane.f32.xlu0 %v9920_v53  ;;  %v17186_v56 = vpop.f32.mrb[40].mxu1  ;;  %v9890_v53 = vsel %vm9778_vm2, %v17170_v51, -inf }
 0x3b6   : > { %v17184_v4 = vpop.f32.mrb[56].mxu0  ;;  %18765 = vst [vmem:[#allocation16_spill] sm:$0xff] %v17186_v56  ;;  %v17188_v2 = vpop.f32.mrb[41].mxu1  ;;  %v9929_v6 = vsel %vm9778_vm2, %v17186_v56, -inf }
 0x3b7   : > { %18764 = vst [vmem:[#allocation17_spill] sm:$0xff] %v17184_v4  ;;  %18766 = vst [vmem:[#allocation46_spill] sm:$0xff] %v17188_v2  ;;  %v17190_v17 = vpop.f32.mrb[57].mxu0  ;;  %9888 = vmax.xlane.f32.xlu1 %v9887_v52  ;;  %v17196_v7 = vpop.f32.mrb[42].mxu1  ;;  %v9914_v52 = vsel %vm9778_vm2, %v17172_v3, -inf  ;;  %v9923_v3 = vsel %vm9778_vm2, %v17188_v2, -inf }
 0x3b8   : > { %18767 = vst [vmem:[#allocation48_spill] sm:$0xff] %v17190_v17  ;;  %v17194_v58 = vpop.f32.mrb[58].mxu0  ;;  %18769 = vst [vmem:[#allocation50_spill] sm:$0xff] %v17196_v7  ;;  %v17198_v9 = vpop.f32.mrb[43].mxu1  ;;  %v9932_v37 = vsel %vm9778_vm2, %v17196_v7, -inf }
 0x3b9   : > { %18768 = vst [vmem:[#allocation49_spill] sm:$0xff] %v17194_v58  ;;  %18770 = vst [vmem:[#allocation55_spill] sm:$0xff] %v17198_v9  ;;  %v17200_v35 = vpop.f32.mrb[59].mxu0  ;;  %9891 = vmax.xlane.f32.xlu0 %v9890_v53  ;;  %v9953_v53 = vsel %vm9778_vm2, %v17184_v4, -inf  ;;  %v9805_v23 = vpop.xlane.xlu1 %9804  ;;  %v9926_v29 = vsel %vm9778_vm2, %v17198_v9, -inf }
 0x3ba   : > { %18771 = vst [vmem:[#allocation56_spill] sm:$0xff] %v17200_v35 }
 0x3bb   : > { %9912 = vmax.xlane.f32.xlu1 %v9911_v31  ;;  %v9787_v31 = vpop.xlane.xlu0 %9786 }
 0x3bd   : > { %9915 = vmax.xlane.f32.xlu0 %v9914_v52  ;;  %v9956_v52 = vsel %vm9778_vm2, %v17194_v58, -inf }
 0x3bf   : > { %9930 = vmax.xlane.f32.xlu1 %v9929_v6  ;;  %v9981_v6 = vsub.f32 %v16642_v14, %v9811_v39  ;;  %v9781_v7 = vpop.xlane.xlu0 %9780  ;;  %v9979_v39 = vsub.f32 %v16654_v54, %v9805_v23 }
 0x3c0   : > { %v9971_v30 = vsub.f32 %v16629_v38, %v9781_v7 }
 0x3c1   : > { %9933 = vmax.xlane.f32.xlu0 %v9932_v37  ;;  %v9973_v37 = vsub.f32 %v16616_v21, %v9787_v31  ;;  %v10055_v14 = vmul.f32 1.442695, %v9981_v6  ;;  %v9950_v31 = vsel %vm9778_vm2, %v17200_v35, -inf  ;;  %v10051_v54 = vmul.f32 1.442695, %v9979_v39 }
 0x3c2   : > { %v10035_v35 = vmul.f32 1.442695, %v9971_v30 }
 0x3c3   : > { %9954 = vmax.xlane.f32.xlu1 %v9953_v53  ;;  %v9784_v53 = vpop.xlane.xlu1 %9783  ;;  %12501 = vpow2.f32 %v10055_v14 }
 0x3c4   : > { %v9972_v23 = vsub.f32 %v16656_v10, %v9784_v53  ;;  %v9790_v33 = vpop.xlane.xlu0 %9789 }
 0x3c5   : > { %9957 = vmax.xlane.f32.xlu0 %v9956_v52  ;;  %v9947_v52 = vsel %vm9778_vm2, %v17190_v17, -inf  ;;  %v10039_v17 = vmul.f32 1.442695, %v9973_v37  ;;  %v9974_v7 = vsub.f32 %v16644_v34, %v9790_v33 }
 0x3c6   : > { %v10037_v38 = vmul.f32 1.442695, %v9972_v23 }
 0x3c7   : > { %9924 = vmax.xlane.f32.xlu1 %v9923_v3  ;;  %12503 = vpow2.f32 %v10039_v17  ;;  %v10041_v10 = vmul.f32 1.442695, %v9974_v7  ;;  %v9799_v17 = vpop.xlane.xlu1 %9798 }
 0x3c8   : > { %12505 = vpow2.f32 %v10051_v54  ;;  %v9814_v39 = vpop.xlane.xlu0 %9813 }
 0x3c9   : > { %9927 = vmax.xlane.f32.xlu0 %v9926_v29  ;;  %12507 = vpow2.f32 %v10035_v35  ;;  %v9982_v33 = vsub.f32 %v16666_v19, %v9814_v39 }
 0x3ca   : > { %v17228_v4 = vpop.f32.mrb[60].mxu0  ;;  %v17230_v56 = vpop.f32.mrb[44].mxu1  ;;  %12509 = vpow2.f32 %v10037_v38 }
 0x3cb   : > { %v17234_v58 = vpop.f32.mrb[45].mxu1  ;;  %v17236_v3 = vpop.f32.mrb[61].mxu0  ;;  %9948 = vmax.xlane.f32.xlu1 %v9947_v52  ;;  %v9941_v6 = vsel %vm9778_vm2, %v17230_v56, -inf  ;;  %v9965_v37 = vsel %vm9778_vm2, %v17228_v4, -inf  ;;  %12511 = vpow2.f32 %v10041_v10 }
 0x3cc   : > { %v17239_v29 = vpop.f32.mrb[62].mxu0  ;;  %v17241_v21 = vpop.f32.mrb[46].mxu1  ;;  %v9935_v53 = vsel %vm9778_vm2, %v17234_v58, -inf  ;;  %v9959_v35 = vsel %vm9778_vm2, %v17236_v3, -inf }
 0x3cd   : > { %v17245_v9 = vpop.f32.mrb[47].mxu1  ;;  %v17247_v2 = vpop.f32.mrb[63].mxu0  ;;  %9951 = vmax.xlane.f32.xlu0 %v9950_v31  ;;  %v9944_v52 = vsel %vm9778_vm2, %v17241_v21, -inf  ;;  %v9968_v14 = vsel %vm9778_vm2, %v17239_v29, -inf }
 0x3ce   : > { %v9938_v30 = vsel %vm9778_vm2, %v17245_v9, -inf  ;;  %v17264_v34 = vpop.eup %12501  ;;  %v9962_v54 = vsel %vm9778_vm2, %v17247_v2, -inf  ;;  %v9823_v23 = vpop.xlane.xlu1 %9822 }
 0x3cf   : > { %9942 = vmax.xlane.f32.xlu1 %v9941_v6  ;;  %18775 = vst [vmem:[#allocation26_spill] sm:$0xff] %v17264_v34  ;;  %v10057_v6 = vmul.f32 1.442695, %v9982_v33  ;;  %v9985_v19 = vsub.f32 %v16731_v28, %v9823_v23 }
 0x3d1   : > { %9945 = vmax.xlane.f32.xlu0 %v9944_v52  ;;  %v17269_v31 = vpop.eup %12503  ;;  %v9808_v52 = vpop.xlane.xlu0 %9807  ;;  %12513 = vpow2.f32 %v10057_v6 }
 0x3d2   : > { %v17275_v7 = vpop.eup %12505  ;;  %v9980_v38 = vsub.f32 %v16678_v40, %v9808_v52  ;;  %v9793_v33 = vpop.xlane.xlu1 %9792 }
 0x3d3   : > { %9966 = vmax.xlane.f32.xlu1 %v9965_v37  ;;  %v10193_v37 = vsel %vm9778_vm2, %v17264_v34, 0.0  ;;  %v17281_v10 = vpop.eup %12507 }
 0x3d4   : > { %v10053_v39 = vmul.f32 1.442695, %v9980_v38  ;;  %v17286_v34 = vpop.eup %12509  ;;  %v10163_v40 = vsel %vm9778_vm2, %v17281_v10, 0.0 }
 0x3d5   : > { %9969 = vmax.xlane.f32.xlu0 %v9968_v14  ;;  %v10169_v14 = vsel %vm9778_vm2, %v17269_v31, 0.0  ;;  %v17290_v28 = vpop.eup %12511  ;;  %v10166_v52 = vsel %vm9778_vm2, %v17286_v34, 0.0 }
 0x3d6   : > { %v10172_v38 = vsel %vm9778_vm2, %v17290_v28, 0.0 }
 0x3d7   : > { %9936 = vmax.xlane.f32.xlu1 %v9935_v53  ;;  %v9977_v53 = vsub.f32 %v16729_v16, %v9799_v17  ;;  %v9975_v16 = vsub.f32 %v16733_v27, %v9793_v33  ;;  %v9817_v17 = vpop.xlane.xlu1 %9816 }
 0x3d9   : > { %9939 = vmax.xlane.f32.xlu0 %v9938_v30  ;;  %v10063_v30 = vmul.f32 1.442695, %v9985_v19  ;;  %v10047_v6 = vmul.f32 1.442695, %v9977_v53 }
 0x3db   : > { %9960 = vmax.xlane.f32.xlu1 %v9959_v35  ;;  %v9802_v35 = vpop.xlane.xlu0 %9801  ;;  %12515 = vpow2.f32 %v10063_v30  ;;  %v17299_v53 = vpop.eup %12513 }
 0x3dc   : > { %12517 = vpow2.f32 %v10053_v39  ;;  %v9978_v19 = vsub.f32 %v16748_v61, %v9802_v35  ;;  %v9835_v39 = vpop.xlane.xlu1 %9834  ;;  %v10196_v61 = vsel %vm9778_vm2, %v17299_v53, 0.0 }
 0x3dd   : > { %9963 = vmax.xlane.f32.xlu0 %v9962_v54  ;;  %v10187_v54 = vsel %vm9778_vm2, %v17275_v7, 0.0  ;;  %12519 = vpow2.f32 %v10047_v6 }
 0x3df   : > { %10194 = vadd.xlane.f32.xlu1 %v10193_v37  ;;  %v9826_v23 = vpop.xlane.xlu0 %9825  ;;  %v9983_v37 = vsub.f32 %v16735_v42, %v9817_v17  ;;  %v10049_v42 = vmul.f32 1.442695, %v9978_v19 }
 0x3e1   : > { %10170 = vadd.xlane.f32.xlu0 %v10169_v14  ;;  %v10043_v14 = vmul.f32 1.442695, %v9975_v16  ;;  %v10059_v30 = vmul.f32 1.442695, %v9983_v37 }
 0x3e3   : > { %10188 = vadd.xlane.f32.xlu1 %v10187_v54  ;;  %v9796_v27 = vpop.xlane.xlu0 %9795  ;;  %12521 = vpow2.f32 %v10059_v30  ;;  %v9989_v54 = vsub.f32 %v16946_v63, %v9835_v39 }
 0x3e4   : > { %v9976_v33 = vsub.f32 %v16758_v59, %v9796_v27  ;;  %12523 = vpow2.f32 %v10043_v14  ;;  %v9859_v59 = vpop.xlane.xlu1 %9858 }
 0x3e5   : > { %10164 = vadd.xlane.f32.xlu0 %v10163_v40  ;;  %v17305_v35 = vpop.eup %12515  ;;  %v9986_v40 = vsub.f32 %v16750_v41, %v9826_v23  ;;  %v10071_v16 = vmul.f32 1.442695, %v9989_v54  ;;  %v9997_v63 = vsub.f32 %v16960_v18, %v9859_v59 }
 0x3e6   : > { %v10045_v6 = vmul.f32 1.442695, %v9976_v33  ;;  %v17308_v17 = vpop.eup %12517  ;;  %v10205_v37 = vsel %vm9778_vm2, %v17305_v35, 0.0 }
 0x3e7   : > { %10167 = vadd.xlane.f32.xlu1 %v10166_v52  ;;  %v9820_v52 = vpop.xlane.xlu0 %9819  ;;  %v10190_v19 = vsel %vm9778_vm2, %v17308_v17, 0.0  ;;  %v10065_v41 = vmul.f32 1.442695, %v9986_v40  ;;  %v17316_v27 = vpop.eup %12519 }
 0x3e8   : > { %12525 = vpow2.f32 %v10045_v6  ;;  %v9984_v23 = vsub.f32 %v16760_v5, %v9820_v52  ;;  %v9829_v30 = vpop.xlane.xlu1 %9828 }
 0x3e9   : > { %10173 = vadd.xlane.f32.xlu0 %v10172_v38  ;;  %12527 = vpow2.f32 %v10071_v16  ;;  %v10087_v38 = vmul.f32 1.442695, %v9997_v63  ;;  %v9987_v39 = vsub.f32 %v16958_v49, %v9829_v30 }
 0x3ea   : > { %12529 = vpow2.f32 %v10049_v42  ;;  %v10061_v18 = vmul.f32 1.442695, %v9984_v23  ;;  %v10181_v42 = vsel %vm9778_vm2, %v17316_v27, 0.0 }
 0x3eb   : > { %10206 = vadd.xlane.f32.xlu1 %v10205_v37  ;;  %v9838_v14 = vpop.xlane.xlu0 %9837  ;;  %12531 = vpow2.f32 %v10087_v38 }
 0x3ec   : > { %12533 = vpow2.f32 %v10065_v41  ;;  %v9990_v54 = vsub.f32 %v16962_v60, %v9838_v14  ;;  %v9853_v6 = vpop.xlane.xlu1 %9852 }
 0x3ed   : > { %10197 = vadd.xlane.f32.xlu0 %v10196_v61  ;;  %v17319_v33 = vpop.eup %12521  ;;  %v10067_v61 = vmul.f32 1.442695, %v9987_v39  ;;  %v9995_v49 = vsub.f32 %v16969_v15, %v9853_v6 }
 0x3ee   : > { %v10199_v40 = vsel %vm9778_vm2, %v17319_v33, 0.0  ;;  %v17326_v16 = vpop.eup %12523  ;;  %v10073_v60 = vmul.f32 1.442695, %v9990_v54 }
 0x3ef   : > { %v9862_v5 = vpop.xlane.xlu0 %9861  ;;  %10200 = vadd.xlane.f32.xlu1 %v10199_v40  ;;  %12535 = vpow2.f32 %v10067_v61  ;;  %v10083_v59 = vmul.f32 1.442695, %v9995_v49 }
 0x3f0   : > { %12537 = vpow2.f32 %v10061_v18  ;;  %v9998_v37 = vsub.f32 %v16973_v20, %v9862_v5  ;;  %v9847_v38 = vpop.xlane.xlu1 %9846 }
 0x3f1   : > { %10191 = vadd.xlane.f32.xlu0 %v10190_v19  ;;  %v10175_v19 = vsel %vm9778_vm2, %v17326_v16, 0.0  ;;  %v9993_v15 = vsub.f32 %v17008_v24, %v9847_v38  ;;  %12539 = vpow2.f32 %v10083_v59 }
 0x3f2   : > { %v17329_v52 = vpop.eup %12525  ;;  %12541 = vpow2.f32 %v10073_v60  ;;  %v10089_v30 = vmul.f32 1.442695, %v9998_v37 }
 0x3f3   : > { %v17332_v63 = vpop.eup %12527  ;;  %v9832_v41 = vpop.xlane.xlu0 %9831  ;;  %v10178_v23 = vsel %vm9778_vm2, %v17329_v52, 0.0  ;;  %v10079_v18 = vmul.f32 1.442695, %v9993_v15 }
 0x3f4   : > { %v17338_v14 = vpop.eup %12529  ;;  %10179 = vadd.xlane.f32.xlu1 %v10178_v23  ;;  %v10217_v20 = vsel %vm9778_vm2, %v17332_v63, 0.0  ;;  %v9988_v39 = vsub.f32 %v16971_v45, %v9832_v41  ;;  %v9871_v5 = vpop.xlane.xlu1 %9870 }
 0x3f5   : > { %10182 = vadd.xlane.f32.xlu0 %v10181_v42  ;;  %v17344_v54 = vpop.eup %12531  ;;  %v10184_v61 = vsel %vm9778_vm2, %v17338_v14, 0.0  ;;  %v10001_v24 = vsub.f32 %v17010_v13, %v9871_v5  ;;  %12543 = vpow2.f32 %v10079_v18 }
 0x3f6   : > { %18776 = vst [vmem:[#allocation27_spill] sm:$0xff] %v17344_v54  ;;  %v17348_v40 = vpop.eup %12533  ;;  %v10241_v6 = vsel %vm9778_vm2, %v17344_v54, 0.0  ;;  %12545 = vpow2.f32 %v10089_v30  ;;  %v10069_v45 = vmul.f32 1.442695, %v9988_v39 }
 0x3f7   : > { %v9856_v42 = vpop.xlane.xlu0 %9855  ;;  %v10095_v60 = vmul.f32 1.442695, %v10001_v24  ;;  %v10208_v59 = vsel %vm9778_vm2, %v17348_v40, 0.0 }
 0x3f8   : > { %10218 = vadd.xlane.f32.xlu1 %v10217_v20  ;;  %v9996_v49 = vsub.f32 %v16980_v62, %v9856_v42  ;;  %v9841_v41 = vpop.xlane.xlu1 %9840 }
 0x3f9   : > { %10176 = vadd.xlane.f32.xlu0 %v10175_v19  ;;  %v17354_v37 = vpop.eup %12535  ;;  %v9991_v13 = vsub.f32 %v17020_v1, %v9841_v41  ;;  %12547 = vpow2.f32 %v10095_v60 }
 0x3fa   : > { %v17358_v23 = vpop.eup %12537  ;;  %v10211_v38 = vsel %vm9778_vm2, %v17354_v37, 0.0  ;;  %12549 = vpow2.f32 %v10069_v45  ;;  %v10085_v62 = vmul.f32 1.442695, %v9996_v49 }
 0x3fb   : > { %v9850_v19 = vpop.xlane.xlu0 %9849  ;;  %v10075_v20 = vmul.f32 1.442695, %v9991_v13  ;;  %v17364_v30 = vpop.eup %12539  ;;  %v10202_v39 = vsel %vm9778_vm2, %v17358_v23, 0.0 }
 0x3fc   : > { %10242 = vadd.xlane.f32.xlu1 %v10241_v6  ;;  %v9994_v15 = vsub.f32 %v17026_v22, %v9850_v19  ;;  %v17368_v42 = vpop.eup %12541  ;;  %v10235_v22 = vsel %vm9778_vm2, %v17364_v30, 0.0 }
 0x3fd   : > { %10185 = vadd.xlane.f32.xlu0 %v10184_v61  ;;  %v9865_v61 = vpop.xlane.xlu1 %9864  ;;  %12551 = vpow2.f32 %v10075_v20  ;;  %v10220_v49 = vsel %vm9778_vm2, %v17368_v42, 0.0 }
 0x3fe   : > { %v9999_v1 = vsub.f32 %v17022_v44, %v9865_v61  ;;  %12553 = vpow2.f32 %v10085_v62  ;;  %v10081_v24 = vmul.f32 1.442695, %v9994_v15 }
 0x3ff   : > { %v9874_v18 = vpop.xlane.xlu0 %9873  ;;  %v17374_v45 = vpop.eup %12543 }
 0x400   : > { %10212 = vadd.xlane.f32.xlu1 %v10211_v38  ;;  %v10002_v5 = vsub.f32 %v17024_v43, %v9874_v18  ;;  %v10091_v6 = vmul.f32 1.442695, %v9999_v1  ;;  %18777 = vst [vmem:[#allocation30_spill] sm:$0xff] %v17374_v45  ;;  %v10229_v19 = vsel %vm9778_vm2, %v17374_v45, 0.0 }
 0x401   : > { %10209 = vadd.xlane.f32.xlu0 %v10208_v59  ;;  %v17378_v59 = vpop.eup %12545 }
 0x402   : > { %v10097_v44 = vmul.f32 1.442695, %v10002_v5  ;;  %12555 = vpow2.f32 %v10091_v6  ;;  %v10244_v62 = vsel %vm9778_vm2, %v17378_v59, 0.0 }
 0x403   : > { %v9844_v60 = vpop.xlane.xlu0 %9843  ;;  %12557 = vpow2.f32 %v10081_v24  ;;  %v17384_v38 = vpop.eup %12547 }
 0x404   : > { %10236 = vadd.xlane.f32.xlu1 %v10235_v22  ;;  %v9992_v43 = vsub.f32 %v17032_v47, %v9844_v60  ;;  %18778 = vst [vmem:[#allocation69_spill] sm:$0xff] %v17384_v38  ;;  %v17388_v20 = vpop.eup %12549  ;;  %12559 = vpow2.f32 %v10097_v44  ;;  %v10253_v18 = vsel %vm9778_vm2, %v17384_v38, 0.0 }
 0x405   : > { %10203 = vadd.xlane.f32.xlu0 %v10202_v39  ;;  %v10214_v22 = vsel %vm9778_vm2, %v17388_v20, 0.0 }
 0x406   : > { %v10077_v47 = vmul.f32 1.442695, %v9992_v43 }
 0x407   : > { %v9868_v15 = vpop.xlane.xlu0 %9867  ;;  %v17394_v5 = vpop.eup %12551 }
 0x408   : > { %10230 = vadd.xlane.f32.xlu1 %v10229_v19  ;;  %v10000_v1 = vsub.f32 %v17034_v46, %v9868_v15  ;;  %18779 = vst [vmem:[#allocation31_spill] sm:$0xff] %v17394_v5  ;;  %v17398_v6 = vpop.eup %12553  ;;  %v10223_v60 = vsel %vm9778_vm2, %v17394_v5, 0.0 }
 0x409   : > { %10221 = vadd.xlane.f32.xlu0 %v10220_v49  ;;  %18780 = vst [vmem:[#allocation45_spill] sm:$0xff] %v17398_v6  ;;  %v10238_v19 = vsel %vm9778_vm2, %v17398_v6, 0.0  ;;  %v18865_v6 = vld [vmem:[#allocation58_spill] sm:$0xff] }
 0x40a   : > { %v10093_v46 = vmul.f32 1.442695, %v10000_v1 }
 0x40c   : > { %v9883_v41 = vpop.xlane.xlu1 %9882  ;;  %10254 = vadd.xlane.f32.xlu1 %v10253_v18  ;;  %v17403_v43 = vpop.eup %12555 }
 0x40d   : > { %v10005_v13 = vsub.f32 %v17096_v11, %v9883_v41  ;;  %10245 = vadd.xlane.f32.xlu0 %v10244_v62  ;;  %18781 = vst [vmem:[#allocation38_spill] sm:$0xff] %v17403_v43  ;;  %v10247_v15 = vsel %vm9778_vm2, %v17403_v43, 0.0 }
 0x40e   : > { %v9886_v24 = vpop.xlane.xlu0 %9885 }
 0x40f   : > { %v10103_v39 = vmul.f32 1.442695, %v10005_v13  ;;  %v17407_v13 = vpop.eup %12557 }
 0x410   : > { %v9907_v61 = vpop.xlane.xlu1 %9906  ;;  %18782 = vst [vmem:[#allocation70_spill] sm:$0xff] %v17407_v13  ;;  %10224 = vadd.xlane.f32.xlu1 %v10223_v60  ;;  %v17412_v18 = vpop.eup %12559  ;;  %v10006_v60 = vsub.f32 %v17104_v57, %v9886_v24 }
 0x411   : > { %12561 = vpow2.f32 %v10103_v39  ;;  %v10013_v11 = vsub.f32 %v17102_v55, %v9907_v61  ;;  %10215 = vadd.xlane.f32.xlu0 %v10214_v22  ;;  %18783 = vst [vmem:[#allocation71_spill] sm:$0xff] %v17412_v18 }
 0x412   : > { %12563 = vpow2.f32 %v10077_v47  ;;  %v9910_v41 = vpop.xlane.xlu0 %9909 }
 0x413   : > { %v10119_v49 = vmul.f32 1.442695, %v10013_v11 }
 0x414   : > { %v9877_v44 = vpop.xlane.xlu1 %9876  ;;  %10248 = vadd.xlane.f32.xlu1 %v10247_v15 }
 0x415   : > { %12565 = vpow2.f32 %v10119_v49  ;;  %v10003_v55 = vsub.f32 %v17098_v8, %v9877_v44  ;;  %10239 = vadd.xlane.f32.xlu0 %v10238_v19  ;;  %v10232_v8 = vsel %vm9778_vm2, %v17407_v13, 0.0  ;;  %v10105_v19 = vmul.f32 1.442695, %v10006_v60  ;;  %v18847_v13 = vld [vmem:[#allocation9_spill] sm:$0xff] }
 0x416   : > { %12567 = vpow2.f32 %v10093_v46  ;;  %v9880_v61 = vpop.xlane.xlu0 %9879  ;;  %v10256_v46 = vsel %vm9778_vm2, %v17412_v18, 0.0 }
 0x417   : > { %v10099_v62 = vmul.f32 1.442695, %v10003_v55  ;;  %v10004_v11 = vsub.f32 %v17110_v12, %v9880_v61 }
 0x418   : > { %v9901_v39 = vpop.xlane.xlu1 %9900 }
 0x419   : > { %v10011_v47 = vsub.f32 %v17108_v32, %v9901_v39  ;;  %10233 = vadd.xlane.f32.xlu0 %v10232_v8  ;;  %12569 = vpow2.f32 %v10099_v62  ;;  %v10101_v32 = vmul.f32 1.442695, %v10004_v11  ;;  %v10014_v62 = vsub.f32 %v17112_v36, %v9910_v41 }
 0x41a   : > { %v9904_v24 = vpop.xlane.xlu0 %9903 }
 0x41b   : > { %v17416_v1 = vpop.eup %12561  ;;  %v10115_v22 = vmul.f32 1.442695, %v10011_v47  ;;  %v10121_v47 = vmul.f32 1.442695, %v10014_v62  ;;  %v10012_v8 = vsub.f32 %v17114_v0, %v9904_v24 }
 0x41c   : > { %18784 = vst [vmem:[#allocation72_spill] sm:$0xff] %v17416_v1  ;;  %v10265_v49 = vsel %vm9778_vm2, %v17416_v1, 0.0  ;;  %v17422_v44 = vpop.eup %12563  ;;  %v18844_v1 = vld [vmem:[#allocation66_spill] sm:$0xff] }
 0x41d   : > { %18785 = vst [vmem:[#allocation73_spill] sm:$0xff] %v17422_v44  ;;  %12571 = vpow2.f32 %v10115_v22  ;;  %10257 = vadd.xlane.f32.xlu0 %v10256_v46  ;;  %10266 = vadd.xlane.f32.xlu1 %v10265_v49  ;;  %v10226_v57 = vsel %vm9778_vm2, %v17422_v44, 0.0  ;;  %v10117_v22 = vmul.f32 1.442695, %v10012_v8 }
 0x41e   : > { %12573 = vpow2.f32 %v10101_v32 }
 0x41f   : > { %v17426_v55 = vpop.eup %12565  ;;  %12575 = vpow2.f32 %v10105_v19 }
 0x420   : > { %18786 = vst [vmem:[#allocation74_spill] sm:$0xff] %v17426_v55  ;;  %v10289_v12 = vsel %vm9778_vm2, %v17426_v55, 0.0  ;;  %v17433_v15 = vpop.eup %12567  ;;  %12577 = vpow2.f32 %v10121_v47 }
 0x421   : > { %18787 = vst [vmem:[#allocation75_spill] sm:$0xff] %v17433_v15  ;;  %10227 = vadd.xlane.f32.xlu0 %v10226_v57  ;;  %10290 = vadd.xlane.f32.xlu1 %v10289_v12  ;;  %v10250_v61 = vsel %vm9778_vm2, %v17433_v15, 0.0  ;;  %12579 = vpow2.f32 %v10117_v22 }
 0x423   : > { %v17435_v39 = vpop.eup %12569 }
 0x424   : > { %18788 = vst [vmem:[#allocation76_spill] sm:$0xff] %v17435_v39  ;;  %v10259_v36 = vsel %vm9778_vm2, %v17435_v39, 0.0 }
 0x425   : > { %10251 = vadd.xlane.f32.xlu0 %v10250_v61 }
 0x427   : > { %v17440_v11 = vpop.eup %12571 }
 0x428   : > { %18789 = vst [vmem:[#allocation77_spill] sm:$0xff] %v17440_v11  ;;  %v17444_v41 = vpop.eup %12573  ;;  %v10283_v0 = vsel %vm9778_vm2, %v17440_v11, 0.0 }
 0x429   : > { %18790 = vst [vmem:[#allocation78_spill] sm:$0xff] %v17444_v41  ;;  %v10262_v49 = vsel %vm9778_vm2, %v17444_v41, 0.0  ;;  %10260 = vadd.xlane.f32.xlu0 %v10259_v36  ;;  %v17450_v60 = vpop.eup %12575 }
 0x42a   : > { %10263 = vadd.xlane.f32.xlu1 %v10262_v49  ;;  %18791 = vst [vmem:[#allocation79_spill] sm:$0xff] %v17450_v60  ;;  %v10268_v32 = vsel %vm9778_vm2, %v17450_v60, 0.0  ;;  %v17454_v46 = vpop.eup %12577 }
 0x42b   : > { %18792 = vst [vmem:[#allocation80_spill] sm:$0xff] %v17454_v46  ;;  %v10292_v12 = vsel %vm9778_vm2, %v17454_v46, 0.0  ;;  %v17458_v19 = vpop.eup %12579 }
 0x42c   : > { %18793 = vst [vmem:[#allocation81_spill] sm:$0xff] %v17458_v19  ;;  %v10286_v62 = vsel %vm9778_vm2, %v17458_v19, 0.0 }
 0x42d   : > { %10284 = vadd.xlane.f32.xlu0 %v10283_v0 }
 0x431   : > { %10269 = vadd.xlane.f32.xlu0 %v10268_v32 }
 0x435   : > { %10293 = vadd.xlane.f32.xlu0 %v10292_v12 }
 0x439   : > { %10287 = vadd.xlane.f32.xlu0 %v10286_v62 }
 0x43c   : > { %v9895_v57 = vpop.xlane.xlu1 %9894 }
 0x43d   : > { %v10009_v24 = vsub.f32 %v17156_v48, %v9895_v57  ;;  %v18794_v57 = vld [vmem:[#allocation22_spill] sm:$0xff] }
 0x43e   : > { %v9898_v47 = vpop.xlane.xlu0 %9897 }
 0x43f   : > { %v10111_v8 = vmul.f32 1.442695, %v10009_v24  ;;  %v10010_v55 = vsub.f32 %v17168_v26, %v9898_v47  ;;  %v18797_v47 = vld [vmem:[#allocation16_spill] sm:$0xff] }
 0x440   : > { %v9919_v61 = vpop.xlane.xlu1 %9918 }
 0x441   : > { %12581 = vpow2.f32 %v10111_v8  ;;  %v10017_v36 = vsub.f32 %v17158_v25, %v9919_v61  ;;  %v10113_v25 = vmul.f32 1.442695, %v10010_v55  ;;  %v18796_v61 = vld [vmem:[#allocation53_spill] sm:$0xff] }
 0x442   : > { %v9922_v22 = vpop.xlane.xlu0 %9921 }
 0x443   : > { %v10127_v49 = vmul.f32 1.442695, %v10017_v36  ;;  %v10018_v36 = vsub.f32 %v18796_v61, %v9922_v22 }
 0x444   : > { %v9889_v0 = vpop.xlane.xlu1 %9888 }
 0x445   : > { %12583 = vpow2.f32 %v10127_v49  ;;  %v10007_v32 = vsub.f32 %v17160_v50, %v9889_v0 }
 0x446   : > { %v9892_v12 = vpop.xlane.xlu0 %9891 }
 0x447   : > { %v10107_v19 = vmul.f32 1.442695, %v10007_v32  ;;  %v10008_v62 = vsub.f32 %v17170_v51, %v9892_v12  ;;  %v18799_v32 = vld [vmem:[#allocation33_spill] sm:$0xff] }
 0x448   : > { %v9913_v11 = vpop.xlane.xlu1 %9912 }
 0x449   : > { %12585 = vpow2.f32 %v10107_v19  ;;  %v10109_v48 = vmul.f32 1.442695, %v10008_v62  ;;  %v10015_v24 = vsub.f32 %v18794_v57, %v9913_v11  ;;  %v10129_v11 = vmul.f32 1.442695, %v10018_v36 }
 0x44a   : > { %v9916_v8 = vpop.xlane.xlu0 %9915 }
 0x44b   : > { %v17468_v46 = vpop.eup %12581  ;;  %12587 = vpow2.f32 %v10109_v48  ;;  %v10123_v49 = vmul.f32 1.442695, %v10015_v24  ;;  %v10016_v12 = vsub.f32 %v18799_v32, %v9916_v8  ;;  %v18800_v48 = vld [vmem:[#allocation17_spill] sm:$0xff] }
 0x44c   : > { %18795 = vst [vmem:[#allocation22_spill] sm:$0xff] %v17468_v46  ;;  %v9931_v50 = vpop.xlane.xlu1 %9930  ;;  %v10277_v26 = vsel %vm9778_vm2, %v17468_v46, 0.0 }
 0x44d   : > { %12589 = vpow2.f32 %v10123_v49  ;;  %v10021_v51 = vsub.f32 %v18797_v47, %v9931_v50  ;;  %10278 = vadd.xlane.f32.xlu1 %v10277_v26  ;;  %v10125_v49 = vmul.f32 1.442695, %v10016_v12  ;;  %v18802_v50 = vld [vmem:[#allocation50_spill] sm:$0xff] }
 0x44e   : > { %v9934_v19 = vpop.xlane.xlu0 %9933  ;;  %12591 = vpow2.f32 %v10113_v25 }
 0x44f   : > { %v17474_v0 = vpop.eup %12583  ;;  %v10135_v55 = vmul.f32 1.442695, %v10021_v51  ;;  %v10022_v26 = vsub.f32 %v18802_v50, %v9934_v19  ;;  %v18804_v51 = vld [vmem:[#allocation46_spill] sm:$0xff]  ;;  %v18806_v19 = vld [vmem:[#allocation49_spill] sm:$0xff] }
 0x450   : > { %18798 = vst [vmem:[#allocation53_spill] sm:$0xff] %v17474_v0  ;;  %v9955_v62 = vpop.xlane.xlu1 %9954  ;;  %v10301_v22 = vsel %vm9778_vm2, %v17474_v0, 0.0 }
 0x451   : > { %12593 = vpow2.f32 %v10135_v55  ;;  %v10029_v57 = vsub.f32 %v18800_v48, %v9955_v62  ;;  %10302 = vadd.xlane.f32.xlu1 %v10301_v22 }
 0x452   : > { %v9958_v24 = vpop.xlane.xlu0 %9957  ;;  %12595 = vpow2.f32 %v10129_v11  ;;  %v10137_v11 = vmul.f32 1.442695, %v10022_v26  ;;  %v18810_v26 = vld [vmem:[#allocation55_spill] sm:$0xff] }
 0x453   : > { %v17480_v61 = vpop.eup %12585  ;;  %v10151_v25 = vmul.f32 1.442695, %v10029_v57  ;;  %v10030_v12 = vsub.f32 %v18806_v19, %v9958_v24 }
 0x454   : > { %18801 = vst [vmem:[#allocation16_spill] sm:$0xff] %v17480_v61  ;;  %v9925_v36 = vpop.xlane.xlu1 %9924  ;;  %v10271_v8 = vsel %vm9778_vm2, %v17480_v61, 0.0 }
 0x455   : > { %v17485_v47 = vpop.eup %12587  ;;  %12597 = vpow2.f32 %v10151_v25  ;;  %v10019_v32 = vsub.f32 %v18804_v51, %v9925_v36  ;;  %10272 = vadd.xlane.f32.xlu0 %v10271_v8  ;;  %v18808_v36 = vld [vmem:[#allocation48_spill] sm:$0xff] }
 0x456   : > { %18803 = vst [vmem:[#allocation33_spill] sm:$0xff] %v17485_v47  ;;  %v9928_v55 = vpop.xlane.xlu0 %9927  ;;  %v10274_v62 = vsel %vm9778_vm2, %v17485_v47, 0.0  ;;  %12599 = vpow2.f32 %v10125_v49  ;;  %v10153_v49 = vmul.f32 1.442695, %v10030_v12  ;;  %v18813_v12 = vld [vmem:[#allocation56_spill] sm:$0xff] }
 0x457   : > { %v17490_v22 = vpop.eup %12589  ;;  %v10131_v48 = vmul.f32 1.442695, %v10019_v32  ;;  %10275 = vadd.xlane.f32.xlu1 %v10274_v62  ;;  %v10020_v46 = vsub.f32 %v18810_v26, %v9928_v55 }
 0x458   : > { %18805 = vst [vmem:[#allocation17_spill] sm:$0xff] %v17490_v22  ;;  %v9949_v57 = vpop.xlane.xlu1 %9948  ;;  %v10295_v50 = vsel %vm9778_vm2, %v17490_v22, 0.0  ;;  %v17495_v25 = vpop.eup %12591 }
 0x459   : > { %18807 = vst [vmem:[#allocation50_spill] sm:$0xff] %v17495_v25  ;;  %12601 = vpow2.f32 %v10131_v48  ;;  %v10027_v8 = vsub.f32 %v18808_v36, %v9949_v57  ;;  %10296 = vadd.xlane.f32.xlu0 %v10295_v50  ;;  %v10280_v62 = vsel %vm9778_vm2, %v17495_v25, 0.0  ;;  %v10133_v55 = vmul.f32 1.442695, %v10020_v46  ;;  %v18833_v25 = vld [vmem:[#allocation6_spill] sm:$0xff] }
 0x45a   : > { %v9952_v51 = vpop.xlane.xlu0 %9951  ;;  %12603 = vpow2.f32 %v10137_v11 }
 0x45b   : > { %v17498_v0 = vpop.eup %12593  ;;  %v10147_v24 = vmul.f32 1.442695, %v10027_v8  ;;  %v10028_v50 = vsub.f32 %v18813_v12, %v9952_v51 }
 0x45c   : > { %18809 = vst [vmem:[#allocation46_spill] sm:$0xff] %v17498_v0  ;;  %v9943_v32 = vpop.xlane.xlu1 %9942  ;;  %v10313_v19 = vsel %vm9778_vm2, %v17498_v0, 0.0  ;;  %v17505_v22 = vpop.eup %12595 }
 0x45d   : > { %18811 = vst [vmem:[#allocation49_spill] sm:$0xff] %v17505_v22  ;;  %12605 = vpow2.f32 %v10147_v24  ;;  %v10025_v48 = vsub.f32 %v17230_v56, %v9943_v32  ;;  %10281 = vadd.xlane.f32.xlu0 %v10280_v62  ;;  %10314 = vadd.xlane.f32.xlu1 %v10313_v19  ;;  %v10304_v26 = vsel %vm9778_vm2, %v17505_v22, 0.0  ;;  %v10149_v46 = vmul.f32 1.442695, %v10028_v50 }
 0x45e   : > { %v9946_v57 = vpop.xlane.xlu0 %9945  ;;  %12607 = vpow2.f32 %v10153_v49 }
 0x45f   : > { %v17508_v11 = vpop.eup %12597  ;;  %v10143_v36 = vmul.f32 1.442695, %v10025_v48  ;;  %v10026_v51 = vsub.f32 %v17241_v21, %v9946_v57 }
 0x460   : > { %18812 = vst [vmem:[#allocation48_spill] sm:$0xff] %v17508_v11  ;;  %v9967_v8 = vpop.xlane.xlu1 %9966  ;;  %v10337_v0 = vsel %vm9778_vm2, %v17508_v11, 0.0  ;;  %v17515_v24 = vpop.eup %12599 }
 0x461   : > { %18814 = vst [vmem:[#allocation55_spill] sm:$0xff] %v17515_v24  ;;  %12609 = vpow2.f32 %v10143_v36  ;;  %10305 = vadd.xlane.f32.xlu0 %v10304_v26  ;;  %10338 = vadd.xlane.f32.xlu1 %v10337_v0  ;;  %v10298_v19 = vsel %vm9778_vm2, %v17515_v24, 0.0  ;;  %v10033_v0 = vsub.f32 %v17228_v4, %v9967_v8  ;;  %v10145_v21 = vmul.f32 1.442695, %v10026_v51  ;;  %v18822_v51 = vld [vmem:[#allocation19_spill] sm:$0xff] }
 0x462   : > { %v17517_v56 = vpop.xlane.xlu0 %9969  ;;  %12611 = vpow2.f32 %v10133_v55 }
 0x463   : > { %v17519_v32 = vpop.eup %12601  ;;  %12613 = vpow2.f32 %v10149_v46 }
 0x464   : > { %18815 = vst [vmem:[#allocation56_spill] sm:$0xff] %v17519_v32  ;;  %v9937_v49 = vpop.xlane.xlu1 %9936  ;;  %v10307_v62 = vsel %vm9778_vm2, %v17519_v32, 0.0  ;;  %v17526_v48 = vpop.eup %12603 }
 0x465   : > { %18816 = vst [vmem:[#allocation82_spill] sm:$0xff] %v17526_v48  ;;  %v10023_v12 = vsub.f32 %v17234_v58, %v9937_v49  ;;  %10308 = vadd.xlane.f32.xlu1 %v10307_v62  ;;  %10299 = vadd.xlane.f32.xlu0 %v10298_v19  ;;  %v10316_v32 = vsel %vm9778_vm2, %v17526_v48, 0.0  ;;  %v18819_v49 = vld [vmem:[#allocation65_spill] sm:$0xff]  ;;  %v18820_v62 = vld [vmem:[#allocation28_spill] sm:$0xff] }
 0x466   : > { %v9940_v36 = vpop.xlane.xlu0 %9939  ;;  %v7553_v4 = vcombine.low %v18820_v62, %v18819_v49  ;;  %v7554_v8 = vcombine.high %v18820_v62, %v18819_v49 }
 0x467   : > { %v17530_v55 = vpop.eup %12605  ;;  %v10139_v57 = vmul.f32 1.442695, %v10023_v12  ;;  %v10024_v50 = vsub.f32 %v17245_v9, %v9940_v36  ;;  %v18821_v9 = vld [vmem:[#allocation63_spill] sm:$0xff]  ;;  %v10159_v36 = vmul.f32 1.442695, %v10033_v0 }
 0x468   : > { %18817 = vst [vmem:[#allocation83_spill] sm:$0xff] %v17530_v55  ;;  %v9961_v26 = vpop.xlane.xlu1 %9960  ;;  %v10331_v11 = vsel %vm9778_vm2, %v17530_v55, 0.0  ;;  %v17537_v58 = vpop.eup %12607  ;;  %v7537_v19 = vcombine.low %v18822_v51, %v18821_v9  ;;  %v7538_v12 = vcombine.high %v18822_v51, %v18821_v9 }
 0x469   : > { %18818 = vst [vmem:[#allocation84_spill] sm:$0xff] %v17537_v58  ;;  %12615 = vpow2.f32 %v10139_v57  ;;  %v10031_v46 = vsub.f32 %v17236_v3, %v9961_v26  ;;  %10332 = vadd.xlane.f32.xlu1 %v10331_v11  ;;  %10317 = vadd.xlane.f32.xlu0 %v10316_v32  ;;  %v10141_v24 = vmul.f32 1.442695, %v10024_v50  ;;  %v10340_v11 = vsel %vm9778_vm2, %v17537_v58, 0.0  ;;  %v18825_v26 = vld [vmem:[#allocation5_spill] sm:$0xff] }
 0x46a   : > { %v9964_v55 = vpop.xlane.xlu0 %9963  ;;  %12617 = vpow2.f32 %v10145_v21  ;;  %v7561_v0 = vrot.slane %v7553_v4, %v18825_v26  ;;  %v7568_v62 = vrot.slane %v7554_v8, %v18825_v26  ;;  %v7545_v50 = vrot.slane %v7537_v19, %v18825_v26 }
 0x46b   : > { %v17548_v48 = vpop.eup %12609  ;;  %v10155_v22 = vmul.f32 1.442695, %v10031_v46  ;;  %v10032_v49 = vsub.f32 %v17247_v2, %v9964_v55  ;;  %v10034_v2 = vsub.f32 %v17239_v29, %v17517_v56  ;;  %v7552_v46 = vrot.slane %v7538_v12, %v18825_v26  ;;  %v18828_v29 = vld [vmem:[#allocation35_spill] sm:$0xff] }
 0x46c   : > { %18823 = vst [vmem:[#allocation65_spill] sm:$0xff] %v17548_v48  ;;  %v10325_v3 = vsel %vm9778_vm2, %v17548_v48, 0.0  ;;  %v17555_v32 = vpop.xlane.xlu1 %10194  ;;  %v17557_v57 = vpop.eup %12611  ;;  %v7570_v51 = vcombine.high %v7545_v50, %v7561_v0 }
 0x46d   : > { %18824 = vst [vmem:[#allocation28_spill] sm:$0xff] %v17557_v57  ;;  %12619 = vpow2.f32 %v10155_v22  ;;  %10326 = vadd.xlane.f32.xlu1 %v10325_v3  ;;  %10341 = vadd.xlane.f32.xlu0 %v10340_v11  ;;  %v10157_v55 = vmul.f32 1.442695, %v10032_v49  ;;  %v10310_v9 = vsel %vm9778_vm2, %v17557_v57, 0.0  ;;  %v17569_v8 = vpop.eup %12613  ;;  %v7569_v22 = vcombine.low %v7545_v50, %v7561_v0  ;;  %v18827_v3 = vld [vmem:[#allocation23_spill] sm:$0xff]  ;;  %v18829_v49 = vld [vmem:[#allocation25_spill] sm:$0xff] }
 0x46e   : > { %12621 = vpow2.f32 %v10159_v36  ;;  %v10171_v21 = vpop.xlane.xlu0 %10170  ;;  %18826 = vst [vmem:[#allocation63_spill] sm:$0xff] %v17569_v8  ;;  %v7585_v36 = vcombine.low %v7552_v46, %v7568_v62  ;;  %v7809_v56 = vcombine.low %v18828_v29, %v18827_v3  ;;  %v18830_v11 = vld [vmem:[#allocation20_spill] sm:$0xff]  ;;  %v10161_v48 = vmul.f32 1.442695, %v10034_v2 }
 0x46f   : > { %12623 = vpow2.f32 %v10141_v24  ;;  %v7825_v19 = vcombine.low %v18830_v11, %v18829_v49  ;;  %v7586_v58 = vcombine.high %v7552_v46, %v7568_v62  ;;  %v7810_v57 = vcombine.high %v18828_v29, %v18827_v3 }
 0x470   : > { %v17567_v4 = vpop.xlane.xlu1 %10188  ;;  %12625 = vpow2.f32 %v10157_v55  ;;  %v7826_v0 = vcombine.high %v18830_v11, %v18829_v49  ;;  %v17588_v47 = vrot.slane %v7569_v22, %v18833_v25  ;;  %v17591_v62 = vrot.slane %v7570_v51, %v18833_v25  ;;  %v18835_v11 = vld [vmem:[#allocation32_spill] sm:$0xff] }
 0x471   : > { %10311 = vadd.xlane.f32.xlu0 %v10310_v9  ;;  %v10334_v9 = vsel %vm9778_vm2, %v17569_v8, 0.0  ;;  %v17594_v46 = vrot.slane %v7585_v36, %v18833_v25  ;;  %v7817_v3 = vrot.slane %v7809_v56, %v18825_v26  ;;  %v7833_v29 = vrot.slane %v7825_v19, %v18825_v26  ;;  %v18839_v56 = vld [vmem:[#allocation40_spill] sm:$0xff] }
 0x472   : > { %v10165_v24 = vpop.xlane.xlu0 %10164  ;;  %v17601_v22 = vrot.slane %v7586_v58, %v18833_v25  ;;  %v17604_v51 = vrot.slane %v7810_v57, %v18825_v26 }
 0x473   : > { %v17575_v12 = vpop.eup %12615  ;;  %12627 = vrcp.f32 %v10165_v24  ;;  %v18836_v24 = vld [vmem:[#allocation54_spill] sm:$0xff]  ;;  %v7842_v61 = vcombine.high %v7817_v3, %v7833_v29 }
 0x474   : > { %18831 = vst [vmem:[#allocation19_spill] sm:$0xff] %v17575_v12  ;;  %v10319_v50 = vsel %vm9778_vm2, %v17575_v12, 0.0  ;;  %12629 = vrcp.f32 %v10171_v21  ;;  %v10168_v2 = vpop.xlane.xlu1 %10167  ;;  %v17585_v55 = vpop.eup %12617  ;;  %v7622_v57 = vcombine.high %v18836_v24, %v18835_v11 }
 0x475   : > { %18832 = vst [vmem:[#allocation5_spill] sm:$0xff] %v17585_v55  ;;  %10320 = vadd.xlane.f32.xlu1 %v10319_v50  ;;  %10335 = vadd.xlane.f32.xlu0 %v10334_v9  ;;  %12631 = vrcp.f32 %v10168_v2  ;;  %v7621_v50 = vcombine.low %v18836_v24, %v18835_v11  ;;  %v18838_v9 = vld [vmem:[#allocation51_spill] sm:$0xff]  ;;  %v10328_v58 = vsel %vm9778_vm2, %v17585_v55, 0.0 }
 0x476   : > { %12633 = vpow2.f32 %v10161_v48  ;;  %v10174_v21 = vpop.xlane.xlu0 %10173  ;;  %v7605_v2 = vcombine.low %v18839_v56, %v18838_v9  ;;  %v7840_v48 = vrot.slane %v7826_v0, %v18825_v26  ;;  %v7606_v8 = vcombine.high %v18839_v56, %v18838_v9 }
 0x477   : > { %v17598_v49 = vpop.eup %12619  ;;  %12635 = vrcp.f32 %v10174_v21  ;;  %v7841_v0 = vcombine.low %v7817_v3, %v7833_v29  ;;  %v7629_v24 = vrot.slane %v7621_v50, %v18825_v26  ;;  %v7636_v55 = vrot.slane %v7622_v57, %v18825_v26  ;;  %v18843_v21 = vld [vmem:[#allocation64_spill] sm:$0xff]  ;;  %v18845_v50 = vld [vmem:[#allocation29_spill] sm:$0xff] }
 0x478   : > { %18834 = vst [vmem:[#allocation23_spill] sm:$0xff] %v17598_v49  ;;  %v17608_v36 = vpop.eup %12621  ;;  %v10343_v19 = vsel %vm9778_vm2, %v17598_v49, 0.0  ;;  %v7857_v9 = vcombine.low %v17604_v51, %v7840_v48  ;;  %v18842_v49 = vld [vmem:[#allocation12_spill] sm:$0xff]  ;;  %v7673_v41 = vcombine.low %v18845_v50, %v18844_v1  ;;  %v7620_v39 = vrot.slane %v7606_v8, %v18825_v26  ;;  %v17655_v57 = vpop.xlane.xlu1 %10206 }
 0x479   : > { %18837 = vst [vmem:[#allocation35_spill] sm:$0xff] %v17608_v36  ;;  %v17617_v12 = vpop.eup %12623  ;;  %10344 = vadd.xlane.f32.xlu1 %v10343_v19  ;;  %10329 = vadd.xlane.f32.xlu0 %v10328_v58  ;;  %v7613_v58 = vrot.slane %v7605_v2, %v18825_v26  ;;  %v10349_v3 = vsel %vm9778_vm2, %v17608_v36, 0.0  ;;  %v7689_v11 = vcombine.low %v18843_v21, %v18842_v49 }
 0x47a   : > { %18840 = vst [vmem:[#allocation25_spill] sm:$0xff] %v17617_v12  ;;  %v17625_v60 = vpop.xlane.xlu0 %10197  ;;  %v17634_v19 = vpop.eup %12625  ;;  %v10322_v29 = vsel %vm9778_vm2, %v17617_v12, 0.0  ;;  %v17649_v38 = vrot.slane %v7841_v0, %v18833_v25  ;;  %v17652_v36 = vrot.slane %v7842_v61, %v18833_v25  ;;  %v7858_v12 = vcombine.high %v17604_v51, %v7840_v48 }
 0x47b   : > { %18841 = vst [vmem:[#allocation20_spill] sm:$0xff] %v17634_v19  ;;  %v7637_v18 = vcombine.low %v7613_v58, %v7629_v24  ;;  %v7638_v45 = vcombine.high %v7613_v58, %v7629_v24  ;;  %v7674_v8 = vcombine.high %v18845_v50, %v18844_v1  ;;  %v17664_v0 = vrot.slane %v7857_v9, %v18833_v25 }
 0x47c   : > { %v10346_v61 = vsel %vm9778_vm2, %v17634_v19, 0.0  ;;  %v7653_v24 = vcombine.low %v7620_v39, %v7636_v55  ;;  %v7654_v58 = vcombine.high %v7620_v39, %v7636_v55  ;;  %v17674_v5 = vpop.xlane.xlu1 %10200  ;;  %v18850_v55 = vld [vmem:[#allocation62_spill] sm:$0xff] }
 0x47d   : > { %v12628_v56 = vpop.eup %12627  ;;  %10350 = vadd.xlane.f32.xlu1 %v10349_v3  ;;  %10323 = vadd.xlane.f32.xlu0 %v10322_v29  ;;  %v7690_v3 = vcombine.high %v18843_v21, %v18842_v49  ;;  %v7697_v49 = vrot.slane %v7689_v11, %v18825_v26  ;;  %v7681_v21 = vrot.slane %v7673_v41, %v18825_v26 }
 0x47e   : > { %v12630_v2 = vpop.eup %12629  ;;  %v10192_v15 = vpop.xlane.xlu0 %10191  ;;  %v10419_v51 = vmul.f32 %v12628_v56, %v17281_v10  ;;  %v18848_v10 = vld [vmem:[#allocation47_spill] sm:$0xff]  ;;  %v7688_v41 = vrot.slane %v7674_v8, %v18825_v26  ;;  %v17697_v11 = vrot.slane %v7653_v24, %v18833_v25 }
 0x47f   : > { %v12632_v43 = vpop.eup %12631  ;;  %v10421_v1 = vmul.f32 %v12630_v2, %v17269_v31  ;;  %v8214_v56 = vcombine.high %v18848_v10, %v18847_v13  ;;  %v7704_v39 = vrot.slane %v7690_v3, %v18825_v26  ;;  %v17687_v31 = vrot.slane %v7858_v12, %v18833_v25  ;;  %v18849_v13 = vld [vmem:[#allocation61_spill] sm:$0xff]  ;;  %v18851_v8 = vld [vmem:[#allocation11_spill] sm:$0xff]  ;;  %v18854_v10 = vld [vmem:[#allocation68_spill] sm:$0xff] }
 0x480   : > { %v17661_v29 = vpop.eup %12633  ;;  %v10420_v48 = vmul.f32 %v12632_v43, %v17286_v34  ;;  %v17679_v34 = vrot.slane %v7637_v18, %v18833_v25  ;;  %v17682_v43 = vrot.slane %v7638_v45, %v18833_v25  ;;  %v8146_v18 = vcombine.high %v18850_v55, %v18849_v13  ;;  %v18857_v55 = vld [vmem:[#allocation18_spill] sm:$0xff] }
 0x481   : > { %18846 = vst [vmem:[#allocation6_spill] sm:$0xff] %v17661_v29  ;;  %v12636_v44 = vpop.eup %12635  ;;  %10347 = vadd.xlane.f32.xlu0 %v10346_v61  ;;  %v7705_v2 = vcombine.low %v7681_v21, %v7697_v49  ;;  %v7706_v3 = vcombine.high %v7681_v21, %v7697_v49  ;;  %v17700_v12 = vrot.slane %v7654_v58, %v18833_v25  ;;  %v18852_v61 = vld [vmem:[#allocation67_spill] sm:$0xff]  ;;  %12637 = vrcp.f32 %v10192_v15  ;;  %v18853_v21 = vld [vmem:[#allocation42_spill] sm:$0xff]  ;;  %v18856_v15 = vld [vmem:[#allocation24_spill] sm:$0xff] }
 0x482   : > { %v10422_v9 = vmul.f32 %v12636_v44, %v17290_v28  ;;  %v10183_v50 = vpop.xlane.xlu0 %10182  ;;  %v10483_v19 = vpack.c.bf16 %v10420_v48, %v10419_v51  ;;  %v10352_v28 = vsel %vm9778_vm2, %v17661_v29, 0.0  ;;  %v7757_v51 = vcombine.low %v18852_v61, %v18851_v8 }
 0x483   : > { %v9038_v48 = vpack.c.bf16 %v8214_v56, %v8146_v18  ;;  %v7721_v24 = vcombine.low %v7688_v41, %v7704_v39  ;;  %v7758_v49 = vcombine.high %v18852_v61, %v18851_v8  ;;  %v7722_v58 = vcombine.high %v7688_v41, %v7704_v39  ;;  %v18858_v8 = vld [vmem:[#allocation21_spill] sm:$0xff]  ;;  %v18859_v61 = vld [vmem:[#allocation15_spill] sm:$0xff] }
 0x484   : > { %v10484_v44 = vpack.c.bf16 %v10422_v9, %v10421_v1  ;;  %12295 = vmatprep.mubr.msk.bf16.mxu1 %vm9778_vm2, %v10483_v19  ;;  %v10180_v1 = vpop.xlane.xlu1 %10179  ;;  %v7893_v45 = vcombine.low %v18857_v55, %v18856_v15  ;;  %v17715_v56 = vrot.slane %v7705_v2, %v18833_v25  ;;  %v7765_v41 = vrot.slane %v7757_v51, %v18825_v26  ;;  %v18860_v39 = vld [vmem:[#allocation13_spill] sm:$0xff]  ;;  %v18862_v9 = vld [vmem:[#allocation60_spill] sm:$0xff] }
 0x485   : > { %10353 = vadd.xlane.f32.xlu0 %v10352_v28  ;;  %v18855_v28 = vld [vmem:[#allocation36_spill] sm:$0xff]  ;;  %v17736_v51 = vrot.slane %v7721_v24, %v18833_v25  ;;  %v7878_v24 = vcombine.high %v18859_v61, %v18858_v8 }
 0x486   : > { %v10177_v19 = vpop.xlane.xlu0 %10176  ;;  %12296 = vmatmul.mubr.msk.bf16.vlgmr.msra.gmra.mrb[48].mxu1 %vm9778_vm2, %v10484_v44  ;;  %v7741_v13 = vcombine.low %v18855_v28, %v18854_v10  ;;  %v17718_v44 = vrot.slane %v7706_v3, %v18833_v25  ;;  %v7742_v18 = vcombine.high %v18855_v28, %v18854_v10  ;;  %v7901_v28 = vrot.slane %v7893_v45, %v18825_v26  ;;  %v18861_v45 = vld [vmem:[#allocation59_spill] sm:$0xff] }
 0x487   : > { %12639 = vrcp.f32 %v10177_v19  ;;  %12304 = vmatpush3.bf16.msra.mxu1 %v18853_v21  ;;  %v7877_v19 = vcombine.low %v18859_v61, %v18858_v8  ;;  %v17744_v3 = vrot.slane %v7722_v58, %v18833_v25  ;;  %v8080_v29 = vcombine.high %v18862_v9, %v18861_v45 }
 0x488   : > { %12305 = vmatprep.subr.bf16.mxu1 %v9038_v48  ;;  %12641 = vrcp.f32 %v10180_v1  ;;  %v17728_v2 = vpop.xlane.xlu1 %10218  ;;  %v7749_v10 = vrot.slane %v7741_v13, %v18825_v26  ;;  %v18867_v58 = vcombine.high %v17588_v47, %v17591_v62 }
 0x489   : > { %12643 = vrcp.f32 %v10183_v50  ;;  %v7772_v50 = vrot.slane %v7758_v49, %v18825_v26  ;;  %v7885_v21 = vrot.slane %v7877_v19, %v18825_v26  ;;  %v18863_v19 = vld [vmem:[#allocation14_spill] sm:$0xff] }
 0x48a   : > { %12645 = vrcp.f32 %v17567_v4  ;;  %v10186_v1 = vpop.xlane.xlu0 %10185  ;;  %v7894_v4 = vcombine.high %v18857_v55, %v18856_v15  ;;  %v7774_v13 = vcombine.high %v7749_v10, %v7765_v41 }
 0x48b   : > { %12647 = vrcp.f32 %v10186_v1  ;;  %12306 = vmatpush3.bf16.msra.mxu1 %v9038_v48  ;;  %v7756_v48 = vrot.slane %v7742_v18, %v18825_v26  ;;  %v7773_v1 = vcombine.low %v7749_v10, %v7765_v41  ;;  %v12638_v18 = vpop.eup %12637  ;;  %v7909_v8 = vcombine.low %v7885_v21, %v7901_v28  ;;  %v18864_v10 = vld [vmem:[#allocation57_spill] sm:$0xff] }
 0x48c   : > { %12307 = vmatprep.subr.bf16.mxu1 %v18860_v39  ;;  %v17752_v55 = vpop.xlane.xlu1 %10242  ;;  %12649 = vrcp.f32 %v17625_v60  ;;  %v17761_v41 = vrot.slane %v7894_v4, %v18825_v26  ;;  %v7910_v61 = vcombine.high %v7885_v21, %v7901_v28  ;;  %v8012_v9 = vcombine.high %v18865_v6, %v18864_v10 }
 0x48d   : > { %v7789_v54 = vcombine.low %v7756_v48, %v7772_v50  ;;  %v7790_v49 = vcombine.high %v7756_v48, %v7772_v50  ;;  %12651 = vrcp.f32 %v17555_v32  ;;  %v17773_v4 = vrot.slane %v7773_v1, %v18833_v25 }
 0x48e   : > { %v10210_v15 = vpop.xlane.xlu0 %10209  ;;  %v17776_v21 = vrot.slane %v7774_v13, %v18833_v25  ;;  %12653 = vrcp.f32 %v17674_v5  ;;  %v17779_v28 = vpack.c.bf16 %v8080_v29, %v8012_v9  ;;  %v17791_v5 = vrot.slane %v7909_v8, %v18833_v25 }
 0x48f   : > { %12308 = vmatpush3.bf16.msra.mxu1 %v18860_v39  ;;  %v7892_v39 = vrot.slane %v7878_v24, %v18825_v26  ;;  %v17782_v60 = vrot.slane %v7789_v54, %v18833_v25  ;;  %v17788_v13 = vrot.slane %v7790_v49, %v18833_v25  ;;  %v17794_v29 = vrot.slane %v7910_v61, %v18833_v25 }
 0x490   : > { %12309 = vmatprep.subr.bf16.mxu1 %v18863_v19  ;;  %v10213_v48 = vpop.xlane.xlu1 %10212  ;;  %v18866_v49 = vcombine.low %v17588_v47, %v17591_v62  ;;  %v18870_v47 = vcombine.low %v17679_v34, %v17682_v43 }
 0x491   : > { %v12640_v45 = vpop.eup %12639  ;;  %v7925_v54 = vcombine.low %v7892_v39, %v17761_v41 }
 0x492   : > { %v12642_v50 = vpop.eup %12641  ;;  %v10204_v6 = vpop.xlane.xlu0 %10203  ;;  %v10423_v32 = vmul.f32 %v12640_v45, %v17326_v16  ;;  %v17804_v45 = vrot.slane %v18866_v49, %v18825_v26  ;;  %v17832_v62 = vrot.slane %v18870_v47, %v18825_v26 }
 0x493   : > { %v12644_v10 = vpop.eup %12643  ;;  %12655 = vrcp.f32 %v10204_v6  ;;  %12310 = vmatpush3.bf16.msra.mxu1 %v18863_v19  ;;  %v10424_v24 = vmul.f32 %v12642_v50, %v17329_v52  ;;  %v7926_v19 = vcombine.high %v7892_v39, %v17761_v41  ;;  %v10428_v52 = vmul.f32 %v12638_v18, %v17308_v17 }
 0x494   : > { %v12646_v1 = vpop.eup %12645  ;;  %12335 = vmatprep.subr.bf16.mxu1 %v17779_v28  ;;  %v10237_v50 = vpop.xlane.xlu1 %10236  ;;  %v10425_v61 = vmul.f32 %v12644_v10, %v17316_v27  ;;  %v17812_v41 = vrot.slane %v18867_v58, %v18825_v26  ;;  %v18868_v17 = vcombine.low %v17594_v46, %v17601_v22  ;;  %12657 = vrcp.f32 %v10210_v15 }
 0x495   : > { %v12648_v9 = vpop.eup %12647  ;;  %v10485_v16 = vpack.c.bf16 %v10424_v24, %v10423_v32  ;;  %v10427_v39 = vmul.f32 %v12646_v1, %v17275_v7  ;;  %v18869_v27 = vcombine.high %v17594_v46, %v17601_v22  ;;  %v18871_v15 = vcombine.high %v17679_v34, %v17682_v43 }
 0x496   : > { %v10222_v8 = vpop.xlane.xlu0 %10221  ;;  %v10426_v6 = vmul.f32 %v12648_v9, %v17338_v14  ;;  %v17818_v18 = vrot.slane %v18868_v17, %v18825_v26  ;;  %v18872_v7 = vcombine.low %v17697_v11, %v17700_v12  ;;  %v18873_v22 = vcombine.high %v17697_v11, %v17700_v12  ;;  %v12650_v24 = vpop.eup %12649  ;;  %v18877_v17 = vld [vmem:[#allocation8_spill] sm:$0xff] }
 0x497   : > { %12299 = vmatprep.mubr.msk.bf16.mxu1 %vm9778_vm2, %v10485_v16  ;;  %v17826_v14 = vrot.slane %v18869_v27, %v18825_v26  ;;  %v17838_v10 = vrot.slane %v18871_v15, %v18825_v26  ;;  %v8829_v1 = vcombine.low %v17773_v4, %v17776_v21  ;;  %v11863_v34 = vcombine.high %v17773_v4, %v17776_v21  ;;  %v12652_v21 = vpop.eup %12651 }
 0x498   : > { %v10486_v58 = vpack.c.bf16 %v10426_v6, %v10425_v61  ;;  %v17844_v46 = vrot.slane %v18872_v7, %v18825_v26  ;;  %v17850_v32 = vrot.slane %v18873_v22, %v18825_v26  ;;  %12659 = vrcp.f32 %v17655_v57  ;;  %v17865_v49 = vpop.xlane.xlu1 %10230  ;;  %v18874_v61 = vld [vmem:[#allocation10_spill] sm:$0xff]  ;;  %v18875_v6 = vld [vmem:[#allocation7_spill] sm:$0xff] }
 0x499   : > { %v10487_v43 = vpack.c.bf16 %v10428_v52, %v10427_v39  ;;  %v8845_v9 = vcombine.low %v17782_v60, %v17788_v13  ;;  %v11864_v16 = vcombine.high %v17782_v60, %v17788_v13  ;;  %v17862_v11 = vrot.slane %v7925_v54, %v18833_v25  ;;  %v18876_v52 = vld [vmem:[#allocation43_spill] sm:$0xff]  ;;  %v12654_v39 = vpop.eup %12653 }
 0x49a   : > { %v10246_v12 = vpop.xlane.xlu0 %10245  ;;  %12300 = vmatmul.mubr.msk.bf16.gmra.mrb[52].mxu1 %vm9778_vm2, %v10486_v58  ;;  %v8216_v4 = vcombine.high %v18875_v6, %v18874_v61  ;;  %v17870_v57 = vrot.slane %v7926_v19, %v18833_v25  ;;  %v8148_v60 = vcombine.high %v18877_v17, %v18876_v52  ;;  %v8657_v13 = vcombine.low %v17804_v45, %v17812_v41 }
 0x49b   : > { %12311 = vmatprep.mubr.msk.bf16.mxu1 %vm9778_vm2, %v10487_v43  ;;  %v8673_v54 = vcombine.low %v17818_v18, %v17826_v14  ;;  %v10430_v27 = vmul.f32 %v12650_v24, %v17299_v53  ;;  %12661 = vrcp.f32 %v10222_v8  ;;  %v8725_v47 = vcombine.low %v17832_v62, %v17838_v10  ;;  %v18880_v24 = vld [vmem:[#allocation26_spill] sm:$0xff] }
 0x49c   : > { %v8741_v19 = vcombine.low %v17844_v46, %v17850_v32  ;;  %v8965_v15 = vcombine.low %v17791_v5, %v17794_v29  ;;  %12663 = vrcp.f32 %v10213_v48  ;;  %v18878_v7 = vcombine.low %v17715_v56, %v17718_v44  ;;  %v17900_v6 = vpop.xlane.xlu1 %10254 }
 0x49d   : > { %v12656_v58 = vpop.eup %12655  ;;  %v18879_v53 = vcombine.high %v17715_v56, %v17718_v44  ;;  %v10429_v43 = vmul.f32 %v12652_v21, %v18880_v24  ;;  %12665 = vrcp.f32 %v17728_v2  ;;  %v9046_v52 = vpack.c.bf16 %v8216_v4, %v8148_v60 }
 0x49e   : > { %v17890_v22 = vrot.slane %v18878_v7, %v18825_v26  ;;  %v10216_v61 = vpop.xlane.xlu0 %10215  ;;  %v10432_v48 = vmul.f32 %v12656_v58, %v17358_v23  ;;  %v10431_v17 = vmul.f32 %v12654_v39, %v17319_v33  ;;  %v17905_v7 = vrot.slane %v8657_v13, %v18833_v25 }
 0x49f   : > { %v17896_v8 = vrot.slane %v18879_v53, %v18825_v26  ;;  %12667 = vrcp.f32 %v10216_v61  ;;  %v17908_v56 = vrot.slane %v8673_v54, %v18833_v25  ;;  %v10488_v44 = vpack.c.bf16 %v10430_v27, %v10429_v43  ;;  %v12658_v53 = vpop.eup %12657 }
 0x4a0   : > { %12669 = vrcp.f32 %v10246_v12  ;;  %v17911_v21 = vrot.slane %v8725_v47, %v18833_v25  ;;  %v17914_v2 = vrot.slane %v8741_v19, %v18833_v25  ;;  %v10489_v23 = vpack.c.bf16 %v10432_v48, %v10431_v17  ;;  %v17923_v12 = vpop.xlane.xlu1 %10224 }
 0x4a1   : > { %12671 = vrcp.f32 %v10237_v50  ;;  %v8793_v33 = vcombine.low %v17890_v22, %v17896_v8  ;;  %v17919_v4 = vrot.slane %v8829_v1, %v18825_v26  ;;  %v17926_v13 = vrot.slane %v11863_v34, %v18825_v26 }
 0x4a2   : > { %12673 = vrcp.f32 %v17752_v55  ;;  %v10240_v60 = vpop.xlane.xlu0 %10239  ;;  %12312 = vmatmul.mubr.msk.bf16.vlgmr.msra.gmra.mrb[56].mxu1 %vm9778_vm2, %v10488_v44  ;;  %v17929_v54 = vrot.slane %v8845_v9, %v18825_v26  ;;  %v17932_v50 = vrot.slane %v11864_v16, %v18825_v26  ;;  %v12660_v39 = vpop.eup %12659  ;;  %v11867_v1 = vcombine.high %v17791_v5, %v17794_v29  ;;  %v18883_v44 = vld [vmem:[#allocation41_spill] sm:$0xff] }
 0x4a3   : > { %v8981_v55 = vcombine.low %v17862_v11, %v17870_v57  ;;  %v11868_v27 = vcombine.high %v17862_v11, %v17870_v57  ;;  %12675 = vrcp.f32 %v10240_v60  ;;  %12336 = vmatpush3.bf16.msra.mxu1 %v17779_v28  ;;  %12315 = vmatprep.mubr.msk.bf16.mxu1 %vm9778_vm2, %v10489_v23  ;;  %v11865_v34 = vcombine.high %v17649_v38, %v17652_v36 }
 0x4a4   : > { %12337 = vmatprep.subr.bf16.mxu1 %v9046_v52  ;;  %v10434_v9 = vmul.f32 %v12658_v53, %v17348_v40  ;;  %v18881_v5 = vcombine.low %v17736_v51, %v17744_v3  ;;  %v18882_v16 = vcombine.high %v17736_v51, %v17744_v3  ;;  %v8913_v28 = vcombine.low %v17664_v0, %v17687_v31  ;;  %v10249_v53 = vpop.xlane.xlu1 %10248 }
 0x4a5   : > { %v11866_v57 = vcombine.high %v17664_v0, %v17687_v31  ;;  %v8689_v40 = vcombine.low %v17905_v7, %v17908_v56  ;;  %v8757_v47 = vcombine.low %v17911_v21, %v17914_v2  ;;  %v12662_v19 = vpop.eup %12661  ;;  %v10433_v24 = vmul.f32 %v12660_v39, %v17305_v35 }
 0x4a6   : > { %v17949_v29 = vrot.slane %v18881_v5, %v18825_v26  ;;  %v17955_v11 = vrot.slane %v18882_v16, %v18825_v26  ;;  %v10234_v58 = vpop.xlane.xlu0 %10233  ;;  %v17967_v3 = vrot.slane %v8793_v33, %v18833_v25  ;;  %v8861_v51 = vcombine.low %v17919_v4, %v17926_v13  ;;  %v12664_v0 = vpop.eup %12663 }
 0x4a7   : > { %v8877_v43 = vcombine.low %v17929_v54, %v17932_v50  ;;  %12338 = vmatpush3.bf16.msra.mxu1 %v9046_v52  ;;  %v17974_v31 = vrot.slane %v8965_v15, %v18825_v26  ;;  %v17977_v61 = vrot.slane %v11867_v1, %v18825_v26  ;;  %v17980_v48 = vrot.slane %v8981_v55, %v18825_v26  ;;  %v12666_v17 = vpop.eup %12665 }
 0x4a8   : > { %v17983_v35 = vrot.slane %v11868_v27, %v18825_v26  ;;  %12339 = vmatprep.subr.bf16.mxu1 %v18883_v44  ;;  %v10490_v23 = vpack.c.bf16 %v10434_v9, %v10433_v24  ;;  %v8809_v52 = vcombine.low %v17949_v29, %v17955_v11  ;;  %v18884_v15 = vcombine.low %v17649_v38, %v17652_v36 }
 0x4a9   : > { %v17995_v60 = vrot.slane %v11865_v34, %v18825_v26  ;;  %v12668_v39 = vpop.eup %12667  ;;  %v10438_v1 = vmul.f32 %v12662_v19, %v17368_v42  ;;  %v8758_v55 = vcombine.high %v17911_v21, %v17914_v2  ;;  %v18001_v27 = vrot.slane %v8913_v28, %v18825_v26 }
 0x4aa   : > { %v17992_v33 = vrot.slane %v18884_v15, %v18825_v26  ;;  %v18004_v9 = vrot.slane %v11866_v57, %v18825_v26  ;;  %v12670_v5 = vpop.eup %12669  ;;  %v10258_v16 = vpop.xlane.xlu0 %10257  ;;  %12316 = vmatmul.mubr.msk.bf16.gmra.mrb[60].mxu1 %vm9778_vm2, %v10490_v23  ;;  %v10435_v38 = vmul.f32 %v12664_v0, %v17354_v37  ;;  %v10436_v36 = vmul.f32 %v12668_v39, %v17388_v20  ;;  %v18885_v20 = vld [vmem:[#allocation39_spill] sm:$0xff] }
 0x4ab   : > { %v18010_v34 = vrot.slane %v8861_v51, %v18833_v25  ;;  %v18013_v42 = vrot.slane %v8877_v43, %v18833_v25  ;;  %v12672_v21 = vpop.eup %12671  ;;  %v10437_v2 = vmul.f32 %v12666_v17, %v17332_v63  ;;  %12340 = vmatpush3.bf16.msra.mxu1 %v18883_v44  ;;  %v9050_v26 = vpack.c.bf16 %v8757_v47, %v8689_v40  ;;  %v18022_v24 = vpop.xlane.xlu1 %10266  ;;  %v18886_v44 = vld [vmem:[#allocation45_spill] sm:$0xff]  ;;  %v18887_v15 = vld [vmem:[#allocation27_spill] sm:$0xff] }
 0x4ac   : > { %v8997_v28 = vcombine.low %v17974_v31, %v17977_v61  ;;  %v9013_v37 = vcombine.low %v17980_v48, %v17983_v35  ;;  %v12674_v57 = vpop.eup %12673  ;;  %12677 = vrcp.f32 %v10234_v58  ;;  %12341 = vmatprep.subr.bf16.mxu1 %v18885_v20  ;;  %v10491_v19 = vpack.c.bf16 %v10436_v36, %v10435_v38 }
 0x4ad   : > { %v8817_v51 = vrot.slane %v8809_v52, %v18833_v25  ;;  %v8929_v63 = vcombine.low %v17992_v33, %v17995_v60  ;;  %v12676_v43 = vpop.eup %12675  ;;  %v10492_v40 = vpack.c.bf16 %v10438_v1, %v10437_v2  ;;  %v10446_v47 = vmul.f32 %v12670_v5, %v17378_v59 }
 0x4ae   : > { %12679 = vrcp.f32 %v17923_v12  ;;  %v8945_v0 = vcombine.low %v18001_v27, %v18004_v9  ;;  %12327 = vmatprep.mubr.msk.bf16.mxu0 %vm9778_vm2, %v10491_v19  ;;  %v10228_v58 = vpop.xlane.xlu0 %10227  ;;  %v10443_v17 = vmul.f32 %v12672_v21, %v17364_v30  ;;  %v10444_v23 = vmul.f32 %v12676_v43, %v18886_v44  ;;  %v18888_v12 = vld [vmem:[#allocation44_spill] sm:$0xff]  ;;  %v18889_v30 = vld [vmem:[#allocation37_spill] sm:$0xff] }
 0x4af   : > { %12681 = vrcp.f32 %v17865_v49  ;;  %v8893_v52 = vcombine.low %v18010_v34, %v18013_v42  ;;  %v10445_v39 = vmul.f32 %v12674_v57, %v18887_v15  ;;  %12328 = vmatmul.mubr.msk.bf16.vlgmr.msra.gmra.mrb[64].mxu0 %vm9778_vm2, %v10492_v40  ;;  %12342 = vmatpush3.bf16.msra.mxu1 %v18885_v20  ;;  %v9005_v59 = vrot.slane %v8997_v28, %v18833_v25  ;;  %v18892_v44 = vld [vmem:[#allocation73_spill] sm:$0xff] }
 0x4b0   : > { %12683 = vrcp.f32 %v10228_v58  ;;  %v9021_v49 = vrot.slane %v9013_v37, %v18833_v25  ;;  %12352 = vmatpush3.bf16.msra.mxu0 %v18888_v12  ;;  %12367 = vmatprep.subr.bf16.mxu1 %v18889_v30  ;;  %v10495_v1 = vpack.c.bf16 %v10444_v23, %v10443_v17  ;;  %v8825_v5 = vcombine.low %v17967_v3, %v8817_v51  ;;  %v18051_v37 = vpop.xlane.xlu1 %10290  ;;  %v18893_v12 = vld [vmem:[#allocation30_spill] sm:$0xff] }
 0x4b1   : > { %12685 = vrcp.f32 %v10258_v16  ;;  %v8690_v38 = vcombine.high %v17905_v7, %v17908_v56  ;;  %v10496_v36 = vpack.c.bf16 %v10446_v47, %v10445_v39  ;;  %12353 = vmatprep.subr.bf16.mxu0 %v9050_v26  ;;  %v8937_v21 = vrot.slane %v8929_v63, %v18833_v25 }
 0x4b2   : > { %12687 = vrcp.f32 %v10249_v53  ;;  %v8953_v2 = vrot.slane %v8945_v0, %v18833_v25  ;;  %12343 = vmatprep.mubr.msk.bf16.mxu1 %vm9778_vm2, %v10495_v1  ;;  %v10252_v16 = vpop.xlane.xlu0 %10251  ;;  %v9051_v57 = vpack.c.bf16 %v8893_v52, %v8825_v5  ;;  %v9029_v7 = vcombine.low %v9005_v59, %v9021_v49  ;;  %v18894_v5 = vld [vmem:[#allocation34_spill] sm:$0xff] }
 0x4b3   : > { %12689 = vrcp.f32 %v17900_v6  ;;  %v9054_v28 = vpack.c.bf16 %v8758_v55, %v8690_v38  ;;  %12344 = vmatmul.mubr.msk.bf16.vlgmr.msra.gmra.mrb[64].mxu1 %vm9778_vm2, %v10496_v36  ;;  %v8894_v56 = vcombine.high %v18010_v34, %v18013_v42  ;;  %v8826_v53 = vcombine.high %v17967_v3, %v8817_v51  ;;  %v18891_v3 = vld [vmem:[#allocation31_spill] sm:$0xff] }
 0x4b4   : > { %12691 = vrcp.f32 %v10252_v16  ;;  %12354 = vmatpush3.bf16.msra.mxu0 %v9050_v26  ;;  %12368 = vmatpush3.bf16.msra.mxu1 %v18889_v30  ;;  %v8961_v6 = vcombine.low %v8937_v21, %v8953_v2  ;;  %v9030_v47 = vcombine.high %v9005_v59, %v9021_v49  ;;  %v8962_v42 = vcombine.high %v8937_v21, %v8953_v2  ;;  %v18890_v26 = vld [vmem:[#allocation70_spill] sm:$0xff]  ;;  %v18895_v36 = vld [vmem:[#allocation71_spill] sm:$0xff] }
 0x4b5   : > { %12355 = vmatprep.subr.bf16.mxu0 %v9051_v57  ;;  %12369 = vmatprep.subr.bf16.mxu1 %v9054_v28  ;;  %v9055_v40 = vpack.c.bf16 %v8894_v56, %v8826_v53  ;;  %v18896_v2 = vld [vmem:[#allocation38_spill] sm:$0xff]  ;;  %v18898_v56 = vld [vmem:[#allocation69_spill] sm:$0xff]  ;;  %v8726_v53 = vcombine.high %v17832_v62, %v17838_v10  ;;  %v8658_v62 = vcombine.high %v17804_v45, %v17812_v41 }
 0x4b6   : > { %v12678_v20 = vpop.eup %12677  ;;  %v10261_v55 = vpop.xlane.xlu0 %10260  ;;  %v9052_v43 = vpack.c.bf16 %v9029_v7, %v8961_v6  ;;  %v9056_v39 = vpack.c.bf16 %v9030_v47, %v8962_v42  ;;  %v18900_v47 = vld [vmem:[#allocation76_spill] sm:$0xff]  ;;  %v8674_v10 = vcombine.high %v17818_v18, %v17826_v14  ;;  %v8794_v14 = vcombine.high %v17890_v22, %v17896_v8 }
 0x4b7   : > { %v10264_v19 = vpop.xlane.xlu1 %10263  ;;  %12693 = vrcp.f32 %v10261_v55  ;;  %v10442_v58 = vmul.f32 %v12678_v20, %v18890_v26  ;;  %v18899_v55 = vld [vmem:[#allocation52_spill] sm:$0xff]  ;;  %v8740_v26 = vrot.slane %v8726_v53, %v18833_v25  ;;  %v8672_v41 = vrot.slane %v8658_v62, %v18833_v25 }
 0x4b8   : > { %v12680_v63 = vpop.eup %12679  ;;  %12356 = vmatpush3.bf16.msra.mxu0 %v9051_v57  ;;  %12370 = vmatpush3.bf16.msra.mxu1 %v9054_v28  ;;  %12695 = vrcp.f32 %v10264_v19  ;;  %v18897_v28 = vld [vmem:[#allocation75_spill] sm:$0xff]  ;;  %v8688_v18 = vrot.slane %v8674_v10, %v18833_v25  ;;  %v8808_v8 = vrot.slane %v8794_v14, %v18833_v25 }
 0x4b9   : > { %v12682_v0 = vpop.eup %12681  ;;  %12357 = vmatprep.subr.bf16.mxu0 %v9052_v43  ;;  %12371 = vmatprep.subr.bf16.mxu1 %v9055_v40  ;;  %v10439_v51 = vmul.f32 %v12680_v63, %v18891_v3  ;;  %12697 = vrcp.f32 %v18022_v24  ;;  %v8742_v63 = vcombine.high %v17844_v46, %v17850_v32  ;;  %v8878_v3 = vcombine.high %v17929_v54, %v17932_v50  ;;  %v18902_v50 = vld [vmem:[#allocation72_spill] sm:$0xff] }
 0x4ba   : > { %v12684_v34 = vpop.eup %12683  ;;  %v10285_v52 = vpop.xlane.xlu0 %10284  ;;  %v10441_v59 = vmul.f32 %v12682_v0, %v18893_v12  ;;  %v8998_v54 = vcombine.high %v17974_v31, %v17977_v61  ;;  %v8691_v22 = vcombine.low %v8672_v41, %v8688_v18  ;;  %v8930_v12 = vcombine.high %v17992_v33, %v17995_v60 }
 0x4bb   : > { %v12686_v17 = vpop.eup %12685  ;;  %v10440_v23 = vmul.f32 %v12684_v34, %v18892_v44  ;;  %v18901_v34 = vld [vmem:[#allocation78_spill] sm:$0xff]  ;;  %v8756_v32 = vrot.slane %v8742_v63, %v18833_v25  ;;  %v8946_v31 = vcombine.high %v18001_v27, %v18004_v9  ;;  %v18904_v9 = vld [vmem:[#allocation80_spill] sm:$0xff] }
 0x4bc   : > { %v12688_v15 = vpop.eup %12687  ;;  %12358 = vmatpush3.bf16.msra.mxu0 %v9052_v43  ;;  %12372 = vmatpush3.bf16.msra.mxu1 %v9055_v40  ;;  %v10494_v38 = vpack.c.bf16 %v10442_v58, %v10441_v59  ;;  %v10450_v21 = vmul.f32 %v12686_v17, %v18895_v36  ;;  %v8862_v58 = vcombine.high %v17919_v4, %v17926_v13 }
 0x4bd   : > { %v12690_v49 = vpop.eup %12689  ;;  %v10493_v30 = vpack.c.bf16 %v10440_v23, %v10439_v51  ;;  %12373 = vmatprep.subr.bf16.mxu1 %v9056_v39  ;;  %12383 = vmatprep.subr.bf16.mxu0 %v18894_v5  ;;  %v10447_v16 = vmul.f32 %v12688_v15, %v18896_v2  ;;  %v8810_v4 = vcombine.high %v17949_v29, %v17955_v11  ;;  %v18903_v23 = vld [vmem:[#allocation79_spill] sm:$0xff]  ;;  %v18905_v2 = vld [vmem:[#allocation77_spill] sm:$0xff] }
 0x4be   : > { %v12692_v1 = vpop.eup %12691  ;;  %v10270_v7 = vpop.xlane.xlu0 %10269  ;;  %v10449_v6 = vmul.f32 %v12690_v49, %v18898_v56  ;;  %v8876_v51 = vrot.slane %v8862_v58, %v18833_v25  ;;  %v8892_v15 = vrot.slane %v8878_v3, %v18833_v25  ;;  %v8944_v33 = vrot.slane %v8930_v12, %v18833_v25  ;;  %v18907_v56 = vld [vmem:[#allocation74_spill] sm:$0xff] }
 0x4bf   : > { %12331 = vmatprep.mubr.msk.bf16.mxu0 %vm9778_vm2, %v10493_v30  ;;  %v10448_v57 = vmul.f32 %v12692_v1, %v18897_v28  ;;  %12699 = vrcp.f32 %v10270_v7  ;;  %v8824_v11 = vrot.slane %v8810_v4, %v18833_v25  ;;  %v9012_v30 = vrot.slane %v8998_v54, %v18833_v25  ;;  %v18906_v28 = vld [vmem:[#allocation81_spill] sm:$0xff] }
 0x4c0   : > { %12332 = vmatmul.mubr.msk.bf16.gmra.mrb[68].mxu0 %vm9778_vm2, %v10494_v38  ;;  %12374 = vmatpush3.bf16.msra.mxu1 %v9056_v39  ;;  %v10498_v19 = vpack.c.bf16 %v10450_v21, %v10449_v6  ;;  %v9014_v39 = vcombine.high %v17980_v48, %v17983_v35  ;;  %v8895_v49 = vcombine.low %v8876_v51, %v8892_v15  ;;  %v18909_v4 = vld [vmem:[#allocation33_spill] sm:$0xff] }
 0x4c1   : > { %v10497_v24 = vpack.c.bf16 %v10448_v57, %v10447_v16  ;;  %v12694_v20 = vpop.eup %12693  ;;  %12399 = vmatprep.subr.bf16.mxu1 %v18899_v55  ;;  %v8827_v38 = vcombine.low %v8808_v8, %v8824_v11  ;;  %v8960_v60 = vrot.slane %v8946_v31, %v18833_v25 }
 0x4c2   : > { %v12696_v43 = vpop.eup %12695  ;;  %v10294_v40 = vpop.xlane.xlu0 %10293  ;;  %v10451_v0 = vmul.f32 %v12694_v20, %v18900_v47  ;;  %v9028_v48 = vrot.slane %v9014_v39, %v18833_v25  ;;  %v18911_v39 = vld [vmem:[#allocation50_spill] sm:$0xff] }
 0x4c3   : > { %12347 = vmatprep.mubr.msk.bf16.mxu1 %vm9778_vm2, %v10497_v24  ;;  %v10452_v42 = vmul.f32 %v12696_v43, %v18901_v34  ;;  %12701 = vrcp.f32 %v10294_v40  ;;  %v12698_v45 = vpop.eup %12697  ;;  %v9059_v21 = vpack.c.bf16 %v8895_v49, %v8827_v38  ;;  %v8963_v53 = vcombine.low %v8944_v33, %v8960_v60 }
 0x4c4   : > { %12348 = vmatmul.mubr.msk.bf16.gmra.mrb[68].mxu1 %vm9778_vm2, %v10498_v19  ;;  %12703 = vrcp.f32 %v10285_v52  ;;  %v10453_v44 = vmul.f32 %v12698_v45, %v18902_v50  ;;  %v9031_v7 = vcombine.low %v9012_v30, %v9028_v48  ;;  %v8692_v19 = vcombine.high %v8672_v41, %v8688_v18  ;;  %v18908_v18 = vld [vmem:[#allocation16_spill] sm:$0xff] }
 0x4c5   : > { %v10499_v46 = vpack.c.bf16 %v10452_v42, %v10451_v0  ;;  %12705 = vrcp.f32 %v18051_v37  ;;  %v8759_v37 = vcombine.low %v8740_v26, %v8756_v32  ;;  %v8896_v43 = vcombine.high %v8876_v51, %v8892_v15 }
 0x4c6   : > { %v10288_v17 = vpop.xlane.xlu0 %10287  ;;  %v9060_v25 = vpack.c.bf16 %v9031_v7, %v8963_v53  ;;  %v8828_v40 = vcombine.high %v8808_v8, %v8824_v11  ;;  %v9032_v34 = vcombine.high %v9012_v30, %v9028_v48  ;;  %v8964_v42 = vcombine.high %v8944_v33, %v8960_v60  ;;  %v18912_v48 = vld [vmem:[#allocation49_spill] sm:$0xff]  ;;  %v18914_v33 = vld [vmem:[#allocation55_spill] sm:$0xff] }
 0x4c7   : > { %12707 = vrcp.f32 %v10288_v17  ;;  %12359 = vmatprep.mubr.msk.bf16.mxu0 %vm9778_vm2, %v10499_v46  ;;  %v9058_v59 = vpack.c.bf16 %v8759_v37, %v8691_v22 }
 0x4c8   : > { %v9063_v0 = vpack.c.bf16 %v8896_v43, %v8828_v40  ;;  %v9064_v62 = vpack.c.bf16 %v9032_v34, %v8964_v42 }
 0x4c9   : > { %v12700_v13 = vpop.eup %12699 }
 0x4ca   : > { %v10454_v52 = vmul.f32 %v12700_v13, %v18903_v23 }
 0x4cc   : > { %v10500_v29 = vpack.c.bf16 %v10454_v52, %v10453_v44  ;;  %v18910_v52 = vld [vmem:[#allocation22_spill] sm:$0xff] }
 0x4cd   : > { %v12702_v61 = vpop.eup %12701 }
 0x4ce   : > { %12360 = vmatmul.mubr.msk.bf16.vlgmr.msra.gmra.mrb[72].mxu0 %vm9778_vm2, %v10500_v29  ;;  %v12704_v35 = vpop.eup %12703  ;;  %v10462_v36 = vmul.f32 %v12702_v61, %v18904_v9 }
 0x4cf   : > { %12384 = vmatpush3.bf16.msra.mxu0 %v18894_v5  ;;  %v12706_v1 = vpop.eup %12705  ;;  %v10459_v16 = vmul.f32 %v12704_v35, %v18905_v2  ;;  %v8760_v5 = vcombine.high %v8740_v26, %v8756_v32 }
 0x4d0   : > { %12385 = vmatprep.subr.bf16.mxu0 %v9058_v59  ;;  %v10461_v6 = vmul.f32 %v12706_v1, %v18907_v56  ;;  %v18913_v1 = vld [vmem:[#allocation17_spill] sm:$0xff] }
 0x4d1   : > { %v12708_v27 = vpop.eup %12707  ;;  %v9062_v63 = vpack.c.bf16 %v8760_v5, %v8692_v19  ;;  %v18917_v19 = vld [vmem:[#allocation56_spill] sm:$0xff] }
 0x4d2   : > { %v10460_v57 = vmul.f32 %v12708_v27, %v18906_v28  ;;  %v10504_v20 = vpack.c.bf16 %v10462_v36, %v10461_v6  ;;  %v18915_v27 = vld [vmem:[#allocation53_spill] sm:$0xff] }
 0x4d3   : > { %12386 = vmatpush3.bf16.msra.mxu0 %v9058_v59 }
 0x4d4   : > { %12387 = vmatprep.subr.bf16.mxu0 %v9059_v21  ;;  %v10503_v24 = vpack.c.bf16 %v10460_v57, %v10459_v16 }
 0x4d6   : > { %12375 = vmatprep.mubr.msk.bf16.mxu1 %vm9778_vm2, %v10503_v24  ;;  %v18916_v24 = vld [vmem:[#allocation82_spill] sm:$0xff] }
 0x4d7   : > { %12388 = vmatpush3.bf16.msra.mxu0 %v9059_v21  ;;  %12376 = vmatmul.mubr.msk.bf16.vlgmr.msra.gmra.mrb[72].mxu1 %vm9778_vm2, %v10504_v20 }
 0x4d8   : > { %12389 = vmatprep.subr.bf16.mxu0 %v9060_v25  ;;  %12400 = vmatpush3.bf16.msra.mxu1 %v18899_v55 }
 0x4d9   : > { %12401 = vmatprep.subr.bf16.mxu1 %v9062_v63 }
 0x4da   : > { %v10279_v47 = vpop.xlane.xlu1 %10278 }
 0x4db   : > { %12390 = vmatpush3.bf16.msra.mxu0 %v9060_v25 }
 0x4dc   : > { %12402 = vmatpush3.bf16.msra.mxu1 %v9062_v63  ;;  %v18918_v63 = vld [vmem:[#allocation28_spill] sm:$0xff] }
 0x4dd   : > { %12403 = vmatprep.subr.bf16.mxu1 %v9063_v0 }
 0x4de   : > { %v10303_v10 = vpop.xlane.xlu1 %10302 }
 0x4e0   : > { %12404 = vmatpush3.bf16.msra.mxu1 %v9063_v0 }
 0x4e1   : > { %12405 = vmatprep.subr.bf16.mxu1 %v9064_v62 }
 0x4e2   : > { %v10273_v26 = vpop.xlane.xlu0 %10272 }
 0x4e3   : > { %12709 = vrcp.f32 %v10273_v26 }
 0x4e4   : > { %v10276_v46 = vpop.xlane.xlu1 %10275  ;;  %12406 = vmatpush3.bf16.msra.mxu1 %v9064_v62 }
 0x4e5   : > { %12711 = vrcp.f32 %v10276_v46  ;;  %v18920_v46 = vld [vmem:[#allocation84_spill] sm:$0xff] }
 0x4e6   : > { %v10297_v32 = vpop.xlane.xlu0 %10296  ;;  %12713 = vrcp.f32 %v10279_v47  ;;  %v18919_v47 = vld [vmem:[#allocation46_spill] sm:$0xff] }
 0x4ea   : > { %v10315_v55 = vpop.xlane.xlu1 %10314  ;;  %v10282_v58 = vpop.xlane.xlu0 %10281 }
 0x4eb   : > { %12715 = vrcp.f32 %v10282_v58 }
 0x4ed   : > { %v12710_v17 = vpop.eup %12709 }
 0x4ee   : > { %v10339_v3 = vpop.xlane.xlu1 %10338  ;;  %v10306_v45 = vpop.xlane.xlu0 %10305  ;;  %v10455_v14 = vmul.f32 %v12710_v17, %v18908_v18  ;;  %v18921_v17 = vld [vmem:[#allocation83_spill] sm:$0xff]  ;;  %v18923_v18 = vld [vmem:[#allocation48_spill] sm:$0xff] }
 0x4ef   : > { %v12712_v41 = vpop.eup %12711  ;;  %12717 = vrcp.f32 %v10306_v45  ;;  %v18922_v45 = vld [vmem:[#allocation63_spill] sm:$0xff] }
 0x4f0   : > { %v10456_v13 = vmul.f32 %v12712_v41, %v18909_v4  ;;  %12719 = vrcp.f32 %v10297_v32  ;;  %v12714_v50 = vpop.eup %12713 }
 0x4f1   : > { %12721 = vrcp.f32 %v10303_v10  ;;  %v10457_v15 = vmul.f32 %v12714_v50, %v18910_v52 }
 0x4f2   : > { %v10309_v37 = vpop.xlane.xlu1 %10308  ;;  %v10300_v51 = vpop.xlane.xlu0 %10299  ;;  %v10501_v54 = vpack.c.bf16 %v10456_v13, %v10455_v14 }
 0x4f3   : > { %12723 = vrcp.f32 %v10300_v51 }
 0x4f4   : > { %12363 = vmatprep.mubr.msk.bf16.mxu0 %vm9778_vm2, %v10501_v54 }
 0x4f5   : > { %v12716_v44 = vpop.eup %12715 }
 0x4f6   : > { %v10318_v23 = vpop.xlane.xlu0 %10317  ;;  %v10458_v22 = vmul.f32 %v12716_v44, %v18911_v39  ;;  %v10333_v8 = vpop.xlane.xlu1 %10332  ;;  %v18925_v39 = vld [vmem:[#allocation19_spill] sm:$0xff] }
 0x4f7   : > { %12725 = vrcp.f32 %v10318_v23  ;;  %v18924_v23 = vld [vmem:[#allocation5_spill] sm:$0xff] }
 0x4f8   : > { %v10502_v29 = vpack.c.bf16 %v10458_v22, %v10457_v15  ;;  %12727 = vrcp.f32 %v10309_v37 }
 0x4f9   : > { %v12718_v12 = vpop.eup %12717  ;;  %12729 = vrcp.f32 %v10315_v55 }
 0x4fa   : > { %v10342_v11 = vpop.xlane.xlu0 %10341  ;;  %12364 = vmatmul.mubr.msk.bf16.gmra.mrb[76].mxu0 %vm9778_vm2, %v10502_v29  ;;  %v12720_v31 = vpop.eup %12719  ;;  %v10466_v35 = vmul.f32 %v12718_v12, %v18912_v48  ;;  %v18929_v48 = vld [vmem:[#allocation20_spill] sm:$0xff] }
 0x4fb   : > { %v12722_v61 = vpop.eup %12721  ;;  %v10327_v49 = vpop.xlane.xlu1 %10326  ;;  %v10463_v38 = vmul.f32 %v12720_v31, %v18913_v1 }
 0x4fc   : > { %v10465_v9 = vmul.f32 %v12722_v61, %v18915_v27 }
 0x4fd   : > { %v12724_v59 = vpop.eup %12723 }
 0x4fe   : > { %v10312_v30 = vpop.xlane.xlu0 %10311  ;;  %v10464_v60 = vmul.f32 %v12724_v59, %v18914_v33  ;;  %v10506_v16 = vpack.c.bf16 %v10466_v35, %v10465_v9  ;;  %v18931_v9 = vld [vmem:[#allocation6_spill] sm:$0xff] }
 0x4ff   : > { %12731 = vrcp.f32 %v10312_v30 }
 0x500   : > { %12733 = vrcp.f32 %v10342_v11  ;;  %v10505_v36 = vpack.c.bf16 %v10464_v60, %v10463_v38  ;;  %v18927_v11 = vld [vmem:[#allocation65_spill] sm:$0xff]  ;;  %v18930_v60 = vld [vmem:[#allocation35_spill] sm:$0xff] }
 0x501   : > { %12735 = vrcp.f32 %v10333_v8  ;;  %v12726_v28 = vpop.eup %12725  ;;  %v18926_v8 = vld [vmem:[#allocation25_spill] sm:$0xff] }
 0x502   : > { %v10321_v21 = vpop.xlane.xlu1 %10320  ;;  %v10336_v2 = vpop.xlane.xlu0 %10335  ;;  %12737 = vrcp.f32 %v10339_v3  ;;  %12379 = vmatprep.mubr.msk.bf16.mxu1 %vm9778_vm2, %v10505_v36  ;;  %v10470_v53 = vmul.f32 %v12726_v28, %v18916_v24 }
 0x503   : > { %12739 = vrcp.f32 %v10336_v2  ;;  %12380 = vmatmul.mubr.msk.bf16.gmra.mrb[76].mxu1 %vm9778_vm2, %v10506_v16  ;;  %v12728_v7 = vpop.eup %12727 }
 0x504   : > { %v12730_v56 = vpop.eup %12729  ;;  %v10467_v25 = vmul.f32 %v12728_v7, %v18917_v19 }
 0x505   : > { %v10469_v0 = vmul.f32 %v12730_v56, %v18919_v47 }
 0x506   : > { %v10330_v57 = vpop.xlane.xlu0 %10329  ;;  %v10345_v6 = vpop.xlane.xlu1 %10344 }
 0x507   : > { %12741 = vrcp.f32 %v10330_v57  ;;  %v10508_v10 = vpack.c.bf16 %v10470_v53, %v10469_v0 }
 0x508   : > { %12743 = vrcp.f32 %v10321_v21 }
 0x509   : > { %v12732_v5 = vpop.eup %12731  ;;  %12745 = vrcp.f32 %v10327_v49  ;;  %v18928_v49 = vld [vmem:[#allocation23_spill] sm:$0xff] }
 0x50a   : > { %v10324_v20 = vpop.xlane.xlu0 %10323  ;;  %v10468_v43 = vmul.f32 %v12732_v5, %v18918_v63  ;;  %v12734_v40 = vpop.eup %12733 }
 0x50b   : > { %v12736_v34 = vpop.eup %12735  ;;  %12747 = vrcp.f32 %v10324_v20  ;;  %v10478_v32 = vmul.f32 %v12734_v40, %v18920_v46  ;;  %v10351_v55 = vpop.xlane.xlu1 %10350 }
 0x50c   : > { %v10507_v42 = vpack.c.bf16 %v10468_v43, %v10467_v25  ;;  %v12738_v62 = vpop.eup %12737  ;;  %12749 = vrcp.f32 %v10345_v6  ;;  %v10475_v3 = vmul.f32 %v12736_v34, %v18921_v17 }
 0x50d   : > { %v12740_v26 = vpop.eup %12739  ;;  %v10477_v14 = vmul.f32 %v12738_v62, %v18923_v18 }
 0x50e   : > { %12391 = vmatprep.mubr.msk.bf16.mxu0 %vm9778_vm2, %v10507_v42  ;;  %v10348_v58 = vpop.xlane.xlu0 %10347  ;;  %v10476_v41 = vmul.f32 %v12740_v26, %v18922_v45 }
 0x50f   : > { %12751 = vrcp.f32 %v10348_v58  ;;  %12392 = vmatmul.mubr.msk.bf16.vlgmr.msra.gmra.mrb[80].mxu0 %vm9778_vm2, %v10508_v10  ;;  %v10512_v13 = vpack.c.bf16 %v10478_v32, %v10477_v14 }
 0x510   : > { %12753 = vrcp.f32 %v10351_v55  ;;  %v10511_v4 = vpack.c.bf16 %v10476_v41, %v10475_v3 }
 0x511   : > { %v12742_v51 = vpop.eup %12741 }
 0x512   : > { %v10354_v37 = vpop.xlane.xlu0 %10353  ;;  %12407 = vmatprep.mubr.msk.bf16.mxu1 %vm9778_vm2, %v10511_v4  ;;  %v12744_v54 = vpop.eup %12743  ;;  %v10474_v52 = vmul.f32 %v12742_v51, %v18924_v23 }
 0x513   : > { %12755 = vrcp.f32 %v10354_v37  ;;  %12408 = vmatmul.mubr.msk.bf16.vlgmr.msra.gmra.mrb[80].mxu1 %vm9778_vm2, %v10512_v13  ;;  %v12746_v50 = vpop.eup %12745  ;;  %v10471_v22 = vmul.f32 %v12744_v54, %v18925_v39 }
 0x514   : > { %v10473_v12 = vmul.f32 %v12746_v50, %v18927_v11 }
 0x515   : > { %v12748_v44 = vpop.eup %12747 }
 0x516   : > { %v12750_v15 = vpop.eup %12749  ;;  %v10472_v29 = vmul.f32 %v12748_v44, %v18926_v8  ;;  %v10510_v59 = vpack.c.bf16 %v10474_v52, %v10473_v12 }
 0x517   : > { %v10479_v30 = vmul.f32 %v12750_v15, %v18928_v49 }
 0x518   : > { %v10509_v61 = vpack.c.bf16 %v10472_v29, %v10471_v22 }
 0x519   : > { %v12752_v31 = vpop.eup %12751 }
 0x51a   : > { %v10480_v35 = vmul.f32 %v12752_v31, %v18929_v48  ;;  %v12754_v1 = vpop.eup %12753  ;;  %12395 = vmatprep.mubr.msk.bf16.mxu0 %vm9778_vm2, %v10509_v61 }
 0x51b   : > { %12396 = vmatmul.mubr.msk.bf16.gmra.mrb[84].mxu0 %vm9778_vm2, %v10510_v59  ;;  %v10481_v27 = vmul.f32 %v12754_v1, %v18930_v60 }
 0x51c   : > { %v10513_v38 = vpack.c.bf16 %v10480_v35, %v10479_v30 }
 0x51d   : > { %v12756_v33 = vpop.eup %12755 }
 0x51e   : > { %12411 = vmatprep.mubr.msk.bf16.mxu1 %vm9778_vm2, %v10513_v38  ;;  %v10482_v36 = vmul.f32 %v12756_v33, %v18931_v9 }
 0x520   : > { %v10514_v21 = vpack.c.bf16 %v10482_v36, %v10481_v27 }
 0x522   : > { %12412 = vmatmul.mubr.msk.bf16.gmra.mrb[84].mxu1 %vm9778_vm2, %v10514_v21 }
 0x559   : > { %v12297_v2 = vpop.f32.mrb[48].mxu1 }
 0x55a   : > { %v10561_v16 = vpop.f32.mrb[49].mxu1 }
 0x55b   : > { %11131 = vxpose.xlu1.b32.start [1/8] (short) (narrow) %v10561_v16, 8  ;;  %v12298_v28 = vpop.f32.mrb[50].mxu1 }
 0x55c   : > { %v10564_v57 = vpop.f32.mrb[51].mxu1 }
 0x55f   : > { %11132 = vxpose.xlu1.b32.cont [2/8] (short) (narrow) %v10564_v57, 8 }
 0x563   : > { %11133 = vxpose.xlu1.b32.cont [3/8] (short) (narrow) %v12297_v2, 8 }
 0x567   : > { %11134 = vxpose.xlu1.b32.cont [4/8] (short) (narrow) %v12298_v28, 8 }
 0x56d   : > { %v12301_v7 = vpop.f32.mrb[52].mxu1 }
 0x56e   : > { %v10577_v56 = vpop.f32.mrb[53].mxu1 }
 0x56f   : > { %11135 = vxpose.xlu1.b32.cont [5/8] (short) (narrow) %v10577_v56, 8  ;;  %v12302_v6 = vpop.f32.mrb[54].mxu1 }
 0x570   : > { %v10580_v5 = vpop.f32.mrb[55].mxu1 }
 0x573   : > { %11136 = vxpose.xlu1.b32.cont [6/8] (short) (narrow) %v10580_v5, 8 }
 0x575   : > { %v12313_v24 = vpop.f32.mrb[56].mxu1 }
 0x576   : > { %v10638_v53 = vpop.f32.mrb[57].mxu1 }
 0x577   : > { %11137 = vxpose.xlu1.b32.cont [7/8] (short) (narrow) %v12301_v7, 8  ;;  %11163 = vxpose.xlu0.b32.start [1/8] (short) (narrow) %v10638_v53, 8  ;;  %v12314_v20 = vpop.f32.mrb[58].mxu1 }
 0x578   : > { %v10641_v19 = vpop.f32.mrb[59].mxu1 }
 0x57b   : > { %11138 = vxpose.xlu1.b32.end [8/8] (short) (narrow) %v12302_v6, 8  ;;  %11164 = vxpose.xlu0.b32.cont [2/8] (short) (narrow) %v10641_v19, 8 }
 0x57d   : > { %v12317_v25 = vpop.f32.mrb[60].mxu1 }
 0x57e   : > { %v10654_v63 = vpop.f32.mrb[61].mxu1 }
 0x57f   : > { %11165 = vxpose.xlu0.b32.cont [3/8] (short) (narrow) %v12313_v24, 8  ;;  %v12318_v43 = vpop.f32.mrb[62].mxu1 }
 0x580   : > { %v10657_v40 = vpop.f32.mrb[63].mxu1 }
 0x582   : > { %v12329_v47 = vpop.f32.mrb[64].mxu0 }
 0x583   : > { %v10715_v0 = vpop.f32.mrb[65].mxu0  ;;  %11166 = vxpose.xlu0.b32.cont [4/8] (short) (narrow) %v12314_v20, 8 }
 0x584   : > { %v12330_v34 = vpop.f32.mrb[66].mxu0 }
 0x585   : > { %v10718_v42 = vpop.f32.mrb[67].mxu0 }
 0x586   : > { %v12345_v62 = vpop.f32.mrb[64].mxu1 }
 0x587   : > { %v10792_v10 = vpop.f32.mrb[65].mxu1  ;;  %11167 = vxpose.xlu0.b32.cont [5/8] (short) (narrow) %v10654_v63, 8 }
 0x588   : > { %11227 = vxpose.xlu1.b32.start [1/8] (short) (narrow) %v10792_v10, 8  ;;  %v12346_v26 = vpop.f32.mrb[66].mxu1 }
 0x589   : > { %v10795_v46 = vpop.f32.mrb[67].mxu1 }
 0x58b   : > { %11168 = vxpose.xlu0.b32.cont [6/8] (short) (narrow) %v10657_v40, 8 }
 0x58c   : > { %11228 = vxpose.xlu1.b32.cont [2/8] (short) (narrow) %v10795_v46, 8 }
 0x58f   : > { %11169 = vxpose.xlu0.b32.cont [7/8] (short) (narrow) %v12317_v25, 8 }
 0x590   : > { %11229 = vxpose.xlu1.b32.cont [3/8] (short) (narrow) %v12345_v62, 8 }
 0x593   : > { %v12333_v32 = vpop.f32.mrb[68].mxu0  ;;  %11170 = vxpose.xlu0.b32.end [8/8] (short) (narrow) %v12318_v43, 8 }
 0x594   : > { %v10731_v55 = vpop.f32.mrb[69].mxu0  ;;  %11230 = vxpose.xlu1.b32.cont [4/8] (short) (narrow) %v12346_v26, 8 }
 0x595   : > { %v12334_v58 = vpop.f32.mrb[70].mxu0 }
 0x596   : > { %v10734_v17 = vpop.f32.mrb[71].mxu0 }
 0x597   : > { %v12349_v3 = vpop.f32.mrb[68].mxu1  ;;  %11195 = vxpose.xlu0.b32.start [1/8] (short) (narrow) %v10715_v0, 8 }
 0x598   : > { %v10808_v45 = vpop.f32.mrb[69].mxu1 }
 0x599   : > { %11231 = vxpose.xlu1.b32.cont [5/8] (short) (narrow) %v10808_v45, 8  ;;  %v12350_v41 = vpop.f32.mrb[70].mxu1 }
 0x59a   : > { %v10811_v18 = vpop.f32.mrb[71].mxu1 }
 0x59b   : > { %11196 = vxpose.xlu0.b32.cont [2/8] (short) (narrow) %v10718_v42, 8 }
 0x59d   : > { %11232 = vxpose.xlu1.b32.cont [6/8] (short) (narrow) %v10811_v18, 8 }
 0x59f   : > { %11197 = vxpose.xlu0.b32.cont [3/8] (short) (narrow) %v12329_v47, 8 }
 0x5a1   : > { %11233 = vxpose.xlu1.b32.cont [7/8] (short) (narrow) %v12349_v3, 8  ;;  %v12361_v14 = vpop.f32.mrb[72].mxu0 }
 0x5a2   : > { %v10869_v4 = vpop.f32.mrb[73].mxu0 }
 0x5a3   : > { %11198 = vxpose.xlu0.b32.cont [4/8] (short) (narrow) %v12330_v34, 8  ;;  %v12362_v13 = vpop.f32.mrb[74].mxu0 }
 0x5a4   : > { %v10872_v37 = vpop.f32.mrb[75].mxu0 }
 0x5a5   : > { %11234 = vxpose.xlu1.b32.end [8/8] (short) (narrow) %v12350_v41, 8 }
 0x5a7   : > { %11199 = vxpose.xlu0.b32.cont [5/8] (short) (narrow) %v10731_v55, 8 }
 0x5aa   : > { %v12377_v51 = vpop.f32.mrb[72].mxu1 }
 0x5ab   : > { %11200 = vxpose.xlu0.b32.cont [6/8] (short) (narrow) %v10734_v17, 8  ;;  %v10946_v54 = vpop.f32.mrb[73].mxu1 }
 0x5ac   : > { %11291 = vxpose.xlu1.b32.start [1/8] (short) (narrow) %v10946_v54, 8  ;;  %v12378_v50 = vpop.f32.mrb[74].mxu1 }
 0x5ad   : > { %v10949_v44 = vpop.f32.mrb[75].mxu1 }
 0x5af   : > { %11201 = vxpose.xlu0.b32.cont [7/8] (short) (narrow) %v12333_v32, 8 }
 0x5b0   : > { %11292 = vxpose.xlu1.b32.cont [2/8] (short) (narrow) %v10949_v44, 8 }
 0x5b3   : > { %11202 = vxpose.xlu0.b32.end [8/8] (short) (narrow) %v12334_v58, 8 }
 0x5b4   : > { %11293 = vxpose.xlu1.b32.cont [3/8] (short) (narrow) %v12377_v51, 8 }
 0x5b7   : > { %11259 = vxpose.xlu0.b32.start [1/8] (short) (narrow) %v10869_v4, 8 }
 0x5b8   : > { %11294 = vxpose.xlu1.b32.cont [4/8] (short) (narrow) %v12378_v50, 8 }
 0x5bb   : > { %11260 = vxpose.xlu0.b32.cont [2/8] (short) (narrow) %v10872_v37, 8 }
 0x5bf   : > { %11261 = vxpose.xlu0.b32.cont [3/8] (short) (narrow) %v12361_v14, 8 }
 0x5c3   : > { %11262 = vxpose.xlu0.b32.cont [4/8] (short) (narrow) %v12362_v13, 8 }
 0x5cd   : > { %v12365_v23 = vpop.f32.mrb[76].mxu0 }
 0x5ce   : > { %v10885_v52 = vpop.f32.mrb[77].mxu0 }
 0x5cf   : > { %v12366_v15 = vpop.f32.mrb[78].mxu0  ;;  %11263 = vxpose.xlu0.b32.cont [5/8] (short) (narrow) %v10885_v52, 8 }
 0x5d0   : > { %v10888_v39 = vpop.f32.mrb[79].mxu0 }
 0x5d3   : > { %11264 = vxpose.xlu0.b32.cont [6/8] (short) (narrow) %v10888_v39, 8 }
 0x5d6   : > { %v12381_v22 = vpop.f32.mrb[76].mxu1 }
 0x5d7   : > { %v10962_v8 = vpop.f32.mrb[77].mxu1  ;;  %11265 = vxpose.xlu0.b32.cont [7/8] (short) (narrow) %v12365_v23, 8 }
 0x5d8   : > { %11295 = vxpose.xlu1.b32.cont [5/8] (short) (narrow) %v10962_v8, 8  ;;  %v12382_v29 = vpop.f32.mrb[78].mxu1 }
 0x5d9   : > { %v10965_v11 = vpop.f32.mrb[79].mxu1 }
 0x5db   : > { %11266 = vxpose.xlu0.b32.end [8/8] (short) (narrow) %v12366_v15, 8 }
 0x5dc   : > { %11296 = vxpose.xlu1.b32.cont [6/8] (short) (narrow) %v10965_v11, 8 }
 0x5df   : > { %v11147_v12 = vpop.trf.xlu1 }
 0x5e0   : > { %11387 = vst.msk [vmem:[%s18163_s16] sm:$0xff] %vm9778_vm2, %v11147_v12  ;;  %11297 = vxpose.xlu1.b32.cont [7/8] (short) (narrow) %v12381_v22, 8 }
 0x5e2   : > { %v12393_v31 = vpop.f32.mrb[80].mxu0 }
 0x5e3   : > { %v11023_v61 = vpop.f32.mrb[81].mxu0 }
 0x5e4   : > { %v12394_v59 = vpop.f32.mrb[82].mxu0  ;;  %11323 = vxpose.xlu0.b32.start [1/8] (short) (narrow) %v11023_v61, 8  ;;  %11298 = vxpose.xlu1.b32.end [8/8] (short) (narrow) %v12382_v29, 8 }
 0x5e5   : > { %v11026_v49 = vpop.f32.mrb[83].mxu0 }
 0x5e6   : > { %v12409_v30 = vpop.f32.mrb[80].mxu1 }
 0x5e7   : > { %v11100_v48 = vpop.f32.mrb[81].mxu1 }
 0x5e8   : > { %11324 = vxpose.xlu0.b32.cont [2/8] (short) (narrow) %v11026_v49, 8  ;;  %11355 = vxpose.xlu1.b32.start [1/8] (short) (narrow) %v11100_v48, 8  ;;  %v12410_v35 = vpop.f32.mrb[82].mxu1 }
 0x5e9   : > { %v11103_v1 = vpop.f32.mrb[83].mxu1 }
 0x5ec   : > { %11325 = vxpose.xlu0.b32.cont [3/8] (short) (narrow) %v12393_v31, 8  ;;  %11356 = vxpose.xlu1.b32.cont [2/8] (short) (narrow) %v11103_v1, 8 }
 0x5ee   : > { %v12397_v38 = vpop.f32.mrb[84].mxu0 }
 0x5ef   : > { %v11039_v33 = vpop.f32.mrb[85].mxu0 }
 0x5f0   : > { %11326 = vxpose.xlu0.b32.cont [4/8] (short) (narrow) %v12394_v59, 8  ;;  %11357 = vxpose.xlu1.b32.cont [3/8] (short) (narrow) %v12409_v30, 8  ;;  %v12398_v60 = vpop.f32.mrb[86].mxu0 }
 0x5f1   : > { %v11042_v27 = vpop.f32.mrb[87].mxu0 }
 0x5f4   : > { %11327 = vxpose.xlu0.b32.cont [5/8] (short) (narrow) %v11039_v33, 8  ;;  %11358 = vxpose.xlu1.b32.cont [4/8] (short) (narrow) %v12410_v35, 8 }
 0x5f5   : > { %v12413_v9 = vpop.f32.mrb[84].mxu1 }
 0x5f6   : > { %v11116_v36 = vpop.f32.mrb[85].mxu1 }
 0x5f7   : > { %v12414_v21 = vpop.f32.mrb[86].mxu1  ;;  %v11179_v2 = vpop.trf.xlu0 }
 0x5f8   : > { %v11119_v16 = vpop.f32.mrb[87].mxu1  ;;  %11328 = vxpose.xlu0.b32.cont [6/8] (short) (narrow) %v11042_v27, 8  ;;  %11388 = vst.msk [vmem:[%s18163_s16 + $0x8] sm:$0xff] %vm9778_vm2, %v11179_v2  ;;  %11359 = vxpose.xlu1.b32.cont [5/8] (short) (narrow) %v11116_v36, 8 }
 0x5fc   : > { %11329 = vxpose.xlu0.b32.cont [7/8] (short) (narrow) %v12397_v38, 8  ;;  %11360 = vxpose.xlu1.b32.cont [6/8] (short) (narrow) %v11119_v16, 8 }
 0x600   : > { %11330 = vxpose.xlu0.b32.end [8/8] (short) (narrow) %v12398_v60, 8  ;;  %11361 = vxpose.xlu1.b32.cont [7/8] (short) (narrow) %v12413_v9, 8 }
 0x604   : > { %11362 = vxpose.xlu1.b32.end [8/8] (short) (narrow) %v12414_v21, 8 }
 0x609   : > { %v11243_v28 = vpop.trf.xlu1 }
 0x60a   : > { %11390 = vst.msk [vmem:[%s18163_s16 + $0x18] sm:$0xff] %vm9778_vm2, %v11243_v28 }
 0x617   : > { %v11211_v57 = vpop.trf.xlu0 }
 0x618   : > { %11389 = vst.msk [vmem:[%s18163_s16 + $0x10] sm:$0xff] %vm9778_vm2, %v11211_v57 }
 0x63f   : > { %v11275_v7 = vpop.trf.xlu0 }
 0x640   : > { %11391 = vst.msk [vmem:[%s18163_s16 + $0x20] sm:$0xff] %vm9778_vm2, %v11275_v7 }
 0x648   : > { %v11307_v56 = vpop.trf.xlu1 }
 0x649   : > { %11392 = vst.msk [vmem:[%s18163_s16 + $0x28] sm:$0xff] %vm9778_vm2, %v11307_v56 }
 0x664   : > { %v11339_v6 = vpop.trf.xlu0 }
 0x665   : > { %11393 = vst.msk [vmem:[%s18163_s16 + $0x30] sm:$0xff] %vm9778_vm2, %v11339_v6 }
 0x668   : > { %v11371_v5 = vpop.trf.xlu1 }
 0x669   : > { %11394 = vst.msk [vmem:[%s18163_s16 + $0x38] sm:$0xff] %vm9778_vm2, %v11371_v5 }
 0x66a   : > { %12816 = shalt.err (!%p12813_p3)
}
 0x66b   : > { %s12817_s12 = scalar_lea.hbm %s18184_s26, 1024  ;;  %s12821_s15 = scalar_lea.hbm %s18238_s5, 2048 }
 0x66c   : > { %p12818_p4 = scmp.ne.s32.totalorder %s18184_s26, %s12817_s12  ;;  %p12822_p9 = scmp.lt.u32.totalorder %s18184_s26, %s18238_s5 }
 0x66d   : > { %p12823_p10 = scmp.lt.u32.totalorder %s12821_s15, %s12817_s12  ;;  %p12825_p12 = scmp.lt.u32.totalorder %s12817_s12, %s18184_s26 }
 0x66e   : > { %p12819_p7 = pnand %p12818_p4, %p12943_p5 }
 0x66f   : > { %p12824_p11 = por %p12823_p10, %p12822_p9 }
 0x670   : > { %p12820_p8 = pneg %p12819_p7 }
 0x671   : > { %p12826_p13 = por %p12825_p12, %p12824_p11 }
 0x673   : > { %p12827_p0 = pnand %p12826_p13, %p12820_p8 }
 0x675   : > { %12830 = shalt.err (!%p12827_p0)
}
 0x676   : > { %s12873_s16 = smov 128   ;;  %s12874_s17 = smov 8  }
 0x677   : > { %12448 = dma.vmem_to_hbm [thread:$0]  (%p12943_p5), %s18186_s23, 1024, %s18184_s26, %s18192_s30, %s12873_s16, %s12873_s16, %s12874_s17  }
 0x678 PF: > { %p12454_p1 = scmp.ge.s32.totalorder %s12865_s21, 2  ;;  %s11425_s8 = sand.u32 1, %s12853_s18  }
 0x679   : > { %s11426_s25 = scalar_lea.sflag [#allocation3], %s11425_s8 }
 0x67a   : > { %p12451_p2 = pnand %p12454_p1, %p12947_p6 }
 0x67c   : > { %12848 = dma.done.wait (!%p12451_p2), %s11426_s25, 1024  }
 0x67d   : > { %12850 = vsyncadd (!%p12451_p2), %s11426_s25, 4294966272  ;;  %p15_p3 = scmp.ge.s32.totalorder %s12930_s24, 4   ;;  %s18932_s18 = smov %s12857_s19 }
 0x67e   : > { %s18933_s19 = smov %s12861_s20  ;;  %s18934_s20 = smov %s12941_s27 }
 0x67f   : > { %s18935_s21 = smov %s12930_s24  ;;  %17 = sbr.rel (!%p15_p3) target bundleno = 3 (0x3), region = 88 }
 0x686   :  { %11431 = vsyncpa [#allocation3], 1 }
 0x687   :  { %11433 = vsyncpa [#allocation3 + $0x1], 1 }

</bundles_post_ra>
